<compile_context>
chip_gen: v6e
topology: v6e:2x2x1
jax: 0.10.0
libtpu: 0.0.40
codegen_flags: <defaults>
</compile_context>

<pallas_src>
import functools

import jax
import jax.numpy as jnp
from jax.experimental import pallas as pl
from jax.experimental.pallas import tpu as pltpu

EPS = 1e-5
_LP = 8          # left pad inside the dynconv VMEM scratch -> interior store stays sublane-aligned


# ------------------------------------------------------------------ kernels

def _pw_bn_kernel(x_ref, w_ref, shift_ref, o_ref, *, relu):
    # x: (TM, Cin) bf16, w: (Cin, Cout) bf16 with BN scale folded in, shift: (1, Cout) f32
    out = jnp.dot(x_ref[...], w_ref[...], preferred_element_type=jnp.float32)
    out = out + shift_ref[...]
    if relu:
        out = jnp.maximum(out, 0.0)
    o_ref[...] = out.astype(o_ref.dtype)


def _pw_bn_res_relu_kernel(x_ref, w_ref, shift_ref, res_ref, o_ref):
    # conv3 + bn3 + residual add (f32) + relu, fused
    out = jnp.dot(x_ref[...], w_ref[...], preferred_element_type=jnp.float32)
    out = out + shift_ref[...] + res_ref[...]
    o_ref[...] = jnp.maximum(out, 0.0).astype(o_ref.dtype)


def _attention_kernel(p_ref, w1_ref, w2_ref, b2_ref, y_ref):
    # p: (N, Cin) pooled features -> fc(squeeze) -> relu -> fc(4)+b -> sigmoid, all N at once
    h = jnp.dot(p_ref[...], w1_ref[...], preferred_element_type=jnp.float32)
    h = jnp.maximum(h, 0.0)
    z = jnp.dot(h, w2_ref[...], preferred_element_type=jnp.float32) + b2_ref[...]
    y_ref[...] = (1.0 / (1.0 + jnp.exp(-z))).astype(y_ref.dtype)


def _dynconv_bn_relu_kernel(y_ref, x_ref, wm_ref, w11_ref, wn1_ref, w1n_ref,
                            wdw_ref, shift_ref, o_ref, xp_ref, *, H, W):
    # y:    (N, 4) f32 attention scalars, whole array in SMEM
    # x:    (1, H*W, C) bf16 input block (one sample)
    # wm:   (9, C, C)  f32 main 3x3 template (BN2 scale folded), VMEM-resident (constant block)
    # w11:  (C, C), wn1/w1n: (3, C, C), wdw: (9, 1, C)  -- shared templates, also resident
    # o:    (1, H*W, C) bf16 output block
    # xp:   (H+2, W+16, C) bf16 VMEM scratch holding the zero-padded sample (no HBM pad)
    n = pl.program_id(0)
    C = o_ref.shape[2]
    HW = H * W

    # stage the 1-pixel halo in VMEM (interior store is sublane-aligned at offset _LP)
    xp_ref[...] = jnp.zeros_like(xp_ref)
    xp_ref[1:H + 1, _LP:_LP + W, :] = x_ref[0].reshape(H, W, C)

    y0 = y_ref[n, 0]   # depthwise template
    y1 = y_ref[n, 1]   # 1x1 template
    y2 = y_ref[n, 2]   # 3x1 template
    y3 = y_ref[n, 3]   # 1x3 template

    # f32 accumulator kept in vregs across the 9 unrolled taps (fits at these sizes).
    # TODO(synk): for large H*W (e.g. 56x56x256+) add a row-tile grid axis so the accumulator
    #             and input/output blocks stay small (v7x 64 MiB / v5e 16 MiB VMEM budgets).
    acc = jnp.zeros((HW, C), jnp.float32)
    for kw in range(3):
        # one column-shifted slab per kw; the kh shift below is a cheap outer-dim value slice
        slab = xp_ref[:, _LP - 1 + kw:_LP - 1 + kw + W, :]          # (H+2, W, C) bf16
        for kh in range(3):
            t = kh * 3 + kw
            patch = slab[kh:kh + H].reshape(HW, C)                  # (HW, C) bf16, free reshape
            # combine shared templates with per-sample attention scalars (tiny VPU work)
            w_tap = wm_ref[t]                                       # (C, C) f32
            if kw == 1:
                w_tap = w_tap + y2 * wn1_ref[kh]
            if kh == 1:
                w_tap = w_tap + y3 * w1n_ref[kw]
            if kh == 1 and kw == 1:
                w_tap = w_tap + y1 * w11_ref[...]
            acc = acc + jnp.dot(patch, w_tap.astype(patch.dtype),
                                preferred_element_type=jnp.float32)
            # depthwise template: per-channel multiply-accumulate on the VPU (no diag matmul)
            acc = acc + patch.astype(jnp.float32) * (y0 * wdw_ref[t])
    out = jnp.maximum(acc + shift_ref[...], 0.0)
    o_ref[...] = out.reshape(1, HW, C).astype(o_ref.dtype)


# ------------------------------------------------------------------ pallas wrappers

def _pick_row_tile(m, target=1024):
    """Largest row tile (multiple of 8 dividing m) no bigger than `target`."""
    if m <= target:
        return m
    for tm in range(target - target % 8, 7, -8):
        if m % tm == 0:
            return tm
    return m


def pointwise_conv_bn(x2d, w, shift, *, relu, residual=None, out_dtype=jnp.float32):
    M, cin = x2d.shape
    cout = w.shape[1]
    tm = _pick_row_tile(M)
    grid = (M // tm,)
    in_specs = [
        pl.BlockSpec((tm, cin), lambda i: (i, 0)),
        pl.BlockSpec((cin, cout), lambda i: (0, 0)),
        pl.BlockSpec((1, cout), lambda i: (0, 0)),
    ]
    args = [x2d, w, shift]
    if residual is None:
        kernel = functools.partial(_pw_bn_kernel, relu=relu)
    else:
        kernel = _pw_bn_res_relu_kernel
        in_specs.append(pl.BlockSpec((tm, cout), lambda i: (i, 0)))
        args.append(residual)
    # TODO(synk): tile cin/cout as well for very large channel counts (keep 2x blocks <= VMEM).
    return pl.pallas_call(
        kernel,
        out_shape=jax.ShapeDtypeStruct((M, cout), out_dtype),
        grid=grid,
        in_specs=in_specs,
        out_specs=pl.BlockSpec((tm, cout), lambda i: (i, 0)),
        compiler_params=pltpu.CompilerParams(dimension_semantics=("parallel",)),
    )(*args)


def attention_forward(pooled, wa1, wa2, b2):
    # pooled: (N, Cin) f32 -> y: (N, 4) f32.  Single kernel invocation for all samples.
    N = pooled.shape[0]
    return pl.pallas_call(
        _attention_kernel,
        out_shape=jax.ShapeDtypeStruct((N, 4), jnp.float32),
    )(pooled, wa1, wa2, b2)


def dynamic_conv_bn_relu(x3d, y, wm, w11, wn1, w1n, wdw, shift2, *, H, W):
    N, HW, C = x3d.shape
    w_pad = W + 2 * _LP
    kernel = functools.partial(_dynconv_bn_relu_kernel, H=H, W=W)
    return pl.pallas_call(
        kernel,
        out_shape=jax.ShapeDtypeStruct((N, HW, C), jnp.bfloat16),
        grid=(N,),
        in_specs=[
            pl.BlockSpec(memory_space=pltpu.MemorySpace.SMEM),      # y (N,4): scalars in SMEM
            pl.BlockSpec((1, HW, C), lambda n: (n, 0, 0)),          # per-sample activations
            pl.BlockSpec((9, C, C), lambda n: (0, 0, 0)),           # shared templates: resident,
            pl.BlockSpec((C, C), lambda n: (0, 0)),                 # DMA'd once (constant index)
            pl.BlockSpec((3, C, C), lambda n: (0, 0, 0)),
            pl.BlockSpec((3, C, C), lambda n: (0, 0, 0)),
            pl.BlockSpec((9, 1, C), lambda n: (0, 0, 0)),
            pl.BlockSpec((1, C), lambda n: (0, 0)),
        ],
        out_specs=pl.BlockSpec((1, HW, C), lambda n: (n, 0, 0)),
        scratch_shapes=[pltpu.VMEM((H + 2, w_pad, C), jnp.bfloat16)],
        compiler_params=pltpu.CompilerParams(dimension_semantics=("parallel",)),
    )(y, x3d, wm, w11, wn1, w1n, wdw, shift2)


# ------------------------------------------------------------------ parameter glue

def bn_init(key, c):
    k1, k2, k3, k4 = jax.random.split(key, 4)
    return dict(
        gamma=1.0 + 0.1 * jax.random.normal(k1, (c,), jnp.float32),
        beta=0.1 * jax.random.normal(k2, (c,), jnp.float32),
        mean=0.1 * jax.random.normal(k3, (c,), jnp.float32),
        var=1.0 + 0.1 * jax.random.uniform(k4, (c,), jnp.float32),
    )


def fold_bn(b):
    scale = b["gamma"] / jnp.sqrt(b["var"] + EPS)
    shift = b["beta"] - b["mean"] * scale
    return scale, shift                     # (C,), (C,)


def init_params(key, inplanes, planes, base_width=64, groups=1):
    width = int(planes * (base_width / 64.0)) * groups
    out_ch = planes * 4  # expansion = 4
    # TODO(synk): Conv2dDynamic squeeze default assumed = max(in,out)//4 (Dassl/DDG impl).
    squeeze = max(width // 4, 1)
    ks = jax.random.split(key, 13)
    nrm = lambda k, s: 0.1 * jax.random.normal(k, s, jnp.float32)
    return {
        "conv1_w": nrm(ks[0], (width, inplanes, 1, 1)),
        "bn1": bn_init(ks[1], width),
        "conv2_main_w": nrm(ks[2], (width, width, 3, 3)),
        "conv2_nn_w": nrm(ks[3], (width, 1, 3, 3)),        # depthwise (groups=width)
        "conv2_11_w": nrm(ks[4], (width, width, 1, 1)),
        "conv2_n1_w": nrm(ks[5], (width, width, 3, 1)),
        "conv2_1n_w": nrm(ks[6], (width, width, 1, 3)),
        # TODO(synk): attention conv1 assumed bias=False, conv2 with bias (Dassl/DDG impl).
        "att_w1": nrm(ks[7], (squeeze, inplanes, 1, 1)),
        "att_w2": nrm(ks[8], (4, squeeze, 1, 1)),
        "att_b2": nrm(ks[9], (4,)),
        "bn2": bn_init(ks[10], width),
        "conv3_w": nrm(ks[11], (out_ch, width, 1, 1)),
        "bn3": bn_init(ks[12], out_ch),
    }


def prepare_dyn_templates(p, scale2):
    """Shared (sample-independent) Conv2dDynamic templates with the BN2 scale folded into the
    output-channel axis.  Shapes: wm (9,C,C), w11 (C,C), wn1/w1n (3,C,C), wdw (9,1,C)."""
    C = p["conv2_main_w"].shape[0]
    wm = (jnp.transpose(p["conv2_main_w"], (2, 3, 1, 0)).reshape(9, C, C)
          * scale2[None, None, :])
    w11 = jnp.transpose(p["conv2_11_w"][:, :, 0, 0]) * scale2[None, :]
    wn1 = jnp.transpose(p["conv2_n1_w"][:, :, :, 0], (2, 1, 0)) * scale2[None, None, :]
    w1n = jnp.transpose(p["conv2_1n_w"][:, :, 0, :], (2, 1, 0)) * scale2[None, None, :]
    wdw = (jnp.transpose(p["conv2_nn_w"][:, 0], (1, 2, 0)).reshape(9, 1, C)
           * scale2[None, None, :])
    return wm, w11, wn1, w1n, wdw


# ------------------------------------------------------------------ forward

def bottleneck_dynamic_forward(x_nchw, p):
    # TODO(synk): stride>1 and the external `downsample` module are not modeled (downsample=None).
    N, cin, H, W = x_nchw.shape
    width = p["conv1_w"].shape[0]
    cout = p["conv3_w"].shape[0]
    assert cin == cout, "identity residual requires inplanes == planes*expansion (downsample=None)"
    assert W % 8 == 0, "width must be a multiple of 8 for the lane/sublane layout used here"

    x = jnp.transpose(x_nchw, (0, 2, 3, 1)).astype(jnp.float32)      # NHWC f32
    x2d = x.reshape(N * H * W, cin)
    x2d_bf16 = x2d.astype(jnp.bfloat16)

    # conv1 (1x1) + bn1 + relu  (BN scale folded into weight columns, bf16 MXU operands)
    s1, t1 = fold_bn(p["bn1"])
    w1 = (jnp.transpose(p["conv1_w"][:, :, 0, 0]) * s1[None, :]).astype(jnp.bfloat16)
    out1 = pointwise_conv_bn(x2d_bf16, w1, t1.reshape(1, -1),
                             relu=True, out_dtype=jnp.bfloat16)      # (M, width) bf16

    # attention branch on the ORIGINAL block input x (GAP in plain JAX, MLP in one Pallas call)
    pooled = jnp.mean(x, axis=(1, 2))                                # (N, cin) f32
    wa1 = jnp.transpose(p["att_w1"][:, :, 0, 0])                     # (cin, squeeze)
    wa2 = jnp.transpose(p["att_w2"][:, :, 0, 0])                     # (squeeze, 4)
    y = attention_forward(pooled, wa1, wa2, p["att_b2"].reshape(1, 4))   # (N, 4) f32

    # dynamic 3x3 conv (+ 4 attention-scaled templates) + bn2 + relu
    s2, t2 = fold_bn(p["bn2"])
    wm, w11, wn1, w1n, wdw = prepare_dyn_templates(p, s2)
    out2 = dynamic_conv_bn_relu(out1.reshape(N, H * W, width), y,
                                wm, w11, wn1, w1n, wdw, t2.reshape(1, -1),
                                H=H, W=W)                            # (N, H*W, width) bf16

    # conv3 (1x1) + bn3 + residual add (f32) + relu, fused
    s3, t3 = fold_bn(p["bn3"])
    w3 = (jnp.transpose(p["conv3_w"][:, :, 0, 0]) * s3[None, :]).astype(jnp.bfloat16)
    out3 = pointwise_conv_bn(out2.reshape(N * H * W, width), w3, t3.reshape(1, -1),
                             relu=True, residual=x2d)                # (M, cout) f32

    out = out3.reshape(N, H, W, cout)
    return jnp.transpose(out, (0, 3, 1, 2))                          # back to NCHW


# ------------------------------------------------------------------ pure-JAX reference (f32)

def reference_forward(x_nchw, p):
    x = jnp.transpose(x_nchw, (0, 2, 3, 1)).astype(jnp.float32)

    def conv(inp, w_oihw, padding=((0, 0), (0, 0)), groups=1):
        w = jnp.transpose(w_oihw, (2, 3, 1, 0))
        return jax.lax.conv_general_dilated(
            inp, w, (1, 1), padding,
            dimension_numbers=("NHWC", "HWIO", "NHWC"),
            feature_group_count=groups,
            precision=jax.lax.Precision.HIGHEST)

    def bn(inp, b):
        return (inp - b["mean"]) / jnp.sqrt(b["var"] + EPS) * b["gamma"] + b["beta"]

    relu = jax.nn.relu
    out = relu(bn(conv(x, p["conv1_w"]), p["bn1"]))

    pooled = jnp.mean(x, axis=(1, 2))
    h = relu(pooled @ jnp.transpose(p["att_w1"][:, :, 0, 0]))
    z = h @ jnp.transpose(p["att_w2"][:, :, 0, 0]) + p["att_b2"]
    yv = 1.0 / (1.0 + jnp.exp(-z))

    C = p["conv2_main_w"].shape[0]
    o = conv(out, p["conv2_main_w"], ((1, 1), (1, 1)))
    o = o + conv(out, p["conv2_nn_w"], ((1, 1), (1, 1)), groups=C) * yv[:, 0][:, None, None, None]
    o = o + conv(out, p["conv2_11_w"], ((0, 0), (0, 0))) * yv[:, 1][:, None, None, None]
    o = o + conv(out, p["conv2_n1_w"], ((1, 1), (0, 0))) * yv[:, 2][:, None, None, None]
    o = o + conv(out, p["conv2_1n_w"], ((0, 0), (1, 1))) * yv[:, 3][:, None, None, None]
    o = relu(bn(o, p["bn2"]))
    o = bn(conv(o, p["conv3_w"]), p["bn3"])
    o = relu(o + x)
    return jnp.transpose(o, (0, 3, 1, 2))


# ------------------------------------------------------------------ main

if __name__ == "__main__":
    key = jax.random.PRNGKey(0)
    k_x, k_p = jax.random.split(key)
    # ResNet-50 layer-1 style bottleneck: inplanes=256, planes=64 -> width=64, out=256
    N, inplanes, H, W = 2, 256, 16, 16
    planes = 64
    x = jax.random.normal(k_x, (N, inplanes, H, W), jnp.float32)
    params = init_params(k_p, inplanes, planes)

    fwd = jax.jit(bottleneck_dynamic_forward)
    out = jax.block_until_ready(fwd(x, params))
    assert out.shape == (N, planes * 4, H, W), out.shape

    ref = reference_forward(x, params)
    err_max = float(jnp.max(jnp.abs(out - ref)))
    err_mean = float(jnp.mean(jnp.abs(out - ref)))
    # bf16 MXU operands vs strict-f32 reference -> small rounding noise is expected.
    assert err_max < 0.15 and err_mean < 2e-2, (err_max, err_mean)
    print("KERNEL_OK")
</pallas_src>

<mosaic_0001>
module attributes {stable_mosaic.version = 11 : i64} {
  func.func @_attention_kernel(%arg0: memref<2x256xf32, #tpu.memory_space<vmem>>, %arg1: memref<256x16xf32, #tpu.memory_space<vmem>>, %arg2: memref<16x4xf32, #tpu.memory_space<vmem>>, %arg3: memref<1x4xf32, #tpu.memory_space<vmem>>, %arg4: memref<2x4xf32, #tpu.memory_space<vmem>>) attributes {dimension_semantics = [], scalar_prefetch = 0 : i64, scratch_operands = 0 : i64, tpu.core_type = #tpu.core_type<tc>} {
    %c0 = arith.constant 0 : index
    %c0_0 = arith.constant 0 : index
    %0 = vector.load %arg0[%c0, %c0_0] : memref<2x256xf32, #tpu.memory_space<vmem>>, vector<2x256xf32>
    %c0_1 = arith.constant 0 : index
    %c0_2 = arith.constant 0 : index
    %1 = vector.load %arg1[%c0_1, %c0_2] : memref<256x16xf32, #tpu.memory_space<vmem>>, vector<256x16xf32>
    %cst = arith.constant dense<0.000000e+00> : vector<2x16xf32>
    %2 = tpu.matmul %0, %1, %cst {dimension_numbers = #tpu.dot_dimension_numbers<[1], [0], [0], [1], [0, 0, 1, 1], [], []>} : vector<2x256xf32>, vector<256x16xf32>, vector<2x16xf32> -> vector<2x16xf32>
    %cst_3 = arith.constant 0.000000e+00 : f32
    %3 = vector.broadcast %cst_3 : f32 to vector<2x16xf32>
    %4 = arith.maximumf %2, %3 : vector<2x16xf32>
    %c0_4 = arith.constant 0 : index
    %c0_5 = arith.constant 0 : index
    %5 = vector.load %arg2[%c0_4, %c0_5] : memref<16x4xf32, #tpu.memory_space<vmem>>, vector<16x4xf32>
    %cst_6 = arith.constant dense<0.000000e+00> : vector<2x4xf32>
    %6 = tpu.matmul %4, %5, %cst_6 {dimension_numbers = #tpu.dot_dimension_numbers<[1], [0], [0], [1], [0, 0, 1, 1], [], []>} : vector<2x16xf32>, vector<16x4xf32>, vector<2x4xf32> -> vector<2x4xf32>
    %c0_7 = arith.constant 0 : index
    %c0_8 = arith.constant 0 : index
    %7 = vector.load %arg3[%c0_7, %c0_8] : memref<1x4xf32, #tpu.memory_space<vmem>>, vector<1x4xf32>
    %8 = vector.broadcast %7 : vector<1x4xf32> to vector<2x4xf32>
    %9 = arith.addf %6, %8 : vector<2x4xf32>
    %cst_9 = arith.constant 0.000000e+00 : f32
    %10 = vector.broadcast %cst_9 : f32 to vector<2x4xf32>
    %11 = arith.subf %10, %9 : vector<2x4xf32>
    %12 = math.exp %11 : vector<2x4xf32>
    %cst_10 = arith.constant 1.000000e+00 : f32
    %13 = vector.broadcast %cst_10 : f32 to vector<2x4xf32>
    %14 = arith.addf %13, %12 : vector<2x4xf32>
    %cst_11 = arith.constant 1.000000e+00 : f32
    %15 = vector.broadcast %cst_11 : f32 to vector<2x4xf32>
    %16 = arith.divf %15, %14 : vector<2x4xf32>
    %c0_12 = arith.constant 0 : index
    %c0_13 = arith.constant 0 : index
    %17 = vector.load %arg4[%c0_12, %c0_13] : memref<2x4xf32, #tpu.memory_space<vmem>>, vector<2x4xf32>
    tpu.vector_store %arg4[%c0_12, %c0_13], %16 {strides = array<i32>} : memref<2x4xf32, #tpu.memory_space<vmem>>, vector<2x4xf32>,
    return
  }
}

module attributes {stable_mosaic.version = 11 : i64} {
  func.func @_pw_bn_kernel(%arg0: i32, %arg1: memref<512x256xbf16, #tpu.memory_space<vmem>>, %arg2: memref<256x64xbf16, #tpu.memory_space<vmem>>, %arg3: memref<1x64xf32, #tpu.memory_space<vmem>>, %arg4: memref<512x64xbf16, #tpu.memory_space<vmem>>) attributes {dimension_semantics = [#tpu.dimension_semantics<parallel>], iteration_bounds = array<i64: 1>, scalar_prefetch = 0 : i64, scratch_operands = 0 : i64, tpu.core_type = #tpu.core_type<tc>, window_params = [{transform_indices = @transform_0, window_bounds = array<i64: 512, 256>}, {pipeline_mode = #tpu.pipeline_mode<synchronous>, transform_indices = @transform_1, window_bounds = array<i64: 256, 64>}, {pipeline_mode = #tpu.pipeline_mode<synchronous>, transform_indices = @transform_2, window_bounds = array<i64: 1, 64>}, {transform_indices = @transform_3, window_bounds = array<i64: 512, 64>}]} {
    %c0 = arith.constant 0 : index
    %c0_0 = arith.constant 0 : index
    %0 = vector.load %arg1[%c0, %c0_0] : memref<512x256xbf16, #tpu.memory_space<vmem>>, vector<512x256xbf16>
    %c0_1 = arith.constant 0 : index
    %c0_2 = arith.constant 0 : index
    %1 = vector.load %arg2[%c0_1, %c0_2] : memref<256x64xbf16, #tpu.memory_space<vmem>>, vector<256x64xbf16>
    %cst = arith.constant dense<0.000000e+00> : vector<512x64xf32>
    %2 = tpu.matmul %0, %1, %cst {dimension_numbers = #tpu.dot_dimension_numbers<[1], [0], [0], [1], [0, 0, 1, 1], [], []>} : vector<512x256xbf16>, vector<256x64xbf16>, vector<512x64xf32> -> vector<512x64xf32>
    %c0_3 = arith.constant 0 : index
    %c0_4 = arith.constant 0 : index
    %3 = vector.load %arg3[%c0_3, %c0_4] : memref<1x64xf32, #tpu.memory_space<vmem>>, vector<1x64xf32>
    %4 = vector.broadcast %3 : vector<1x64xf32> to vector<512x64xf32>
    %5 = arith.addf %2, %4 : vector<512x64xf32>
    %cst_5 = arith.constant 0.000000e+00 : f32
    %6 = vector.broadcast %cst_5 : f32 to vector<512x64xf32>
    %7 = arith.maximumf %5, %6 : vector<512x64xf32>
    %8 = arith.truncf %7 : vector<512x64xf32> to vector<512x64xbf16>
    %c0_6 = arith.constant 0 : index
    %c0_7 = arith.constant 0 : index
    %9 = vector.load %arg4[%c0_6, %c0_7] : memref<512x64xbf16, #tpu.memory_space<vmem>>, vector<512x64xbf16>
    tpu.vector_store %arg4[%c0_6, %c0_7], %8 {strides = array<i32>} : memref<512x64xbf16, #tpu.memory_space<vmem>>, vector<512x64xbf16>,
    return
  }
  func.func @transform_0(%arg0: i32) -> (i32, i32) {
    %c0_i32 = arith.constant 0 : i32
    %c0_i32_0 = arith.constant 0 : i32
    return %arg0, %c0_i32 : i32, i32
  }
  func.func @transform_1(%arg0: i32) -> (i32, i32) {
    %c0_i32 = arith.constant 0 : i32
    %c0_i32_0 = arith.constant 0 : i32
    %c0_i32_1 = arith.constant 0 : i32
    return %c0_i32, %c0_i32_0 : i32, i32
  }
  func.func @transform_2(%arg0: i32) -> (i32, i32) {
    %c0_i32 = arith.constant 0 : i32
    %c0_i32_0 = arith.constant 0 : i32
    %c0_i32_1 = arith.constant 0 : i32
    return %c0_i32, %c0_i32_0 : i32, i32
  }
  func.func @transform_3(%arg0: i32) -> (i32, i32) {
    %c0_i32 = arith.constant 0 : i32
    %c0_i32_0 = arith.constant 0 : i32
    return %arg0, %c0_i32 : i32, i32
  }
}

module attributes {stable_mosaic.version = 11 : i64} {
  func.func @_dynconv_bn_relu_kernel(%arg0: i32, %arg1: memref<2x4xf32, #tpu.memory_space<smem>>, %arg2: memref<1x256x64xbf16, #tpu.memory_space<vmem>>, %arg3: memref<9x64x64xf32, #tpu.memory_space<vmem>>, %arg4: memref<64x64xf32, #tpu.memory_space<vmem>>, %arg5: memref<3x64x64xf32, #tpu.memory_space<vmem>>, %arg6: memref<3x64x64xf32, #tpu.memory_space<vmem>>, %arg7: memref<9x1x64xf32, #tpu.memory_space<vmem>>, %arg8: memref<1x64xf32, #tpu.memory_space<vmem>>, %arg9: memref<1x256x64xbf16, #tpu.memory_space<vmem>>, %arg10: memref<18x32x64xbf16, #tpu.memory_space<vmem>>) attributes {dimension_semantics = [#tpu.dimension_semantics<parallel>], iteration_bounds = array<i64: 2>, scalar_prefetch = 0 : i64, scratch_operands = 1 : i64, tpu.core_type = #tpu.core_type<tc>, window_params = [{transform_indices = @transform_0, window_bounds = array<i64: 2, 4>}, {transform_indices = @transform_1, window_bounds = array<i64: 1, 256, 64>}, {pipeline_mode = #tpu.pipeline_mode<synchronous>, transform_indices = @transform_2, window_bounds = array<i64: 9, 64, 64>}, {pipeline_mode = #tpu.pipeline_mode<synchronous>, transform_indices = @transform_3, window_bounds = array<i64: 64, 64>}, {pipeline_mode = #tpu.pipeline_mode<synchronous>, transform_indices = @transform_4, window_bounds = array<i64: 3, 64, 64>}, {pipeline_mode = #tpu.pipeline_mode<synchronous>, transform_indices = @transform_5, window_bounds = array<i64: 3, 64, 64>}, {pipeline_mode = #tpu.pipeline_mode<synchronous>, transform_indices = @transform_6, window_bounds = array<i64: 9, 1, 64>}, {pipeline_mode = #tpu.pipeline_mode<synchronous>, transform_indices = @transform_7, window_bounds = array<i64: 1, 64>}, {transform_indices = @transform_8, window_bounds = array<i64: 1, 256, 64>}]} {
    %cst = arith.constant 0.000000e+00 : bf16
    %0 = vector.broadcast %cst : bf16 to vector<18x32x64xbf16>
    %c0 = arith.constant 0 : index
    %c0_0 = arith.constant 0 : index
    %c0_1 = arith.constant 0 : index
    %1 = vector.load %arg10[%c0, %c0_0, %c0_1] : memref<18x32x64xbf16, #tpu.memory_space<vmem>>, vector<18x32x64xbf16>
    tpu.vector_store %arg10[%c0, %c0_0, %c0_1], %0 {strides = array<i32>} : memref<18x32x64xbf16, #tpu.memory_space<vmem>>, vector<18x32x64xbf16>,
    %c0_2 = arith.constant 0 : index
    %c0_3 = arith.constant 0 : index
    %c0_4 = arith.constant 0 : index
    %2 = vector.load %arg2[%c0_2, %c0_3, %c0_4] : memref<1x256x64xbf16, #tpu.memory_space<vmem>>, vector<1x256x64xbf16>
    %3 = vector.shape_cast %2 : vector<1x256x64xbf16> to vector<256x64xbf16>
    %4 = vector.shape_cast %3 : vector<256x64xbf16> to vector<16x16x64xbf16>
    %c1 = arith.constant 1 : index
    %c8 = arith.constant 8 : index
    %c0_5 = arith.constant 0 : index
    %5 = vector.load %arg10[%c1, %c8, %c0_5] : memref<18x32x64xbf16, #tpu.memory_space<vmem>>, vector<16x16x64xbf16>
    tpu.vector_store %arg10[%c1, %c8, %c0_5], %4 {strides = array<i32>} : memref<18x32x64xbf16, #tpu.memory_space<vmem>>, vector<16x16x64xbf16>,
    %6 = arith.index_cast %arg0 : i32 to index
    %c0_6 = arith.constant 0 : index
    %7 = memref.load %arg1[%6, %c0_6] : memref<2x4xf32, #tpu.memory_space<smem>>
    %8 = arith.index_cast %arg0 : i32 to index
    %c1_7 = arith.constant 1 : index
    %9 = memref.load %arg1[%8, %c1_7] : memref<2x4xf32, #tpu.memory_space<smem>>
    %10 = arith.index_cast %arg0 : i32 to index
    %c2 = arith.constant 2 : index
    %11 = memref.load %arg1[%10, %c2] : memref<2x4xf32, #tpu.memory_space<smem>>
    %12 = arith.index_cast %arg0 : i32 to index
    %c3 = arith.constant 3 : index
    %13 = memref.load %arg1[%12, %c3] : memref<2x4xf32, #tpu.memory_space<smem>>
    %cst_8 = arith.constant 0.000000e+00 : f32
    %14 = vector.broadcast %cst_8 : f32 to vector<256x64xf32>
    %c0_9 = arith.constant 0 : index
    %c7 = arith.constant 7 : index
    %c0_10 = arith.constant 0 : index
    %15 = vector.load %arg10[%c0_9, %c7, %c0_10] : memref<18x32x64xbf16, #tpu.memory_space<vmem>>, vector<18x16x64xbf16>
    %16 = vector.extract_strided_slice %15 {offsets = [0, 0, 0], sizes = [16, 16, 64], strides = [1, 1, 1]} : vector<18x16x64xbf16> to vector<16x16x64xbf16>
    %17 = vector.shape_cast %16 : vector<16x16x64xbf16> to vector<256x64xbf16>
    %c0_11 = arith.constant 0 : index
    %c0_12 = arith.constant 0 : index
    %c0_13 = arith.constant 0 : index
    %18 = vector.load %arg3[%c0_11, %c0_12, %c0_13] : memref<9x64x64xf32, #tpu.memory_space<vmem>>, vector<1x64x64xf32>
    %19 = vector.shape_cast %18 : vector<1x64x64xf32> to vector<64x64xf32>
    %20 = arith.truncf %19 : vector<64x64xf32> to vector<64x64xbf16>
    %cst_14 = arith.constant dense<0.000000e+00> : vector<256x64xf32>
    %21 = tpu.matmul %17, %20, %cst_14 {dimension_numbers = #tpu.dot_dimension_numbers<[1], [0], [0], [1], [0, 0, 1, 1], [], []>} : vector<256x64xbf16>, vector<64x64xbf16>, vector<256x64xf32> -> vector<256x64xf32>
    %22 = arith.addf %14, %21 : vector<256x64xf32>
    %23 = arith.extf %17 : vector<256x64xbf16> to vector<256x64xf32>
    %c0_15 = arith.constant 0 : index
    %c0_16 = arith.constant 0 : index
    %c0_17 = arith.constant 0 : index
    %24 = vector.load %arg7[%c0_15, %c0_16, %c0_17] : memref<9x1x64xf32, #tpu.memory_space<vmem>>, vector<1x1x64xf32>
    %25 = vector.shape_cast %24 : vector<1x1x64xf32> to vector<1x64xf32>
    %26 = vector.broadcast %7 : f32 to vector<1x64xf32>
    %27 = arith.mulf %26, %25 : vector<1x64xf32>
    %28 = vector.broadcast %27 : vector<1x64xf32> to vector<256x64xf32>
    %29 = arith.mulf %23, %28 : vector<256x64xf32>
    %30 = arith.addf %22, %29 : vector<256x64xf32>
    %31 = vector.extract_strided_slice %15 {offsets = [1, 0, 0], sizes = [16, 16, 64], strides = [1, 1, 1]} : vector<18x16x64xbf16> to vector<16x16x64xbf16>
    %32 = vector.shape_cast %31 : vector<16x16x64xbf16> to vector<256x64xbf16>
    %c3_18 = arith.constant 3 : index
    %c0_19 = arith.constant 0 : index
    %c0_20 = arith.constant 0 : index
    %33 = vector.load %arg3[%c3_18, %c0_19, %c0_20] : memref<9x64x64xf32, #tpu.memory_space<vmem>>, vector<1x64x64xf32>
    %34 = vector.shape_cast %33 : vector<1x64x64xf32> to vector<64x64xf32>
    %c0_21 = arith.constant 0 : index
    %c0_22 = arith.constant 0 : index
    %c0_23 = arith.constant 0 : index
    %35 = vector.load %arg6[%c0_21, %c0_22, %c0_23] : memref<3x64x64xf32, #tpu.memory_space<vmem>>, vector<1x64x64xf32>
    %36 = vector.shape_cast %35 : vector<1x64x64xf32> to vector<64x64xf32>
    %37 = vector.broadcast %13 : f32 to vector<64x64xf32>
    %38 = arith.mulf %37, %36 : vector<64x64xf32>
    %39 = arith.addf %34, %38 : vector<64x64xf32>
    %40 = arith.truncf %39 : vector<64x64xf32> to vector<64x64xbf16>
    %cst_24 = arith.constant dense<0.000000e+00> : vector<256x64xf32>
    %41 = tpu.matmul %32, %40, %cst_24 {dimension_numbers = #tpu.dot_dimension_numbers<[1], [0], [0], [1], [0, 0, 1, 1], [], []>} : vector<256x64xbf16>, vector<64x64xbf16>, vector<256x64xf32> -> vector<256x64xf32>
    %42 = arith.addf %30, %41 : vector<256x64xf32>
    %43 = arith.extf %32 : vector<256x64xbf16> to vector<256x64xf32>
    %c3_25 = arith.constant 3 : index
    %c0_26 = arith.constant 0 : index
    %c0_27 = arith.constant 0 : index
    %44 = vector.load %arg7[%c3_25, %c0_26, %c0_27] : memref<9x1x64xf32, #tpu.memory_space<vmem>>, vector<1x1x64xf32>
    %45 = vector.shape_cast %44 : vector<1x1x64xf32> to vector<1x64xf32>
    %46 = vector.broadcast %7 : f32 to vector<1x64xf32>
    %47 = arith.mulf %46, %45 : vector<1x64xf32>
    %48 = vector.broadcast %47 : vector<1x64xf32> to vector<256x64xf32>
    %49 = arith.mulf %43, %48 : vector<256x64xf32>
    %50 = arith.addf %42, %49 : vector<256x64xf32>
    %51 = vector.extract_strided_slice %15 {offsets = [2, 0, 0], sizes = [16, 16, 64], strides = [1, 1, 1]} : vector<18x16x64xbf16> to vector<16x16x64xbf16>
    %52 = vector.shape_cast %51 : vector<16x16x64xbf16> to vector<256x64xbf16>
    %c6 = arith.constant 6 : index
    %c0_28 = arith.constant 0 : index
    %c0_29 = arith.constant 0 : index
    %53 = vector.load %arg3[%c6, %c0_28, %c0_29] : memref<9x64x64xf32, #tpu.memory_space<vmem>>, vector<1x64x64xf32>
    %54 = vector.shape_cast %53 : vector<1x64x64xf32> to vector<64x64xf32>
    %55 = arith.truncf %54 : vector<64x64xf32> to vector<64x64xbf16>
    %cst_30 = arith.constant dense<0.000000e+00> : vector<256x64xf32>
    %56 = tpu.matmul %52, %55, %cst_30 {dimension_numbers = #tpu.dot_dimension_numbers<[1], [0], [0], [1], [0, 0, 1, 1], [], []>} : vector<256x64xbf16>, vector<64x64xbf16>, vector<256x64xf32> -> vector<256x64xf32>
    %57 = arith.addf %50, %56 : vector<256x64xf32>
    %58 = arith.extf %52 : vector<256x64xbf16> to vector<256x64xf32>
    %c6_31 = arith.constant 6 : index
    %c0_32 = arith.constant 0 : index
    %c0_33 = arith.constant 0 : index
    %59 = vector.load %arg7[%c6_31, %c0_32, %c0_33] : memref<9x1x64xf32, #tpu.memory_space<vmem>>, vector<1x1x64xf32>
    %60 = vector.shape_cast %59 : vector<1x1x64xf32> to vector<1x64xf32>
    %61 = vector.broadcast %7 : f32 to vector<1x64xf32>
    %62 = arith.mulf %61, %60 : vector<1x64xf32>
    %63 = vector.broadcast %62 : vector<1x64xf32> to vector<256x64xf32>
    %64 = arith.mulf %58, %63 : vector<256x64xf32>
    %65 = arith.addf %57, %64 : vector<256x64xf32>
    %c0_34 = arith.constant 0 : index
    %c8_35 = arith.constant 8 : index
    %c0_36 = arith.constant 0 : index
    %66 = vector.load %arg10[%c0_34, %c8_35, %c0_36] : memref<18x32x64xbf16, #tpu.memory_space<vmem>>, vector<18x16x64xbf16>
    %67 = vector.extract_strided_slice %66 {offsets = [0, 0, 0], sizes = [16, 16, 64], strides = [1, 1, 1]} : vector<18x16x64xbf16> to vector<16x16x64xbf16>
    %68 = vector.shape_cast %67 : vector<16x16x64xbf16> to vector<256x64xbf16>
    %c1_37 = arith.constant 1 : index
    %c0_38 = arith.constant 0 : index
    %c0_39 = arith.constant 0 : index
    %69 = vector.load %arg3[%c1_37, %c0_38, %c0_39] : memref<9x64x64xf32, #tpu.memory_space<vmem>>, vector<1x64x64xf32>
    %70 = vector.shape_cast %69 : vector<1x64x64xf32> to vector<64x64xf32>
    %c0_40 = arith.constant 0 : index
    %c0_41 = arith.constant 0 : index
    %c0_42 = arith.constant 0 : index
    %71 = vector.load %arg5[%c0_40, %c0_41, %c0_42] : memref<3x64x64xf32, #tpu.memory_space<vmem>>, vector<1x64x64xf32>
    %72 = vector.shape_cast %71 : vector<1x64x64xf32> to vector<64x64xf32>
    %73 = vector.broadcast %11 : f32 to vector<64x64xf32>
    %74 = arith.mulf %73, %72 : vector<64x64xf32>
    %75 = arith.addf %70, %74 : vector<64x64xf32>
    %76 = arith.truncf %75 : vector<64x64xf32> to vector<64x64xbf16>
    %cst_43 = arith.constant dense<0.000000e+00> : vector<256x64xf32>
    %77 = tpu.matmul %68, %76, %cst_43 {dimension_numbers = #tpu.dot_dimension_numbers<[1], [0], [0], [1], [0, 0, 1, 1], [], []>} : vector<256x64xbf16>, vector<64x64xbf16>, vector<256x64xf32> -> vector<256x64xf32>
    %78 = arith.addf %65, %77 : vector<256x64xf32>
    %79 = arith.extf %68 : vector<256x64xbf16> to vector<256x64xf32>
    %c1_44 = arith.constant 1 : index
    %c0_45 = arith.constant 0 : index
    %c0_46 = arith.constant 0 : index
    %80 = vector.load %arg7[%c1_44, %c0_45, %c0_46] : memref<9x1x64xf32, #tpu.memory_space<vmem>>, vector<1x1x64xf32>
    %81 = vector.shape_cast %80 : vector<1x1x64xf32> to vector<1x64xf32>
    %82 = vector.broadcast %7 : f32 to vector<1x64xf32>
    %83 = arith.mulf %82, %81 : vector<1x64xf32>
    %84 = vector.broadcast %83 : vector<1x64xf32> to vector<256x64xf32>
    %85 = arith.mulf %79, %84 : vector<256x64xf32>
    %86 = arith.addf %78, %85 : vector<256x64xf32>
    %87 = vector.extract_strided_slice %66 {offsets = [1, 0, 0], sizes = [16, 16, 64], strides = [1, 1, 1]} : vector<18x16x64xbf16> to vector<16x16x64xbf16>
    %88 = vector.shape_cast %87 : vector<16x16x64xbf16> to vector<256x64xbf16>
    %c4 = arith.constant 4 : index
    %c0_47 = arith.constant 0 : index
    %c0_48 = arith.constant 0 : index
    %89 = vector.load %arg3[%c4, %c0_47, %c0_48] : memref<9x64x64xf32, #tpu.memory_space<vmem>>, vector<1x64x64xf32>
    %90 = vector.shape_cast %89 : vector<1x64x64xf32> to vector<64x64xf32>
    %c1_49 = arith.constant 1 : index
    %c0_50 = arith.constant 0 : index
    %c0_51 = arith.constant 0 : index
    %91 = vector.load %arg5[%c1_49, %c0_50, %c0_51] : memref<3x64x64xf32, #tpu.memory_space<vmem>>, vector<1x64x64xf32>
    %92 = vector.shape_cast %91 : vector<1x64x64xf32> to vector<64x64xf32>
    %93 = vector.broadcast %11 : f32 to vector<64x64xf32>
    %94 = arith.mulf %93, %92 : vector<64x64xf32>
    %95 = arith.addf %90, %94 : vector<64x64xf32>
    %c1_52 = arith.constant 1 : index
    %c0_53 = arith.constant 0 : index
    %c0_54 = arith.constant 0 : index
    %96 = vector.load %arg6[%c1_52, %c0_53, %c0_54] : memref<3x64x64xf32, #tpu.memory_space<vmem>>, vector<1x64x64xf32>
    %97 = vector.shape_cast %96 : vector<1x64x64xf32> to vector<64x64xf32>
    %98 = vector.broadcast %13 : f32 to vector<64x64xf32>
    %99 = arith.mulf %98, %97 : vector<64x64xf32>
    %100 = arith.addf %95, %99 : vector<64x64xf32>
    %c0_55 = arith.constant 0 : index
    %c0_56 = arith.constant 0 : index
    %101 = vector.load %arg4[%c0_55, %c0_56] : memref<64x64xf32, #tpu.memory_space<vmem>>, vector<64x64xf32>
    %102 = vector.broadcast %9 : f32 to vector<64x64xf32>
    %103 = arith.mulf %102, %101 : vector<64x64xf32>
    %104 = arith.addf %100, %103 : vector<64x64xf32>
    %105 = arith.truncf %104 : vector<64x64xf32> to vector<64x64xbf16>
    %cst_57 = arith.constant dense<0.000000e+00> : vector<256x64xf32>
    %106 = tpu.matmul %88, %105, %cst_57 {dimension_numbers = #tpu.dot_dimension_numbers<[1], [0], [0], [1], [0, 0, 1, 1], [], []>} : vector<256x64xbf16>, vector<64x64xbf16>, vector<256x64xf32> -> vector<256x64xf32>
    %107 = arith.addf %86, %106 : vector<256x64xf32>
    %108 = arith.extf %88 : vector<256x64xbf16> to vector<256x64xf32>
    %c4_58 = arith.constant 4 : index
    %c0_59 = arith.constant 0 : index
    %c0_60 = arith.constant 0 : index
    %109 = vector.load %arg7[%c4_58, %c0_59, %c0_60] : memref<9x1x64xf32, #tpu.memory_space<vmem>>, vector<1x1x64xf32>
    %110 = vector.shape_cast %109 : vector<1x1x64xf32> to vector<1x64xf32>
    %111 = vector.broadcast %7 : f32 to vector<1x64xf32>
    %112 = arith.mulf %111, %110 : vector<1x64xf32>
    %113 = vector.broadcast %112 : vector<1x64xf32> to vector<256x64xf32>
    %114 = arith.mulf %108, %113 : vector<256x64xf32>
    %115 = arith.addf %107, %114 : vector<256x64xf32>
    %116 = vector.extract_strided_slice %66 {offsets = [2, 0, 0], sizes = [16, 16, 64], strides = [1, 1, 1]} : vector<18x16x64xbf16> to vector<16x16x64xbf16>
    %117 = vector.shape_cast %116 : vector<16x16x64xbf16> to vector<256x64xbf16>
    %c7_61 = arith.constant 7 : index
    %c0_62 = arith.constant 0 : index
    %c0_63 = arith.constant 0 : index
    %118 = vector.load %arg3[%c7_61, %c0_62, %c0_63] : memref<9x64x64xf32, #tpu.memory_space<vmem>>, vector<1x64x64xf32>
    %119 = vector.shape_cast %118 : vector<1x64x64xf32> to vector<64x64xf32>
    %c2_64 = arith.constant 2 : index
    %c0_65 = arith.constant 0 : index
    %c0_66 = arith.constant 0 : index
    %120 = vector.load %arg5[%c2_64, %c0_65, %c0_66] : memref<3x64x64xf32, #tpu.memory_space<vmem>>, vector<1x64x64xf32>
    %121 = vector.shape_cast %120 : vector<1x64x64xf32> to vector<64x64xf32>
    %122 = vector.broadcast %11 : f32 to vector<64x64xf32>
    %123 = arith.mulf %122, %121 : vector<64x64xf32>
    %124 = arith.addf %119, %123 : vector<64x64xf32>
    %125 = arith.truncf %124 : vector<64x64xf32> to vector<64x64xbf16>
    %cst_67 = arith.constant dense<0.000000e+00> : vector<256x64xf32>
    %126 = tpu.matmul %117, %125, %cst_67 {dimension_numbers = #tpu.dot_dimension_numbers<[1], [0], [0], [1], [0, 0, 1, 1], [], []>} : vector<256x64xbf16>, vector<64x64xbf16>, vector<256x64xf32> -> vector<256x64xf32>
    %127 = arith.addf %115, %126 : vector<256x64xf32>
    %128 = arith.extf %117 : vector<256x64xbf16> to vector<256x64xf32>
    %c7_68 = arith.constant 7 : index
    %c0_69 = arith.constant 0 : index
    %c0_70 = arith.constant 0 : index
    %129 = vector.load %arg7[%c7_68, %c0_69, %c0_70] : memref<9x1x64xf32, #tpu.memory_space<vmem>>, vector<1x1x64xf32>
    %130 = vector.shape_cast %129 : vector<1x1x64xf32> to vector<1x64xf32>
    %131 = vector.broadcast %7 : f32 to vector<1x64xf32>
    %132 = arith.mulf %131, %130 : vector<1x64xf32>
    %133 = vector.broadcast %132 : vector<1x64xf32> to vector<256x64xf32>
    %134 = arith.mulf %128, %133 : vector<256x64xf32>
    %135 = arith.addf %127, %134 : vector<256x64xf32>
    %c0_71 = arith.constant 0 : index
    %c9 = arith.constant 9 : index
    %c0_72 = arith.constant 0 : index
    %136 = vector.load %arg10[%c0_71, %c9, %c0_72] : memref<18x32x64xbf16, #tpu.memory_space<vmem>>, vector<18x16x64xbf16>
    %137 = vector.extract_strided_slice %136 {offsets = [0, 0, 0], sizes = [16, 16, 64], strides = [1, 1, 1]} : vector<18x16x64xbf16> to vector<16x16x64xbf16>
    %138 = vector.shape_cast %137 : vector<16x16x64xbf16> to vector<256x64xbf16>
    %c2_73 = arith.constant 2 : index
    %c0_74 = arith.constant 0 : index
    %c0_75 = arith.constant 0 : index
    %139 = vector.load %arg3[%c2_73, %c0_74, %c0_75] : memref<9x64x64xf32, #tpu.memory_space<vmem>>, vector<1x64x64xf32>
    %140 = vector.shape_cast %139 : vector<1x64x64xf32> to vector<64x64xf32>
    %141 = arith.truncf %140 : vector<64x64xf32> to vector<64x64xbf16>
    %cst_76 = arith.constant dense<0.000000e+00> : vector<256x64xf32>
    %142 = tpu.matmul %138, %141, %cst_76 {dimension_numbers = #tpu.dot_dimension_numbers<[1], [0], [0], [1], [0, 0, 1, 1], [], []>} : vector<256x64xbf16>, vector<64x64xbf16>, vector<256x64xf32> -> vector<256x64xf32>
    %143 = arith.addf %135, %142 : vector<256x64xf32>
    %144 = arith.extf %138 : vector<256x64xbf16> to vector<256x64xf32>
    %c2_77 = arith.constant 2 : index
    %c0_78 = arith.constant 0 : index
    %c0_79 = arith.constant 0 : index
    %145 = vector.load %arg7[%c2_77, %c0_78, %c0_79] : memref<9x1x64xf32, #tpu.memory_space<vmem>>, vector<1x1x64xf32>
    %146 = vector.shape_cast %145 : vector<1x1x64xf32> to vector<1x64xf32>
    %147 = vector.broadcast %7 : f32 to vector<1x64xf32>
    %148 = arith.mulf %147, %146 : vector<1x64xf32>
    %149 = vector.broadcast %148 : vector<1x64xf32> to vector<256x64xf32>
    %150 = arith.mulf %144, %149 : vector<256x64xf32>
    %151 = arith.addf %143, %150 : vector<256x64xf32>
    %152 = vector.extract_strided_slice %136 {offsets = [1, 0, 0], sizes = [16, 16, 64], strides = [1, 1, 1]} : vector<18x16x64xbf16> to vector<16x16x64xbf16>
    %153 = vector.shape_cast %152 : vector<16x16x64xbf16> to vector<256x64xbf16>
    %c5 = arith.constant 5 : index
    %c0_80 = arith.constant 0 : index
    %c0_81 = arith.constant 0 : index
    %154 = vector.load %arg3[%c5, %c0_80, %c0_81] : memref<9x64x64xf32, #tpu.memory_space<vmem>>, vector<1x64x64xf32>
    %155 = vector.shape_cast %154 : vector<1x64x64xf32> to vector<64x64xf32>
    %c2_82 = arith.constant 2 : index
    %c0_83 = arith.constant 0 : index
    %c0_84 = arith.constant 0 : index
    %156 = vector.load %arg6[%c2_82, %c0_83, %c0_84] : memref<3x64x64xf32, #tpu.memory_space<vmem>>, vector<1x64x64xf32>
    %157 = vector.shape_cast %156 : vector<1x64x64xf32> to vector<64x64xf32>
    %158 = vector.broadcast %13 : f32 to vector<64x64xf32>
    %159 = arith.mulf %158, %157 : vector<64x64xf32>
    %160 = arith.addf %155, %159 : vector<64x64xf32>
    %161 = arith.truncf %160 : vector<64x64xf32> to vector<64x64xbf16>
    %cst_85 = arith.constant dense<0.000000e+00> : vector<256x64xf32>
    %162 = tpu.matmul %153, %161, %cst_85 {dimension_numbers = #tpu.dot_dimension_numbers<[1], [0], [0], [1], [0, 0, 1, 1], [], []>} : vector<256x64xbf16>, vector<64x64xbf16>, vector<256x64xf32> -> vector<256x64xf32>
    %163 = arith.addf %151, %162 : vector<256x64xf32>
    %164 = arith.extf %153 : vector<256x64xbf16> to vector<256x64xf32>
    %c5_86 = arith.constant 5 : index
    %c0_87 = arith.constant 0 : index
    %c0_88 = arith.constant 0 : index
    %165 = vector.load %arg7[%c5_86, %c0_87, %c0_88] : memref<9x1x64xf32, #tpu.memory_space<vmem>>, vector<1x1x64xf32>
    %166 = vector.shape_cast %165 : vector<1x1x64xf32> to vector<1x64xf32>
    %167 = vector.broadcast %7 : f32 to vector<1x64xf32>
    %168 = arith.mulf %167, %166 : vector<1x64xf32>
    %169 = vector.broadcast %168 : vector<1x64xf32> to vector<256x64xf32>
    %170 = arith.mulf %164, %169 : vector<256x64xf32>
    %171 = arith.addf %163, %170 : vector<256x64xf32>
    %172 = vector.extract_strided_slice %136 {offsets = [2, 0, 0], sizes = [16, 16, 64], strides = [1, 1, 1]} : vector<18x16x64xbf16> to vector<16x16x64xbf16>
    %173 = vector.shape_cast %172 : vector<16x16x64xbf16> to vector<256x64xbf16>
    %c8_89 = arith.constant 8 : index
    %c0_90 = arith.constant 0 : index
    %c0_91 = arith.constant 0 : index
    %174 = vector.load %arg3[%c8_89, %c0_90, %c0_91] : memref<9x64x64xf32, #tpu.memory_space<vmem>>, vector<1x64x64xf32>
    %175 = vector.shape_cast %174 : vector<1x64x64xf32> to vector<64x64xf32>
    %176 = arith.truncf %175 : vector<64x64xf32> to vector<64x64xbf16>
    %cst_92 = arith.constant dense<0.000000e+00> : vector<256x64xf32>
    %177 = tpu.matmul %173, %176, %cst_92 {dimension_numbers = #tpu.dot_dimension_numbers<[1], [0], [0], [1], [0, 0, 1, 1], [], []>} : vector<256x64xbf16>, vector<64x64xbf16>, vector<256x64xf32> -> vector<256x64xf32>
    %178 = arith.addf %171, %177 : vector<256x64xf32>
    %179 = arith.extf %173 : vector<256x64xbf16> to vector<256x64xf32>
    %c8_93 = arith.constant 8 : index
    %c0_94 = arith.constant 0 : index
    %c0_95 = arith.constant 0 : index
    %180 = vector.load %arg7[%c8_93, %c0_94, %c0_95] : memref<9x1x64xf32, #tpu.memory_space<vmem>>, vector<1x1x64xf32>
    %181 = vector.shape_cast %180 : vector<1x1x64xf32> to vector<1x64xf32>
    %182 = vector.broadcast %7 : f32 to vector<1x64xf32>
    %183 = arith.mulf %182, %181 : vector<1x64xf32>
    %184 = vector.broadcast %183 : vector<1x64xf32> to vector<256x64xf32>
    %185 = arith.mulf %179, %184 : vector<256x64xf32>
    %186 = arith.addf %178, %185 : vector<256x64xf32>
    %c0_96 = arith.constant 0 : index
    %c0_97 = arith.constant 0 : index
    %187 = vector.load %arg8[%c0_96, %c0_97] : memref<1x64xf32, #tpu.memory_space<vmem>>, vector<1x64xf32>
    %188 = vector.broadcast %187 : vector<1x64xf32> to vector<256x64xf32>
    %189 = arith.addf %186, %188 : vector<256x64xf32>
    %cst_98 = arith.constant 0.000000e+00 : f32
    %190 = vector.broadcast %cst_98 : f32 to vector<256x64xf32>
    %191 = arith.maximumf %189, %190 : vector<256x64xf32>
    %192 = vector.shape_cast %191 : vector<256x64xf32> to vector<1x256x64xf32>
    %193 = arith.truncf %192 : vector<1x256x64xf32> to vector<1x256x64xbf16>
    %c0_99 = arith.constant 0 : index
    %c0_100 = arith.constant 0 : index
    %c0_101 = arith.constant 0 : index
    %194 = vector.load %arg9[%c0_99, %c0_100, %c0_101] : memref<1x256x64xbf16, #tpu.memory_space<vmem>>, vector<1x256x64xbf16>
    tpu.vector_store %arg9[%c0_99, %c0_100, %c0_101], %193 {strides = array<i32>} : memref<1x256x64xbf16, #tpu.memory_space<vmem>>, vector<1x256x64xbf16>,
    return
  }
  func.func @transform_0(%arg0: i32) -> (i32, i32) {
    %c0_i32 = arith.constant 0 : i32
    %c0_i32_0 = arith.constant 0 : i32
    %c0_i32_1 = arith.constant 0 : i32
    return %c0_i32, %c0_i32_0 : i32, i32
  }
  func.func @transform_1(%arg0: i32) -> (i32, i32, i32) {
    %c0_i32 = arith.constant 0 : i32
    %c0_i32_0 = arith.constant 0 : i32
    %c0_i32_1 = arith.constant 0 : i32
    return %arg0, %c0_i32, %c0_i32_0 : i32, i32, i32
  }
  func.func @transform_2(%arg0: i32) -> (i32, i32, i32) {
    %c0_i32 = arith.constant 0 : i32
    %c0_i32_0 = arith.constant 0 : i32
    %c0_i32_1 = arith.constant 0 : i32
    %c0_i32_2 = arith.constant 0 : i32
    return %c0_i32, %c0_i32_0, %c0_i32_1 : i32, i32, i32
  }
  func.func @transform_3(%arg0: i32) -> (i32, i32) {
    %c0_i32 = arith.constant 0 : i32
    %c0_i32_0 = arith.constant 0 : i32
    %c0_i32_1 = arith.constant 0 : i32
    return %c0_i32, %c0_i32_0 : i32, i32
  }
  func.func @transform_4(%arg0: i32) -> (i32, i32, i32) {
    %c0_i32 = arith.constant 0 : i32
    %c0_i32_0 = arith.constant 0 : i32
    %c0_i32_1 = arith.constant 0 : i32
    %c0_i32_2 = arith.constant 0 : i32
    return %c0_i32, %c0_i32_0, %c0_i32_1 : i32, i32, i32
  }
  func.func @transform_5(%arg0: i32) -> (i32, i32, i32) {
    %c0_i32 = arith.constant 0 : i32
    %c0_i32_0 = arith.constant 0 : i32
    %c0_i32_1 = arith.constant 0 : i32
    %c0_i32_2 = arith.constant 0 : i32
    return %c0_i32, %c0_i32_0, %c0_i32_1 : i32, i32, i32
  }
  func.func @transform_6(%arg0: i32) -> (i32, i32, i32) {
    %c0_i32 = arith.constant 0 : i32
    %c0_i32_0 = arith.constant 0 : i32
    %c0_i32_1 = arith.constant 0 : i32
    %c0_i32_2 = arith.constant 0 : i32
    return %c0_i32, %c0_i32_0, %c0_i32_1 : i32, i32, i32
  }
  func.func @transform_7(%arg0: i32) -> (i32, i32) {
    %c0_i32 = arith.constant 0 : i32
    %c0_i32_0 = arith.constant 0 : i32
    %c0_i32_1 = arith.constant 0 : i32
    return %c0_i32, %c0_i32_0 : i32, i32
  }
  func.func @transform_8(%arg0: i32) -> (i32, i32, i32) {
    %c0_i32 = arith.constant 0 : i32
    %c0_i32_0 = arith.constant 0 : i32
    %c0_i32_1 = arith.constant 0 : i32
    return %arg0, %c0_i32, %c0_i32_0 : i32, i32, i32
  }
}

module attributes {stable_mosaic.version = 11 : i64} {
  func.func @_pw_bn_res_relu_kernel(%arg0: i32, %arg1: memref<512x64xbf16, #tpu.memory_space<vmem>>, %arg2: memref<64x256xbf16, #tpu.memory_space<vmem>>, %arg3: memref<1x256xf32, #tpu.memory_space<vmem>>, %arg4: memref<512x256xf32, #tpu.memory_space<vmem>>, %arg5: memref<512x256xf32, #tpu.memory_space<vmem>>) attributes {dimension_semantics = [#tpu.dimension_semantics<parallel>], iteration_bounds = array<i64: 1>, scalar_prefetch = 0 : i64, scratch_operands = 0 : i64, tpu.core_type = #tpu.core_type<tc>, window_params = [{transform_indices = @transform_0, window_bounds = array<i64: 512, 64>}, {pipeline_mode = #tpu.pipeline_mode<synchronous>, transform_indices = @transform_1, window_bounds = array<i64: 64, 256>}, {pipeline_mode = #tpu.pipeline_mode<synchronous>, transform_indices = @transform_2, window_bounds = array<i64: 1, 256>}, {transform_indices = @transform_3, window_bounds = array<i64: 512, 256>}, {transform_indices = @transform_4, window_bounds = array<i64: 512, 256>}]} {
    %c0 = arith.constant 0 : index
    %c0_0 = arith.constant 0 : index
    %0 = vector.load %arg1[%c0, %c0_0] : memref<512x64xbf16, #tpu.memory_space<vmem>>, vector<512x64xbf16>
    %c0_1 = arith.constant 0 : index
    %c0_2 = arith.constant 0 : index
    %1 = vector.load %arg2[%c0_1, %c0_2] : memref<64x256xbf16, #tpu.memory_space<vmem>>, vector<64x256xbf16>
    %cst = arith.constant dense<0.000000e+00> : vector<512x256xf32>
    %2 = tpu.matmul %0, %1, %cst {dimension_numbers = #tpu.dot_dimension_numbers<[1], [0], [0], [1], [0, 0, 1, 1], [], []>} : vector<512x64xbf16>, vector<64x256xbf16>, vector<512x256xf32> -> vector<512x256xf32>
    %c0_3 = arith.constant 0 : index
    %c0_4 = arith.constant 0 : index
    %3 = vector.load %arg3[%c0_3, %c0_4] : memref<1x256xf32, #tpu.memory_space<vmem>>, vector<1x256xf32>
    %4 = vector.broadcast %3 : vector<1x256xf32> to vector<512x256xf32>
    %5 = arith.addf %2, %4 : vector<512x256xf32>
    %c0_5 = arith.constant 0 : index
    %c0_6 = arith.constant 0 : index
    %6 = vector.load %arg4[%c0_5, %c0_6] : memref<512x256xf32, #tpu.memory_space<vmem>>, vector<512x256xf32>
    %7 = arith.addf %5, %6 : vector<512x256xf32>
    %cst_7 = arith.constant 0.000000e+00 : f32
    %8 = vector.broadcast %cst_7 : f32 to vector<512x256xf32>
    %9 = arith.maximumf %7, %8 : vector<512x256xf32>
    %c0_8 = arith.constant 0 : index
    %c0_9 = arith.constant 0 : index
    %10 = vector.load %arg5[%c0_8, %c0_9] : memref<512x256xf32, #tpu.memory_space<vmem>>, vector<512x256xf32>
    tpu.vector_store %arg5[%c0_8, %c0_9], %9 {strides = array<i32>} : memref<512x256xf32, #tpu.memory_space<vmem>>, vector<512x256xf32>,
    return
  }
  func.func @transform_0(%arg0: i32) -> (i32, i32) {
    %c0_i32 = arith.constant 0 : i32
    %c0_i32_0 = arith.constant 0 : i32
    return %arg0, %c0_i32 : i32, i32
  }
  func.func @transform_1(%arg0: i32) -> (i32, i32) {
    %c0_i32 = arith.constant 0 : i32
    %c0_i32_0 = arith.constant 0 : i32
    %c0_i32_1 = arith.constant 0 : i32
    return %c0_i32, %c0_i32_0 : i32, i32
  }
  func.func @transform_2(%arg0: i32) -> (i32, i32) {
    %c0_i32 = arith.constant 0 : i32
    %c0_i32_0 = arith.constant 0 : i32
    %c0_i32_1 = arith.constant 0 : i32
    return %c0_i32, %c0_i32_0 : i32, i32
  }
  func.func @transform_3(%arg0: i32) -> (i32, i32) {
    %c0_i32 = arith.constant 0 : i32
    %c0_i32_0 = arith.constant 0 : i32
    return %arg0, %c0_i32 : i32, i32
  }
  func.func @transform_4(%arg0: i32) -> (i32, i32) {
    %c0_i32 = arith.constant 0 : i32
    %c0_i32_0 = arith.constant 0 : i32
    return %arg0, %c0_i32 : i32, i32
  }
}

</mosaic_0001>

<bundles_post_ra>
// kernel: bottleneck_dynamic_forward.5
= control target key start
LH: loop header
LB: loop body
LE: loop exit
PB: predicated region body
PF: predicated region fallthrough
CT: control target
= control target key end

     0   :  { %v281_v34 = vmov 0.0   ;;  %vm282_vm0 = vmmov 0   ;;  %vm141_vm1 = vcmask 130048   ;;  %vm221_vm2 = vcmask 25600   ;;  %s419_s1 = inlined_call_operand.vmem [shape: f32[256,16], index: 1, kind: input, shape index: {}]   ;;  %s420_s0 = inlined_call_operand.vmem [shape: f32[2,256], index: 0, kind: input, shape index: {}]   ;;  %s421_s2 = inlined_call_operand.vmem [shape: f32[16,4], index: 2, kind: input, shape index: {}]   ;;  %s422_s3 = inlined_call_operand.vmem [shape: f32[1,4], index: 3, kind: input, shape index: {}]   ;;  %s423_s4 = inlined_call_operand.vmem [shape: f32[2,4], index: 4, kind: output, shape index: {}]  }
   0x1   :  { %v49_v0 = vld [vmem:[%s419_s1 + $0xf8] sm:$0xff]  ;;  %v48_v2 = vld [vmem:[%s419_s1 + $0xf0] sm:$0xff]  ;;  %v47_v4 = vld [vmem:[%s419_s1 + $0xe8] sm:$0xff]  ;;  %268 = vmatprep.subr.mxu1 %v281_v34  ;;  %272 = vmatprep.mubr.msk.f32.mxu1 %vm282_vm0, %v281_v34 }
   0x2   :  { %v33_v1 = vld [vmem:[%s419_s1 + $0x78] sm:$0xff]  ;;  %230 = vmatprep.subr.mxu0 %v49_v0  ;;  %v32_v3 = vld [vmem:[%s419_s1 + $0x70] sm:$0xff]  ;;  %v31_v5 = vld [vmem:[%s419_s1 + $0x68] sm:$0xff] }
   0x3   :  { %231 = vmatpush3.msra.mxu0 %v33_v1  ;;  %v46_v6 = vld [vmem:[%s419_s1 + $0xe0] sm:$0xff]  ;;  %v45_v8 = vld [vmem:[%s419_s1 + $0xd8] sm:$0xff]  ;;  %v44_v10 = vld [vmem:[%s419_s1 + $0xd0] sm:$0xff] }
   0x4   :  { %232 = vmatprep.subr.mxu0 %v48_v2  ;;  %v30_v7 = vld [vmem:[%s419_s1 + $0x60] sm:$0xff]  ;;  %v29_v9 = vld [vmem:[%s419_s1 + $0x58] sm:$0xff]  ;;  %v28_v11 = vld [vmem:[%s419_s1 + $0x50] sm:$0xff] }
   0x5   :  { %233 = vmatpush3.msra.mxu0 %v32_v3  ;;  %v43_v12 = vld [vmem:[%s419_s1 + $0xc8] sm:$0xff]  ;;  %v227_v13 = vld.sshfl [vmem:[%s420_s0] sm:$0x33 pattern:$0x76325410]  ;;  %v41_v18 = vld [vmem:[%s419_s1 + $0xb8] sm:$0xff] }
   0x6   :  { %234 = vmatprep.subr.mxu0 %v47_v4  ;;  %v27_v14 = vld [vmem:[%s419_s1 + $0x48] sm:$0xff]  ;;  %v58_v15 = vcombine.high %v227_v13, %v227_v13  ;;  %v42_v16 = vld [vmem:[%s419_s1 + $0xc0] sm:$0xff]  ;;  %v25_v19 = vld [vmem:[%s419_s1 + $0x38] sm:$0xff] }
   0x7   :  { %235 = vmatpush3.msra.mxu0 %v31_v5  ;;  %v26_v17 = vld [vmem:[%s419_s1 + $0x40] sm:$0xff]  ;;  %v40_v20 = vld [vmem:[%s419_s1 + $0xb0] sm:$0xff]  ;;  %v39_v22 = vld [vmem:[%s419_s1 + $0xa8] sm:$0xff] }
   0x8   :  { %236 = vmatprep.subr.mxu0 %v46_v6  ;;  %125 = vmatprep.mubr.f32.mxu0 %v58_v15  ;;  %v24_v21 = vld [vmem:[%s419_s1 + $0x30] sm:$0xff]  ;;  %v23_v23 = vld [vmem:[%s419_s1 + $0x28] sm:$0xff]  ;;  %v38_v24 = vld [vmem:[%s419_s1 + $0xa0] sm:$0xff] }
   0x9   :  { %237 = vmatpush3.msra.mxu0 %v30_v7  ;;  %v22_v25 = vld [vmem:[%s419_s1 + $0x20] sm:$0xff]  ;;  %v37_v26 = vld [vmem:[%s419_s1 + $0x98] sm:$0xff]  ;;  %v36_v28 = vld [vmem:[%s419_s1 + $0x90] sm:$0xff] }
   0xa   :  { %238 = vmatprep.subr.mxu0 %v45_v8  ;;  %v21_v27 = vld [vmem:[%s419_s1 + $0x18] sm:$0xff]  ;;  %v20_v29 = vld [vmem:[%s419_s1 + $0x10] sm:$0xff]  ;;  %v35_v30 = vld [vmem:[%s419_s1 + $0x88] sm:$0xff] }
   0xb   :  { %239 = vmatpush3.msra.mxu0 %v29_v9  ;;  %v19_v31 = vld [vmem:[%s419_s1 + $0x8] sm:$0xff]  ;;  %v34_v32 = vld [vmem:[%s419_s1 + $0x80] sm:$0xff] }
   0xc   :  { %240 = vmatprep.subr.mxu0 %v44_v10  ;;  %v18_v33 = vld [vmem:[%s419_s1] sm:$0xff]  ;;  %v133_v35 = vld [vmem:[%s421_s2 + $0x8] sm:$0xff] }
   0xd   :  { %241 = vmatpush3.msra.mxu0 %v28_v11  ;;  %269 = vmatpush3.msra.mxu1 %v133_v35  ;;  %v132_v36 = vld [vmem:[%s421_s2] sm:$0xff] }
   0xe   :  { %242 = vmatprep.subr.mxu0 %v43_v12  ;;  %270 = vmatprep.subr.mxu1 %v281_v34  ;;  %v228_v41 = vld [vmem:[%s422_s3] ss:$0 sm:$0xff] }
   0xf   :  { %243 = vmatpush3.msra.mxu0 %v27_v14  ;;  %271 = vmatpush3.msra.mxu1 %v132_v36 }
  0x10   :  { %244 = vmatprep.subr.mxu0 %v42_v16 }
  0x11   :  { %245 = vmatpush3.msra.mxu0 %v26_v17 }
  0x12   :  { %246 = vmatprep.subr.mxu0 %v41_v18 }
  0x13   :  { %247 = vmatpush3.msra.mxu0 %v25_v19 }
  0x14   :  { %248 = vmatprep.subr.mxu0 %v40_v20 }
  0x15   :  { %249 = vmatpush3.msra.mxu0 %v24_v21 }
  0x16   :  { %250 = vmatprep.subr.mxu0 %v39_v22 }
  0x17   :  { %251 = vmatpush3.msra.mxu0 %v23_v23 }
  0x18   :  { %252 = vmatprep.subr.mxu0 %v38_v24 }
  0x19   :  { %253 = vmatpush3.msra.mxu0 %v22_v25 }
  0x1a   :  { %254 = vmatprep.subr.mxu0 %v37_v26 }
  0x1b   :  { %255 = vmatpush3.msra.mxu0 %v21_v27 }
  0x1c   :  { %256 = vmatprep.subr.mxu0 %v36_v28 }
  0x1d   :  { %257 = vmatpush3.msra.mxu0 %v20_v29 }
  0x1e   :  { %258 = vmatprep.subr.mxu0 %v35_v30 }
  0x1f   :  { %259 = vmatpush3.msra.mxu0 %v19_v31 }
  0x20   :  { %260 = vmatprep.subr.mxu0 %v34_v32 }
  0x21   :  { %261 = vmatpush3.msra.mxu0 %v18_v33 }
  0x22   :  { %126 = vmatmul.mubr.f32.vlgmr.msra.gmra.mxu0 %v227_v13 }
  0xe2   :  { %v262_v37 = vpop.f32.mrf.mxu0 }
  0xe4   :  { %v263_v38 = vpop.f32.mrf.mxu0 }
  0xe5   :  { %v264_v39 = vadd.f32 %v263_v38, %v262_v37 }
  0xe7   :  { %v131_v40 = vmax.f32 %v264_v39, 0.0 }
  0xe9   :  { %273 = vmatmul.mubr.msk.f32.vlgmr.msra.gmra.mxu1 %vm141_vm1, %v131_v40 }
 0x1a9   :  { %v211_v42 = vpop.f32.mrf.mxu1 }
 0x1aa   :  { %v212_v43 = vadd.f32 %v228_v41, %v211_v42 }
 0x1ab   :  { %v274_v44 = vpop.f32.mrf.mxu1 }
 0x1ac   :  { %v215_v45 = vsub.f32 0.0, %v212_v43 }
 0x1ae   :  { %v216_v46 = vmul.f32 1.442695, %v215_v45 }
 0x1b0   :  { %277 = vpow2.f32 %v216_v46 }
 0x1bd   :  { %v278_v47 = vpop.eup %277 }
 0x1be   :  { %v218_v48 = vadd.f32 1.0, %v278_v47 }
 0x1c0   :  { %279 = vrcp.f32 %v218_v48 }
 0x1cd   :  { %v280_v49 = vpop.eup %279 }
 0x1ce   :  { %222 = vst.msk [vmem:[%s423_s4] sm:$0x3] %vm221_vm2, %v280_v49 }

// kernel: bottleneck_dynamic_forward.4
= control target key start
LH: loop header
LB: loop body
LE: loop exit
PB: predicated region body
PF: predicated region fallthrough
CT: control target
= control target key end

     0   :  { %v1566_v0 = vmov 0   ;;  %vm1143_vm0 = vcmask 519168   ;;  %s2184_s1 = inlined_call_operand.vmem [shape: bf16[256,64], index: 1, kind: input, shape index: {}]   ;;  %s2185_s0 = inlined_call_operand.vmem [shape: bf16[512,256], index: 0, kind: input, shape index: {}]   ;;  %s2186_s2 = inlined_call_operand.vmem [shape: f32[1,64], index: 2, kind: input, shape index: {}]   ;;  %s2187_s3 = inlined_call_operand.vmem [shape: bf16[512,64], index: 3, kind: output, shape index: {}]  }
   0x1   :  { %534 = vmatprep.subr.bf16.mxu0 %v1566_v0  ;;  %1421 = vmatprep.subr.bf16.mxu1 %v1566_v0  ;;  %v1454_v1 = vld [vmem:[%s2184_s1 + $0x38] sm:$0xff]   ;;  %v1455_v2 = vld [vmem:[%s2184_s1 + $0x30] sm:$0xff]   ;;  %v1456_v3 = vld [vmem:[%s2184_s1 + $0x28] sm:$0xff]  }
   0x2   :  { %535 = vmatpush1.bf16.msra.mxu0 %v1454_v1  ;;  %1437 = vmatpush1.bf16.msra.mxu1 %v1454_v1  ;;  %v1457_v4 = vld [vmem:[%s2184_s1 + $0x20] sm:$0xff]   ;;  %v1458_v5 = vld [vmem:[%s2184_s1 + $0x18] sm:$0xff]   ;;  %v1459_v7 = vld [vmem:[%s2184_s1 + $0x10] sm:$0xff]  }
   0x3   :  { %536 = vmatprep.subr.bf16.mxu0 %v1566_v0  ;;  %1422 = vmatprep.subr.bf16.mxu1 %v1566_v0  ;;  %v1472_v6 = vld [vmem:[%s2185_s0 + $0x4] ss:$8 sps:$4 sm:$0xff]   ;;  %v1462_v11 = vld [vmem:[%s2184_s1 + $0x78] sm:$0xff]   ;;  %v1463_v12 = vld [vmem:[%s2184_s1 + $0x70] sm:$0xff]  }
   0x4   :  { %v1475_v8 = vld [vmem:[%s2185_s0 + $0x104] ss:$8 sps:$4 sm:$0xff]   ;;  %566 = vmatprep.mubr.bf16.mxu0 %v1472_v6  ;;  %v1466_v15 = vld [vmem:[%s2184_s1 + $0x58] sm:$0xff]   ;;  %v1467_v16 = vld [vmem:[%s2184_s1 + $0x50] sm:$0xff]  }
   0x5   :  { %694 = vmatprep.mubr.bf16.mxu1 %v1475_v8  ;;  %v1460_v9 = vld [vmem:[%s2184_s1 + $0x8] sm:$0xff]   ;;  %v1461_v10 = vld [vmem:[%s2184_s1] sm:$0xff]   ;;  %v1476_v21 = vld [vmem:[%s2185_s0 + $0x14] ss:$8 sps:$4 sm:$0xff]  }
   0x6   :  { %537 = vmatpush1.bf16.msra.mxu0 %v1455_v2  ;;  %1438 = vmatpush1.bf16.msra.mxu1 %v1455_v2  ;;  %v1464_v13 = vld [vmem:[%s2184_s1 + $0x68] sm:$0xff]   ;;  %v1465_v14 = vld [vmem:[%s2184_s1 + $0x60] sm:$0xff]   ;;  %v1478_v22 = vld [vmem:[%s2185_s0 + $0x114] ss:$8 sps:$4 sm:$0xff]  }
   0x7   :  { %538 = vmatprep.subr.bf16.mxu0 %v1566_v0  ;;  %1423 = vmatprep.subr.bf16.mxu1 %v1566_v0  ;;  %v1468_v17 = vld [vmem:[%s2184_s1 + $0x48] sm:$0xff]   ;;  %v1469_v18 = vld [vmem:[%s2184_s1 + $0x40] sm:$0xff]   ;;  %v1480_v23 = vld [vmem:[%s2185_s0 + $0x10] ss:$8 sps:$4 sm:$0xff]  }
   0x8   :  { %v1470_v19 = vld [vmem:[%s2185_s0] ss:$8 sps:$4 sm:$0xff]   ;;  %v1481_v24 = vld [vmem:[%s2185_s0 + $0x110] ss:$8 sps:$4 sm:$0xff]   ;;  %v1482_v25 = vld [vmem:[%s2185_s0 + $0x24] ss:$8 sps:$4 sm:$0xff]  }
   0x9   :  { %v1473_v20 = vld [vmem:[%s2185_s0 + $0x100] ss:$8 sps:$4 sm:$0xff]   ;;  %v1484_v26 = vld [vmem:[%s2185_s0 + $0x124] ss:$8 sps:$4 sm:$0xff]   ;;  %v1488_v29 = vld [vmem:[%s2185_s0 + $0x34] ss:$8 sps:$4 sm:$0xff]  }
   0xa   :  { %539 = vmatpush1.bf16.msra.mxu0 %v1456_v3  ;;  %1439 = vmatpush1.bf16.msra.mxu1 %v1456_v3  ;;  %v1486_v27 = vld [vmem:[%s2185_s0 + $0x20] ss:$8 sps:$4 sm:$0xff]   ;;  %v1490_v30 = vld [vmem:[%s2185_s0 + $0x134] ss:$8 sps:$4 sm:$0xff]   ;;  %v1492_v31 = vld [vmem:[%s2185_s0 + $0x30] ss:$8 sps:$4 sm:$0xff]  }
   0xb   :  { %540 = vmatprep.subr.bf16.mxu0 %v1566_v0  ;;  %1424 = vmatprep.subr.bf16.mxu1 %v1566_v0  ;;  %v1487_v28 = vld [vmem:[%s2185_s0 + $0x120] ss:$8 sps:$4 sm:$0xff]   ;;  %v1493_v32 = vld [vmem:[%s2185_s0 + $0x130] ss:$8 sps:$4 sm:$0xff]   ;;  %v1494_v33 = vld [vmem:[%s2185_s0 + $0x44] ss:$8 sps:$4 sm:$0xff]  }
   0xc   :  { %v1496_v34 = vld [vmem:[%s2185_s0 + $0x144] ss:$8 sps:$4 sm:$0xff]   ;;  %v1498_v35 = vld [vmem:[%s2185_s0 + $0x40] ss:$8 sps:$4 sm:$0xff]   ;;  %v1500_v37 = vld [vmem:[%s2185_s0 + $0x54] ss:$8 sps:$4 sm:$0xff]  }
   0xd   :  { %v1499_v36 = vld [vmem:[%s2185_s0 + $0x140] ss:$8 sps:$4 sm:$0xff]   ;;  %v1502_v38 = vld [vmem:[%s2185_s0 + $0x154] ss:$8 sps:$4 sm:$0xff]   ;;  %v1504_v39 = vld [vmem:[%s2185_s0 + $0x50] ss:$8 sps:$4 sm:$0xff]  }
   0xe   :  { %541 = vmatpush1.bf16.msra.mxu0 %v1457_v4  ;;  %1440 = vmatpush1.bf16.msra.mxu1 %v1457_v4  ;;  %v1505_v40 = vld [vmem:[%s2185_s0 + $0x150] ss:$8 sps:$4 sm:$0xff]   ;;  %v1506_v41 = vld [vmem:[%s2185_s0 + $0x64] ss:$8 sps:$4 sm:$0xff]   ;;  %v1510_v43 = vld [vmem:[%s2185_s0 + $0x60] ss:$8 sps:$4 sm:$0xff]  }
   0xf   :  { %542 = vmatprep.subr.bf16.mxu0 %v1566_v0  ;;  %1425 = vmatprep.subr.bf16.mxu1 %v1566_v0  ;;  %v1508_v42 = vld [vmem:[%s2185_s0 + $0x164] ss:$8 sps:$4 sm:$0xff]   ;;  %v1511_v44 = vld [vmem:[%s2185_s0 + $0x160] ss:$8 sps:$4 sm:$0xff]   ;;  %v1512_v45 = vld [vmem:[%s2185_s0 + $0x74] ss:$8 sps:$4 sm:$0xff]  }
  0x10   :  { %v1514_v46 = vld [vmem:[%s2185_s0 + $0x174] ss:$8 sps:$4 sm:$0xff]   ;;  %v1516_v47 = vld [vmem:[%s2185_s0 + $0x70] ss:$8 sps:$4 sm:$0xff]   ;;  %v1518_v49 = vld [vmem:[%s2185_s0 + $0x84] ss:$8 sps:$4 sm:$0xff]  }
  0x11   :  { %v1517_v48 = vld [vmem:[%s2185_s0 + $0x170] ss:$8 sps:$4 sm:$0xff]   ;;  %v1520_v50 = vld [vmem:[%s2185_s0 + $0x184] ss:$8 sps:$4 sm:$0xff]   ;;  %v1522_v51 = vld [vmem:[%s2185_s0 + $0x80] ss:$8 sps:$4 sm:$0xff]  }
  0x12   :  { %543 = vmatpush1.bf16.msra.mxu0 %v1458_v5  ;;  %1441 = vmatpush1.bf16.msra.mxu1 %v1458_v5  ;;  %v1523_v52 = vld [vmem:[%s2185_s0 + $0x180] ss:$8 sps:$4 sm:$0xff]   ;;  %v1524_v53 = vld [vmem:[%s2185_s0 + $0x94] ss:$8 sps:$4 sm:$0xff]   ;;  %v1528_v55 = vld [vmem:[%s2185_s0 + $0x90] ss:$8 sps:$4 sm:$0xff]  }
  0x13   :  { %544 = vmatprep.subr.bf16.mxu0 %v1566_v0  ;;  %1426 = vmatprep.subr.bf16.mxu1 %v1566_v0  ;;  %v1526_v54 = vld [vmem:[%s2185_s0 + $0x194] ss:$8 sps:$4 sm:$0xff]   ;;  %v1529_v56 = vld [vmem:[%s2185_s0 + $0x190] ss:$8 sps:$4 sm:$0xff]   ;;  %v1530_v57 = vld [vmem:[%s2185_s0 + $0xa4] ss:$8 sps:$4 sm:$0xff]  }
  0x14   :  { %v1532_v58 = vld [vmem:[%s2185_s0 + $0x1a4] ss:$8 sps:$4 sm:$0xff]   ;;  %v1534_v59 = vld [vmem:[%s2185_s0 + $0xa0] ss:$8 sps:$4 sm:$0xff]   ;;  %v1536_v61 = vld [vmem:[%s2185_s0 + $0xb4] ss:$8 sps:$4 sm:$0xff]  }
  0x15   :  { %v1535_v60 = vld [vmem:[%s2185_s0 + $0x1a0] ss:$8 sps:$4 sm:$0xff]   ;;  %v1538_v62 = vld [vmem:[%s2185_s0 + $0x1b4] ss:$8 sps:$4 sm:$0xff]   ;;  %v1540_v63 = vld [vmem:[%s2185_s0 + $0xb0] ss:$8 sps:$4 sm:$0xff]  }
  0x16   :  { %545 = vmatpush1.bf16.msra.mxu0 %v1459_v7  ;;  %1442 = vmatpush1.bf16.msra.mxu1 %v1459_v7  ;;  %v1542_v1 = vld [vmem:[%s2185_s0 + $0xc4] ss:$8 sps:$4 sm:$0xff]   ;;  %v1546_v3 = vld [vmem:[%s2185_s0 + $0xc0] ss:$8 sps:$4 sm:$0xff]   ;;  %v1548_v5 = vld [vmem:[%s2185_s0 + $0xd4] ss:$8 sps:$4 sm:$0xff]  }
  0x17   :  { %546 = vmatprep.subr.bf16.mxu0 %v1566_v0  ;;  %1427 = vmatprep.subr.bf16.mxu1 %v1566_v0  ;;  %v1544_v2 = vld [vmem:[%s2185_s0 + $0x1c4] ss:$8 sps:$4 sm:$0xff]   ;;  %v1547_v4 = vld [vmem:[%s2185_s0 + $0x1c0] ss:$8 sps:$4 sm:$0xff]   ;;  %v1550_v6 = vld [vmem:[%s2185_s0 + $0x1d4] ss:$8 sps:$4 sm:$0xff]  }
  0x18   :  { %v1552_v7 = vld [vmem:[%s2185_s0 + $0xd0] ss:$8 sps:$4 sm:$0xff]  }
  0x19   :  { %v1553_v8 = vld [vmem:[%s2185_s0 + $0x1d0] ss:$8 sps:$4 sm:$0xff]  }
  0x1a   :  { %547 = vmatpush1.bf16.msra.mxu0 %v1460_v9  ;;  %1443 = vmatpush1.bf16.msra.mxu1 %v1460_v9  ;;  %v1554_v9 = vld [vmem:[%s2185_s0 + $0xe4] ss:$8 sps:$4 sm:$0xff]  }
  0x1b   :  { %548 = vmatprep.subr.bf16.mxu0 %v1566_v0  ;;  %1428 = vmatprep.subr.bf16.mxu1 %v1566_v0 }
  0x1e   :  { %549 = vmatpush1.bf16.msra.mxu0 %v1461_v10  ;;  %1444 = vmatpush1.bf16.msra.mxu1 %v1461_v10  ;;  %v1556_v10 = vld [vmem:[%s2185_s0 + $0x1e4] ss:$8 sps:$4 sm:$0xff]  }
  0x1f   :  { %550 = vmatprep.subr.bf16.mxu0 %v1566_v0  ;;  %1429 = vmatprep.subr.bf16.mxu1 %v1566_v0 }
  0x22   :  { %551 = vmatpush2.bf16.msra.mxu0 %v1462_v11  ;;  %1445 = vmatpush2.bf16.msra.mxu1 %v1462_v11  ;;  %v1558_v11 = vld [vmem:[%s2185_s0 + $0xe0] ss:$8 sps:$4 sm:$0xff]  }
  0x23   :  { %552 = vmatprep.subr.bf16.mxu0 %v1566_v0  ;;  %1430 = vmatprep.subr.bf16.mxu1 %v1566_v0 }
  0x26   :  { %553 = vmatpush2.bf16.msra.mxu0 %v1463_v12  ;;  %1446 = vmatpush2.bf16.msra.mxu1 %v1463_v12  ;;  %v1559_v12 = vld [vmem:[%s2185_s0 + $0x1e0] ss:$8 sps:$4 sm:$0xff]  }
  0x27   :  { %554 = vmatprep.subr.bf16.mxu0 %v1566_v0  ;;  %1431 = vmatprep.subr.bf16.mxu1 %v1566_v0 }
  0x2a   :  { %555 = vmatpush2.bf16.msra.mxu0 %v1464_v13  ;;  %1447 = vmatpush2.bf16.msra.mxu1 %v1464_v13  ;;  %v1560_v13 = vld [vmem:[%s2185_s0 + $0xf4] ss:$8 sps:$4 sm:$0xff]  }
  0x2b   :  { %556 = vmatprep.subr.bf16.mxu0 %v1566_v0  ;;  %1432 = vmatprep.subr.bf16.mxu1 %v1566_v0 }
  0x2e   :  { %557 = vmatpush2.bf16.msra.mxu0 %v1465_v14  ;;  %1448 = vmatpush2.bf16.msra.mxu1 %v1465_v14  ;;  %v1562_v14 = vld [vmem:[%s2185_s0 + $0x1f4] ss:$8 sps:$4 sm:$0xff]  }
  0x2f   :  { %558 = vmatprep.subr.bf16.mxu0 %v1566_v0  ;;  %1433 = vmatprep.subr.bf16.mxu1 %v1566_v0 }
  0x32   :  { %559 = vmatpush2.bf16.msra.mxu0 %v1466_v15  ;;  %1449 = vmatpush2.bf16.msra.mxu1 %v1466_v15  ;;  %v1564_v15 = vld [vmem:[%s2185_s0 + $0xf0] ss:$8 sps:$4 sm:$0xff]  }
  0x33   :  { %560 = vmatprep.subr.bf16.mxu0 %v1566_v0  ;;  %1434 = vmatprep.subr.bf16.mxu1 %v1566_v0 }
  0x36   :  { %561 = vmatpush2.bf16.msra.mxu0 %v1467_v16  ;;  %1450 = vmatpush2.bf16.msra.mxu1 %v1467_v16  ;;  %v1565_v16 = vld [vmem:[%s2185_s0 + $0x1f0] ss:$8 sps:$4 sm:$0xff]  }
  0x37   :  { %562 = vmatprep.subr.bf16.mxu0 %v1566_v0  ;;  %1435 = vmatprep.subr.bf16.mxu1 %v1566_v0 }
  0x3a   :  { %563 = vmatpush2.bf16.msra.mxu0 %v1468_v17  ;;  %1451 = vmatpush2.bf16.msra.mxu1 %v1468_v17  ;;  %v1862_v17 = vld [vmem:[%s2186_s2] ss:$0 sm:$0xff] }
  0x3b   :  { %564 = vmatprep.subr.bf16.mxu0 %v1566_v0  ;;  %1436 = vmatprep.subr.bf16.mxu1 %v1566_v0  ;;  %v1541_v0 = vld [vmem:[%s2185_s0 + $0x1b0] ss:$8 sps:$4 sm:$0xff]  }
  0x3e   :  { %565 = vmatpush2.bf16.msra.mxu0 %v1469_v18  ;;  %1452 = vmatpush2.bf16.msra.mxu1 %v1469_v18 }
  0x41   :  { %567 = vmatmul.mubr.bf16.vlgmr.msra.gmra.mxu0 %v1470_v19  ;;  %695 = vmatmul.mubr.bf16.vlgmr.msra.gmra.mxu1 %v1473_v20 }
  0x42   :  { %574 = vmatprep.mubr.bf16.mxu0 %v1476_v21  ;;  %702 = vmatprep.mubr.bf16.mxu1 %v1478_v22 }
  0x49   :  { %575 = vmatmul.mubr.bf16.gmra.mxu0 %v1480_v23  ;;  %703 = vmatmul.mubr.bf16.gmra.mxu1 %v1481_v24 }
  0x4a   :  { %582 = vmatprep.mubr.bf16.mxu0 %v1482_v25  ;;  %710 = vmatprep.mubr.bf16.mxu1 %v1484_v26 }
  0x51   :  { %583 = vmatmul.mubr.bf16.gmra.mxu0 %v1486_v27  ;;  %711 = vmatmul.mubr.bf16.gmra.mxu1 %v1487_v28 }
  0x52   :  { %590 = vmatprep.mubr.bf16.mxu0 %v1488_v29  ;;  %718 = vmatprep.mubr.bf16.mxu1 %v1490_v30 }
  0x59   :  { %591 = vmatmul.mubr.bf16.gmra.mxu0 %v1492_v31  ;;  %719 = vmatmul.mubr.bf16.gmra.mxu1 %v1493_v32 }
  0x5a   :  { %598 = vmatprep.mubr.bf16.mxu0 %v1494_v33  ;;  %726 = vmatprep.mubr.bf16.mxu1 %v1496_v34 }
  0x61   :  { %599 = vmatmul.mubr.bf16.gmra.mxu0 %v1498_v35  ;;  %727 = vmatmul.mubr.bf16.gmra.mxu1 %v1499_v36 }
  0x62   :  { %606 = vmatprep.mubr.bf16.mxu0 %v1500_v37  ;;  %734 = vmatprep.mubr.bf16.mxu1 %v1502_v38 }
  0x69   :  { %607 = vmatmul.mubr.bf16.gmra.mxu0 %v1504_v39  ;;  %735 = vmatmul.mubr.bf16.gmra.mxu1 %v1505_v40 }
  0x6a   :  { %614 = vmatprep.mubr.bf16.mxu0 %v1506_v41  ;;  %742 = vmatprep.mubr.bf16.mxu1 %v1508_v42 }
  0x71   :  { %615 = vmatmul.mubr.bf16.gmra.mxu0 %v1510_v43  ;;  %743 = vmatmul.mubr.bf16.gmra.mxu1 %v1511_v44 }
  0x72   :  { %622 = vmatprep.mubr.bf16.mxu0 %v1512_v45  ;;  %750 = vmatprep.mubr.bf16.mxu1 %v1514_v46 }
  0x79   :  { %623 = vmatmul.mubr.bf16.gmra.mxu0 %v1516_v47  ;;  %751 = vmatmul.mubr.bf16.gmra.mxu1 %v1517_v48 }
  0x7a   :  { %630 = vmatprep.mubr.bf16.mxu0 %v1518_v49  ;;  %758 = vmatprep.mubr.bf16.mxu1 %v1520_v50 }
  0x81   :  { %631 = vmatmul.mubr.bf16.gmra.mxu0 %v1522_v51  ;;  %759 = vmatmul.mubr.bf16.gmra.mxu1 %v1523_v52 }
  0x82   :  { %638 = vmatprep.mubr.bf16.mxu0 %v1524_v53  ;;  %766 = vmatprep.mubr.bf16.mxu1 %v1526_v54 }
  0x89   :  { %639 = vmatmul.mubr.bf16.gmra.mxu0 %v1528_v55  ;;  %767 = vmatmul.mubr.bf16.gmra.mxu1 %v1529_v56 }
  0x8a   :  { %646 = vmatprep.mubr.bf16.mxu0 %v1530_v57  ;;  %774 = vmatprep.mubr.bf16.mxu1 %v1532_v58 }
  0x91   :  { %647 = vmatmul.mubr.bf16.gmra.mxu0 %v1534_v59  ;;  %775 = vmatmul.mubr.bf16.gmra.mxu1 %v1535_v60 }
  0x92   :  { %654 = vmatprep.mubr.bf16.mxu0 %v1536_v61  ;;  %782 = vmatprep.mubr.bf16.mxu1 %v1538_v62 }
  0x99   :  { %655 = vmatmul.mubr.bf16.gmra.mxu0 %v1540_v63  ;;  %783 = vmatmul.mubr.bf16.gmra.mxu1 %v1541_v0 }
  0x9a   :  { %662 = vmatprep.mubr.bf16.mxu0 %v1542_v1  ;;  %790 = vmatprep.mubr.bf16.mxu1 %v1544_v2 }
  0xa1   :  { %663 = vmatmul.mubr.bf16.gmra.mxu0 %v1546_v3  ;;  %791 = vmatmul.mubr.bf16.gmra.mxu1 %v1547_v4 }
  0xa2   :  { %670 = vmatprep.mubr.bf16.mxu0 %v1548_v5  ;;  %798 = vmatprep.mubr.bf16.mxu1 %v1550_v6 }
  0xa9   :  { %671 = vmatmul.mubr.bf16.gmra.mxu0 %v1552_v7  ;;  %799 = vmatmul.mubr.bf16.gmra.mxu1 %v1553_v8 }
  0xaa   :  { %678 = vmatprep.mubr.bf16.mxu0 %v1554_v9  ;;  %806 = vmatprep.mubr.bf16.mxu1 %v1556_v10 }
  0xb1   :  { %679 = vmatmul.mubr.bf16.gmra.mxu0 %v1558_v11  ;;  %807 = vmatmul.mubr.bf16.gmra.mxu1 %v1559_v12 }
  0xb2   :  { %686 = vmatprep.mubr.bf16.mxu0 %v1560_v13  ;;  %814 = vmatprep.mubr.bf16.mxu1 %v1562_v14 }
  0xb9   :  { %687 = vmatmul.mubr.bf16.gmra.mxu0 %v1564_v15  ;;  %815 = vmatmul.mubr.bf16.gmra.mxu1 %v1565_v16 }
 0x101   :  { %v568_v18 = vpop.f32.mrf.mxu0  ;;  %v696_v19 = vpop.f32.mrf.mxu1 }
 0x102   :  { %v569_v20 = vadd.f32 %v1862_v17, %v568_v18  ;;  %v697_v21 = vadd.f32 %v1862_v17, %v696_v19 }
 0x103   :  { %v570_v22 = vpop.f32.mrf.mxu0  ;;  %v698_v23 = vpop.f32.mrf.mxu1 }
 0x104   :  { %v823_v24 = vmax.f32 %v569_v20, 0.0  ;;  %v855_v25 = vmax.f32 %v697_v21, 0.0 }
 0x105   :  { %v571_v26 = vpop.f32.mrf.mxu0  ;;  %v699_v27 = vpop.f32.mrf.mxu1 }
 0x106   :  { %v1357_v28 = vpack.c.bf16 %v823_v24, %v823_v24  ;;  %v1389_v29 = vpack.c.bf16 %v855_v25, %v855_v25  ;;  %v572_v30 = vadd.f32 %v1862_v17, %v571_v26  ;;  %v700_v31 = vadd.f32 %v1862_v17, %v699_v27 }
 0x107   :  { %v573_v32 = vpop.f32.mrf.mxu0  ;;  %v701_v33 = vpop.f32.mrf.mxu1 }
 0x108   :  { %1144 = vst.msk [vmem:[%s2187_s3] sm:$0xf] %vm1143_vm0, %v1357_v28  ;;  %1176 = vst.msk [vmem:[%s2187_s3 + $0x80] sm:$0xf] %vm1143_vm0, %v1389_v29  ;;  %v824_v34 = vmax.f32 %v572_v30, 0.0  ;;  %v856_v35 = vmax.f32 %v700_v31, 0.0 }
 0x109   :  { %v576_v36 = vpop.f32.mrf.mxu0  ;;  %v704_v37 = vpop.f32.mrf.mxu1 }
 0x10a   :  { %v1358_v38 = vpack.c.bf16 %v824_v34, %v824_v34  ;;  %v1390_v39 = vpack.c.bf16 %v856_v35, %v856_v35  ;;  %v577_v40 = vadd.f32 %v1862_v17, %v576_v36  ;;  %v705_v41 = vadd.f32 %v1862_v17, %v704_v37 }
 0x10b   :  { %v578_v42 = vpop.f32.mrf.mxu0  ;;  %v706_v43 = vpop.f32.mrf.mxu1 }
 0x10c   :  { %1145 = vst.msk [vmem:[%s2187_s3 + $0x4] sm:$0xf] %vm1143_vm0, %v1358_v38  ;;  %1177 = vst.msk [vmem:[%s2187_s3 + $0x84] sm:$0xf] %vm1143_vm0, %v1390_v39  ;;  %v825_v44 = vmax.f32 %v577_v40, 0.0  ;;  %v857_v45 = vmax.f32 %v705_v41, 0.0 }
 0x10d   :  { %v579_v46 = vpop.f32.mrf.mxu0  ;;  %v707_v47 = vpop.f32.mrf.mxu1 }
 0x10e   :  { %v1359_v48 = vpack.c.bf16 %v825_v44, %v825_v44  ;;  %v1391_v49 = vpack.c.bf16 %v857_v45, %v857_v45  ;;  %v580_v50 = vadd.f32 %v1862_v17, %v579_v46  ;;  %v708_v51 = vadd.f32 %v1862_v17, %v707_v47 }
 0x10f   :  { %v581_v52 = vpop.f32.mrf.mxu0  ;;  %v709_v53 = vpop.f32.mrf.mxu1 }
 0x110   :  { %1146 = vst.msk [vmem:[%s2187_s3 + $0x8] sm:$0xf] %vm1143_vm0, %v1359_v48  ;;  %1178 = vst.msk [vmem:[%s2187_s3 + $0x88] sm:$0xf] %vm1143_vm0, %v1391_v49  ;;  %v826_v54 = vmax.f32 %v580_v50, 0.0  ;;  %v858_v55 = vmax.f32 %v708_v51, 0.0 }
 0x111   :  { %v584_v56 = vpop.f32.mrf.mxu0  ;;  %v712_v57 = vpop.f32.mrf.mxu1 }
 0x112   :  { %v1360_v58 = vpack.c.bf16 %v826_v54, %v826_v54  ;;  %v1392_v59 = vpack.c.bf16 %v858_v55, %v858_v55  ;;  %v585_v60 = vadd.f32 %v1862_v17, %v584_v56  ;;  %v713_v61 = vadd.f32 %v1862_v17, %v712_v57 }
 0x113   :  { %v586_v62 = vpop.f32.mrf.mxu0  ;;  %v714_v63 = vpop.f32.mrf.mxu1 }
 0x114   :  { %1147 = vst.msk [vmem:[%s2187_s3 + $0xc] sm:$0xf] %vm1143_vm0, %v1360_v58  ;;  %1179 = vst.msk [vmem:[%s2187_s3 + $0x8c] sm:$0xf] %vm1143_vm0, %v1392_v59  ;;  %v827_v0 = vmax.f32 %v585_v60, 0.0  ;;  %v859_v1 = vmax.f32 %v713_v61, 0.0 }
 0x115   :  { %v587_v2 = vpop.f32.mrf.mxu0  ;;  %v715_v3 = vpop.f32.mrf.mxu1 }
 0x116   :  { %v1361_v4 = vpack.c.bf16 %v827_v0, %v827_v0  ;;  %v1393_v5 = vpack.c.bf16 %v859_v1, %v859_v1  ;;  %v588_v6 = vadd.f32 %v1862_v17, %v587_v2  ;;  %v716_v7 = vadd.f32 %v1862_v17, %v715_v3 }
 0x117   :  { %v589_v8 = vpop.f32.mrf.mxu0  ;;  %v717_v9 = vpop.f32.mrf.mxu1 }
 0x118   :  { %1148 = vst.msk [vmem:[%s2187_s3 + $0x10] sm:$0xf] %vm1143_vm0, %v1361_v4  ;;  %1180 = vst.msk [vmem:[%s2187_s3 + $0x90] sm:$0xf] %vm1143_vm0, %v1393_v5  ;;  %v828_v10 = vmax.f32 %v588_v6, 0.0  ;;  %v860_v11 = vmax.f32 %v716_v7, 0.0 }
 0x119   :  { %v592_v12 = vpop.f32.mrf.mxu0  ;;  %v720_v13 = vpop.f32.mrf.mxu1 }
 0x11a   :  { %v1362_v14 = vpack.c.bf16 %v828_v10, %v828_v10  ;;  %v1394_v15 = vpack.c.bf16 %v860_v11, %v860_v11  ;;  %v593_v16 = vadd.f32 %v1862_v17, %v592_v12  ;;  %v721_v18 = vadd.f32 %v1862_v17, %v720_v13 }
 0x11b   :  { %v594_v19 = vpop.f32.mrf.mxu0  ;;  %v722_v20 = vpop.f32.mrf.mxu1 }
 0x11c   :  { %1149 = vst.msk [vmem:[%s2187_s3 + $0x14] sm:$0xf] %vm1143_vm0, %v1362_v14  ;;  %1181 = vst.msk [vmem:[%s2187_s3 + $0x94] sm:$0xf] %vm1143_vm0, %v1394_v15  ;;  %v829_v21 = vmax.f32 %v593_v16, 0.0  ;;  %v861_v22 = vmax.f32 %v721_v18, 0.0 }
 0x11d   :  { %v595_v23 = vpop.f32.mrf.mxu0  ;;  %v723_v24 = vpop.f32.mrf.mxu1 }
 0x11e   :  { %v1363_v25 = vpack.c.bf16 %v829_v21, %v829_v21  ;;  %v1395_v26 = vpack.c.bf16 %v861_v22, %v861_v22  ;;  %v596_v27 = vadd.f32 %v1862_v17, %v595_v23  ;;  %v724_v28 = vadd.f32 %v1862_v17, %v723_v24 }
 0x11f   :  { %v597_v29 = vpop.f32.mrf.mxu0  ;;  %v725_v30 = vpop.f32.mrf.mxu1 }
 0x120   :  { %1150 = vst.msk [vmem:[%s2187_s3 + $0x18] sm:$0xf] %vm1143_vm0, %v1363_v25  ;;  %1182 = vst.msk [vmem:[%s2187_s3 + $0x98] sm:$0xf] %vm1143_vm0, %v1395_v26  ;;  %v830_v31 = vmax.f32 %v596_v27, 0.0  ;;  %v862_v32 = vmax.f32 %v724_v28, 0.0 }
 0x121   :  { %v600_v33 = vpop.f32.mrf.mxu0  ;;  %v728_v34 = vpop.f32.mrf.mxu1 }
 0x122   :  { %v1364_v35 = vpack.c.bf16 %v830_v31, %v830_v31  ;;  %v1396_v36 = vpack.c.bf16 %v862_v32, %v862_v32  ;;  %v601_v37 = vadd.f32 %v1862_v17, %v600_v33  ;;  %v729_v38 = vadd.f32 %v1862_v17, %v728_v34 }
 0x123   :  { %v602_v39 = vpop.f32.mrf.mxu0  ;;  %v730_v40 = vpop.f32.mrf.mxu1 }
 0x124   :  { %1151 = vst.msk [vmem:[%s2187_s3 + $0x1c] sm:$0xf] %vm1143_vm0, %v1364_v35  ;;  %1183 = vst.msk [vmem:[%s2187_s3 + $0x9c] sm:$0xf] %vm1143_vm0, %v1396_v36  ;;  %v831_v41 = vmax.f32 %v601_v37, 0.0  ;;  %v863_v42 = vmax.f32 %v729_v38, 0.0 }
 0x125   :  { %v603_v43 = vpop.f32.mrf.mxu0  ;;  %v731_v44 = vpop.f32.mrf.mxu1 }
 0x126   :  { %v1365_v45 = vpack.c.bf16 %v831_v41, %v831_v41  ;;  %v1397_v46 = vpack.c.bf16 %v863_v42, %v863_v42  ;;  %v604_v47 = vadd.f32 %v1862_v17, %v603_v43  ;;  %v732_v48 = vadd.f32 %v1862_v17, %v731_v44 }
 0x127   :  { %v605_v49 = vpop.f32.mrf.mxu0  ;;  %v733_v50 = vpop.f32.mrf.mxu1 }
 0x128   :  { %1152 = vst.msk [vmem:[%s2187_s3 + $0x20] sm:$0xf] %vm1143_vm0, %v1365_v45  ;;  %1184 = vst.msk [vmem:[%s2187_s3 + $0xa0] sm:$0xf] %vm1143_vm0, %v1397_v46  ;;  %v832_v51 = vmax.f32 %v604_v47, 0.0  ;;  %v864_v52 = vmax.f32 %v732_v48, 0.0 }
 0x129   :  { %v608_v53 = vpop.f32.mrf.mxu0  ;;  %v736_v54 = vpop.f32.mrf.mxu1 }
 0x12a   :  { %v1366_v55 = vpack.c.bf16 %v832_v51, %v832_v51  ;;  %v1398_v56 = vpack.c.bf16 %v864_v52, %v864_v52  ;;  %v609_v57 = vadd.f32 %v1862_v17, %v608_v53  ;;  %v737_v58 = vadd.f32 %v1862_v17, %v736_v54 }
 0x12b   :  { %v610_v59 = vpop.f32.mrf.mxu0  ;;  %v738_v60 = vpop.f32.mrf.mxu1 }
 0x12c   :  { %1153 = vst.msk [vmem:[%s2187_s3 + $0x24] sm:$0xf] %vm1143_vm0, %v1366_v55  ;;  %1185 = vst.msk [vmem:[%s2187_s3 + $0xa4] sm:$0xf] %vm1143_vm0, %v1398_v56  ;;  %v833_v61 = vmax.f32 %v609_v57, 0.0  ;;  %v865_v62 = vmax.f32 %v737_v58, 0.0 }
 0x12d   :  { %v611_v63 = vpop.f32.mrf.mxu0  ;;  %v739_v0 = vpop.f32.mrf.mxu1 }
 0x12e   :  { %v1367_v1 = vpack.c.bf16 %v833_v61, %v833_v61  ;;  %v1399_v2 = vpack.c.bf16 %v865_v62, %v865_v62  ;;  %v612_v3 = vadd.f32 %v1862_v17, %v611_v63  ;;  %v740_v4 = vadd.f32 %v1862_v17, %v739_v0 }
 0x12f   :  { %v613_v5 = vpop.f32.mrf.mxu0  ;;  %v741_v6 = vpop.f32.mrf.mxu1 }
 0x130   :  { %1154 = vst.msk [vmem:[%s2187_s3 + $0x28] sm:$0xf] %vm1143_vm0, %v1367_v1  ;;  %1186 = vst.msk [vmem:[%s2187_s3 + $0xa8] sm:$0xf] %vm1143_vm0, %v1399_v2  ;;  %v834_v7 = vmax.f32 %v612_v3, 0.0  ;;  %v866_v8 = vmax.f32 %v740_v4, 0.0 }
 0x131   :  { %v616_v9 = vpop.f32.mrf.mxu0  ;;  %v744_v10 = vpop.f32.mrf.mxu1 }
 0x132   :  { %v1368_v11 = vpack.c.bf16 %v834_v7, %v834_v7  ;;  %v1400_v12 = vpack.c.bf16 %v866_v8, %v866_v8  ;;  %v617_v13 = vadd.f32 %v1862_v17, %v616_v9  ;;  %v745_v14 = vadd.f32 %v1862_v17, %v744_v10 }
 0x133   :  { %v618_v15 = vpop.f32.mrf.mxu0  ;;  %v746_v16 = vpop.f32.mrf.mxu1 }
 0x134   :  { %1155 = vst.msk [vmem:[%s2187_s3 + $0x2c] sm:$0xf] %vm1143_vm0, %v1368_v11  ;;  %1187 = vst.msk [vmem:[%s2187_s3 + $0xac] sm:$0xf] %vm1143_vm0, %v1400_v12  ;;  %v835_v18 = vmax.f32 %v617_v13, 0.0  ;;  %v867_v19 = vmax.f32 %v745_v14, 0.0 }
 0x135   :  { %v619_v20 = vpop.f32.mrf.mxu0  ;;  %v747_v21 = vpop.f32.mrf.mxu1 }
 0x136   :  { %v1369_v22 = vpack.c.bf16 %v835_v18, %v835_v18  ;;  %v1401_v23 = vpack.c.bf16 %v867_v19, %v867_v19  ;;  %v620_v24 = vadd.f32 %v1862_v17, %v619_v20  ;;  %v748_v25 = vadd.f32 %v1862_v17, %v747_v21 }
 0x137   :  { %v621_v26 = vpop.f32.mrf.mxu0  ;;  %v749_v27 = vpop.f32.mrf.mxu1 }
 0x138   :  { %1156 = vst.msk [vmem:[%s2187_s3 + $0x30] sm:$0xf] %vm1143_vm0, %v1369_v22  ;;  %1188 = vst.msk [vmem:[%s2187_s3 + $0xb0] sm:$0xf] %vm1143_vm0, %v1401_v23  ;;  %v836_v28 = vmax.f32 %v620_v24, 0.0  ;;  %v868_v29 = vmax.f32 %v748_v25, 0.0 }
 0x139   :  { %v624_v30 = vpop.f32.mrf.mxu0  ;;  %v752_v31 = vpop.f32.mrf.mxu1 }
 0x13a   :  { %v1370_v32 = vpack.c.bf16 %v836_v28, %v836_v28  ;;  %v1402_v33 = vpack.c.bf16 %v868_v29, %v868_v29  ;;  %v625_v34 = vadd.f32 %v1862_v17, %v624_v30  ;;  %v753_v35 = vadd.f32 %v1862_v17, %v752_v31 }
 0x13b   :  { %v626_v36 = vpop.f32.mrf.mxu0  ;;  %v754_v37 = vpop.f32.mrf.mxu1 }
 0x13c   :  { %1157 = vst.msk [vmem:[%s2187_s3 + $0x34] sm:$0xf] %vm1143_vm0, %v1370_v32  ;;  %1189 = vst.msk [vmem:[%s2187_s3 + $0xb4] sm:$0xf] %vm1143_vm0, %v1402_v33  ;;  %v837_v38 = vmax.f32 %v625_v34, 0.0  ;;  %v869_v39 = vmax.f32 %v753_v35, 0.0 }
 0x13d   :  { %v627_v40 = vpop.f32.mrf.mxu0  ;;  %v755_v41 = vpop.f32.mrf.mxu1 }
 0x13e   :  { %v1371_v42 = vpack.c.bf16 %v837_v38, %v837_v38  ;;  %v1403_v43 = vpack.c.bf16 %v869_v39, %v869_v39  ;;  %v628_v44 = vadd.f32 %v1862_v17, %v627_v40  ;;  %v756_v45 = vadd.f32 %v1862_v17, %v755_v41 }
 0x13f   :  { %v629_v46 = vpop.f32.mrf.mxu0  ;;  %v757_v47 = vpop.f32.mrf.mxu1 }
 0x140   :  { %1158 = vst.msk [vmem:[%s2187_s3 + $0x38] sm:$0xf] %vm1143_vm0, %v1371_v42  ;;  %1190 = vst.msk [vmem:[%s2187_s3 + $0xb8] sm:$0xf] %vm1143_vm0, %v1403_v43  ;;  %v838_v48 = vmax.f32 %v628_v44, 0.0  ;;  %v870_v49 = vmax.f32 %v756_v45, 0.0 }
 0x141   :  { %v632_v50 = vpop.f32.mrf.mxu0  ;;  %v760_v51 = vpop.f32.mrf.mxu1 }
 0x142   :  { %v1372_v52 = vpack.c.bf16 %v838_v48, %v838_v48  ;;  %v1404_v53 = vpack.c.bf16 %v870_v49, %v870_v49  ;;  %v633_v54 = vadd.f32 %v1862_v17, %v632_v50  ;;  %v761_v55 = vadd.f32 %v1862_v17, %v760_v51 }
 0x143   :  { %v634_v56 = vpop.f32.mrf.mxu0  ;;  %v762_v57 = vpop.f32.mrf.mxu1 }
 0x144   :  { %1159 = vst.msk [vmem:[%s2187_s3 + $0x3c] sm:$0xf] %vm1143_vm0, %v1372_v52  ;;  %1191 = vst.msk [vmem:[%s2187_s3 + $0xbc] sm:$0xf] %vm1143_vm0, %v1404_v53  ;;  %v839_v58 = vmax.f32 %v633_v54, 0.0  ;;  %v871_v59 = vmax.f32 %v761_v55, 0.0 }
 0x145   :  { %v635_v60 = vpop.f32.mrf.mxu0  ;;  %v763_v61 = vpop.f32.mrf.mxu1 }
 0x146   :  { %v1373_v62 = vpack.c.bf16 %v839_v58, %v839_v58  ;;  %v1405_v63 = vpack.c.bf16 %v871_v59, %v871_v59  ;;  %v636_v0 = vadd.f32 %v1862_v17, %v635_v60  ;;  %v764_v1 = vadd.f32 %v1862_v17, %v763_v61 }
 0x147   :  { %v637_v2 = vpop.f32.mrf.mxu0  ;;  %v765_v3 = vpop.f32.mrf.mxu1 }
 0x148   :  { %1160 = vst.msk [vmem:[%s2187_s3 + $0x40] sm:$0xf] %vm1143_vm0, %v1373_v62  ;;  %1192 = vst.msk [vmem:[%s2187_s3 + $0xc0] sm:$0xf] %vm1143_vm0, %v1405_v63  ;;  %v840_v4 = vmax.f32 %v636_v0, 0.0  ;;  %v872_v5 = vmax.f32 %v764_v1, 0.0 }
 0x149   :  { %v640_v6 = vpop.f32.mrf.mxu0  ;;  %v768_v7 = vpop.f32.mrf.mxu1 }
 0x14a   :  { %v1374_v8 = vpack.c.bf16 %v840_v4, %v840_v4  ;;  %v1406_v9 = vpack.c.bf16 %v872_v5, %v872_v5  ;;  %v641_v10 = vadd.f32 %v1862_v17, %v640_v6  ;;  %v769_v11 = vadd.f32 %v1862_v17, %v768_v7 }
 0x14b   :  { %v642_v12 = vpop.f32.mrf.mxu0  ;;  %v770_v13 = vpop.f32.mrf.mxu1 }
 0x14c   :  { %1161 = vst.msk [vmem:[%s2187_s3 + $0x44] sm:$0xf] %vm1143_vm0, %v1374_v8  ;;  %1193 = vst.msk [vmem:[%s2187_s3 + $0xc4] sm:$0xf] %vm1143_vm0, %v1406_v9  ;;  %v841_v14 = vmax.f32 %v641_v10, 0.0  ;;  %v873_v15 = vmax.f32 %v769_v11, 0.0 }
 0x14d   :  { %v643_v16 = vpop.f32.mrf.mxu0  ;;  %v771_v18 = vpop.f32.mrf.mxu1 }
 0x14e   :  { %v1375_v19 = vpack.c.bf16 %v841_v14, %v841_v14  ;;  %v1407_v20 = vpack.c.bf16 %v873_v15, %v873_v15  ;;  %v644_v21 = vadd.f32 %v1862_v17, %v643_v16  ;;  %v772_v22 = vadd.f32 %v1862_v17, %v771_v18 }
 0x14f   :  { %v645_v23 = vpop.f32.mrf.mxu0  ;;  %v773_v24 = vpop.f32.mrf.mxu1 }
 0x150   :  { %1162 = vst.msk [vmem:[%s2187_s3 + $0x48] sm:$0xf] %vm1143_vm0, %v1375_v19  ;;  %1194 = vst.msk [vmem:[%s2187_s3 + $0xc8] sm:$0xf] %vm1143_vm0, %v1407_v20  ;;  %v842_v25 = vmax.f32 %v644_v21, 0.0  ;;  %v874_v26 = vmax.f32 %v772_v22, 0.0 }
 0x151   :  { %v648_v27 = vpop.f32.mrf.mxu0  ;;  %v776_v28 = vpop.f32.mrf.mxu1 }
 0x152   :  { %v1376_v29 = vpack.c.bf16 %v842_v25, %v842_v25  ;;  %v1408_v30 = vpack.c.bf16 %v874_v26, %v874_v26  ;;  %v649_v31 = vadd.f32 %v1862_v17, %v648_v27  ;;  %v777_v32 = vadd.f32 %v1862_v17, %v776_v28 }
 0x153   :  { %v650_v33 = vpop.f32.mrf.mxu0  ;;  %v778_v34 = vpop.f32.mrf.mxu1 }
 0x154   :  { %1163 = vst.msk [vmem:[%s2187_s3 + $0x4c] sm:$0xf] %vm1143_vm0, %v1376_v29  ;;  %1195 = vst.msk [vmem:[%s2187_s3 + $0xcc] sm:$0xf] %vm1143_vm0, %v1408_v30  ;;  %v843_v35 = vmax.f32 %v649_v31, 0.0  ;;  %v875_v36 = vmax.f32 %v777_v32, 0.0 }
 0x155   :  { %v651_v37 = vpop.f32.mrf.mxu0  ;;  %v779_v38 = vpop.f32.mrf.mxu1 }
 0x156   :  { %v1377_v39 = vpack.c.bf16 %v843_v35, %v843_v35  ;;  %v1409_v40 = vpack.c.bf16 %v875_v36, %v875_v36  ;;  %v652_v41 = vadd.f32 %v1862_v17, %v651_v37  ;;  %v780_v42 = vadd.f32 %v1862_v17, %v779_v38 }
 0x157   :  { %v653_v43 = vpop.f32.mrf.mxu0  ;;  %v781_v44 = vpop.f32.mrf.mxu1 }
 0x158   :  { %1164 = vst.msk [vmem:[%s2187_s3 + $0x50] sm:$0xf] %vm1143_vm0, %v1377_v39  ;;  %1196 = vst.msk [vmem:[%s2187_s3 + $0xd0] sm:$0xf] %vm1143_vm0, %v1409_v40  ;;  %v844_v45 = vmax.f32 %v652_v41, 0.0  ;;  %v876_v46 = vmax.f32 %v780_v42, 0.0 }
 0x159   :  { %v656_v47 = vpop.f32.mrf.mxu0  ;;  %v784_v48 = vpop.f32.mrf.mxu1 }
 0x15a   :  { %v1378_v49 = vpack.c.bf16 %v844_v45, %v844_v45  ;;  %v1410_v50 = vpack.c.bf16 %v876_v46, %v876_v46  ;;  %v657_v51 = vadd.f32 %v1862_v17, %v656_v47  ;;  %v785_v52 = vadd.f32 %v1862_v17, %v784_v48 }
 0x15b   :  { %v658_v53 = vpop.f32.mrf.mxu0  ;;  %v786_v54 = vpop.f32.mrf.mxu1 }
 0x15c   :  { %1165 = vst.msk [vmem:[%s2187_s3 + $0x54] sm:$0xf] %vm1143_vm0, %v1378_v49  ;;  %1197 = vst.msk [vmem:[%s2187_s3 + $0xd4] sm:$0xf] %vm1143_vm0, %v1410_v50  ;;  %v845_v55 = vmax.f32 %v657_v51, 0.0  ;;  %v877_v56 = vmax.f32 %v785_v52, 0.0 }
 0x15d   :  { %v659_v57 = vpop.f32.mrf.mxu0  ;;  %v787_v58 = vpop.f32.mrf.mxu1 }
 0x15e   :  { %v1379_v59 = vpack.c.bf16 %v845_v55, %v845_v55  ;;  %v1411_v60 = vpack.c.bf16 %v877_v56, %v877_v56  ;;  %v660_v61 = vadd.f32 %v1862_v17, %v659_v57  ;;  %v788_v62 = vadd.f32 %v1862_v17, %v787_v58 }
 0x15f   :  { %v661_v63 = vpop.f32.mrf.mxu0  ;;  %v789_v0 = vpop.f32.mrf.mxu1 }
 0x160   :  { %1166 = vst.msk [vmem:[%s2187_s3 + $0x58] sm:$0xf] %vm1143_vm0, %v1379_v59  ;;  %1198 = vst.msk [vmem:[%s2187_s3 + $0xd8] sm:$0xf] %vm1143_vm0, %v1411_v60  ;;  %v846_v1 = vmax.f32 %v660_v61, 0.0  ;;  %v878_v2 = vmax.f32 %v788_v62, 0.0 }
 0x161   :  { %v664_v3 = vpop.f32.mrf.mxu0  ;;  %v792_v4 = vpop.f32.mrf.mxu1 }
 0x162   :  { %v1380_v5 = vpack.c.bf16 %v846_v1, %v846_v1  ;;  %v1412_v6 = vpack.c.bf16 %v878_v2, %v878_v2  ;;  %v665_v7 = vadd.f32 %v1862_v17, %v664_v3  ;;  %v793_v8 = vadd.f32 %v1862_v17, %v792_v4 }
 0x163   :  { %v666_v9 = vpop.f32.mrf.mxu0  ;;  %v794_v10 = vpop.f32.mrf.mxu1 }
 0x164   :  { %1167 = vst.msk [vmem:[%s2187_s3 + $0x5c] sm:$0xf] %vm1143_vm0, %v1380_v5  ;;  %1199 = vst.msk [vmem:[%s2187_s3 + $0xdc] sm:$0xf] %vm1143_vm0, %v1412_v6  ;;  %v847_v11 = vmax.f32 %v665_v7, 0.0  ;;  %v879_v12 = vmax.f32 %v793_v8, 0.0 }
 0x165   :  { %v667_v13 = vpop.f32.mrf.mxu0  ;;  %v795_v14 = vpop.f32.mrf.mxu1 }
 0x166   :  { %v1381_v15 = vpack.c.bf16 %v847_v11, %v847_v11  ;;  %v1413_v16 = vpack.c.bf16 %v879_v12, %v879_v12  ;;  %v668_v18 = vadd.f32 %v1862_v17, %v667_v13  ;;  %v796_v19 = vadd.f32 %v1862_v17, %v795_v14 }
 0x167   :  { %v669_v20 = vpop.f32.mrf.mxu0  ;;  %v797_v21 = vpop.f32.mrf.mxu1 }
 0x168   :  { %1168 = vst.msk [vmem:[%s2187_s3 + $0x60] sm:$0xf] %vm1143_vm0, %v1381_v15  ;;  %1200 = vst.msk [vmem:[%s2187_s3 + $0xe0] sm:$0xf] %vm1143_vm0, %v1413_v16  ;;  %v848_v22 = vmax.f32 %v668_v18, 0.0  ;;  %v880_v23 = vmax.f32 %v796_v19, 0.0 }
 0x169   :  { %v672_v24 = vpop.f32.mrf.mxu0  ;;  %v800_v25 = vpop.f32.mrf.mxu1 }
 0x16a   :  { %v1382_v26 = vpack.c.bf16 %v848_v22, %v848_v22  ;;  %v1414_v27 = vpack.c.bf16 %v880_v23, %v880_v23  ;;  %v673_v28 = vadd.f32 %v1862_v17, %v672_v24  ;;  %v801_v29 = vadd.f32 %v1862_v17, %v800_v25 }
 0x16b   :  { %v674_v30 = vpop.f32.mrf.mxu0  ;;  %v802_v31 = vpop.f32.mrf.mxu1 }
 0x16c   :  { %1169 = vst.msk [vmem:[%s2187_s3 + $0x64] sm:$0xf] %vm1143_vm0, %v1382_v26  ;;  %1201 = vst.msk [vmem:[%s2187_s3 + $0xe4] sm:$0xf] %vm1143_vm0, %v1414_v27  ;;  %v849_v32 = vmax.f32 %v673_v28, 0.0  ;;  %v881_v33 = vmax.f32 %v801_v29, 0.0 }
 0x16d   :  { %v675_v34 = vpop.f32.mrf.mxu0  ;;  %v803_v35 = vpop.f32.mrf.mxu1 }
 0x16e   :  { %v1383_v36 = vpack.c.bf16 %v849_v32, %v849_v32  ;;  %v1415_v37 = vpack.c.bf16 %v881_v33, %v881_v33  ;;  %v676_v38 = vadd.f32 %v1862_v17, %v675_v34  ;;  %v804_v39 = vadd.f32 %v1862_v17, %v803_v35 }
 0x16f   :  { %v677_v40 = vpop.f32.mrf.mxu0  ;;  %v805_v41 = vpop.f32.mrf.mxu1 }
 0x170   :  { %1170 = vst.msk [vmem:[%s2187_s3 + $0x68] sm:$0xf] %vm1143_vm0, %v1383_v36  ;;  %1202 = vst.msk [vmem:[%s2187_s3 + $0xe8] sm:$0xf] %vm1143_vm0, %v1415_v37  ;;  %v850_v42 = vmax.f32 %v676_v38, 0.0  ;;  %v882_v43 = vmax.f32 %v804_v39, 0.0 }
 0x171   :  { %v680_v44 = vpop.f32.mrf.mxu0  ;;  %v808_v45 = vpop.f32.mrf.mxu1 }
 0x172   :  { %v1384_v46 = vpack.c.bf16 %v850_v42, %v850_v42  ;;  %v1416_v47 = vpack.c.bf16 %v882_v43, %v882_v43  ;;  %v681_v48 = vadd.f32 %v1862_v17, %v680_v44  ;;  %v809_v49 = vadd.f32 %v1862_v17, %v808_v45 }
 0x173   :  { %v682_v50 = vpop.f32.mrf.mxu0  ;;  %v810_v51 = vpop.f32.mrf.mxu1 }
 0x174   :  { %1171 = vst.msk [vmem:[%s2187_s3 + $0x6c] sm:$0xf] %vm1143_vm0, %v1384_v46  ;;  %1203 = vst.msk [vmem:[%s2187_s3 + $0xec] sm:$0xf] %vm1143_vm0, %v1416_v47  ;;  %v851_v52 = vmax.f32 %v681_v48, 0.0  ;;  %v883_v53 = vmax.f32 %v809_v49, 0.0 }
 0x175   :  { %v683_v54 = vpop.f32.mrf.mxu0  ;;  %v811_v55 = vpop.f32.mrf.mxu1 }
 0x176   :  { %v1385_v56 = vpack.c.bf16 %v851_v52, %v851_v52  ;;  %v1417_v57 = vpack.c.bf16 %v883_v53, %v883_v53  ;;  %v684_v58 = vadd.f32 %v1862_v17, %v683_v54  ;;  %v812_v59 = vadd.f32 %v1862_v17, %v811_v55 }
 0x177   :  { %v685_v60 = vpop.f32.mrf.mxu0  ;;  %v813_v61 = vpop.f32.mrf.mxu1 }
 0x178   :  { %1172 = vst.msk [vmem:[%s2187_s3 + $0x70] sm:$0xf] %vm1143_vm0, %v1385_v56  ;;  %1204 = vst.msk [vmem:[%s2187_s3 + $0xf0] sm:$0xf] %vm1143_vm0, %v1417_v57  ;;  %v852_v62 = vmax.f32 %v684_v58, 0.0  ;;  %v884_v63 = vmax.f32 %v812_v59, 0.0 }
 0x179   :  { %v688_v0 = vpop.f32.mrf.mxu0  ;;  %v816_v1 = vpop.f32.mrf.mxu1 }
 0x17a   :  { %v1386_v2 = vpack.c.bf16 %v852_v62, %v852_v62  ;;  %v1418_v3 = vpack.c.bf16 %v884_v63, %v884_v63  ;;  %v689_v4 = vadd.f32 %v1862_v17, %v688_v0  ;;  %v817_v5 = vadd.f32 %v1862_v17, %v816_v1 }
 0x17b   :  { %v690_v6 = vpop.f32.mrf.mxu0  ;;  %v818_v7 = vpop.f32.mrf.mxu1 }
 0x17c   :  { %1173 = vst.msk [vmem:[%s2187_s3 + $0x74] sm:$0xf] %vm1143_vm0, %v1386_v2  ;;  %1205 = vst.msk [vmem:[%s2187_s3 + $0xf4] sm:$0xf] %vm1143_vm0, %v1418_v3  ;;  %v853_v8 = vmax.f32 %v689_v4, 0.0  ;;  %v885_v9 = vmax.f32 %v817_v5, 0.0 }
 0x17d   :  { %v691_v10 = vpop.f32.mrf.mxu0  ;;  %v819_v11 = vpop.f32.mrf.mxu1 }
 0x17e   :  { %v1387_v12 = vpack.c.bf16 %v853_v8, %v853_v8  ;;  %v1419_v13 = vpack.c.bf16 %v885_v9, %v885_v9  ;;  %v692_v14 = vadd.f32 %v1862_v17, %v691_v10  ;;  %v820_v15 = vadd.f32 %v1862_v17, %v819_v11 }
 0x17f   :  { %v693_v16 = vpop.f32.mrf.mxu0  ;;  %v821_v18 = vpop.f32.mrf.mxu1 }
 0x180   :  { %1174 = vst.msk [vmem:[%s2187_s3 + $0x78] sm:$0xf] %vm1143_vm0, %v1387_v12  ;;  %1206 = vst.msk [vmem:[%s2187_s3 + $0xf8] sm:$0xf] %vm1143_vm0, %v1419_v13  ;;  %v854_v19 = vmax.f32 %v692_v14, 0.0  ;;  %v886_v20 = vmax.f32 %v820_v15, 0.0 }
 0x182   :  { %v1388_v21 = vpack.c.bf16 %v854_v19, %v854_v19  ;;  %v1420_v22 = vpack.c.bf16 %v886_v20, %v886_v20 }
 0x184   :  { %1175 = vst.msk [vmem:[%s2187_s3 + $0x7c] sm:$0xf] %vm1143_vm0, %v1388_v21  ;;  %1207 = vst.msk [vmem:[%s2187_s3 + $0xfc] sm:$0xf] %vm1143_vm0, %v1420_v22 }

// kernel: bottleneck_dynamic_forward.7
= control target key start
LH: loop header
LB: loop body
LE: loop exit
PB: predicated region body
PF: predicated region fallthrough
CT: control target
= control target key end

     0   :  { %v1431_v2 = vmov 0   ;;  %vm303_vm0 = vcmask 523264   ;;  %s2166_s0 = inlined_call_operand.vmem [shape: bf16[512,64], index: 0, kind: input, shape index: {}]   ;;  %s2167_s1 = inlined_call_operand.vmem [shape: bf16[64,256], index: 1, kind: input, shape index: {}]   ;;  %s2168_s2 = inlined_call_operand.vmem [shape: f32[1,256], index: 2, kind: input, shape index: {}]   ;;  %s2169_s3 = inlined_call_operand.vmem [shape: f32[512,256], index: 3, kind: input, shape index: {}]   ;;  %s2170_s4 = inlined_call_operand.hbm [shape: f32[512,256], index: 4, kind: output, shape index: {}]  }
   0x1   :  { %v1365_v0 = vld [vmem:[%s2167_s1 + $0x34] ss:$8 sps:$4 sm:$0xff]   ;;  %v1367_v1 = vld [vmem:[%s2167_s1 + $0x30] ss:$8 sps:$4 sm:$0xff]   ;;  %432 = vmatprep.mubr.bf16.mxu0 %v1431_v2  ;;  %592 = vmatprep.mubr.bf16.mxu1 %v1431_v2  ;;  %v1368_v3 = vld [vmem:[%s2167_s1 + $0x24] ss:$8 sps:$4 sm:$0xff]  }
   0x2   :  { %408 = vmatprep.subr.bf16.mxu0 %v1365_v0  ;;  %1353 = vmatprep.subr.bf16.mxu1 %v1365_v0  ;;  %v1370_v4 = vld [vmem:[%s2167_s1 + $0x20] ss:$8 sps:$4 sm:$0xff]   ;;  %v1371_v5 = vld [vmem:[%s2167_s1 + $0x14] ss:$8 sps:$4 sm:$0xff]   ;;  %v1373_v6 = vld [vmem:[%s2167_s1 + $0x10] ss:$8 sps:$4 sm:$0xff]  }
   0x3   :  { %409 = vmatpush1.bf16.msra.mxu0 %v1367_v1  ;;  %1357 = vmatpush1.bf16.msra.mxu1 %v1367_v1  ;;  %v1374_v7 = vld [vmem:[%s2167_s1 + $0x4] ss:$8 sps:$4 sm:$0xff]   ;;  %v1376_v8 = vld [vmem:[%s2167_s1] ss:$8 sps:$4 sm:$0xff]   ;;  %v1381_v13 = vld [vmem:[%s2166_s0 + $0x10] sm:$0xff]  }
   0x4   :  { %410 = vmatprep.subr.bf16.mxu0 %v1368_v3  ;;  %1354 = vmatprep.subr.bf16.mxu1 %v1368_v3  ;;  %v1377_v9 = vld [vmem:[%s2166_s0] sm:$0xff]   ;;  %v1379_v11 = vld [vmem:[%s2166_s0 + $0x8] sm:$0xff]   ;;  %v1382_v14 = vld [vmem:[%s2166_s0 + $0x90] sm:$0xff]  }
   0x5   :  { %v1378_v10 = vld [vmem:[%s2166_s0 + $0x80] sm:$0xff]   ;;  %v1380_v12 = vld [vmem:[%s2166_s0 + $0x88] sm:$0xff]  }
   0x7   :  { %411 = vmatpush1.bf16.msra.mxu0 %v1370_v4  ;;  %1358 = vmatpush1.bf16.msra.mxu1 %v1370_v4 }
   0x8   :  { %412 = vmatprep.subr.bf16.mxu0 %v1371_v5  ;;  %1355 = vmatprep.subr.bf16.mxu1 %v1371_v5 }
   0xb   :  { %413 = vmatpush1.bf16.msra.mxu0 %v1373_v6  ;;  %1359 = vmatpush1.bf16.msra.mxu1 %v1373_v6 }
   0xc   :  { %414 = vmatprep.subr.bf16.mxu0 %v1374_v7  ;;  %1356 = vmatprep.subr.bf16.mxu1 %v1374_v7 }
   0xf   :  { %415 = vmatpush1.bf16.msra.mxu0 %v1376_v8  ;;  %1360 = vmatpush1.bf16.msra.mxu1 %v1376_v8 }
  0x12   :  { %1321 = vmatmul.mubr.msk.bf16.vlgmr.msra.gmra.mxu0 %vm303_vm0, %v1377_v9  ;;  %1337 = vmatmul.mubr.msk.bf16.vlgmr.msra.gmra.mxu1 %vm303_vm0, %v1378_v10 }
  0x13   :  { %442 = vmatprep.mubr.bf16.mxu0 %v1431_v2  ;;  %602 = vmatprep.mubr.bf16.mxu1 %v1431_v2 }
  0x1a   :  { %1322 = vmatmul.mubr.msk.bf16.gmra.mxu0 %vm303_vm0, %v1379_v11  ;;  %1338 = vmatmul.mubr.msk.bf16.gmra.mxu1 %vm303_vm0, %v1380_v12 }
  0x1b   :  { %452 = vmatprep.mubr.bf16.mxu0 %v1431_v2  ;;  %612 = vmatprep.mubr.bf16.mxu1 %v1431_v2 }
  0x22   :  { %1323 = vmatmul.mubr.msk.bf16.gmra.mxu0 %vm303_vm0, %v1381_v13  ;;  %1339 = vmatmul.mubr.msk.bf16.gmra.mxu1 %vm303_vm0, %v1382_v14 }
  0x23   :  { %462 = vmatprep.mubr.bf16.mxu0 %v1431_v2  ;;  %622 = vmatprep.mubr.bf16.mxu1 %v1431_v2 }
  0x24   :  { %9 = vsyncpa [#allocation3], 0  ;;  %v1383_v15 = vld [vmem:[%s2166_s0 + $0x18] sm:$0xff]   ;;  %v1385_v17 = vld [vmem:[%s2166_s0 + $0x20] sm:$0xff]   ;;  %v93_v41 = vlaneseq  ;;  %s1432_s11 = smov [#allocation2]  }
  0x25   :  { %v1384_v16 = vld [vmem:[%s2166_s0 + $0x98] sm:$0xff]   ;;  %v1386_v18 = vld [vmem:[%s2166_s0 + $0xa0] sm:$0xff]   ;;  %v1387_v19 = vld [vmem:[%s2166_s0 + $0x28] sm:$0xff]   ;;  %s1270_s12 = sshll.u32 %s1432_s11, 4  ;;  %s1271_s12 = int_to_ptr.vmem [resolvable:$true] %s1270_s12 }
  0x26   :  { %v1388_v20 = vld [vmem:[%s2166_s0 + $0xa8] sm:$0xff]   ;;  %v1389_v21 = vld [vmem:[%s2166_s0 + $0x30] sm:$0xff]   ;;  %v1391_v23 = vld [vmem:[%s2166_s0 + $0x38] sm:$0xff]   ;;  %v94_v42 = vshrl.u32 %v93_v41, 7  ;;  %p1414_p1 = scmp.lt.s32.totalorder %s1271_s12, %s1271_s12 }
  0x27   :  { %v1390_v22 = vld [vmem:[%s2166_s0 + $0xb0] sm:$0xff]   ;;  %v1392_v24 = vld [vmem:[%s2166_s0 + $0xb8] sm:$0xff]   ;;  %v1393_v25 = vld [vmem:[%s2166_s0 + $0x40] sm:$0xff]  }
  0x28   :  { %v1394_v26 = vld [vmem:[%s2166_s0 + $0xc0] sm:$0xff]   ;;  %v1395_v27 = vld [vmem:[%s2166_s0 + $0x48] sm:$0xff]   ;;  %v1397_v29 = vld [vmem:[%s2166_s0 + $0x50] sm:$0xff]   ;;  %v95_v43 = vsub.s32 0, %v94_v42  ;;  %v99_v45 = vsub.s32 1, %v94_v42 }
  0x29   :  { %v1396_v28 = vld [vmem:[%s2166_s0 + $0xc8] sm:$0xff]   ;;  %v1398_v30 = vld [vmem:[%s2166_s0 + $0xd0] sm:$0xff]   ;;  %v1399_v31 = vld [vmem:[%s2166_s0 + $0x58] sm:$0xff]  }
  0x2a   :  { %1324 = vmatmul.mubr.msk.bf16.gmra.mxu0 %vm303_vm0, %v1383_v15  ;;  %1340 = vmatmul.mubr.msk.bf16.gmra.mxu1 %vm303_vm0, %v1384_v16  ;;  %v1400_v32 = vld [vmem:[%s2166_s0 + $0xd8] sm:$0xff]   ;;  %v1401_v33 = vld [vmem:[%s2166_s0 + $0x60] sm:$0xff]   ;;  %v1403_v35 = vld [vmem:[%s2166_s0 + $0x68] sm:$0xff]  }
  0x2b   :  { %472 = vmatprep.mubr.bf16.mxu0 %v1431_v2  ;;  %632 = vmatprep.mubr.bf16.mxu1 %v1431_v2  ;;  %v1402_v34 = vld [vmem:[%s2166_s0 + $0xe0] sm:$0xff]   ;;  %v1404_v36 = vld [vmem:[%s2166_s0 + $0xe8] sm:$0xff]   ;;  %v1405_v37 = vld [vmem:[%s2166_s0 + $0x70] sm:$0xff]  }
  0x2c   :  { %v1406_v38 = vld [vmem:[%s2166_s0 + $0xf0] sm:$0xff]   ;;  %v1407_v39 = vld [vmem:[%s2166_s0 + $0x78] sm:$0xff]   ;;  %v91_v44 = vld [vmem:[%s2168_s2] sm:$0x3] }
  0x2d   :  { %v1408_v40 = vld [vmem:[%s2166_s0 + $0xf8] sm:$0xff]   ;;  %v1647_v46 = vrot.slane %v91_v44, %v95_v43  ;;  %v1649_v47 = vrot.slane %v91_v44, %v99_v45  ;;  %v753_v49 = vld [vmem:[%s2169_s3] sm:$0xff]  ;;  %v754_v55 = vld [vmem:[%s2169_s3 + $0x8] sm:$0xff] }
  0x2e   :  { %v817_v51 = vld [vmem:[%s2169_s3 + $0x200] sm:$0xff]  ;;  %v818_v57 = vld [vmem:[%s2169_s3 + $0x208] sm:$0xff]  ;;  %v755_v4 = vld [vmem:[%s2169_s3 + $0x10] sm:$0xff] }
  0x2f   :  { %v819_v5 = vld [vmem:[%s2169_s3 + $0x210] sm:$0xff]  ;;  %v756_v9 = vld [vmem:[%s2169_s3 + $0x18] sm:$0xff] }
  0x30   :  { %v820_v11 = vld [vmem:[%s2169_s3 + $0x218] sm:$0xff]  ;;  %v823_v41 = vld [vmem:[%s2169_s3 + $0x230] sm:$0xff] }
  0x32   :  { %1325 = vmatmul.mubr.msk.bf16.gmra.mxu0 %vm303_vm0, %v1385_v17  ;;  %1341 = vmatmul.mubr.msk.bf16.gmra.mxu1 %vm303_vm0, %v1386_v18 }
  0x33   :  { %482 = vmatprep.mubr.bf16.mxu0 %v1431_v2  ;;  %642 = vmatprep.mubr.bf16.mxu1 %v1431_v2 }
  0x3a   :  { %1326 = vmatmul.mubr.msk.bf16.gmra.mxu0 %vm303_vm0, %v1387_v19  ;;  %1342 = vmatmul.mubr.msk.bf16.gmra.mxu1 %vm303_vm0, %v1388_v20  ;;  %v757_v19 = vld [vmem:[%s2169_s3 + $0x20] sm:$0xff] }
  0x3b   :  { %492 = vmatprep.mubr.bf16.mxu0 %v1431_v2  ;;  %652 = vmatprep.mubr.bf16.mxu1 %v1431_v2 }
  0x42   :  { %1327 = vmatmul.mubr.msk.bf16.gmra.mxu0 %vm303_vm0, %v1389_v21  ;;  %1343 = vmatmul.mubr.msk.bf16.gmra.mxu1 %vm303_vm0, %v1390_v22  ;;  %v821_v21 = vld [vmem:[%s2169_s3 + $0x220] sm:$0xff] }
  0x43   :  { %502 = vmatprep.mubr.bf16.mxu0 %v1431_v2  ;;  %662 = vmatprep.mubr.bf16.mxu1 %v1431_v2 }
  0x4a   :  { %1328 = vmatmul.mubr.msk.bf16.gmra.mxu0 %vm303_vm0, %v1391_v23  ;;  %1344 = vmatmul.mubr.msk.bf16.gmra.mxu1 %vm303_vm0, %v1392_v24 }
  0x4b   :  { %512 = vmatprep.mubr.bf16.mxu0 %v1431_v2  ;;  %672 = vmatprep.mubr.bf16.mxu1 %v1431_v2 }
  0x52   :  { %1329 = vmatmul.mubr.msk.bf16.gmra.mxu0 %vm303_vm0, %v1393_v25  ;;  %1345 = vmatmul.mubr.msk.bf16.gmra.mxu1 %vm303_vm0, %v1394_v26 }
  0x53   :  { %522 = vmatprep.mubr.bf16.mxu0 %v1431_v2  ;;  %682 = vmatprep.mubr.bf16.mxu1 %v1431_v2 }
  0x5a   :  { %1330 = vmatmul.mubr.msk.bf16.gmra.mxu0 %vm303_vm0, %v1395_v27  ;;  %1346 = vmatmul.mubr.msk.bf16.gmra.mxu1 %vm303_vm0, %v1396_v28 }
  0x5b   :  { %532 = vmatprep.mubr.bf16.mxu0 %v1431_v2  ;;  %692 = vmatprep.mubr.bf16.mxu1 %v1431_v2 }
  0x62   :  { %1331 = vmatmul.mubr.msk.bf16.gmra.mxu0 %vm303_vm0, %v1397_v29  ;;  %1347 = vmatmul.mubr.msk.bf16.gmra.mxu1 %vm303_vm0, %v1398_v30 }
  0x63   :  { %542 = vmatprep.mubr.bf16.mxu0 %v1431_v2  ;;  %702 = vmatprep.mubr.bf16.mxu1 %v1431_v2 }
  0x6a   :  { %1332 = vmatmul.mubr.msk.bf16.gmra.mxu0 %vm303_vm0, %v1399_v31  ;;  %1348 = vmatmul.mubr.msk.bf16.gmra.mxu1 %vm303_vm0, %v1400_v32 }
  0x6b   :  { %552 = vmatprep.mubr.bf16.mxu0 %v1431_v2  ;;  %712 = vmatprep.mubr.bf16.mxu1 %v1431_v2 }
  0x72   :  { %1333 = vmatmul.mubr.msk.bf16.gmra.mxu0 %vm303_vm0, %v1401_v33  ;;  %1349 = vmatmul.mubr.msk.bf16.gmra.mxu1 %vm303_vm0, %v1402_v34  ;;  %v758_v34 = vld [vmem:[%s2169_s3 + $0x28] sm:$0xff] }
  0x73   :  { %562 = vmatprep.mubr.bf16.mxu0 %v1431_v2  ;;  %722 = vmatprep.mubr.bf16.mxu1 %v1431_v2 }
  0x7a   :  { %1334 = vmatmul.mubr.msk.bf16.gmra.mxu0 %vm303_vm0, %v1403_v35  ;;  %1350 = vmatmul.mubr.msk.bf16.gmra.mxu1 %vm303_vm0, %v1404_v36  ;;  %v822_v35 = vld [vmem:[%s2169_s3 + $0x228] sm:$0xff] }
  0x7b   :  { %572 = vmatprep.mubr.bf16.mxu0 %v1431_v2  ;;  %732 = vmatprep.mubr.bf16.mxu1 %v1431_v2 }
  0x82   :  { %1335 = vmatmul.mubr.msk.bf16.gmra.mxu0 %vm303_vm0, %v1405_v37  ;;  %1351 = vmatmul.mubr.msk.bf16.gmra.mxu1 %vm303_vm0, %v1406_v38 }
  0x83   :  { %582 = vmatprep.mubr.bf16.mxu0 %v1431_v2  ;;  %742 = vmatprep.mubr.bf16.mxu1 %v1431_v2 }
  0x8a   :  { %1336 = vmatmul.mubr.msk.bf16.gmra.mxu0 %vm303_vm0, %v1407_v39  ;;  %1352 = vmatmul.mubr.msk.bf16.gmra.mxu1 %vm303_vm0, %v1408_v40  ;;  %v759_v39 = vld [vmem:[%s2169_s3 + $0x30] sm:$0xff] }
  0xd2   :  { %v434_v48 = vpop.f32.mrf.mxu0  ;;  %v594_v50 = vpop.f32.mrf.mxu1 }
  0xd3   :  { %v435_v52 = vadd.f32 %v434_v48, %v1647_v46  ;;  %v595_v53 = vadd.f32 %v594_v50, %v1647_v46 }
  0xd4   :  { %v436_v54 = vpop.f32.mrf.mxu0  ;;  %v596_v56 = vpop.f32.mrf.mxu1 }
  0xd5   :  { %v881_v58 = vadd.f32 %v753_v49, %v435_v52  ;;  %v945_v59 = vadd.f32 %v817_v51, %v595_v53  ;;  %v437_v60 = vadd.f32 %v436_v54, %v1649_v47  ;;  %v597_v61 = vadd.f32 %v596_v56, %v1649_v47  ;;  %v760_v51 = vld [vmem:[%s2169_s3 + $0x38] sm:$0xff] }
  0xd6   :  { %v438_v62 = vpop.f32.mrf.mxu0  ;;  %v598_v63 = vpop.f32.mrf.mxu1  ;;  %v824_v53 = vld [vmem:[%s2169_s3 + $0x238] sm:$0xff] }
  0xd7   :  { %v1009_v0 = vmax.f32 %v881_v58, 0.0  ;;  %v1073_v1 = vmax.f32 %v945_v59, 0.0  ;;  %v882_v2 = vadd.f32 %v754_v55, %v437_v60  ;;  %v946_v3 = vadd.f32 %v818_v57, %v597_v61 }
  0xd8   :  { %v439_v6 = vadd.f32 %v438_v62, %v1647_v46  ;;  %v599_v7 = vadd.f32 %v598_v63, %v1647_v46  ;;  %v440_v8 = vpop.f32.mrf.mxu0  ;;  %v600_v10 = vpop.f32.mrf.mxu1 }
  0xd9   :  { %1137 = vst [vmem:[#allocation2] sm:$0xff] %v1009_v0  ;;  %1201 = vst [vmem:[#allocation2 + $0x200] sm:$0xff] %v1073_v1  ;;  %v1010_v12 = vmax.f32 %v882_v2, 0.0  ;;  %v1074_v13 = vmax.f32 %v946_v3, 0.0  ;;  %v441_v14 = vadd.f32 %v440_v8, %v1649_v47  ;;  %v601_v15 = vadd.f32 %v600_v10, %v1649_v47  ;;  %v761_v2 = vld [vmem:[%s2169_s3 + $0x40] sm:$0xff] }
  0xda   :  { %v883_v16 = vadd.f32 %v755_v4, %v439_v6  ;;  %v947_v17 = vadd.f32 %v819_v5, %v599_v7  ;;  %v444_v18 = vpop.f32.mrf.mxu0  ;;  %v604_v20 = vpop.f32.mrf.mxu1  ;;  %v825_v3 = vld [vmem:[%s2169_s3 + $0x240] sm:$0xff]  ;;  %v762_v7 = vld [vmem:[%s2169_s3 + $0x48] sm:$0xff] }
  0xdb   :  { %1138 = vst [vmem:[#allocation2 + $0x8] sm:$0xff] %v1010_v12  ;;  %1202 = vst [vmem:[#allocation2 + $0x208] sm:$0xff] %v1074_v13  ;;  %v884_v22 = vadd.f32 %v756_v9, %v441_v14  ;;  %v948_v23 = vadd.f32 %v820_v11, %v601_v15  ;;  %v445_v24 = vadd.f32 %v444_v18, %v1647_v46  ;;  %v826_v9 = vld [vmem:[%s2169_s3 + $0x248] sm:$0xff] }
  0xdc   :  { %v605_v25 = vadd.f32 %v604_v20, %v1647_v46  ;;  %v1011_v26 = vmax.f32 %v883_v16, 0.0  ;;  %v1075_v27 = vmax.f32 %v947_v17, 0.0  ;;  %v446_v28 = vpop.f32.mrf.mxu0  ;;  %v606_v29 = vpop.f32.mrf.mxu1  ;;  %v763_v17 = vld [vmem:[%s2169_s3 + $0x50] sm:$0xff] }
  0xdd   :  { %v1012_v30 = vmax.f32 %v884_v22, 0.0  ;;  %v1076_v31 = vmax.f32 %v948_v23, 0.0  ;;  %v885_v32 = vadd.f32 %v757_v19, %v445_v24  ;;  %v447_v36 = vadd.f32 %v446_v28, %v1649_v47  ;;  %v827_v19 = vld [vmem:[%s2169_s3 + $0x250] sm:$0xff] }
  0xde   :  { %v949_v33 = vadd.f32 %v821_v21, %v605_v25  ;;  %1139 = vst [vmem:[#allocation2 + $0x10] sm:$0xff] %v1011_v26  ;;  %1203 = vst [vmem:[#allocation2 + $0x210] sm:$0xff] %v1075_v27  ;;  %v607_v37 = vadd.f32 %v606_v29, %v1649_v47  ;;  %v448_v38 = vpop.f32.mrf.mxu0  ;;  %v608_v40 = vpop.f32.mrf.mxu1 }
  0xdf   :  { %1140 = vst [vmem:[#allocation2 + $0x18] sm:$0xff] %v1012_v30  ;;  %1204 = vst [vmem:[#allocation2 + $0x218] sm:$0xff] %v1076_v31  ;;  %v1013_v42 = vmax.f32 %v885_v32, 0.0  ;;  %v449_v44 = vadd.f32 %v448_v38, %v1647_v46  ;;  %v609_v45 = vadd.f32 %v608_v40, %v1647_v46  ;;  %v886_v48 = vadd.f32 %v758_v34, %v447_v36  ;;  %v764_v32 = vld [vmem:[%s2169_s3 + $0x58] sm:$0xff] }
  0xe0   :  { %v1077_v43 = vmax.f32 %v949_v33, 0.0  ;;  %v950_v49 = vadd.f32 %v822_v35, %v607_v37  ;;  %v450_v50 = vpop.f32.mrf.mxu0  ;;  %v610_v52 = vpop.f32.mrf.mxu1  ;;  %v828_v33 = vld [vmem:[%s2169_s3 + $0x258] sm:$0xff]  ;;  %v765_v37 = vld [vmem:[%s2169_s3 + $0x60] sm:$0xff] }
  0xe1   :  { %1141 = vst [vmem:[#allocation2 + $0x20] sm:$0xff] %v1013_v42  ;;  %v887_v54 = vadd.f32 %v759_v39, %v449_v44  ;;  %v951_v55 = vadd.f32 %v823_v41, %v609_v45  ;;  %v451_v56 = vadd.f32 %v450_v50, %v1649_v47  ;;  %v611_v57 = vadd.f32 %v610_v52, %v1649_v47  ;;  %v829_v39 = vld [vmem:[%s2169_s3 + $0x260] sm:$0xff] }
  0xe2   :  { %1205 = vst [vmem:[#allocation2 + $0x220] sm:$0xff] %v1077_v43  ;;  %v1014_v58 = vmax.f32 %v886_v48, 0.0  ;;  %v1078_v59 = vmax.f32 %v950_v49, 0.0  ;;  %v454_v60 = vpop.f32.mrf.mxu0  ;;  %v614_v61 = vpop.f32.mrf.mxu1  ;;  %v766_v49 = vld [vmem:[%s2169_s3 + $0x68] sm:$0xff] }
  0xe3   :  { %v1015_v62 = vmax.f32 %v887_v54, 0.0  ;;  %v1079_v63 = vmax.f32 %v951_v55, 0.0  ;;  %v888_v0 = vadd.f32 %v760_v51, %v451_v56  ;;  %v952_v1 = vadd.f32 %v824_v53, %v611_v57  ;;  %v830_v51 = vld [vmem:[%s2169_s3 + $0x268] sm:$0xff] }
  0xe4   :  { %1142 = vst [vmem:[#allocation2 + $0x28] sm:$0xff] %v1014_v58  ;;  %1206 = vst [vmem:[#allocation2 + $0x228] sm:$0xff] %v1078_v59  ;;  %v455_v4 = vadd.f32 %v454_v60, %v1647_v46  ;;  %v615_v5 = vadd.f32 %v614_v61, %v1647_v46  ;;  %v456_v6 = vpop.f32.mrf.mxu0  ;;  %v616_v8 = vpop.f32.mrf.mxu1 }
  0xe5   :  { %1143 = vst [vmem:[#allocation2 + $0x30] sm:$0xff] %v1015_v62  ;;  %1207 = vst [vmem:[#allocation2 + $0x230] sm:$0xff] %v1079_v63  ;;  %v1016_v10 = vmax.f32 %v888_v0, 0.0  ;;  %v1080_v11 = vmax.f32 %v952_v1, 0.0  ;;  %v457_v12 = vadd.f32 %v456_v6, %v1649_v47  ;;  %v617_v13 = vadd.f32 %v616_v8, %v1649_v47  ;;  %v767_v0 = vld [vmem:[%s2169_s3 + $0x70] sm:$0xff] }
  0xe6   :  { %v889_v14 = vadd.f32 %v761_v2, %v455_v4  ;;  %v953_v15 = vadd.f32 %v825_v3, %v615_v5  ;;  %v458_v16 = vpop.f32.mrf.mxu0  ;;  %v618_v18 = vpop.f32.mrf.mxu1  ;;  %v831_v1 = vld [vmem:[%s2169_s3 + $0x270] sm:$0xff]  ;;  %v768_v5 = vld [vmem:[%s2169_s3 + $0x78] sm:$0xff] }
  0xe7   :  { %1144 = vst [vmem:[#allocation2 + $0x38] sm:$0xff] %v1016_v10  ;;  %1208 = vst [vmem:[#allocation2 + $0x238] sm:$0xff] %v1080_v11  ;;  %v890_v20 = vadd.f32 %v762_v7, %v457_v12  ;;  %v954_v21 = vadd.f32 %v826_v9, %v617_v13  ;;  %v459_v22 = vadd.f32 %v458_v16, %v1647_v46  ;;  %v832_v7 = vld [vmem:[%s2169_s3 + $0x278] sm:$0xff] }
  0xe8   :  { %v619_v23 = vadd.f32 %v618_v18, %v1647_v46  ;;  %v1017_v24 = vmax.f32 %v889_v14, 0.0  ;;  %v1081_v25 = vmax.f32 %v953_v15, 0.0  ;;  %v460_v26 = vpop.f32.mrf.mxu0  ;;  %v620_v27 = vpop.f32.mrf.mxu1  ;;  %v769_v15 = vld [vmem:[%s2169_s3 + $0x80] sm:$0xff] }
  0xe9   :  { %v1018_v28 = vmax.f32 %v890_v20, 0.0  ;;  %v1082_v29 = vmax.f32 %v954_v21, 0.0  ;;  %v891_v30 = vadd.f32 %v763_v17, %v459_v22  ;;  %v461_v34 = vadd.f32 %v460_v26, %v1649_v47  ;;  %v833_v17 = vld [vmem:[%s2169_s3 + $0x280] sm:$0xff] }
  0xea   :  { %v955_v31 = vadd.f32 %v827_v19, %v619_v23  ;;  %1145 = vst [vmem:[#allocation2 + $0x40] sm:$0xff] %v1017_v24  ;;  %1209 = vst [vmem:[#allocation2 + $0x240] sm:$0xff] %v1081_v25  ;;  %v621_v35 = vadd.f32 %v620_v27, %v1649_v47  ;;  %v464_v36 = vpop.f32.mrf.mxu0  ;;  %v624_v38 = vpop.f32.mrf.mxu1 }
  0xeb   :  { %1146 = vst [vmem:[#allocation2 + $0x48] sm:$0xff] %v1018_v28  ;;  %1210 = vst [vmem:[#allocation2 + $0x248] sm:$0xff] %v1082_v29  ;;  %v1019_v40 = vmax.f32 %v891_v30, 0.0  ;;  %v465_v42 = vadd.f32 %v464_v36, %v1647_v46  ;;  %v625_v43 = vadd.f32 %v624_v38, %v1647_v46  ;;  %v892_v44 = vadd.f32 %v764_v32, %v461_v34  ;;  %v770_v30 = vld [vmem:[%s2169_s3 + $0x88] sm:$0xff] }
  0xec   :  { %v1083_v41 = vmax.f32 %v955_v31, 0.0  ;;  %v956_v45 = vadd.f32 %v828_v33, %v621_v35  ;;  %v466_v48 = vpop.f32.mrf.mxu0  ;;  %v626_v50 = vpop.f32.mrf.mxu1  ;;  %v834_v31 = vld [vmem:[%s2169_s3 + $0x288] sm:$0xff]  ;;  %v771_v35 = vld [vmem:[%s2169_s3 + $0x90] sm:$0xff] }
  0xed   :  { %1147 = vst [vmem:[#allocation2 + $0x50] sm:$0xff] %v1019_v40  ;;  %v893_v52 = vadd.f32 %v765_v37, %v465_v42  ;;  %v957_v53 = vadd.f32 %v829_v39, %v625_v43  ;;  %v467_v54 = vadd.f32 %v466_v48, %v1649_v47  ;;  %v627_v55 = vadd.f32 %v626_v50, %v1649_v47  ;;  %v835_v37 = vld [vmem:[%s2169_s3 + $0x290] sm:$0xff] }
  0xee   :  { %1211 = vst [vmem:[#allocation2 + $0x250] sm:$0xff] %v1083_v41  ;;  %v1020_v56 = vmax.f32 %v892_v44, 0.0  ;;  %v1084_v57 = vmax.f32 %v956_v45, 0.0  ;;  %v468_v58 = vpop.f32.mrf.mxu0  ;;  %v628_v59 = vpop.f32.mrf.mxu1  ;;  %v772_v45 = vld [vmem:[%s2169_s3 + $0x98] sm:$0xff] }
  0xef   :  { %v1021_v60 = vmax.f32 %v893_v52, 0.0  ;;  %v1085_v61 = vmax.f32 %v957_v53, 0.0  ;;  %v894_v62 = vadd.f32 %v766_v49, %v467_v54  ;;  %v958_v63 = vadd.f32 %v830_v51, %v627_v55  ;;  %v836_v49 = vld [vmem:[%s2169_s3 + $0x298] sm:$0xff] }
  0xf0   :  { %1148 = vst [vmem:[#allocation2 + $0x58] sm:$0xff] %v1020_v56  ;;  %1212 = vst [vmem:[#allocation2 + $0x258] sm:$0xff] %v1084_v57  ;;  %v469_v2 = vadd.f32 %v468_v58, %v1647_v46  ;;  %v629_v3 = vadd.f32 %v628_v59, %v1647_v46  ;;  %v470_v4 = vpop.f32.mrf.mxu0  ;;  %v630_v6 = vpop.f32.mrf.mxu1 }
  0xf1   :  { %1149 = vst [vmem:[#allocation2 + $0x60] sm:$0xff] %v1021_v60  ;;  %1213 = vst [vmem:[#allocation2 + $0x260] sm:$0xff] %v1085_v61  ;;  %v1022_v8 = vmax.f32 %v894_v62, 0.0  ;;  %v1086_v9 = vmax.f32 %v958_v63, 0.0  ;;  %v471_v10 = vadd.f32 %v470_v4, %v1649_v47  ;;  %v631_v11 = vadd.f32 %v630_v6, %v1649_v47  ;;  %v773_v62 = vld [vmem:[%s2169_s3 + $0xa0] sm:$0xff] }
  0xf2   :  { %v895_v12 = vadd.f32 %v767_v0, %v469_v2  ;;  %v959_v13 = vadd.f32 %v831_v1, %v629_v3  ;;  %v474_v14 = vpop.f32.mrf.mxu0  ;;  %v634_v16 = vpop.f32.mrf.mxu1  ;;  %v837_v63 = vld [vmem:[%s2169_s3 + $0x2a0] sm:$0xff]  ;;  %v774_v3 = vld [vmem:[%s2169_s3 + $0xa8] sm:$0xff] }
  0xf3   :  { %1150 = vst [vmem:[#allocation2 + $0x68] sm:$0xff] %v1022_v8  ;;  %1214 = vst [vmem:[#allocation2 + $0x268] sm:$0xff] %v1086_v9  ;;  %v896_v18 = vadd.f32 %v768_v5, %v471_v10  ;;  %v960_v19 = vadd.f32 %v832_v7, %v631_v11  ;;  %v475_v20 = vadd.f32 %v474_v14, %v1647_v46  ;;  %v838_v5 = vld [vmem:[%s2169_s3 + $0x2a8] sm:$0xff] }
  0xf4   :  { %v635_v21 = vadd.f32 %v634_v16, %v1647_v46  ;;  %v1023_v22 = vmax.f32 %v895_v12, 0.0  ;;  %v1087_v23 = vmax.f32 %v959_v13, 0.0  ;;  %v476_v24 = vpop.f32.mrf.mxu0  ;;  %v636_v25 = vpop.f32.mrf.mxu1  ;;  %v775_v13 = vld [vmem:[%s2169_s3 + $0xb0] sm:$0xff] }
  0xf5   :  { %v1024_v26 = vmax.f32 %v896_v18, 0.0  ;;  %v1088_v27 = vmax.f32 %v960_v19, 0.0  ;;  %v897_v28 = vadd.f32 %v769_v15, %v475_v20  ;;  %v477_v32 = vadd.f32 %v476_v24, %v1649_v47  ;;  %v839_v15 = vld [vmem:[%s2169_s3 + $0x2b0] sm:$0xff] }
  0xf6   :  { %v961_v29 = vadd.f32 %v833_v17, %v635_v21  ;;  %1151 = vst [vmem:[#allocation2 + $0x70] sm:$0xff] %v1023_v22  ;;  %1215 = vst [vmem:[#allocation2 + $0x270] sm:$0xff] %v1087_v23  ;;  %v637_v33 = vadd.f32 %v636_v25, %v1649_v47  ;;  %v478_v34 = vpop.f32.mrf.mxu0  ;;  %v638_v36 = vpop.f32.mrf.mxu1 }
  0xf7   :  { %1152 = vst [vmem:[#allocation2 + $0x78] sm:$0xff] %v1024_v26  ;;  %1216 = vst [vmem:[#allocation2 + $0x278] sm:$0xff] %v1088_v27  ;;  %v1025_v38 = vmax.f32 %v897_v28, 0.0  ;;  %v479_v40 = vadd.f32 %v478_v34, %v1647_v46  ;;  %v639_v41 = vadd.f32 %v638_v36, %v1647_v46  ;;  %v898_v42 = vadd.f32 %v770_v30, %v477_v32  ;;  %v776_v28 = vld [vmem:[%s2169_s3 + $0xb8] sm:$0xff] }
  0xf8   :  { %v1089_v39 = vmax.f32 %v961_v29, 0.0  ;;  %v962_v43 = vadd.f32 %v834_v31, %v637_v33  ;;  %v480_v44 = vpop.f32.mrf.mxu0  ;;  %v640_v48 = vpop.f32.mrf.mxu1  ;;  %v840_v29 = vld [vmem:[%s2169_s3 + $0x2b8] sm:$0xff]  ;;  %v777_v33 = vld [vmem:[%s2169_s3 + $0xc0] sm:$0xff] }
  0xf9   :  { %1153 = vst [vmem:[#allocation2 + $0x80] sm:$0xff] %v1025_v38  ;;  %v899_v50 = vadd.f32 %v771_v35, %v479_v40  ;;  %v963_v51 = vadd.f32 %v835_v37, %v639_v41  ;;  %v481_v52 = vadd.f32 %v480_v44, %v1649_v47  ;;  %v641_v53 = vadd.f32 %v640_v48, %v1649_v47  ;;  %v841_v35 = vld [vmem:[%s2169_s3 + $0x2c0] sm:$0xff] }
  0xfa   :  { %1217 = vst [vmem:[#allocation2 + $0x280] sm:$0xff] %v1089_v39  ;;  %v1026_v54 = vmax.f32 %v898_v42, 0.0  ;;  %v1090_v55 = vmax.f32 %v962_v43, 0.0  ;;  %v484_v56 = vpop.f32.mrf.mxu0  ;;  %v644_v57 = vpop.f32.mrf.mxu1  ;;  %v778_v43 = vld [vmem:[%s2169_s3 + $0xc8] sm:$0xff] }
  0xfb   :  { %v1027_v58 = vmax.f32 %v899_v50, 0.0  ;;  %v1091_v59 = vmax.f32 %v963_v51, 0.0  ;;  %v900_v60 = vadd.f32 %v772_v45, %v481_v52  ;;  %v964_v61 = vadd.f32 %v836_v49, %v641_v53  ;;  %v842_v45 = vld [vmem:[%s2169_s3 + $0x2c8] sm:$0xff] }
  0xfc   :  { %1154 = vst [vmem:[#allocation2 + $0x88] sm:$0xff] %v1026_v54  ;;  %1218 = vst [vmem:[#allocation2 + $0x288] sm:$0xff] %v1090_v55  ;;  %v485_v0 = vadd.f32 %v484_v56, %v1647_v46  ;;  %v645_v1 = vadd.f32 %v644_v57, %v1647_v46  ;;  %v486_v2 = vpop.f32.mrf.mxu0  ;;  %v646_v4 = vpop.f32.mrf.mxu1 }
  0xfd   :  { %1155 = vst [vmem:[#allocation2 + $0x90] sm:$0xff] %v1027_v58  ;;  %1219 = vst [vmem:[#allocation2 + $0x290] sm:$0xff] %v1091_v59  ;;  %v1028_v6 = vmax.f32 %v900_v60, 0.0  ;;  %v1092_v7 = vmax.f32 %v964_v61, 0.0  ;;  %v487_v8 = vadd.f32 %v486_v2, %v1649_v47  ;;  %v647_v9 = vadd.f32 %v646_v4, %v1649_v47  ;;  %v779_v60 = vld [vmem:[%s2169_s3 + $0xd0] sm:$0xff] }
  0xfe   :  { %v901_v10 = vadd.f32 %v773_v62, %v485_v0  ;;  %v965_v11 = vadd.f32 %v837_v63, %v645_v1  ;;  %v488_v12 = vpop.f32.mrf.mxu0  ;;  %v648_v14 = vpop.f32.mrf.mxu1  ;;  %v843_v61 = vld [vmem:[%s2169_s3 + $0x2d0] sm:$0xff]  ;;  %v780_v1 = vld [vmem:[%s2169_s3 + $0xd8] sm:$0xff] }
  0xff   :  { %1156 = vst [vmem:[#allocation2 + $0x98] sm:$0xff] %v1028_v6  ;;  %1220 = vst [vmem:[#allocation2 + $0x298] sm:$0xff] %v1092_v7  ;;  %v902_v16 = vadd.f32 %v774_v3, %v487_v8  ;;  %v966_v17 = vadd.f32 %v838_v5, %v647_v9  ;;  %v489_v18 = vadd.f32 %v488_v12, %v1647_v46  ;;  %v844_v3 = vld [vmem:[%s2169_s3 + $0x2d8] sm:$0xff] }
 0x100   :  { %v649_v19 = vadd.f32 %v648_v14, %v1647_v46  ;;  %v1029_v20 = vmax.f32 %v901_v10, 0.0  ;;  %v1093_v21 = vmax.f32 %v965_v11, 0.0  ;;  %v490_v22 = vpop.f32.mrf.mxu0  ;;  %v650_v23 = vpop.f32.mrf.mxu1  ;;  %v781_v11 = vld [vmem:[%s2169_s3 + $0xe0] sm:$0xff] }
 0x101   :  { %v1030_v24 = vmax.f32 %v902_v16, 0.0  ;;  %v1094_v25 = vmax.f32 %v966_v17, 0.0  ;;  %v903_v26 = vadd.f32 %v775_v13, %v489_v18  ;;  %v491_v30 = vadd.f32 %v490_v22, %v1649_v47  ;;  %v845_v13 = vld [vmem:[%s2169_s3 + $0x2e0] sm:$0xff] }
 0x102   :  { %v967_v27 = vadd.f32 %v839_v15, %v649_v19  ;;  %1157 = vst [vmem:[#allocation2 + $0xa0] sm:$0xff] %v1029_v20  ;;  %1221 = vst [vmem:[#allocation2 + $0x2a0] sm:$0xff] %v1093_v21  ;;  %v651_v31 = vadd.f32 %v650_v23, %v1649_v47  ;;  %v494_v32 = vpop.f32.mrf.mxu0  ;;  %v654_v34 = vpop.f32.mrf.mxu1 }
 0x103   :  { %1158 = vst [vmem:[#allocation2 + $0xa8] sm:$0xff] %v1030_v24  ;;  %1222 = vst [vmem:[#allocation2 + $0x2a8] sm:$0xff] %v1094_v25  ;;  %v1031_v36 = vmax.f32 %v903_v26, 0.0  ;;  %v495_v38 = vadd.f32 %v494_v32, %v1647_v46  ;;  %v655_v39 = vadd.f32 %v654_v34, %v1647_v46  ;;  %v904_v40 = vadd.f32 %v776_v28, %v491_v30  ;;  %v782_v26 = vld [vmem:[%s2169_s3 + $0xe8] sm:$0xff] }
 0x104   :  { %v1095_v37 = vmax.f32 %v967_v27, 0.0  ;;  %v968_v41 = vadd.f32 %v840_v29, %v651_v31  ;;  %v496_v42 = vpop.f32.mrf.mxu0  ;;  %v656_v44 = vpop.f32.mrf.mxu1  ;;  %v846_v27 = vld [vmem:[%s2169_s3 + $0x2e8] sm:$0xff]  ;;  %v783_v31 = vld [vmem:[%s2169_s3 + $0xf0] sm:$0xff] }
 0x105   :  { %1159 = vst [vmem:[#allocation2 + $0xb0] sm:$0xff] %v1031_v36  ;;  %v905_v48 = vadd.f32 %v777_v33, %v495_v38  ;;  %v969_v49 = vadd.f32 %v841_v35, %v655_v39  ;;  %v497_v50 = vadd.f32 %v496_v42, %v1649_v47  ;;  %v657_v51 = vadd.f32 %v656_v44, %v1649_v47  ;;  %v847_v33 = vld [vmem:[%s2169_s3 + $0x2f0] sm:$0xff] }
 0x106   :  { %1223 = vst [vmem:[#allocation2 + $0x2b0] sm:$0xff] %v1095_v37  ;;  %v1032_v52 = vmax.f32 %v904_v40, 0.0  ;;  %v1096_v53 = vmax.f32 %v968_v41, 0.0  ;;  %v498_v54 = vpop.f32.mrf.mxu0  ;;  %v658_v55 = vpop.f32.mrf.mxu1  ;;  %v784_v41 = vld [vmem:[%s2169_s3 + $0xf8] sm:$0xff] }
 0x107   :  { %v1033_v56 = vmax.f32 %v905_v48, 0.0  ;;  %v1097_v57 = vmax.f32 %v969_v49, 0.0  ;;  %v906_v58 = vadd.f32 %v778_v43, %v497_v50  ;;  %v970_v59 = vadd.f32 %v842_v45, %v657_v51  ;;  %v848_v43 = vld [vmem:[%s2169_s3 + $0x2f8] sm:$0xff] }
 0x108   :  { %1160 = vst [vmem:[#allocation2 + $0xb8] sm:$0xff] %v1032_v52  ;;  %1224 = vst [vmem:[#allocation2 + $0x2b8] sm:$0xff] %v1096_v53  ;;  %v499_v62 = vadd.f32 %v498_v54, %v1647_v46  ;;  %v659_v63 = vadd.f32 %v658_v55, %v1647_v46  ;;  %v500_v0 = vpop.f32.mrf.mxu0  ;;  %v660_v2 = vpop.f32.mrf.mxu1 }
 0x109   :  { %1161 = vst [vmem:[#allocation2 + $0xc0] sm:$0xff] %v1033_v56  ;;  %1225 = vst [vmem:[#allocation2 + $0x2c0] sm:$0xff] %v1097_v57  ;;  %v1034_v4 = vmax.f32 %v906_v58, 0.0  ;;  %v1098_v5 = vmax.f32 %v970_v59, 0.0  ;;  %v501_v6 = vadd.f32 %v500_v0, %v1649_v47  ;;  %v661_v7 = vadd.f32 %v660_v2, %v1649_v47  ;;  %v785_v58 = vld [vmem:[%s2169_s3 + $0x100] sm:$0xff] }
 0x10a   :  { %v907_v8 = vadd.f32 %v779_v60, %v499_v62  ;;  %v971_v9 = vadd.f32 %v843_v61, %v659_v63  ;;  %v504_v10 = vpop.f32.mrf.mxu0  ;;  %v664_v12 = vpop.f32.mrf.mxu1  ;;  %v849_v59 = vld [vmem:[%s2169_s3 + $0x300] sm:$0xff]  ;;  %v786_v63 = vld [vmem:[%s2169_s3 + $0x108] sm:$0xff] }
 0x10b   :  { %1162 = vst [vmem:[#allocation2 + $0xc8] sm:$0xff] %v1034_v4  ;;  %1226 = vst [vmem:[#allocation2 + $0x2c8] sm:$0xff] %v1098_v5  ;;  %v908_v14 = vadd.f32 %v780_v1, %v501_v6  ;;  %v972_v15 = vadd.f32 %v844_v3, %v661_v7  ;;  %v505_v16 = vadd.f32 %v504_v10, %v1647_v46  ;;  %v850_v1 = vld [vmem:[%s2169_s3 + $0x308] sm:$0xff] }
 0x10c   :  { %v665_v17 = vadd.f32 %v664_v12, %v1647_v46  ;;  %v1035_v18 = vmax.f32 %v907_v8, 0.0  ;;  %v1099_v19 = vmax.f32 %v971_v9, 0.0  ;;  %v506_v20 = vpop.f32.mrf.mxu0  ;;  %v666_v21 = vpop.f32.mrf.mxu1  ;;  %v787_v9 = vld [vmem:[%s2169_s3 + $0x110] sm:$0xff] }
 0x10d   :  { %v1036_v22 = vmax.f32 %v908_v14, 0.0  ;;  %v1100_v23 = vmax.f32 %v972_v15, 0.0  ;;  %v909_v24 = vadd.f32 %v781_v11, %v505_v16  ;;  %v507_v28 = vadd.f32 %v506_v20, %v1649_v47  ;;  %v851_v11 = vld [vmem:[%s2169_s3 + $0x310] sm:$0xff] }
 0x10e   :  { %v973_v25 = vadd.f32 %v845_v13, %v665_v17  ;;  %1163 = vst [vmem:[#allocation2 + $0xd0] sm:$0xff] %v1035_v18  ;;  %1227 = vst [vmem:[#allocation2 + $0x2d0] sm:$0xff] %v1099_v19  ;;  %v667_v29 = vadd.f32 %v666_v21, %v1649_v47  ;;  %v508_v30 = vpop.f32.mrf.mxu0  ;;  %v668_v32 = vpop.f32.mrf.mxu1 }
 0x10f   :  { %1164 = vst [vmem:[#allocation2 + $0xd8] sm:$0xff] %v1036_v22  ;;  %1228 = vst [vmem:[#allocation2 + $0x2d8] sm:$0xff] %v1100_v23  ;;  %v1037_v34 = vmax.f32 %v909_v24, 0.0  ;;  %v509_v36 = vadd.f32 %v508_v30, %v1647_v46  ;;  %v669_v37 = vadd.f32 %v668_v32, %v1647_v46  ;;  %v910_v38 = vadd.f32 %v782_v26, %v507_v28  ;;  %v788_v24 = vld [vmem:[%s2169_s3 + $0x118] sm:$0xff] }
 0x110   :  { %v1101_v35 = vmax.f32 %v973_v25, 0.0  ;;  %v974_v39 = vadd.f32 %v846_v27, %v667_v29  ;;  %v510_v40 = vpop.f32.mrf.mxu0  ;;  %v670_v42 = vpop.f32.mrf.mxu1  ;;  %v852_v25 = vld [vmem:[%s2169_s3 + $0x318] sm:$0xff]  ;;  %v789_v29 = vld [vmem:[%s2169_s3 + $0x120] sm:$0xff] }
 0x111   :  { %1165 = vst [vmem:[#allocation2 + $0xe0] sm:$0xff] %v1037_v34  ;;  %v911_v44 = vadd.f32 %v783_v31, %v509_v36  ;;  %v975_v45 = vadd.f32 %v847_v33, %v669_v37  ;;  %v511_v48 = vadd.f32 %v510_v40, %v1649_v47  ;;  %v671_v49 = vadd.f32 %v670_v42, %v1649_v47  ;;  %v853_v31 = vld [vmem:[%s2169_s3 + $0x320] sm:$0xff] }
 0x112   :  { %1229 = vst [vmem:[#allocation2 + $0x2e0] sm:$0xff] %v1101_v35  ;;  %v1038_v50 = vmax.f32 %v910_v38, 0.0  ;;  %v1102_v51 = vmax.f32 %v974_v39, 0.0  ;;  %v514_v52 = vpop.f32.mrf.mxu0  ;;  %v674_v53 = vpop.f32.mrf.mxu1  ;;  %v790_v39 = vld [vmem:[%s2169_s3 + $0x128] sm:$0xff] }
 0x113   :  { %v1039_v54 = vmax.f32 %v911_v44, 0.0  ;;  %v1103_v55 = vmax.f32 %v975_v45, 0.0  ;;  %v912_v56 = vadd.f32 %v784_v41, %v511_v48  ;;  %v976_v57 = vadd.f32 %v848_v43, %v671_v49  ;;  %v854_v41 = vld [vmem:[%s2169_s3 + $0x328] sm:$0xff] }
 0x114   :  { %1166 = vst [vmem:[#allocation2 + $0xe8] sm:$0xff] %v1038_v50  ;;  %1230 = vst [vmem:[#allocation2 + $0x2e8] sm:$0xff] %v1102_v51  ;;  %v515_v60 = vadd.f32 %v514_v52, %v1647_v46  ;;  %v675_v61 = vadd.f32 %v674_v53, %v1647_v46  ;;  %v516_v62 = vpop.f32.mrf.mxu0  ;;  %v676_v0 = vpop.f32.mrf.mxu1 }
 0x115   :  { %1167 = vst [vmem:[#allocation2 + $0xf0] sm:$0xff] %v1039_v54  ;;  %1231 = vst [vmem:[#allocation2 + $0x2f0] sm:$0xff] %v1103_v55  ;;  %v1040_v2 = vmax.f32 %v912_v56, 0.0  ;;  %v1104_v3 = vmax.f32 %v976_v57, 0.0  ;;  %v517_v4 = vadd.f32 %v516_v62, %v1649_v47  ;;  %v677_v5 = vadd.f32 %v676_v0, %v1649_v47  ;;  %v791_v56 = vld [vmem:[%s2169_s3 + $0x130] sm:$0xff] }
 0x116   :  { %v913_v6 = vadd.f32 %v785_v58, %v515_v60  ;;  %v977_v7 = vadd.f32 %v849_v59, %v675_v61  ;;  %v518_v8 = vpop.f32.mrf.mxu0  ;;  %v678_v10 = vpop.f32.mrf.mxu1  ;;  %v855_v57 = vld [vmem:[%s2169_s3 + $0x330] sm:$0xff]  ;;  %v792_v61 = vld [vmem:[%s2169_s3 + $0x138] sm:$0xff] }
 0x117   :  { %1168 = vst [vmem:[#allocation2 + $0xf8] sm:$0xff] %v1040_v2  ;;  %1232 = vst [vmem:[#allocation2 + $0x2f8] sm:$0xff] %v1104_v3  ;;  %v914_v12 = vadd.f32 %v786_v63, %v517_v4  ;;  %v978_v13 = vadd.f32 %v850_v1, %v677_v5  ;;  %v519_v14 = vadd.f32 %v518_v8, %v1647_v46  ;;  %v856_v63 = vld [vmem:[%s2169_s3 + $0x338] sm:$0xff] }
 0x118   :  { %v679_v15 = vadd.f32 %v678_v10, %v1647_v46  ;;  %v1041_v16 = vmax.f32 %v913_v6, 0.0  ;;  %v1105_v17 = vmax.f32 %v977_v7, 0.0  ;;  %v520_v18 = vpop.f32.mrf.mxu0  ;;  %v680_v19 = vpop.f32.mrf.mxu1  ;;  %v793_v7 = vld [vmem:[%s2169_s3 + $0x140] sm:$0xff] }
 0x119   :  { %v1042_v20 = vmax.f32 %v914_v12, 0.0  ;;  %v1106_v21 = vmax.f32 %v978_v13, 0.0  ;;  %v915_v22 = vadd.f32 %v787_v9, %v519_v14  ;;  %v521_v26 = vadd.f32 %v520_v18, %v1649_v47  ;;  %v857_v9 = vld [vmem:[%s2169_s3 + $0x340] sm:$0xff] }
 0x11a   :  { %v979_v23 = vadd.f32 %v851_v11, %v679_v15  ;;  %1169 = vst [vmem:[#allocation2 + $0x100] sm:$0xff] %v1041_v16  ;;  %1233 = vst [vmem:[#allocation2 + $0x300] sm:$0xff] %v1105_v17  ;;  %v681_v27 = vadd.f32 %v680_v19, %v1649_v47  ;;  %v524_v28 = vpop.f32.mrf.mxu0  ;;  %v684_v30 = vpop.f32.mrf.mxu1 }
 0x11b   :  { %1170 = vst [vmem:[#allocation2 + $0x108] sm:$0xff] %v1042_v20  ;;  %1234 = vst [vmem:[#allocation2 + $0x308] sm:$0xff] %v1106_v21  ;;  %v1043_v32 = vmax.f32 %v915_v22, 0.0  ;;  %v525_v34 = vadd.f32 %v524_v28, %v1647_v46  ;;  %v685_v35 = vadd.f32 %v684_v30, %v1647_v46  ;;  %v916_v36 = vadd.f32 %v788_v24, %v521_v26  ;;  %v794_v22 = vld [vmem:[%s2169_s3 + $0x148] sm:$0xff] }
 0x11c   :  { %v1107_v33 = vmax.f32 %v979_v23, 0.0  ;;  %v980_v37 = vadd.f32 %v852_v25, %v681_v27  ;;  %v526_v38 = vpop.f32.mrf.mxu0  ;;  %v686_v40 = vpop.f32.mrf.mxu1  ;;  %v858_v23 = vld [vmem:[%s2169_s3 + $0x348] sm:$0xff]  ;;  %v795_v27 = vld [vmem:[%s2169_s3 + $0x150] sm:$0xff] }
 0x11d   :  { %1171 = vst [vmem:[#allocation2 + $0x110] sm:$0xff] %v1043_v32  ;;  %v917_v42 = vadd.f32 %v789_v29, %v525_v34  ;;  %v981_v43 = vadd.f32 %v853_v31, %v685_v35  ;;  %v527_v44 = vadd.f32 %v526_v38, %v1649_v47  ;;  %v687_v45 = vadd.f32 %v686_v40, %v1649_v47  ;;  %v859_v29 = vld [vmem:[%s2169_s3 + $0x350] sm:$0xff] }
 0x11e   :  { %1235 = vst [vmem:[#allocation2 + $0x310] sm:$0xff] %v1107_v33  ;;  %v1044_v48 = vmax.f32 %v916_v36, 0.0  ;;  %v1108_v49 = vmax.f32 %v980_v37, 0.0  ;;  %v528_v50 = vpop.f32.mrf.mxu0  ;;  %v688_v51 = vpop.f32.mrf.mxu1  ;;  %v796_v37 = vld [vmem:[%s2169_s3 + $0x158] sm:$0xff] }
 0x11f   :  { %v1045_v52 = vmax.f32 %v917_v42, 0.0  ;;  %v1109_v53 = vmax.f32 %v981_v43, 0.0  ;;  %v918_v54 = vadd.f32 %v790_v39, %v527_v44  ;;  %v982_v55 = vadd.f32 %v854_v41, %v687_v45  ;;  %v860_v39 = vld [vmem:[%s2169_s3 + $0x358] sm:$0xff] }
 0x120   :  { %1172 = vst [vmem:[#allocation2 + $0x118] sm:$0xff] %v1044_v48  ;;  %1236 = vst [vmem:[#allocation2 + $0x318] sm:$0xff] %v1108_v49  ;;  %v529_v58 = vadd.f32 %v528_v50, %v1647_v46  ;;  %v689_v59 = vadd.f32 %v688_v51, %v1647_v46  ;;  %v530_v60 = vpop.f32.mrf.mxu0  ;;  %v690_v62 = vpop.f32.mrf.mxu1 }
 0x121   :  { %1173 = vst [vmem:[#allocation2 + $0x120] sm:$0xff] %v1045_v52  ;;  %1237 = vst [vmem:[#allocation2 + $0x320] sm:$0xff] %v1109_v53  ;;  %v1046_v0 = vmax.f32 %v918_v54, 0.0  ;;  %v1110_v1 = vmax.f32 %v982_v55, 0.0  ;;  %v531_v2 = vadd.f32 %v530_v60, %v1649_v47  ;;  %v691_v3 = vadd.f32 %v690_v62, %v1649_v47  ;;  %v797_v54 = vld [vmem:[%s2169_s3 + $0x160] sm:$0xff] }
 0x122   :  { %v919_v4 = vadd.f32 %v791_v56, %v529_v58  ;;  %v983_v5 = vadd.f32 %v855_v57, %v689_v59  ;;  %v534_v6 = vpop.f32.mrf.mxu0  ;;  %v694_v8 = vpop.f32.mrf.mxu1  ;;  %v861_v55 = vld [vmem:[%s2169_s3 + $0x360] sm:$0xff]  ;;  %v798_v59 = vld [vmem:[%s2169_s3 + $0x168] sm:$0xff] }
 0x123   :  { %1174 = vst [vmem:[#allocation2 + $0x128] sm:$0xff] %v1046_v0  ;;  %1238 = vst [vmem:[#allocation2 + $0x328] sm:$0xff] %v1110_v1  ;;  %v920_v10 = vadd.f32 %v792_v61, %v531_v2  ;;  %v984_v11 = vadd.f32 %v856_v63, %v691_v3  ;;  %v535_v12 = vadd.f32 %v534_v6, %v1647_v46  ;;  %v862_v61 = vld [vmem:[%s2169_s3 + $0x368] sm:$0xff] }
 0x124   :  { %v695_v13 = vadd.f32 %v694_v8, %v1647_v46  ;;  %v1047_v14 = vmax.f32 %v919_v4, 0.0  ;;  %v1111_v15 = vmax.f32 %v983_v5, 0.0  ;;  %v536_v16 = vpop.f32.mrf.mxu0  ;;  %v696_v17 = vpop.f32.mrf.mxu1  ;;  %v799_v5 = vld [vmem:[%s2169_s3 + $0x170] sm:$0xff] }
 0x125   :  { %v1048_v18 = vmax.f32 %v920_v10, 0.0  ;;  %v1112_v19 = vmax.f32 %v984_v11, 0.0  ;;  %v921_v20 = vadd.f32 %v793_v7, %v535_v12  ;;  %v537_v24 = vadd.f32 %v536_v16, %v1649_v47  ;;  %v863_v7 = vld [vmem:[%s2169_s3 + $0x370] sm:$0xff] }
 0x126   :  { %v985_v21 = vadd.f32 %v857_v9, %v695_v13  ;;  %1175 = vst [vmem:[#allocation2 + $0x130] sm:$0xff] %v1047_v14  ;;  %1239 = vst [vmem:[#allocation2 + $0x330] sm:$0xff] %v1111_v15  ;;  %v697_v25 = vadd.f32 %v696_v17, %v1649_v47  ;;  %v538_v26 = vpop.f32.mrf.mxu0  ;;  %v698_v28 = vpop.f32.mrf.mxu1 }
 0x127   :  { %1176 = vst [vmem:[#allocation2 + $0x138] sm:$0xff] %v1048_v18  ;;  %1240 = vst [vmem:[#allocation2 + $0x338] sm:$0xff] %v1112_v19  ;;  %v1049_v30 = vmax.f32 %v921_v20, 0.0  ;;  %v539_v32 = vadd.f32 %v538_v26, %v1647_v46  ;;  %v699_v33 = vadd.f32 %v698_v28, %v1647_v46  ;;  %v922_v34 = vadd.f32 %v794_v22, %v537_v24  ;;  %v800_v20 = vld [vmem:[%s2169_s3 + $0x178] sm:$0xff] }
 0x128   :  { %v1113_v31 = vmax.f32 %v985_v21, 0.0  ;;  %v986_v35 = vadd.f32 %v858_v23, %v697_v25  ;;  %v540_v36 = vpop.f32.mrf.mxu0  ;;  %v700_v38 = vpop.f32.mrf.mxu1  ;;  %v864_v21 = vld [vmem:[%s2169_s3 + $0x378] sm:$0xff]  ;;  %v801_v25 = vld [vmem:[%s2169_s3 + $0x180] sm:$0xff] }
 0x129   :  { %1177 = vst [vmem:[#allocation2 + $0x140] sm:$0xff] %v1049_v30  ;;  %v923_v40 = vadd.f32 %v795_v27, %v539_v32  ;;  %v987_v41 = vadd.f32 %v859_v29, %v699_v33  ;;  %v541_v42 = vadd.f32 %v540_v36, %v1649_v47  ;;  %v701_v43 = vadd.f32 %v700_v38, %v1649_v47  ;;  %v865_v27 = vld [vmem:[%s2169_s3 + $0x380] sm:$0xff] }
 0x12a   :  { %1241 = vst [vmem:[#allocation2 + $0x340] sm:$0xff] %v1113_v31  ;;  %v1050_v44 = vmax.f32 %v922_v34, 0.0  ;;  %v1114_v45 = vmax.f32 %v986_v35, 0.0  ;;  %v544_v48 = vpop.f32.mrf.mxu0  ;;  %v704_v49 = vpop.f32.mrf.mxu1  ;;  %v802_v35 = vld [vmem:[%s2169_s3 + $0x188] sm:$0xff] }
 0x12b   :  { %v1051_v50 = vmax.f32 %v923_v40, 0.0  ;;  %v1115_v51 = vmax.f32 %v987_v41, 0.0  ;;  %v924_v52 = vadd.f32 %v796_v37, %v541_v42  ;;  %v988_v53 = vadd.f32 %v860_v39, %v701_v43  ;;  %v866_v37 = vld [vmem:[%s2169_s3 + $0x388] sm:$0xff] }
 0x12c   :  { %1178 = vst [vmem:[#allocation2 + $0x148] sm:$0xff] %v1050_v44  ;;  %1242 = vst [vmem:[#allocation2 + $0x348] sm:$0xff] %v1114_v45  ;;  %v545_v56 = vadd.f32 %v544_v48, %v1647_v46  ;;  %v705_v57 = vadd.f32 %v704_v49, %v1647_v46  ;;  %v546_v58 = vpop.f32.mrf.mxu0  ;;  %v706_v60 = vpop.f32.mrf.mxu1 }
 0x12d   :  { %1179 = vst [vmem:[#allocation2 + $0x150] sm:$0xff] %v1051_v50  ;;  %1243 = vst [vmem:[#allocation2 + $0x350] sm:$0xff] %v1115_v51  ;;  %v1052_v62 = vmax.f32 %v924_v52, 0.0  ;;  %v1116_v63 = vmax.f32 %v988_v53, 0.0  ;;  %v547_v0 = vadd.f32 %v546_v58, %v1649_v47  ;;  %v707_v1 = vadd.f32 %v706_v60, %v1649_v47  ;;  %v803_v52 = vld [vmem:[%s2169_s3 + $0x190] sm:$0xff] }
 0x12e   :  { %v925_v2 = vadd.f32 %v797_v54, %v545_v56  ;;  %v989_v3 = vadd.f32 %v861_v55, %v705_v57  ;;  %v548_v4 = vpop.f32.mrf.mxu0  ;;  %v708_v6 = vpop.f32.mrf.mxu1  ;;  %v867_v53 = vld [vmem:[%s2169_s3 + $0x390] sm:$0xff]  ;;  %v804_v57 = vld [vmem:[%s2169_s3 + $0x198] sm:$0xff] }
 0x12f   :  { %1180 = vst [vmem:[#allocation2 + $0x158] sm:$0xff] %v1052_v62  ;;  %1244 = vst [vmem:[#allocation2 + $0x358] sm:$0xff] %v1116_v63  ;;  %v926_v8 = vadd.f32 %v798_v59, %v547_v0  ;;  %v990_v9 = vadd.f32 %v862_v61, %v707_v1  ;;  %v549_v10 = vadd.f32 %v548_v4, %v1647_v46  ;;  %v868_v59 = vld [vmem:[%s2169_s3 + $0x398] sm:$0xff] }
 0x130   :  { %v709_v11 = vadd.f32 %v708_v6, %v1647_v46  ;;  %v1053_v12 = vmax.f32 %v925_v2, 0.0  ;;  %v1117_v13 = vmax.f32 %v989_v3, 0.0  ;;  %v550_v14 = vpop.f32.mrf.mxu0  ;;  %v710_v15 = vpop.f32.mrf.mxu1  ;;  %v805_v3 = vld [vmem:[%s2169_s3 + $0x1a0] sm:$0xff] }
 0x131   :  { %v1054_v16 = vmax.f32 %v926_v8, 0.0  ;;  %v1118_v17 = vmax.f32 %v990_v9, 0.0  ;;  %v927_v18 = vadd.f32 %v799_v5, %v549_v10  ;;  %v551_v22 = vadd.f32 %v550_v14, %v1649_v47  ;;  %v869_v5 = vld [vmem:[%s2169_s3 + $0x3a0] sm:$0xff] }
 0x132   :  { %v991_v19 = vadd.f32 %v863_v7, %v709_v11  ;;  %1181 = vst [vmem:[#allocation2 + $0x160] sm:$0xff] %v1053_v12  ;;  %1245 = vst [vmem:[#allocation2 + $0x360] sm:$0xff] %v1117_v13  ;;  %v711_v23 = vadd.f32 %v710_v15, %v1649_v47  ;;  %v554_v24 = vpop.f32.mrf.mxu0  ;;  %v714_v26 = vpop.f32.mrf.mxu1 }
 0x133   :  { %1182 = vst [vmem:[#allocation2 + $0x168] sm:$0xff] %v1054_v16  ;;  %1246 = vst [vmem:[#allocation2 + $0x368] sm:$0xff] %v1118_v17  ;;  %v1055_v28 = vmax.f32 %v927_v18, 0.0  ;;  %v555_v30 = vadd.f32 %v554_v24, %v1647_v46  ;;  %v715_v31 = vadd.f32 %v714_v26, %v1647_v46  ;;  %v928_v32 = vadd.f32 %v800_v20, %v551_v22  ;;  %v806_v18 = vld [vmem:[%s2169_s3 + $0x1a8] sm:$0xff] }
 0x134   :  { %v1119_v29 = vmax.f32 %v991_v19, 0.0  ;;  %v992_v33 = vadd.f32 %v864_v21, %v711_v23  ;;  %v556_v34 = vpop.f32.mrf.mxu0  ;;  %v716_v36 = vpop.f32.mrf.mxu1  ;;  %v870_v19 = vld [vmem:[%s2169_s3 + $0x3a8] sm:$0xff]  ;;  %v807_v23 = vld [vmem:[%s2169_s3 + $0x1b0] sm:$0xff] }
 0x135   :  { %1183 = vst [vmem:[#allocation2 + $0x170] sm:$0xff] %v1055_v28  ;;  %v929_v38 = vadd.f32 %v801_v25, %v555_v30  ;;  %v993_v39 = vadd.f32 %v865_v27, %v715_v31  ;;  %v557_v40 = vadd.f32 %v556_v34, %v1649_v47  ;;  %v717_v41 = vadd.f32 %v716_v36, %v1649_v47  ;;  %v871_v25 = vld [vmem:[%s2169_s3 + $0x3b0] sm:$0xff] }
 0x136   :  { %1247 = vst [vmem:[#allocation2 + $0x370] sm:$0xff] %v1119_v29  ;;  %v1056_v42 = vmax.f32 %v928_v32, 0.0  ;;  %v1120_v43 = vmax.f32 %v992_v33, 0.0  ;;  %v558_v44 = vpop.f32.mrf.mxu0  ;;  %v718_v45 = vpop.f32.mrf.mxu1  ;;  %v808_v33 = vld [vmem:[%s2169_s3 + $0x1b8] sm:$0xff] }
 0x137   :  { %v1057_v48 = vmax.f32 %v929_v38, 0.0  ;;  %v1121_v49 = vmax.f32 %v993_v39, 0.0  ;;  %v930_v50 = vadd.f32 %v802_v35, %v557_v40  ;;  %v994_v51 = vadd.f32 %v866_v37, %v717_v41  ;;  %v872_v35 = vld [vmem:[%s2169_s3 + $0x3b8] sm:$0xff] }
 0x138   :  { %1184 = vst [vmem:[#allocation2 + $0x178] sm:$0xff] %v1056_v42  ;;  %1248 = vst [vmem:[#allocation2 + $0x378] sm:$0xff] %v1120_v43  ;;  %v559_v54 = vadd.f32 %v558_v44, %v1647_v46  ;;  %v719_v55 = vadd.f32 %v718_v45, %v1647_v46  ;;  %v560_v56 = vpop.f32.mrf.mxu0  ;;  %v720_v58 = vpop.f32.mrf.mxu1 }
 0x139   :  { %1185 = vst [vmem:[#allocation2 + $0x180] sm:$0xff] %v1057_v48  ;;  %1249 = vst [vmem:[#allocation2 + $0x380] sm:$0xff] %v1121_v49  ;;  %v1058_v60 = vmax.f32 %v930_v50, 0.0  ;;  %v1122_v61 = vmax.f32 %v994_v51, 0.0  ;;  %v561_v62 = vadd.f32 %v560_v56, %v1649_v47  ;;  %v721_v63 = vadd.f32 %v720_v58, %v1649_v47  ;;  %v809_v50 = vld [vmem:[%s2169_s3 + $0x1c0] sm:$0xff] }
 0x13a   :  { %v931_v0 = vadd.f32 %v803_v52, %v559_v54  ;;  %v995_v1 = vadd.f32 %v867_v53, %v719_v55  ;;  %v564_v2 = vpop.f32.mrf.mxu0  ;;  %v724_v4 = vpop.f32.mrf.mxu1  ;;  %v873_v51 = vld [vmem:[%s2169_s3 + $0x3c0] sm:$0xff]  ;;  %v810_v55 = vld [vmem:[%s2169_s3 + $0x1c8] sm:$0xff] }
 0x13b   :  { %1186 = vst [vmem:[#allocation2 + $0x188] sm:$0xff] %v1058_v60  ;;  %1250 = vst [vmem:[#allocation2 + $0x388] sm:$0xff] %v1122_v61  ;;  %v932_v6 = vadd.f32 %v804_v57, %v561_v62  ;;  %v996_v7 = vadd.f32 %v868_v59, %v721_v63  ;;  %v565_v8 = vadd.f32 %v564_v2, %v1647_v46  ;;  %v874_v57 = vld [vmem:[%s2169_s3 + $0x3c8] sm:$0xff] }
 0x13c   :  { %v725_v9 = vadd.f32 %v724_v4, %v1647_v46  ;;  %v1059_v10 = vmax.f32 %v931_v0, 0.0  ;;  %v1123_v11 = vmax.f32 %v995_v1, 0.0  ;;  %v566_v12 = vpop.f32.mrf.mxu0  ;;  %v726_v13 = vpop.f32.mrf.mxu1  ;;  %v811_v1 = vld [vmem:[%s2169_s3 + $0x1d0] sm:$0xff] }
 0x13d   :  { %v1060_v14 = vmax.f32 %v932_v6, 0.0  ;;  %v1124_v15 = vmax.f32 %v996_v7, 0.0  ;;  %v933_v16 = vadd.f32 %v805_v3, %v565_v8  ;;  %v567_v20 = vadd.f32 %v566_v12, %v1649_v47  ;;  %v875_v3 = vld [vmem:[%s2169_s3 + $0x3d0] sm:$0xff] }
 0x13e   :  { %v997_v17 = vadd.f32 %v869_v5, %v725_v9  ;;  %1187 = vst [vmem:[#allocation2 + $0x190] sm:$0xff] %v1059_v10  ;;  %1251 = vst [vmem:[#allocation2 + $0x390] sm:$0xff] %v1123_v11  ;;  %v727_v21 = vadd.f32 %v726_v13, %v1649_v47  ;;  %v568_v22 = vpop.f32.mrf.mxu0  ;;  %v728_v24 = vpop.f32.mrf.mxu1 }
 0x13f   :  { %1188 = vst [vmem:[#allocation2 + $0x198] sm:$0xff] %v1060_v14  ;;  %1252 = vst [vmem:[#allocation2 + $0x398] sm:$0xff] %v1124_v15  ;;  %v1061_v26 = vmax.f32 %v933_v16, 0.0  ;;  %v569_v28 = vadd.f32 %v568_v22, %v1647_v46  ;;  %v729_v29 = vadd.f32 %v728_v24, %v1647_v46  ;;  %v934_v30 = vadd.f32 %v806_v18, %v567_v20  ;;  %v812_v16 = vld [vmem:[%s2169_s3 + $0x1d8] sm:$0xff] }
 0x140   :  { %v1125_v27 = vmax.f32 %v997_v17, 0.0  ;;  %v998_v31 = vadd.f32 %v870_v19, %v727_v21  ;;  %v570_v32 = vpop.f32.mrf.mxu0  ;;  %v730_v34 = vpop.f32.mrf.mxu1  ;;  %v876_v17 = vld [vmem:[%s2169_s3 + $0x3d8] sm:$0xff]  ;;  %v813_v21 = vld [vmem:[%s2169_s3 + $0x1e0] sm:$0xff] }
 0x141   :  { %1189 = vst [vmem:[#allocation2 + $0x1a0] sm:$0xff] %v1061_v26  ;;  %v935_v36 = vadd.f32 %v807_v23, %v569_v28  ;;  %v999_v37 = vadd.f32 %v871_v25, %v729_v29  ;;  %v571_v38 = vadd.f32 %v570_v32, %v1649_v47  ;;  %v731_v39 = vadd.f32 %v730_v34, %v1649_v47  ;;  %v877_v23 = vld [vmem:[%s2169_s3 + $0x3e0] sm:$0xff] }
 0x142   :  { %1253 = vst [vmem:[#allocation2 + $0x3a0] sm:$0xff] %v1125_v27  ;;  %v1062_v40 = vmax.f32 %v934_v30, 0.0  ;;  %v1126_v41 = vmax.f32 %v998_v31, 0.0  ;;  %v574_v42 = vpop.f32.mrf.mxu0  ;;  %v734_v43 = vpop.f32.mrf.mxu1  ;;  %v814_v31 = vld [vmem:[%s2169_s3 + $0x1e8] sm:$0xff] }
 0x143   :  { %v1063_v44 = vmax.f32 %v935_v36, 0.0  ;;  %v1127_v45 = vmax.f32 %v999_v37, 0.0  ;;  %v936_v48 = vadd.f32 %v808_v33, %v571_v38  ;;  %v1000_v49 = vadd.f32 %v872_v35, %v731_v39  ;;  %v878_v33 = vld [vmem:[%s2169_s3 + $0x3e8] sm:$0xff] }
 0x144   :  { %1190 = vst [vmem:[#allocation2 + $0x1a8] sm:$0xff] %v1062_v40  ;;  %1254 = vst [vmem:[#allocation2 + $0x3a8] sm:$0xff] %v1126_v41  ;;  %v575_v52 = vadd.f32 %v574_v42, %v1647_v46  ;;  %v735_v53 = vadd.f32 %v734_v43, %v1647_v46  ;;  %v576_v54 = vpop.f32.mrf.mxu0  ;;  %v736_v56 = vpop.f32.mrf.mxu1 }
 0x145   :  { %1191 = vst [vmem:[#allocation2 + $0x1b0] sm:$0xff] %v1063_v44  ;;  %1255 = vst [vmem:[#allocation2 + $0x3b0] sm:$0xff] %v1127_v45  ;;  %v1064_v58 = vmax.f32 %v936_v48, 0.0  ;;  %v1128_v59 = vmax.f32 %v1000_v49, 0.0  ;;  %v577_v60 = vadd.f32 %v576_v54, %v1649_v47  ;;  %v737_v61 = vadd.f32 %v736_v56, %v1649_v47  ;;  %v815_v48 = vld [vmem:[%s2169_s3 + $0x1f0] sm:$0xff] }
 0x146   :  { %v937_v62 = vadd.f32 %v809_v50, %v575_v52  ;;  %v1001_v63 = vadd.f32 %v873_v51, %v735_v53  ;;  %v578_v0 = vpop.f32.mrf.mxu0  ;;  %v738_v2 = vpop.f32.mrf.mxu1  ;;  %v879_v49 = vld [vmem:[%s2169_s3 + $0x3f0] sm:$0xff]  ;;  %v816_v53 = vld [vmem:[%s2169_s3 + $0x1f8] sm:$0xff] }
 0x147   :  { %1192 = vst [vmem:[#allocation2 + $0x1b8] sm:$0xff] %v1064_v58  ;;  %1256 = vst [vmem:[#allocation2 + $0x3b8] sm:$0xff] %v1128_v59  ;;  %v938_v4 = vadd.f32 %v810_v55, %v577_v60  ;;  %v1002_v5 = vadd.f32 %v874_v57, %v737_v61  ;;  %v579_v6 = vadd.f32 %v578_v0, %v1647_v46  ;;  %v880_v55 = vld [vmem:[%s2169_s3 + $0x3f8] sm:$0xff]  ;;  %s1409_s3 = scalar_lea.vmem %s1271_s12, 16384 }
 0x148   :  { %v739_v7 = vadd.f32 %v738_v2, %v1647_v46  ;;  %v1065_v8 = vmax.f32 %v937_v62, 0.0  ;;  %v1129_v9 = vmax.f32 %v1001_v63, 0.0  ;;  %v580_v10 = vpop.f32.mrf.mxu0  ;;  %v740_v11 = vpop.f32.mrf.mxu1  ;;  %p1410_p0 = scmp.ne.s32.totalorder %s1271_s12, %s1409_s3  ;;  %p1415_p2 = scmp.lt.s32.totalorder %s1409_s3, %s1409_s3 }
 0x149   :  { %v1066_v12 = vmax.f32 %v938_v4, 0.0  ;;  %v1130_v13 = vmax.f32 %v1002_v5, 0.0  ;;  %v939_v14 = vadd.f32 %v811_v1, %v579_v6  ;;  %v581_v18 = vadd.f32 %v580_v10, %v1649_v47 }
 0x14a   :  { %v1003_v15 = vadd.f32 %v875_v3, %v739_v7  ;;  %1193 = vst [vmem:[#allocation2 + $0x1c0] sm:$0xff] %v1065_v8  ;;  %1257 = vst [vmem:[#allocation2 + $0x3c0] sm:$0xff] %v1129_v9  ;;  %v741_v19 = vadd.f32 %v740_v11, %v1649_v47  ;;  %v584_v20 = vpop.f32.mrf.mxu0  ;;  %v744_v22 = vpop.f32.mrf.mxu1  ;;  %p1416_p3 = por %p1415_p2, %p1414_p1 }
 0x14b   :  { %1194 = vst [vmem:[#allocation2 + $0x1c8] sm:$0xff] %v1066_v12  ;;  %1258 = vst [vmem:[#allocation2 + $0x3c8] sm:$0xff] %v1130_v13  ;;  %v1067_v24 = vmax.f32 %v939_v14, 0.0  ;;  %v585_v26 = vadd.f32 %v584_v20, %v1647_v46  ;;  %v745_v27 = vadd.f32 %v744_v22, %v1647_v46  ;;  %v940_v28 = vadd.f32 %v812_v16, %v581_v18 }
 0x14c   :  { %v1131_v25 = vmax.f32 %v1003_v15, 0.0  ;;  %v1004_v29 = vadd.f32 %v876_v17, %v741_v19  ;;  %v586_v30 = vpop.f32.mrf.mxu0  ;;  %v746_v32 = vpop.f32.mrf.mxu1  ;;  %p1417_p4 = pnand %p1416_p3, %p1410_p0 }
 0x14d   :  { %1195 = vst [vmem:[#allocation2 + $0x1d0] sm:$0xff] %v1067_v24  ;;  %v941_v34 = vadd.f32 %v813_v21, %v585_v26  ;;  %v1005_v35 = vadd.f32 %v877_v23, %v745_v27  ;;  %v587_v36 = vadd.f32 %v586_v30, %v1649_v47  ;;  %v747_v37 = vadd.f32 %v746_v32, %v1649_v47 }
 0x14e   :  { %1259 = vst [vmem:[#allocation2 + $0x3d0] sm:$0xff] %v1131_v25  ;;  %v1068_v38 = vmax.f32 %v940_v28, 0.0  ;;  %v1132_v39 = vmax.f32 %v1004_v29, 0.0  ;;  %v588_v40 = vpop.f32.mrf.mxu0  ;;  %v748_v41 = vpop.f32.mrf.mxu1 }
 0x14f   :  { %v1069_v42 = vmax.f32 %v941_v34, 0.0  ;;  %v1133_v43 = vmax.f32 %v1005_v35, 0.0  ;;  %v942_v44 = vadd.f32 %v814_v31, %v587_v36  ;;  %v1006_v45 = vadd.f32 %v878_v33, %v747_v37 }
 0x150   :  { %1196 = vst [vmem:[#allocation2 + $0x1d8] sm:$0xff] %v1068_v38  ;;  %1260 = vst [vmem:[#allocation2 + $0x3d8] sm:$0xff] %v1132_v39  ;;  %v589_v50 = vadd.f32 %v588_v40, %v1647_v46  ;;  %v749_v51 = vadd.f32 %v748_v41, %v1647_v46  ;;  %v590_v52 = vpop.f32.mrf.mxu0  ;;  %v750_v54 = vpop.f32.mrf.mxu1 }
 0x151   :  { %1197 = vst [vmem:[#allocation2 + $0x1e0] sm:$0xff] %v1069_v42  ;;  %1261 = vst [vmem:[#allocation2 + $0x3e0] sm:$0xff] %v1133_v43  ;;  %v1070_v56 = vmax.f32 %v942_v44, 0.0  ;;  %v1134_v57 = vmax.f32 %v1006_v45, 0.0  ;;  %v591_v58 = vadd.f32 %v590_v52, %v1649_v47  ;;  %v751_v59 = vadd.f32 %v750_v54, %v1649_v47 }
 0x152   :  { %v943_v60 = vadd.f32 %v815_v48, %v589_v50  ;;  %v1007_v46 = vadd.f32 %v879_v49, %v749_v51 }
 0x153   :  { %1198 = vst [vmem:[#allocation2 + $0x1e8] sm:$0xff] %v1070_v56  ;;  %1262 = vst [vmem:[#allocation2 + $0x3e8] sm:$0xff] %v1134_v57  ;;  %v944_v61 = vadd.f32 %v816_v53, %v591_v58  ;;  %v1008_v62 = vadd.f32 %v880_v55, %v751_v59 }
 0x154   :  { %v1071_v63 = vmax.f32 %v943_v60, 0.0  ;;  %v1135_v0 = vmax.f32 %v1007_v46, 0.0 }
 0x155   :  { %v1072_v1 = vmax.f32 %v944_v61, 0.0  ;;  %v1136_v2 = vmax.f32 %v1008_v62, 0.0 }
 0x156   :  { %1199 = vst [vmem:[#allocation2 + $0x1f0] sm:$0xff] %v1071_v63  ;;  %1263 = vst [vmem:[#allocation2 + $0x3f0] sm:$0xff] %v1135_v0 }
 0x157   :  { %1200 = vst [vmem:[#allocation2 + $0x1f8] sm:$0xff] %v1072_v1  ;;  %1264 = vst [vmem:[#allocation2 + $0x3f8] sm:$0xff] %v1136_v2 }
 0x158   :  { %1420 = shalt.err (!%p1417_p4)
}
 0x159   :  { %s1433_s13 = smov 256   ;;  %s1434_s14 = smov 16  }
 0x15a   :  { %1276 = dma.vmem_to_hbm [thread:$0]  %s1271_s12, 16384, %s2170_s4, [#allocation3], %s1433_s13, %s1433_s13, %s1434_s14  }
 0x15b   :  { %1429 = dma.done.wait [#allocation3], 16384  }
 0x15c   :  { %1430 = vsyncadd [#allocation3], 4294950912 }
 0x15d   :  { %1280 = vsyncpa [#allocation3], 1 }

// kernel: bottleneck_dynamic_forward.6
= control target key start
LH: loop header
LB: loop body
LE: loop exit
PB: predicated region body
PF: predicated region fallthrough
CT: control target
= control target key end

     0   :  { %13 = vsyncpa [#allocation4], 0  ;;  %s5972_s27 = smov 0   ;;  %s9547_s0 = inlined_call_operand.vmem [shape: f32[2,4], index: 0, kind: input, shape index: {}]   ;;  %s9548_s1 = inlined_call_operand.vmem [shape: bf16[2,256,64], index: 1, kind: input, shape index: {}]   ;;  %s9549_s2 = inlined_call_operand.vmem [shape: f32[9,64,64], index: 2, kind: input, shape index: {}]   ;;  %s9550_s3 = inlined_call_operand.vmem [shape: f32[64,64], index: 3, kind: input, shape index: {}]   ;;  %s9551_s4 = inlined_call_operand.vmem [shape: f32[3,64,64], index: 4, kind: input, shape index: {}]   ;;  %s9552_s5 = inlined_call_operand.vmem [shape: f32[3,64,64], index: 5, kind: input, shape index: {}]   ;;  %s9553_s6 = inlined_call_operand.vmem [shape: f32[9,1,64], index: 6, kind: input, shape index: {}]   ;;  %s9554_s7 = inlined_call_operand.vmem [shape: f32[1,64], index: 7, kind: input, shape index: {}]   ;;  %s9555_s8 = inlined_call_operand.vmem [shape: bf16[2,256,64], index: 8, kind: output, shape index: {}]  }
   0x1 LB: > { %s5978_s28 = sadd.s32 4294967295, %s5923_s27   ;;  %p4871_p0 = scmp.ge.s32.totalorder %s5923_s27, 1  ;;  %s5923_s27 = sphi %s5972_s27, %s19_s27  }
   0x2   : > { %p223_p1 = scmp.lt.s32.totalorder %s5923_s27, 3  ;;  %s236_s9 = sshll.u32 %s9547_s0, 4  ;;  %s237_s9 = int_to_ptr.vmem [resolvable:$true] %s236_s9 }
   0x3   : > { %p5826_p3 = scmp.eq.s32.totalorder %s5978_s28, 0  ;;  %s5898_s11 = scalar_lea.vmem %s237_s9, 32 }
   0x4   : > { %p5985_p2 = pnand %p4871_p0, %p223_p1  ;;  %p5899_p6 = scmp.ne.s32.totalorder %s237_s9, %s5898_s11 }
   0x5   : > { %p5906_p10 = scmp.lt.s32.totalorder %s237_s9, %s237_s9  ;;  %p5907_p11 = scmp.lt.s32.totalorder %s5898_s11, %s5898_s11 }
   0x6   : > { %p5822_p4 = pneg %p5985_p2 }
   0x7   : > { %p5908_p12 = por %p5907_p11, %p5906_p10 }
   0x8   : > { %p5823_p5 = pnand %p5826_p3, %p5822_p4 }
   0xa   : > { %p5900_p7 = pneg %p5823_p5 }
   0xc   : > { %p5901_p8 = pnand %p5900_p7, %p5899_p6 }
   0xe   : > { %p5902_p9 = pneg %p5901_p8 }
  0x10   : > { %p5909_p13 = pnand %p5908_p12, %p5902_p9 }
  0x12   : > { %5912 = shalt.err (!%p5909_p13)
}
  0x13   : > { %s5925_s12 = smov [#allocation3]   ;;  %275 = sbr.rel (%p5985_p2) target bundleno = 608 (0x260), region = 52 }
  0x14   : > { %5825 = dma.vmem_to_smem (!%p5823_p5), %s237_s9, 32, %s5925_s12, [#allocation4]  }
  0x18   : > { %5918 = dma.done.wait (%p5826_p3), [#allocation4], 32  }
  0x19   : > { %5920 = vsyncadd (%p5826_p3), [#allocation4], 4294967264 }
  0x1a   : > { %281 = sfence }
  0x1b   : > { %v914_v0 = vld [vmem:[%s9549_s2 + $0x30] sm:$0xff]  ;;  %v915_v1 = vld [vmem:[%s9549_s2 + $0x38] sm:$0xff]  ;;  %v6009_v2 = vld [vmem:[%s9549_s2 + $0x20] sm:$0xff]  ;;  %vm321_vm0 = vcmask 519168   ;;  %v5926_v5 = vmov 0   ;;  %p310_p0 = scmp.lt.s32.totalorder %s5978_s28, 1 }
  0x1c   : > { %v6011_v3 = vpack.c.bf16 %v915_v1, %v914_v0  ;;  %v6016_v4 = vld [vmem:[%s9549_s2 + $0x28] sm:$0xff]  ;;  %322 = vst.msk [vmem:[#allocation2] sm:$0xf] %vm321_vm0, %v5926_v5  ;;  %323 = vst.msk [vmem:[#allocation2 + $0x4] sm:$0xf] %vm321_vm0, %v5926_v5  ;;  %v910_v7 = vld [vmem:[%s9549_s2 + $0x10] sm:$0xff] }
  0x1d   : > { %324 = vst.msk [vmem:[#allocation2 + $0x8] sm:$0xf] %vm321_vm0, %v5926_v5  ;;  %325 = vst.msk [vmem:[#allocation2 + $0xc] sm:$0xf] %vm321_vm0, %v5926_v5  ;;  %v918_v6 = vpack.c.bf16 %v6016_v4, %v6009_v2  ;;  %v911_v8 = vld [vmem:[%s9549_s2 + $0x18] sm:$0xff]  ;;  %s6172_s25 = sshll.u32 %s5978_s28, 7 }
  0x1e   : > { %326 = vst.msk [vmem:[#allocation2 + $0x10] sm:$0xf] %vm321_vm0, %v5926_v5  ;;  %327 = vst.msk [vmem:[#allocation2 + $0x14] sm:$0xf] %vm321_vm0, %v5926_v5  ;;  %5450 = vmatprep.subr.bf16.mxu0 %v6011_v3  ;;  %5810 = vmatprep.subr.bf16.mxu1 %v6011_v3  ;;  %s10235_s28 = smov (!%p310_p0, %s5978_s28), 1  ;;  %s465_s26 = sadd.s32 3, %s6172_s25  ;;  %v917_v9 = vpack.c.bf16 %v911_v8, %v910_v7 }
  0x1f   : > { %328 = vst.msk [vmem:[#allocation2 + $0x18] sm:$0xf] %vm321_vm0, %v5926_v5  ;;  %329 = vst.msk [vmem:[#allocation2 + $0x1c] sm:$0xf] %vm321_vm0, %v5926_v5  ;;  %5451 = vmatpush3.bf16.msra.mxu0 %v6011_v3  ;;  %5814 = vmatpush3.bf16.msra.mxu1 %v6011_v3  ;;  %v908_v10 = vld [vmem:[%s9549_s2] sm:$0xff]  ;;  %v909_v11 = vld [vmem:[%s9549_s2 + $0x8] sm:$0xff] }
  0x20   : > { %330 = vst.msk [vmem:[#allocation2 + $0x20] sm:$0xf] %vm321_vm0, %v5926_v5  ;;  %331 = vst.msk [vmem:[#allocation2 + $0x24] sm:$0xf] %vm321_vm0, %v5926_v5  ;;  %5452 = vmatprep.subr.bf16.mxu0 %v918_v6  ;;  %5811 = vmatprep.subr.bf16.mxu1 %v918_v6  ;;  %s5236_s11 = sshll.u32 %s10235_s28, 7  ;;  %s6189_s12 = sld [smem:[#allocation3 + %s465_s26]]  ;;  %v916_v15 = vpack.c.bf16 %v909_v11, %v908_v10 }
  0x21   : > { %332 = vst.msk [vmem:[#allocation2 + $0x28] sm:$0xf] %vm321_vm0, %v5926_v5  ;;  %333 = vst.msk [vmem:[#allocation2 + $0x2c] sm:$0xf] %vm321_vm0, %v5926_v5  ;;  %vm521_vm1 = vsmask.f32 256  ;;  %s6196_s15 = scalar_lea.vmem %s9548_s1, %s5236_s11 }
  0x22   : > { %334 = vst.msk [vmem:[#allocation2 + $0x30] sm:$0xf] %vm321_vm0, %v5926_v5  ;;  %335 = vst.msk [vmem:[#allocation2 + $0x34] sm:$0xf] %vm321_vm0, %v5926_v5  ;;  %vm522_vm2 = vsmask.f32 4368 }
  0x23   : > { %336 = vst.msk [vmem:[#allocation2 + $0x38] sm:$0xf] %vm321_vm0, %v5926_v5  ;;  %337 = vst.msk [vmem:[#allocation2 + $0x3c] sm:$0xf] %vm321_vm0, %v5926_v5  ;;  %v394_v12 = vld [vmem:[%s6196_s15] sm:$0xf]  ;;  %5453 = vmatpush3.bf16.msra.mxu0 %v918_v6  ;;  %5815 = vmatpush3.bf16.msra.mxu1 %v918_v6 }
  0x24   : > { %338 = vst.msk [vmem:[#allocation2 + $0x40] sm:$0xf] %vm321_vm0, %v5926_v5  ;;  %339 = vst.msk [vmem:[#allocation2 + $0x44] sm:$0xf] %vm321_vm0, %v5926_v5  ;;  %v395_v13 = vld [vmem:[%s6196_s15 + $0x4] sm:$0xf]  ;;  %5454 = vmatprep.subr.bf16.mxu0 %v917_v9  ;;  %5812 = vmatprep.subr.bf16.mxu1 %v917_v9 }
  0x25   : > { %340 = vst.msk [vmem:[#allocation2 + $0x48] sm:$0xf] %vm321_vm0, %v5926_v5  ;;  %341 = vst.msk [vmem:[#allocation2 + $0x4c] sm:$0xf] %vm321_vm0, %v5926_v5  ;;  %v408_v14 = vld [vmem:[%s6196_s15 + $0x38] sm:$0xf] }
  0x26   : > { %342 = vst.msk [vmem:[#allocation2 + $0x50] sm:$0xf] %vm321_vm0, %v5926_v5  ;;  %343 = vst.msk [vmem:[#allocation2 + $0x54] sm:$0xf] %vm321_vm0, %v5926_v5  ;;  %v467_v16 = vld [vmem:[#allocation2] sm:$0x8]  ;;  %v6229_v39 = vstv %s6189_s12 }
  0x27   : > { %344 = vst.msk [vmem:[#allocation2 + $0x58] sm:$0xf] %vm321_vm0, %v5926_v5  ;;  %345 = vst.msk [vmem:[#allocation2 + $0x5c] sm:$0xf] %vm321_vm0, %v5926_v5  ;;  %v468_v17 = vld [vmem:[#allocation2 + $0x4] sm:$0xf]  ;;  %5455 = vmatpush3.bf16.msra.mxu0 %v917_v9  ;;  %5816 = vmatpush3.bf16.msra.mxu1 %v917_v9 }
  0x28   : > { %346 = vst.msk [vmem:[#allocation2 + $0x60] sm:$0xf] %vm321_vm0, %v5926_v5  ;;  %347 = vst.msk [vmem:[#allocation2 + $0x64] sm:$0xf] %vm321_vm0, %v5926_v5  ;;  %v469_v18 = vld [vmem:[#allocation2 + $0x8] sm:$0xf]  ;;  %5456 = vmatprep.subr.bf16.mxu0 %v916_v15  ;;  %5813 = vmatprep.subr.bf16.mxu1 %v916_v15 }
  0x29   : > { %348 = vst.msk [vmem:[#allocation2 + $0x68] sm:$0xf] %vm321_vm0, %v5926_v5  ;;  %349 = vst.msk [vmem:[#allocation2 + $0x6c] sm:$0xf] %vm321_vm0, %v5926_v5  ;;  %v4963_v19 = vld [vmem:[%s9549_s2 + $0x1b0] sm:$0xff]  ;;  %v4964_v20 = vld [vmem:[%s9549_s2 + $0x1b8] sm:$0xff] }
  0x2a   : > { %350 = vst.msk [vmem:[#allocation2 + $0x70] sm:$0xf] %vm321_vm0, %v5926_v5  ;;  %351 = vst.msk [vmem:[#allocation2 + $0x74] sm:$0xf] %vm321_vm0, %v5926_v5  ;;  %v525_v21 = vshrl.u32 %v467_v16, 16  ;;  %v530_v22 = vshrl.u32 %v468_v17, 16  ;;  %v6239_v46 = vpack.c.bf16 %v4964_v20, %v4963_v19 }
  0x2b   : > { %352 = vst.msk [vmem:[#allocation2 + $0x78] sm:$0xf] %vm321_vm0, %v5926_v5  ;;  %353 = vst.msk [vmem:[#allocation2 + $0x7c] sm:$0xf] %vm321_vm0, %v5926_v5  ;;  %v533_v23 = vshll.u32 %v468_v17, 16  ;;  %v539_v24 = vshrl.u32 %v469_v18, 16  ;;  %5457 = vmatpush3.bf16.msra.mxu0 %v916_v15  ;;  %5817 = vmatpush3.bf16.msra.mxu1 %v916_v15 }
  0x2c   : > { %354 = vst.msk [vmem:[#allocation2 + $0x80] sm:$0xf] %vm321_vm0, %v5926_v5  ;;  %355 = vst.msk [vmem:[#allocation2 + $0x84] sm:$0xf] %vm321_vm0, %v5926_v5  ;;  %v470_v25 = vld [vmem:[#allocation2 + $0x10] sm:$0x8]  ;;  %5530 = vmatprep.subr.bf16.mxu0 %v6239_v46 }
  0x2d   : > { %356 = vst.msk [vmem:[#allocation2 + $0x88] sm:$0xf] %vm321_vm0, %v5926_v5  ;;  %357 = vst.msk [vmem:[#allocation2 + $0x8c] sm:$0xf] %vm321_vm0, %v5926_v5  ;;  %v1290_v26 = vld [vmem:[%s9552_s5 + $0x30] sm:$0xff]  ;;  %v1291_v27 = vld [vmem:[%s9552_s5 + $0x38] sm:$0xff] }
  0x2e   : > { %358 = vst.msk [vmem:[#allocation2 + $0x90] sm:$0xf] %vm321_vm0, %v5926_v5  ;;  %359 = vst.msk [vmem:[#allocation2 + $0x94] sm:$0xf] %vm321_vm0, %v5926_v5  ;;  %v542_v28 = vshll.u32 %v469_v18, 16  ;;  %v547_v29 = vshrl.u32 %v470_v25, 16  ;;  %v1299_v52 = vmul.f32 %v6229_v39, %v1290_v26  ;;  %v1300_v53 = vmul.f32 %v6229_v39, %v1291_v27 }
  0x2f   : > { %360 = vst.msk [vmem:[#allocation2 + $0x98] sm:$0xf] %vm321_vm0, %v5926_v5  ;;  %361 = vst.msk [vmem:[#allocation2 + $0x9c] sm:$0xf] %vm321_vm0, %v5926_v5  ;;  %v409_v30 = vld [vmem:[%s6196_s15 + $0x3c] sm:$0xf] }
  0x30   : > { %362 = vst.msk [vmem:[#allocation2 + $0xa0] sm:$0xf] %vm321_vm0, %v5926_v5  ;;  %363 = vst.msk [vmem:[#allocation2 + $0xa4] sm:$0xf] %vm321_vm0, %v5926_v5  ;;  %v4881_v33 = vrot.slane %v525_v21, 11  ;;  %v532_v34 = vrot.slane %v530_v22, 7 }
  0x31   : > { %364 = vst.msk [vmem:[#allocation2 + $0xa8] sm:$0xf] %vm321_vm0, %v5926_v5  ;;  %365 = vst.msk [vmem:[#allocation2 + $0xac] sm:$0xf] %vm321_vm0, %v5926_v5  ;;  %v541_v35 = vrot.slane %v539_v24, 7  ;;  %v4961_v37 = vld [vmem:[%s9549_s2 + $0x1a0] sm:$0xff] }
  0x32   : > { %366 = vst.msk [vmem:[#allocation2 + $0xb0] sm:$0xf] %vm321_vm0, %v5926_v5  ;;  %367 = vst.msk [vmem:[#allocation2 + $0xb4] sm:$0xf] %vm321_vm0, %v5926_v5  ;;  %v410_v36 = vld [vmem:[%s6196_s15 + $0x40] sm:$0xf]  ;;  %v535_v43 = vor.u32 %v533_v23, %v532_v34 }
  0x33   : > { %368 = vst.msk [vmem:[#allocation2 + $0xb8] sm:$0xf] %vm321_vm0, %v5926_v5  ;;  %369 = vst.msk [vmem:[#allocation2 + $0xbc] sm:$0xf] %vm321_vm0, %v5926_v5  ;;  %v491_v31 = vld [vmem:[#allocation2 + $0x80] sm:$0x8]  ;;  %v544_v45 = vor.u32 %v542_v28, %v541_v35 }
  0x34   : > { %370 = vst.msk [vmem:[#allocation2 + $0xc0] sm:$0xf] %vm321_vm0, %v5926_v5  ;;  %371 = vst.msk [vmem:[#allocation2 + $0xc4] sm:$0xf] %vm321_vm0, %v5926_v5  ;;  %v701_v38 = vshrl.u32 %v491_v31, 16  ;;  %v4962_v42 = vld [vmem:[%s9549_s2 + $0x1a8] sm:$0xff] }
  0x35   : > { %372 = vst.msk [vmem:[#allocation2 + $0xc8] sm:$0xf] %vm321_vm0, %v5926_v5  ;;  %373 = vst.msk [vmem:[#allocation2 + $0xcc] sm:$0xf] %vm321_vm0, %v5926_v5  ;;  %v411_v40 = vld [vmem:[%s6196_s15 + $0x44] sm:$0xf]  ;;  %v6263_v60 = vpack.c.bf16 %v4962_v42, %v4961_v37 }
  0x36   : > { %374 = vst.msk [vmem:[#allocation2 + $0xd0] sm:$0xf] %vm321_vm0, %v5926_v5  ;;  %375 = vst.msk [vmem:[#allocation2 + $0xd4] sm:$0xf] %vm321_vm0, %v5926_v5  ;;  %v6233_v41 = vld [vmem:[#allocation2 + $0x90] sm:$0x8] }
  0x37   : > { %376 = vst.msk [vmem:[#allocation2 + $0xd8] sm:$0xf] %vm321_vm0, %v5926_v5  ;;  %377 = vst.msk [vmem:[#allocation2 + $0xdc] sm:$0xf] %vm321_vm0, %v5926_v5  ;;  %v537_v44 = vrot.slane %v532_v34, 4  ;;  %vm1041_vm4 = vcmask 523264  }
  0x38   : > { %378 = vst.msk [vmem:[#allocation2 + $0xe0] sm:$0xf] %vm321_vm0, %v5926_v5  ;;  %379 = vst.msk [vmem:[#allocation2 + $0xe4] sm:$0xf] %vm321_vm0, %v5926_v5  ;;  %v396_v47 = vld [vmem:[%s6196_s15 + $0x8] sm:$0xf] }
  0x39   : > { %380 = vst.msk [vmem:[#allocation2 + $0xe8] sm:$0xf] %vm321_vm0, %v5926_v5  ;;  %381 = vst.msk [vmem:[#allocation2 + $0xec] sm:$0xf] %vm321_vm0, %v5926_v5  ;;  %v397_v48 = vld [vmem:[%s6196_s15 + $0xc] sm:$0xf] }
  0x3a   : > { %382 = vst.msk [vmem:[#allocation2 + $0xf0] sm:$0xf] %vm321_vm0, %v5926_v5  ;;  %383 = vst.msk [vmem:[#allocation2 + $0xf4] sm:$0xf] %vm321_vm0, %v5926_v5  ;;  %v4882_v49 = vrot.slane %v547_v29, 11  ;;  %v4936_v50 = vld [vmem:[%s9549_s2 + $0xf0] sm:$0xff] }
  0x3b   : > { %384 = vst.msk [vmem:[#allocation2 + $0xf8] sm:$0xf] %vm321_vm0, %v5926_v5  ;;  %385 = vst.msk [vmem:[#allocation2 + $0xfc] sm:$0xf] %vm321_vm0, %v5926_v5  ;;  %v4937_v51 = vld [vmem:[%s9549_s2 + $0xf8] sm:$0xff]  ;;  %v4889_v63 = vrot.slane %v701_v38, 11  ;;  %v1307_v11 = vadd.f32 %v4936_v50, %v1299_v52 }
  0x3c   : > { %386 = vst.msk [vmem:[#allocation2 + $0x100] sm:$0xf] %vm321_vm0, %v5926_v5  ;;  %387 = vst.msk [vmem:[#allocation2 + $0x104] sm:$0xf] %vm321_vm0, %v5926_v5  ;;  %v398_v54 = vld [vmem:[%s6196_s15 + $0x10] sm:$0xf] }
  0x3d   : > { %388 = vst.msk [vmem:[#allocation2 + $0x108] sm:$0xf] %vm321_vm0, %v5926_v5  ;;  %389 = vst.msk [vmem:[#allocation2 + $0x10c] sm:$0xf] %vm321_vm0, %v5926_v5  ;;  %v723_v0 = vshrl.u32 %v6233_v41, 16  ;;  %v1288_v2 = vld [vmem:[%s9552_s5 + $0x20] sm:$0xff] }
  0x3e   : > { %390 = vst.msk [vmem:[#allocation2 + $0x110] sm:$0xf] %vm321_vm0, %v5926_v5  ;;  %391 = vst.msk [vmem:[#allocation2 + $0x114] sm:$0xf] %vm321_vm0, %v5926_v5  ;;  %v399_v1 = vld [vmem:[%s6196_s15 + $0x14] sm:$0xf]  ;;  %v6282_v23 = vmul.f32 %v6229_v39, %v1288_v2 }
  0x3f   : > { %392 = vst.msk [vmem:[#allocation2 + $0x118] sm:$0xf] %vm321_vm0, %v5926_v5  ;;  %393 = vst.msk [vmem:[#allocation2 + $0x11c] sm:$0xf] %vm321_vm0, %v5926_v5  ;;  %v412_v7 = vld [vmem:[%s6196_s15 + $0x48] sm:$0xf] }
  0x40   : > { %427 = vst.msk [vmem:[#allocation2 + $0x14] sm:$0xf] %vm321_vm0, %v394_v12  ;;  %428 = vst.msk [vmem:[#allocation2 + $0x18] sm:$0xf] %vm321_vm0, %v395_v13  ;;  %v1308_v12 = vadd.f32 %v4937_v51, %v1300_v53  ;;  %v413_v13 = vld [vmem:[%s6196_s15 + $0x4c] sm:$0xf] }
  0x41   : > { %441 = vst.msk [vmem:[#allocation2 + $0x84] sm:$0xf] %vm321_vm0, %v408_v14  ;;  %vm6219_vm3 = vmor %vm521_vm1, %vm522_vm2  ;;  %v473_v28 = vld [vmem:[#allocation2 + $0x20] sm:$0x8]  ;;  %v1289_v41 = vld [vmem:[%s9552_s5 + $0x28] sm:$0xff]  ;;  %s463_s18 = sadd.s32 2, %s6172_s25 }
  0x42   : > { %442 = vst.msk [vmem:[#allocation2 + $0x88] sm:$0xf] %vm321_vm0, %v409_v30  ;;  %443 = vst.msk [vmem:[#allocation2 + $0x94] sm:$0xf] %vm321_vm0, %v410_v36  ;;  %v6256_v55 = vsel %vm6219_vm3, %v4881_v33, %v535_v43  ;;  %v6260_v56 = vsel %vm6219_vm3, %v537_v44, %v544_v45  ;;  %v6279_v21 = vpack.c.bf16 %v1308_v12, %v1307_v11  ;;  %v414_v42 = vld [vmem:[%s6196_s15 + $0x50] sm:$0xf] }
  0x43   : > { %444 = vst.msk [vmem:[#allocation2 + $0x98] sm:$0xf] %vm321_vm0, %v411_v40  ;;  %429 = vst.msk [vmem:[#allocation2 + $0x24] sm:$0xf] %vm321_vm0, %v396_v47  ;;  %v4897_v61 = vcombine.low %v6256_v55, %v6260_v56  ;;  %v476_v40 = vld [vmem:[#allocation2 + $0x30] sm:$0x8] }
  0x44   : > { %430 = vst.msk [vmem:[#allocation2 + $0x28] sm:$0xf] %vm321_vm0, %v397_v48  ;;  %431 = vst.msk [vmem:[#allocation2 + $0x34] sm:$0xf] %vm321_vm0, %v398_v54  ;;  %5490 = vmatprep.subr.bf16.mxu1 %v6279_v21  ;;  %v415_v43 = vld [vmem:[%s6196_s15 + $0x54] sm:$0xf] }
  0x45   : > { %432 = vst.msk [vmem:[#allocation2 + $0x38] sm:$0xf] %vm321_vm0, %v399_v1  ;;  %5458 = vmatprep.mubr.msk.bf16.mxu0 %vm1041_vm4, %v4897_v61  ;;  %445 = vst.msk [vmem:[#allocation2 + $0xa4] sm:$0xf] %vm321_vm0, %v412_v7  ;;  %v4890_v45 = vrot.slane %v723_v0, 11  ;;  %v569_v51 = vshrl.u32 %v473_v28, 16 }
  0x46   : > { %446 = vst.msk [vmem:[#allocation2 + $0xa8] sm:$0xf] %vm321_vm0, %v413_v13  ;;  %447 = vst.msk [vmem:[#allocation2 + $0xb4] sm:$0xf] %vm321_vm0, %v414_v42  ;;  %v4935_v42 = vld [vmem:[%s9549_s2 + $0xe8] sm:$0xff]  ;;  %s6548_s21 = sld [smem:[#allocation3 + %s463_s18]] }
  0x47   : > { %v471_v57 = vld [vmem:[#allocation2 + $0x14] sm:$0xf]  ;;  %v472_v58 = vld [vmem:[#allocation2 + $0x18] sm:$0xf]  ;;  %448 = vst.msk [vmem:[#allocation2 + $0xb8] sm:$0xf] %vm321_vm0, %v415_v43 }
  0x48   : > { %v492_v59 = vld [vmem:[#allocation2 + $0x84] sm:$0xf]  ;;  %v552_v62 = vshrl.u32 %v471_v57, 16  ;;  %v555_v3 = vshll.u32 %v471_v57, 16  ;;  %v561_v4 = vshrl.u32 %v472_v58, 16  ;;  %v564_v5 = vshll.u32 %v472_v58, 16 }
  0x49   : > { %v706_v6 = vshrl.u32 %v492_v59, 16  ;;  %v493_v9 = vld [vmem:[#allocation2 + $0x88] sm:$0xf]  ;;  %v709_v10 = vshll.u32 %v492_v59, 16  ;;  %v495_v18 = vld [vmem:[#allocation2 + $0x94] sm:$0xf] }
  0x4a   : > { %v554_v8 = vrot.slane %v552_v62, 7  ;;  %v563_v14 = vrot.slane %v561_v4, 7  ;;  %v715_v16 = vshrl.u32 %v493_v9, 16  ;;  %v718_v17 = vshll.u32 %v493_v9, 16  ;;  %v496_v22 = vld [vmem:[#allocation2 + $0x98] sm:$0xf] }
  0x4b   : > { %v708_v15 = vrot.slane %v706_v6, 7  ;;  %v728_v30 = vshrl.u32 %v495_v18, 16  ;;  %v731_v31 = vshll.u32 %v495_v18, 16  ;;  %v737_v33 = vshrl.u32 %v496_v22, 16  ;;  %v474_v34 = vld [vmem:[#allocation2 + $0x24] sm:$0xf] }
  0x4c   : > { %v557_v19 = vor.u32 %v555_v3, %v554_v8  ;;  %v559_v20 = vrot.slane %v554_v8, 4  ;;  %v566_v24 = vor.u32 %v564_v5, %v563_v14  ;;  %v717_v27 = vrot.slane %v715_v16, 7  ;;  %v477_v54 = vld [vmem:[#allocation2 + $0x34] sm:$0xf]  ;;  %v478_v61 = vld [vmem:[#allocation2 + $0x38] sm:$0xf] }
  0x4d   : > { %v711_v25 = vor.u32 %v709_v10, %v708_v15  ;;  %v713_v26 = vrot.slane %v708_v15, 4  ;;  %v740_v38 = vshll.u32 %v496_v22, 16  ;;  %v730_v47 = vrot.slane %v728_v30, 7  ;;  %v497_v4 = vld [vmem:[#allocation2 + $0xa0] sm:$0x8]  ;;  %s461_s22 = sadd.s32 1, %s6172_s25 }
  0x4e   : > { %v6286_v29 = vsel %vm6219_vm3, %v4882_v49, %v557_v19  ;;  %v6291_v35 = vsel %vm6219_vm3, %v559_v20, %v566_v24  ;;  %v720_v37 = vor.u32 %v718_v17, %v717_v27  ;;  %v739_v48 = vrot.slane %v737_v33, 7  ;;  %v475_v49 = vld [vmem:[#allocation2 + $0x28] sm:$0xf]  ;;  %v401_v5 = vld [vmem:[%s6196_s15 + $0x1c] sm:$0xf]  ;;  %s6588_s10 = sld [smem:[#allocation3 + %s461_s22]] }
  0x4f   : > { %9721 = vst [vmem:[#allocation6_spill] sm:$0xff] %v6286_v29  ;;  %9722 = vst [vmem:[#allocation7_spill] sm:$0xff] %v6291_v35  ;;  %v6295_v36 = vsel %vm6219_vm3, %v4889_v63, %v711_v25  ;;  %v6304_v44 = vcombine.low %v6286_v29, %v6291_v35  ;;  %v574_v52 = vshrl.u32 %v474_v34, 16  ;;  %v577_v53 = vshll.u32 %v474_v34, 16  ;;  %v400_v63 = vld [vmem:[%s6196_s15 + $0x18] sm:$0xf] }
  0x50   : > { %v6310_v50 = vsel %vm6219_vm3, %v713_v26, %v720_v37  ;;  %v733_v58 = vor.u32 %v731_v31, %v730_v47  ;;  %v735_v59 = vrot.slane %v730_v47, 4  ;;  %v6319_v62 = vmul.f32 %v6229_v39, %v1289_v41  ;;  %433 = vst.msk [vmem:[#allocation2 + $0x44] sm:$0xf] %vm321_vm0, %v400_v63  ;;  %434 = vst.msk [vmem:[#allocation2 + $0x48] sm:$0xf] %vm321_vm0, %v401_v5  ;;  %v4934_v34 = vld [vmem:[%s9549_s2 + $0xe0] sm:$0xff] }
  0x51   : > { %5459 = vmatmul.mubr.msk.bf16.vlgmr.msra.gmra.mxu0 %vm1041_vm4, %v6304_v44  ;;  %v6316_v57 = vcombine.low %v6295_v36, %v6310_v50  ;;  %v742_v0 = vor.u32 %v740_v38, %v739_v48  ;;  %v4883_v1 = vrot.slane %v569_v51, 11  ;;  %v576_v2 = vrot.slane %v574_v52, 7  ;;  %v402_v14 = vld [vmem:[%s6196_s15 + $0x20] sm:$0xf]  ;;  %v403_v15 = vld [vmem:[%s6196_s15 + $0x24] sm:$0xf] }
  0x52   : > { %5531 = vmatpush3.bf16.msra.mxu0 %v6239_v46  ;;  %v583_v3 = vshrl.u32 %v475_v49, 16  ;;  %v6329_v6 = vsel %vm6219_vm3, %v4890_v45, %v733_v58  ;;  %v586_v7 = vshll.u32 %v475_v49, 16  ;;  %v591_v8 = vshrl.u32 %v476_v40, 16  ;;  %v498_v46 = vld [vmem:[#allocation2 + $0xa4] sm:$0xf]  ;;  %v1908_v29 = vld [vmem:[%s9551_s4 + $0x8] sm:$0xff] }
  0x53   : > { %5474 = vmatprep.mubr.msk.bf16.mxu1 %vm1041_vm4, %v6316_v57  ;;  %9723 = vst [vmem:[#allocation8_spill] sm:$0xff] %v6329_v6  ;;  %v596_v9 = vshrl.u32 %v477_v54, 16  ;;  %5532 = vmatprep.subr.bf16.mxu0 %v6263_v60  ;;  %v6335_v10 = vsel %vm6219_vm3, %v735_v59, %v742_v0  ;;  %v579_v11 = vor.u32 %v577_v53, %v576_v2  ;;  %v581_v12 = vrot.slane %v576_v2, 4  ;;  %v499_v20 = vld [vmem:[#allocation2 + $0xa8] sm:$0xf]  ;;  %v5078_v32 = vld [vmem:[%s9551_s4 + $0xa0] sm:$0xff] }
  0x54   : > { %9724 = vst [vmem:[#allocation9_spill] sm:$0xff] %v6335_v10  ;;  %v585_v13 = vrot.slane %v583_v3, 7  ;;  %v6341_v16 = vcombine.low %v6329_v6, %v6335_v10  ;;  %v4884_v17 = vrot.slane %v591_v8, 11  ;;  %v599_v19 = vshll.u32 %v477_v54, 16  ;;  %435 = vst.msk [vmem:[#allocation2 + $0x54] sm:$0xf] %vm321_vm0, %v402_v14 }
  0x55   : > { %v598_v18 = vrot.slane %v596_v9, 7  ;;  %436 = vst.msk [vmem:[#allocation2 + $0x58] sm:$0xf] %vm321_vm0, %v403_v15  ;;  %v6347_v22 = vsel %vm6219_vm3, %v4883_v1, %v579_v11  ;;  %v605_v25 = vshrl.u32 %v478_v61, 16  ;;  %v608_v26 = vshll.u32 %v478_v61, 16  ;;  %v4983_v6 = vld [vmem:[%s9549_s2 + $0x40] sm:$0xff] }
  0x56   : > { %9725 = vst [vmem:[#allocation10_spill] sm:$0xff] %v6347_v22  ;;  %v588_v24 = vor.u32 %v586_v7, %v585_v13  ;;  %v500_v27 = vld [vmem:[#allocation2 + $0xb0] sm:$0x8]  ;;  %5533 = vmatpush3.bf16.msra.mxu0 %v6263_v60  ;;  %5475 = vmatmul.mubr.msk.bf16.vlgmr.msra.gmra.mxu1 %vm1041_vm4, %v6341_v16  ;;  %v745_v31 = vshrl.u32 %v497_v4, 16  ;;  %v750_v33 = vshrl.u32 %v498_v46, 16  ;;  %v753_v60 = vshll.u32 %v498_v46, 16 }
  0x57   : > { %v601_v28 = vor.u32 %v599_v19, %v598_v18  ;;  %v603_v30 = vrot.slane %v598_v18, 4  ;;  %v416_v37 = vld [vmem:[%s6196_s15 + $0x58] sm:$0xf]  ;;  %5491 = vmatpush3.bf16.msra.mxu1 %v6279_v21  ;;  %v607_v40 = vrot.slane %v605_v25, 7  ;;  %v759_v41 = vshrl.u32 %v499_v20, 16  ;;  %s6967_s30 = sld [smem:[#allocation3 + %s6172_s25]]  ;;  %s9234_s25 = scalar_lea.vmem %s9555_s8, %s5236_s11 }
  0x58   : > { %v6359_v38 = vsel %vm6219_vm3, %v581_v12, %v588_v24  ;;  %v417_v43 = vld [vmem:[%s6196_s15 + $0x5c] sm:$0xf]  ;;  %449 = vst.msk [vmem:[#allocation2 + $0xc4] sm:$0xf] %vm321_vm0, %v416_v37  ;;  %v4891_v47 = vrot.slane %v745_v31, 11  ;;  %v752_v48 = vrot.slane %v750_v33, 7  ;;  %v1305_v54 = vadd.f32 %v4934_v34, %v6282_v23 }
  0x59   : > { %9726 = vst [vmem:[#allocation11_spill] sm:$0xff] %v6359_v38  ;;  %v6368_v45 = vcombine.low %v6347_v22, %v6359_v38  ;;  %v6372_v21 = vsel %vm6219_vm3, %v4884_v17, %v601_v28  ;;  %v501_v49 = vld [vmem:[#allocation2 + $0xb4] sm:$0xf]  ;;  %450 = vst.msk [vmem:[#allocation2 + $0xc8] sm:$0xf] %vm321_vm0, %v417_v43  ;;  %v610_v51 = vor.u32 %v608_v26, %v607_v40  ;;  %v761_v52 = vrot.slane %v759_v41, 7 }
  0x5a   : > { %9727 = vst [vmem:[#allocation12_spill] sm:$0xff] %v6372_v21  ;;  %v762_v53 = vshll.u32 %v499_v20, 16  ;;  %v479_v58 = vld [vmem:[#allocation2 + $0x40] sm:$0x8]  ;;  %v755_v61 = vor.u32 %v753_v60, %v752_v48  ;;  %v757_v63 = vrot.slane %v752_v48, 4  ;;  %v1306_v0 = vadd.f32 %v4935_v42, %v6319_v62 }
  0x5b   : > { %v418_v59 = vld [vmem:[%s6196_s15 + $0x60] sm:$0xf]  ;;  %5462 = vmatprep.mubr.msk.bf16.mxu0 %vm1041_vm4, %v6368_v45  ;;  %v502_v1 = vld [vmem:[#allocation2 + $0xb8] sm:$0xf]  ;;  %v767_v2 = vshrl.u32 %v500_v27, 16  ;;  %v6384_v4 = vsel %vm6219_vm3, %v603_v30, %v610_v51  ;;  %v772_v5 = vshrl.u32 %v501_v49, 16 }
  0x5c   : > { %v419_v3 = vld [vmem:[%s6196_s15 + $0x64] sm:$0xf]  ;;  %451 = vst.msk [vmem:[#allocation2 + $0xd4] sm:$0xf] %vm321_vm0, %v418_v59  ;;  %9728 = vst [vmem:[#allocation13_spill] sm:$0xff] %v6384_v4  ;;  %v764_v23 = vor.u32 %v762_v53, %v761_v52  ;;  %v775_v7 = vshll.u32 %v501_v49, 16  ;;  %v6393_v62 = vcombine.low %v6372_v21, %v6384_v4  ;;  %v6397_v46 = vsel %vm6219_vm3, %v4891_v47, %v755_v61 }
  0x5d   : > { %v6386_v8 = vld [vmem:[#allocation2 + $0x44] sm:$0xf]  ;;  %v6388_v9 = vld [vmem:[#allocation2 + $0x48] sm:$0xf]  ;;  %452 = vst.msk [vmem:[#allocation2 + $0xd8] sm:$0xf] %vm321_vm0, %v419_v3  ;;  %v1311_v11 = vpack.c.bf16 %v1306_v0, %v1305_v54 }
  0x5e   : > { %9729 = vst [vmem:[#allocation14_spill] sm:$0xff] %v6397_v46  ;;  %v4892_v12 = vrot.slane %v767_v2, 11  ;;  %v404_v13 = vld [vmem:[%s6196_s15 + $0x28] sm:$0xf]  ;;  %v405_v14 = vld [vmem:[%s6196_s15 + $0x2c] sm:$0xf]  ;;  %v6403_v15 = vsel %vm6219_vm3, %v757_v63, %v764_v23  ;;  %5463 = vmatmul.mubr.msk.bf16.gmra.mxu0 %vm1041_vm4, %v6393_v62 }
  0x5f   : > { %9730 = vst [vmem:[#allocation15_spill] sm:$0xff] %v6403_v15  ;;  %v774_v17 = vrot.slane %v772_v5, 7  ;;  %v781_v18 = vshrl.u32 %v502_v1, 16  ;;  %v784_v19 = vshll.u32 %v502_v1, 16  ;;  %v482_v20 = vld [vmem:[#allocation2 + $0x50] sm:$0x8]  ;;  %v6411_v24 = vcombine.low %v6397_v46, %v6403_v15  ;;  %5492 = vmatprep.subr.bf16.mxu1 %v1311_v11 }
  0x60   : > { %437 = vst.msk [vmem:[#allocation2 + $0x64] sm:$0xf] %vm321_vm0, %v404_v13  ;;  %438 = vst.msk [vmem:[#allocation2 + $0x68] sm:$0xf] %vm321_vm0, %v405_v14  ;;  %v613_v25 = vshrl.u32 %v479_v58, 16  ;;  %v618_v26 = vshrl.u32 %v6386_v8, 16  ;;  %5493 = vmatpush3.bf16.msra.mxu1 %v1311_v11 }
  0x61   : > { %v621_v27 = vshll.u32 %v6386_v8, 16  ;;  %v6415_v28 = vld [vmem:[#allocation2 + $0x54] sm:$0xf]  ;;  %v777_v30 = vor.u32 %v775_v7, %v774_v17  ;;  %v779_v31 = vrot.slane %v774_v17, 4  ;;  %v783_v33 = vrot.slane %v781_v18, 7  ;;  %5478 = vmatprep.mubr.msk.bf16.mxu1 %vm1041_vm4, %v6411_v24  ;;  %v1287_v5 = vld [vmem:[%s9552_s5 + $0x18] sm:$0xff] }
  0x62   : > { %v627_v34 = vshrl.u32 %v6388_v9, 16  ;;  %v6418_v37 = vld [vmem:[#allocation2 + $0x58] sm:$0xf]  ;;  %v4885_v40 = vrot.slane %v613_v25, 11  ;;  %v620_v60 = vrot.slane %v618_v26, 7  ;;  %v630_v41 = vshll.u32 %v6388_v9, 16 }
  0x63   : > { %v635_v42 = vshrl.u32 %v482_v20, 16  ;;  %v406_v43 = vld [vmem:[%s6196_s15 + $0x30] sm:$0xf]  ;;  %v6426_v47 = vsel %vm6219_vm3, %v4892_v12, %v777_v30  ;;  %v786_v48 = vor.u32 %v784_v19, %v783_v33  ;;  %v640_v51 = vshrl.u32 %v6415_v28, 16  ;;  %v503_v52 = vld [vmem:[#allocation2 + $0xc0] sm:$0x8] }
  0x64   : > { %9731 = vst [vmem:[#allocation16_spill] sm:$0xff] %v6426_v47  ;;  %v629_v49 = vrot.slane %v627_v34, 7  ;;  %v407_v53 = vld [vmem:[%s6196_s15 + $0x34] sm:$0xf]  ;;  %439 = vst.msk [vmem:[#allocation2 + $0x74] sm:$0xf] %vm321_vm0, %v406_v43  ;;  %v623_v54 = vor.u32 %v621_v27, %v620_v60 }
  0x65   : > { %v625_v58 = vrot.slane %v620_v60, 4  ;;  %v4886_v59 = vrot.slane %v635_v42, 11  ;;  %v643_v61 = vshll.u32 %v6415_v28, 16  ;;  %440 = vst.msk [vmem:[#allocation2 + $0x78] sm:$0xf] %vm321_vm0, %v407_v53  ;;  %v6435_v63 = vsel %vm6219_vm3, %v779_v31, %v786_v48  ;;  %v1286_v23 = vld [vmem:[%s9552_s5 + $0x10] sm:$0xff] }
  0x66   : > { %9732 = vst [vmem:[#allocation17_spill] sm:$0xff] %v6435_v63  ;;  %v632_v0 = vor.u32 %v630_v41, %v629_v49  ;;  %v642_v1 = vrot.slane %v640_v51, 7  ;;  %v649_v2 = vshrl.u32 %v6418_v37, 16  ;;  %v504_v3 = vld [vmem:[#allocation2 + $0xc4] sm:$0xf]  ;;  %v6447_v11 = vcombine.low %v6426_v47, %v6435_v63  ;;  %v4932_v49 = vld [vmem:[%s9549_s2 + $0xd0] sm:$0xff] }
  0x67   : > { %v420_v7 = vld [vmem:[%s6196_s15 + $0x68] sm:$0xf]  ;;  %v6451_v12 = vsel %vm6219_vm3, %v4885_v40, %v623_v54  ;;  %v652_v13 = vshll.u32 %v6418_v37, 16  ;;  %v789_v17 = vshrl.u32 %v503_v52, 16  ;;  %v506_v18 = vld [vmem:[#allocation2 + $0xd0] sm:$0x8]  ;;  %v1295_v54 = vmul.f32 %v6229_v39, %v1286_v23 }
  0x68   : > { %9733 = vst [vmem:[#allocation18_spill] sm:$0xff] %v6451_v12  ;;  %v505_v14 = vld [vmem:[#allocation2 + $0xc8] sm:$0xf]  ;;  %453 = vst.msk [vmem:[#allocation2 + $0xe4] sm:$0xf] %vm321_vm0, %v420_v7  ;;  %v6457_v19 = vsel %vm6219_vm3, %v625_v58, %v632_v0  ;;  %v645_v20 = vor.u32 %v643_v61, %v642_v1  ;;  %v647_v25 = vrot.slane %v642_v1, 4  ;;  %5479 = vmatmul.mubr.msk.bf16.gmra.mxu1 %vm1041_vm4, %v6447_v11 }
  0x69   : > { %9734 = vst [vmem:[#allocation19_spill] sm:$0xff] %v6457_v19  ;;  %v651_v26 = vrot.slane %v649_v2, 7  ;;  %v507_v27 = vld [vmem:[#allocation2 + $0xd4] sm:$0xf]  ;;  %v421_v30 = vld [vmem:[%s6196_s15 + $0x6c] sm:$0xf]  ;;  %v6464_v31 = vcombine.low %v6451_v12, %v6457_v19  ;;  %v1296_v58 = vmul.f32 %v6229_v39, %v1287_v5 }
  0x6a   : > { %v4893_v33 = vrot.slane %v789_v17, 11  ;;  %v794_v34 = vshrl.u32 %v504_v3, 16  ;;  %v797_v40 = vshll.u32 %v504_v3, 16  ;;  %454 = vst.msk [vmem:[#allocation2 + $0xe8] sm:$0xf] %vm321_vm0, %v421_v30  ;;  %v6470_v41 = vsel %vm6219_vm3, %v4886_v59, %v645_v20  ;;  %v4933_v53 = vld [vmem:[%s9549_s2 + $0xd8] sm:$0xff] }
  0x6b   : > { %v422_v60 = vld [vmem:[%s6196_s15 + $0x70] sm:$0xf]  ;;  %9735 = vst [vmem:[#allocation20_spill] sm:$0xff] %v6470_v41  ;;  %v654_v42 = vor.u32 %v652_v13, %v651_v26  ;;  %v803_v43 = vshrl.u32 %v505_v14, 16  ;;  %v806_v48 = vshll.u32 %v505_v14, 16  ;;  %5466 = vmatprep.mubr.msk.bf16.mxu0 %vm1041_vm4, %v6464_v31  ;;  %v811_v59 = vshrl.u32 %v506_v18, 16 }
  0x6c   : > { %v423_v51 = vld [vmem:[%s6196_s15 + $0x74] sm:$0xf]  ;;  %455 = vst.msk [vmem:[#allocation2 + $0xf4] sm:$0xf] %vm321_vm0, %v422_v60  ;;  %v796_v52 = vrot.slane %v794_v34, 7  ;;  %v816_v3 = vshrl.u32 %v507_v27, 16  ;;  %v1303_v17 = vadd.f32 %v4932_v49, %v1295_v54  ;;  %v1304_v20 = vadd.f32 %v4933_v53, %v1296_v58 }
  0x6d   : > { %v4959_v61 = vld [vmem:[%s9549_s2 + $0x190] sm:$0xff]  ;;  %456 = vst.msk [vmem:[#allocation2 + $0xf8] sm:$0xf] %vm321_vm0, %v423_v51  ;;  %v6490_v0 = vsel %vm6219_vm3, %v647_v25, %v654_v42  ;;  %v805_v1 = vrot.slane %v803_v43, 7  ;;  %v508_v2 = vld [vmem:[#allocation2 + $0xd8] sm:$0xf] }
  0x6e   : > { %9736 = vst [vmem:[#allocation21_spill] sm:$0xff] %v6490_v0  ;;  %v819_v7 = vshll.u32 %v507_v27, 16  ;;  %v4960_v23 = vld [vmem:[%s9549_s2 + $0x198] sm:$0xff]  ;;  %v6497_v5 = vcombine.low %v6470_v41, %v6490_v0  ;;  %v799_v13 = vor.u32 %v797_v40, %v796_v52  ;;  %v801_v14 = vrot.slane %v796_v52, 4  ;;  %v485_v30 = vld [vmem:[#allocation2 + $0x60] sm:$0x8] }
  0x6f   : > { %v808_v18 = vor.u32 %v806_v48, %v805_v1  ;;  %v4894_v26 = vrot.slane %v811_v59, 11  ;;  %v818_v25 = vrot.slane %v816_v3, 7  ;;  %v6499_v34 = vld [vmem:[#allocation2 + $0x64] sm:$0xf]  ;;  %v825_v60 = vshrl.u32 %v508_v2, 16  ;;  %v2427_v63 = vld [vmem:[%s9550_s3 + $0x30] sm:$0xff] }
  0x70   : > { %5467 = vmatmul.mubr.msk.bf16.gmra.mxu0 %vm1041_vm4, %v6497_v5  ;;  %v6505_v27 = vsel %vm6219_vm3, %v4893_v33, %v799_v13  ;;  %v828_v42 = vshll.u32 %v508_v2, 16  ;;  %v1621_v43 = vpack.c.bf16 %v4960_v23, %v4959_v61  ;;  %v6507_v40 = vld [vmem:[#allocation2 + $0x68] sm:$0xf]  ;;  %v1310_v49 = vpack.c.bf16 %v1304_v20, %v1303_v17  ;;  %v488_v53 = vld [vmem:[#allocation2 + $0x70] sm:$0x8] }
  0x71   : > { %9737 = vst [vmem:[#allocation22_spill] sm:$0xff] %v6505_v27  ;;  %v6511_v48 = vsel %vm6219_vm3, %v801_v14, %v808_v18  ;;  %v821_v51 = vor.u32 %v819_v7, %v818_v25  ;;  %v823_v52 = vrot.slane %v818_v25, 4  ;;  %v6513_v54 = vld [vmem:[#allocation2 + $0x74] sm:$0xf]  ;;  %v827_v33 = vrot.slane %v825_v60, 7 }
  0x72   : > { %9738 = vst [vmem:[#allocation23_spill] sm:$0xff] %v6511_v48  ;;  %v6517_v58 = vcombine.low %v6505_v27, %v6511_v48  ;;  %5534 = vmatprep.subr.bf16.mxu0 %v1621_v43  ;;  %v657_v59 = vshrl.u32 %v485_v30, 16  ;;  %v662_v61 = vshrl.u32 %v6499_v34, 16  ;;  %v6520_v1 = vld [vmem:[#allocation2 + $0x78] sm:$0xf]  ;;  %5494 = vmatprep.subr.bf16.mxu1 %v1310_v49  ;;  %v665_v3 = vshll.u32 %v6499_v34, 16 }
  0x73   : > { %v6524_v2 = vsel %vm6219_vm3, %v4894_v26, %v821_v51  ;;  %5535 = vmatpush3.bf16.msra.mxu0 %v1621_v43  ;;  %v671_v7 = vshrl.u32 %v6507_v40, 16  ;;  %v674_v23 = vshll.u32 %v6507_v40, 16  ;;  %v830_v13 = vor.u32 %v828_v42, %v827_v33  ;;  %5495 = vmatpush3.bf16.msra.mxu1 %v1310_v49  ;;  %v509_v20 = vld [vmem:[#allocation2 + $0xe0] sm:$0x8]  ;;  %v6535_v43 = vld [vmem:[#allocation2 + $0xe4] sm:$0xf] }
  0x74   : > { %9739 = vst [vmem:[#allocation24_spill] sm:$0xff] %v6524_v2  ;;  %5482 = vmatprep.mubr.msk.bf16.mxu1 %vm1041_vm4, %v6517_v58  ;;  %v4887_v14 = vrot.slane %v657_v59, 11  ;;  %v664_v17 = vrot.slane %v662_v61, 7  ;;  %v679_v18 = vshrl.u32 %v488_v53, 16  ;;  %v684_v26 = vshrl.u32 %v6513_v54, 16  ;;  %v1284_v48 = vld [vmem:[%s9552_s5] sm:$0xff] }
  0x75   : > { %v673_v25 = vrot.slane %v671_v7, 7  ;;  %v687_v30 = vshll.u32 %v6513_v54, 16  ;;  %v693_v60 = vshrl.u32 %v6520_v1, 16  ;;  %v6539_v51 = vsel %vm6219_vm3, %v823_v52, %v830_v13  ;;  %v6555_v13 = vld [vmem:[#allocation2 + $0xe8] sm:$0xf] }
  0x76   : > { %9740 = vst [vmem:[#allocation25_spill] sm:$0xff] %v6539_v51  ;;  %v667_v42 = vor.u32 %v665_v3, %v664_v17  ;;  %v669_v49 = vrot.slane %v664_v17, 4  ;;  %v4888_v33 = vrot.slane %v679_v18, 11  ;;  %v6543_v53 = vcombine.low %v6524_v2, %v6539_v51 }
  0x77   : > { %v676_v59 = vor.u32 %v674_v23, %v673_v25  ;;  %v686_v61 = vrot.slane %v684_v26, 7  ;;  %v695_v7 = vrot.slane %v693_v60, 7  ;;  %v696_v3 = vshll.u32 %v6520_v1, 16  ;;  %v1285_v60 = vld [vmem:[%s9552_s5 + $0x8] sm:$0xff] }
  0x78   : > { %v6552_v52 = vsel %vm6219_vm3, %v4887_v14, %v667_v42  ;;  %v833_v17 = vshrl.u32 %v509_v20, 16  ;;  %v838_v18 = vshrl.u32 %v6535_v43, 16  ;;  %5483 = vmatmul.mubr.msk.bf16.gmra.mxu1 %vm1041_vm4, %v6543_v53  ;;  %v841_v14 = vshll.u32 %v6535_v43, 16 }
  0x79   : > { %9741 = vst [vmem:[#allocation26_spill] sm:$0xff] %v6552_v52  ;;  %v6563_v23 = vsel %vm6219_vm3, %v669_v49, %v676_v59  ;;  %v689_v25 = vor.u32 %v687_v30, %v686_v61  ;;  %v691_v26 = vrot.slane %v686_v61, 4  ;;  %v698_v42 = vor.u32 %v696_v3, %v695_v7  ;;  %v4930_v49 = vld [vmem:[%s9549_s2 + $0xc0] sm:$0xff]  ;;  %v512_v59 = vld [vmem:[#allocation2 + $0xf0] sm:$0x8] }
  0x7a   : > { %9742 = vst [vmem:[#allocation27_spill] sm:$0xff] %v6563_v23  ;;  %v6571_v20 = vcombine.low %v6552_v52, %v6563_v23  ;;  %v4895_v51 = vrot.slane %v833_v17, 11  ;;  %v840_v27 = vrot.slane %v838_v18, 7  ;;  %v847_v61 = vshrl.u32 %v6555_v13, 16  ;;  %v4931_v23 = vld [vmem:[%s9549_s2 + $0xc8] sm:$0xff] }
  0x7b   : > { %v6578_v30 = vsel %vm6219_vm3, %v4888_v33, %v689_v25  ;;  %v850_v2 = vshll.u32 %v6555_v13, 16  ;;  %v1293_v7 = vmul.f32 %v6229_v39, %v1284_v48  ;;  %v6586_v3 = vld [vmem:[#allocation2 + $0xf4] sm:$0xf]  ;;  %v6594_v33 = vsel %vm6219_vm3, %v691_v26, %v698_v42  ;;  %v6597_v52 = vld [vmem:[#allocation2 + $0xf8] sm:$0xf]  ;;  %v4957_v26 = vld [vmem:[%s9549_s2 + $0x180] sm:$0xff] }
  0x7c   : > { %9743 = vst [vmem:[#allocation28_spill] sm:$0xff] %v6578_v30  ;;  %5470 = vmatprep.mubr.msk.bf16.mxu0 %vm1041_vm4, %v6571_v20  ;;  %9744 = vst [vmem:[#allocation29_spill] sm:$0xff] %v6594_v33  ;;  %v843_v17 = vor.u32 %v841_v14, %v840_v27  ;;  %v845_v18 = vrot.slane %v840_v27, 4  ;;  %v1294_v25 = vmul.f32 %v6229_v39, %v1285_v60  ;;  %v849_v19 = vrot.slane %v847_v61, 7  ;;  %v4958_v27 = vld [vmem:[%s9549_s2 + $0x188] sm:$0xff] }
  0x7d   : > { %v6601_v48 = vcombine.low %v6578_v30, %v6594_v33  ;;  %v1301_v0 = vadd.f32 %v4930_v49, %v1293_v7  ;;  %v855_v12 = vshrl.u32 %v512_v59, 16  ;;  %v860_v42 = vshrl.u32 %v6586_v3, 16  ;;  %v1913_v49 = vld [vmem:[%s9551_s4 + $0x30] sm:$0xff]  ;;  %v1914_v59 = vld [vmem:[%s9551_s4 + $0x38] sm:$0xff] }
  0x7e   : > { %v6611_v14 = vsel %vm6219_vm3, %v4895_v51, %v843_v17  ;;  %v1302_v60 = vadd.f32 %v4931_v23, %v1294_v25  ;;  %v863_v61 = vshll.u32 %v6586_v3, 16  ;;  %v424_v7 = vld [vmem:[%s6196_s15 + $0x78] sm:$0xf]  ;;  %v852_v51 = vor.u32 %v850_v2, %v849_v19  ;;  %v5038_v33 = vld [vmem:[%s9551_s4 + $0x70] sm:$0xff]  ;;  %v425_v30 = vld [vmem:[%s6196_s15 + $0x7c] sm:$0xf] }
  0x7f   : > { %9745 = vst [vmem:[#allocation30_spill] sm:$0xff] %v6611_v14  ;;  %5471 = vmatmul.mubr.msk.bf16.gmra.mxu0 %vm1041_vm4, %v6601_v48  ;;  %v4896_v17 = vrot.slane %v855_v12, 11  ;;  %v869_v23 = vshrl.u32 %v6597_v52, 16  ;;  %v872_v25 = vshll.u32 %v6597_v52, 16  ;;  %457 = vst.msk [vmem:[#allocation2 + $0x104] sm:$0xf] %vm321_vm0, %v424_v7  ;;  %v1620_v38 = vpack.c.bf16 %v4958_v27, %v4957_v26 }
  0x80   : > { %v1309_v41 = vpack.c.bf16 %v1302_v60, %v1301_v0  ;;  %v862_v15 = vrot.slane %v860_v42, 7  ;;  %5538 = vmatprep.mubr.msk.bf16.mxu0 %vm1041_vm4, %v6368_v45  ;;  %v4989_v12 = vld [vmem:[%s9549_s2 + $0x70] sm:$0xff]  ;;  %v4990_v19 = vld [vmem:[%s9549_s2 + $0x78] sm:$0xff]  ;;  %v6640_v2 = vstv %s6548_s21  ;;  %458 = vst.msk [vmem:[#allocation2 + $0x108] sm:$0xf] %vm321_vm0, %v425_v30  ;;  %v6645_v0 = vsel %vm6219_vm3, %v845_v18, %v852_v51 }
  0x81   : > { %9746 = vst [vmem:[#allocation31_spill] sm:$0xff] %v6645_v0  ;;  %v871_v26 = vrot.slane %v869_v23, 7  ;;  %v1922_v27 = vmul.f32 %v6640_v2, %v1913_v49  ;;  %v1923_v60 = vmul.f32 %v6640_v2, %v1914_v59  ;;  %v5030_v42 = vld [vmem:[%s9549_s2 + $0x130] sm:$0xff]  ;;  %v5039_v7 = vld [vmem:[%s9551_s4 + $0x78] sm:$0xff]  ;;  %v6660_v18 = vcombine.low %v6611_v14, %v6645_v0  ;;  %5536 = vmatprep.subr.bf16.mxu0 %v1620_v38 }
  0x82   : > { %v5046_v30 = vld [vmem:[%s9552_s5 + $0x70] sm:$0xff]  ;;  %5496 = vmatprep.subr.bf16.mxu1 %v1309_v41  ;;  %v865_v49 = vor.u32 %v863_v61, %v862_v15  ;;  %v867_v59 = vrot.slane %v862_v15, 4  ;;  %v2386_v51 = vmul.f32 %v5038_v33, %v6640_v2  ;;  %v5047_v23 = vld [vmem:[%s9552_s5 + $0x78] sm:$0xff]  ;;  %5537 = vmatpush3.bf16.msra.mxu0 %v1620_v38  ;;  %v6676_v61 = vstv %s6588_s10 }
  0x83   : > { %v874_v4 = vor.u32 %v872_v25, %v871_v26  ;;  %5497 = vmatpush3.bf16.msra.mxu1 %v1309_v41  ;;  %v1930_v46 = vadd.f32 %v4989_v12, %v1922_v27  ;;  %v1931_v0 = vadd.f32 %v4990_v19, %v1923_v60  ;;  %v5031_v15 = vld [vmem:[%s9549_s2 + $0x138] sm:$0xff]  ;;  %5486 = vmatprep.mubr.msk.bf16.mxu1 %vm1041_vm4, %v6660_v18  ;;  %v1911_v19 = vld [vmem:[%s9551_s4 + $0x20] sm:$0xff]  ;;  %v1912_v26 = vld [vmem:[%s9551_s4 + $0x28] sm:$0xff]  ;;  %vm3094_vm5 = vsmask.f32 3328 }
  0x84   : > { %v2428_v33 = vld [vmem:[%s9550_s3 + $0x38] sm:$0xff]  ;;  %v6682_v25 = vsel %vm6219_vm3, %v4896_v17, %v865_v49  ;;  %v2387_v38 = vmul.f32 %v5039_v7, %v6640_v2  ;;  %v2394_v41 = vadd.f32 %v5030_v42, %v2386_v51  ;;  %v2411_v12 = vmul.f32 %v5046_v30, %v6229_v39  ;;  %v5036_v27 = vld [vmem:[%s9551_s4 + $0x60] sm:$0xff]  ;;  %v5037_v49 = vld [vmem:[%s9551_s4 + $0x68] sm:$0xff] }
  0x85   : > { %9747 = vst [vmem:[#allocation32_spill] sm:$0xff] %v6682_v25  ;;  %v6697_v17 = vsel %vm6219_vm3, %v867_v59, %v874_v4  ;;  %v6699_v60 = vpack.c.bf16 %v1931_v0, %v1930_v46  ;;  %v2412_v42 = vmul.f32 %v5047_v23, %v6229_v39  ;;  %v2436_v7 = vmul.f32 %v6676_v61, %v2427_v63  ;;  %v4987_v30 = vld [vmem:[%s9549_s2 + $0x60] sm:$0xff]  ;;  %v4988_v63 = vld [vmem:[%s9549_s2 + $0x68] sm:$0xff] }
  0x86   : > { %9748 = vst [vmem:[#allocation33_spill] sm:$0xff] %v6697_v17  ;;  %v6711_v51 = vcombine.low %v6682_v25, %v6697_v17  ;;  %v2395_v4 = vadd.f32 %v5031_v15, %v2387_v38  ;;  %v2419_v59 = vadd.f32 %v2411_v12, %v2394_v41  ;;  %v2437_v46 = vmul.f32 %v6676_v61, %v2428_v33  ;;  %v5028_v0 = vld [vmem:[%s9549_s2 + $0x120] sm:$0xff]  ;;  %v5029_v38 = vld [vmem:[%s9549_s2 + $0x128] sm:$0xff]  ;;  %v1909_v25 = vld [vmem:[%s9551_s4 + $0x10] sm:$0xff] }
  0x87   : > { %v5044_v23 = vld [vmem:[%s9552_s5 + $0x60] sm:$0xff]  ;;  %5539 = vmatmul.mubr.msk.bf16.vlgmr.msra.gmra.mxu0 %vm1041_vm4, %v6393_v62  ;;  %5570 = vmatprep.subr.bf16.mxu1 %v6699_v60  ;;  %v1920_v15 = vmul.f32 %v6640_v2, %v1911_v19  ;;  %v1921_v33 = vmul.f32 %v6640_v2, %v1912_v26  ;;  %v2384_v41 = vmul.f32 %v5036_v27, %v6640_v2  ;;  %v5045_v12 = vld [vmem:[%s9552_s5 + $0x68] sm:$0xff]  ;;  %vm3095_vm6 = vsmask.f32 7440 }
  0x88   : > { %v2425_v17 = vld [vmem:[%s9550_s3 + $0x20] sm:$0xff]  ;;  %5487 = vmatmul.mubr.msk.bf16.gmra.mxu1 %vm1041_vm4, %v6711_v51  ;;  %v2420_v19 = vadd.f32 %v2412_v42, %v2395_v4  ;;  %v2444_v14 = vadd.f32 %v2436_v7, %v2419_v59  ;;  %5542 = vmatprep.mubr.msk.bf16.mxu0 %vm1041_vm4, %v6464_v31  ;;  %v2385_v26 = vmul.f32 %v5037_v49, %v6640_v2  ;;  %v2426_v27 = vld [vmem:[%s9550_s3 + $0x28] sm:$0xff]  ;;  %v4985_v49 = vld [vmem:[%s9549_s2 + $0x50] sm:$0xff] }
  0x89   : > { %5498 = vmatprep.mubr.msk.bf16.mxu1 %vm1041_vm4, %v6304_v44  ;;  %v1928_v22 = vadd.f32 %v4987_v30, %v1920_v15  ;;  %v1929_v47 = vadd.f32 %v4988_v63, %v1921_v33  ;;  %v2392_v42 = vadd.f32 %v5028_v0, %v2384_v41  ;;  %v2409_v7 = vmul.f32 %v5044_v23, %v6229_v39  ;;  %v1910_v4 = vld [vmem:[%s9551_s4 + $0x18] sm:$0xff]  ;;  %v5034_v59 = vld [vmem:[%s9551_s4 + $0x50] sm:$0xff]  ;;  %vm7142_vm7 = vmor %vm3094_vm5, %vm3095_vm6 }
  0x8a   : > { %v2445_v21 = vadd.f32 %v2437_v46, %v2420_v19  ;;  %v2393_v10 = vadd.f32 %v5029_v38, %v2385_v26  ;;  %v2410_v44 = vmul.f32 %v5045_v12, %v6229_v39  ;;  %v2434_v30 = vmul.f32 %v6676_v61, %v2425_v17  ;;  %v4986_v63 = vld [vmem:[%s9549_s2 + $0x58] sm:$0xff]  ;;  %v5042_v23 = vld [vmem:[%s9552_s5 + $0x50] sm:$0xff] }
  0x8b   : > { %v5035_v0 = vld [vmem:[%s9551_s4 + $0x58] sm:$0xff]  ;;  %v6772_v15 = vpack.c.bf16 %v1929_v47, %v1928_v22  ;;  %v2417_v46 = vadd.f32 %v2409_v7, %v2392_v42  ;;  %v2435_v33 = vmul.f32 %v6676_v61, %v2426_v27  ;;  %v1918_v38 = vmul.f32 %v6640_v2, %v1909_v25  ;;  %v5026_v17 = vld [vmem:[%s9549_s2 + $0x110] sm:$0xff]  ;;  %v1907_v42 = vld [vmem:[%s9551_s4] sm:$0xff] }
  0x8c   : > { %v5027_v41 = vld [vmem:[%s9549_s2 + $0x118] sm:$0xff]  ;;  %v2449_v19 = vpack.c.bf16 %v2445_v21, %v2444_v14  ;;  %v2418_v22 = vadd.f32 %v2410_v44, %v2393_v10  ;;  %v1919_v47 = vmul.f32 %v6640_v2, %v1910_v4  ;;  %v2382_v26 = vmul.f32 %v5034_v59, %v6640_v2  ;;  %v2423_v25 = vld [vmem:[%s9550_s3 + $0x10] sm:$0xff] }
  0x8d   : > { %v5043_v12 = vld [vmem:[%s9552_s5 + $0x58] sm:$0xff]  ;;  %v2442_v7 = vadd.f32 %v2434_v30, %v2417_v46  ;;  %v1926_v35 = vadd.f32 %v4985_v49, %v1918_v38  ;;  %v2383_v10 = vmul.f32 %v5035_v0, %v6640_v2  ;;  %v2407_v21 = vmul.f32 %v5042_v23, %v6229_v39  ;;  %v5032_v46 = vld [vmem:[%s9551_s4 + $0x40] sm:$0xff] }
  0x8e   : > { %v2424_v27 = vld [vmem:[%s9550_s3 + $0x18] sm:$0xff]  ;;  %5610 = vmatprep.subr.bf16.mxu0 %v2449_v19  ;;  %v2443_v14 = vadd.f32 %v2435_v33, %v2418_v22  ;;  %v1927_v4 = vadd.f32 %v4986_v63, %v1919_v47  ;;  %v2390_v59 = vadd.f32 %v5026_v17, %v2382_v26  ;;  %v2408_v44 = vmul.f32 %v5043_v12, %v6229_v39  ;;  %v4984_v63 = vld [vmem:[%s9549_s2 + $0x48] sm:$0xff]  ;;  %v5024_v12 = vld [vmem:[%s9549_s2 + $0x100] sm:$0xff] }
  0x8f   : > { %5611 = vmatpush3.bf16.msra.mxu0 %v2449_v19  ;;  %v2391_v49 = vadd.f32 %v5027_v41, %v2383_v10  ;;  %v2432_v30 = vmul.f32 %v6676_v61, %v2423_v25  ;;  %v2433_v0 = vmul.f32 %v6676_v61, %v2424_v27  ;;  %v1916_v23 = vmul.f32 %v6640_v2, %v1907_v42  ;;  %v5033_v33 = vld [vmem:[%s9551_s4 + $0x48] sm:$0xff]  ;;  %v5040_v19 = vld [vmem:[%s9552_s5 + $0x40] sm:$0xff] }
  0x90   : > { %5499 = vmatmul.mubr.msk.bf16.vlgmr.msra.gmra.mxu1 %vm1041_vm4, %v6368_v45  ;;  %5543 = vmatmul.mubr.msk.bf16.gmra.mxu0 %vm1041_vm4, %v6497_v5  ;;  %v2448_v38 = vpack.c.bf16 %v2443_v14, %v2442_v7  ;;  %v1933_v17 = vpack.c.bf16 %v1927_v4, %v1926_v35  ;;  %v2415_v41 = vadd.f32 %v2407_v21, %v2390_v59  ;;  %v5041_v22 = vld [vmem:[%s9552_s5 + $0x48] sm:$0xff]  ;;  %v2421_v25 = vld [vmem:[%s9550_s3] sm:$0xff] }
  0x91   : > { %5571 = vmatpush3.bf16.msra.mxu1 %v6699_v60  ;;  %5502 = vmatprep.mubr.msk.bf16.mxu1 %vm1041_vm4, %v6393_v62  ;;  %v2416_v45 = vadd.f32 %v2408_v44, %v2391_v49  ;;  %v1917_v35 = vmul.f32 %v6640_v2, %v1908_v29  ;;  %v1924_v47 = vadd.f32 %v4983_v6, %v1916_v23  ;;  %v5025_v26 = vld [vmem:[%s9549_s2 + $0x108] sm:$0xff] }
  0x92   : > { %v2422_v27 = vld [vmem:[%s9550_s3 + $0x8] sm:$0xff]  ;;  %5546 = vmatprep.mubr.msk.bf16.mxu0 %vm1041_vm4, %v6571_v20  ;;  %5572 = vmatprep.subr.bf16.mxu1 %v6772_v15  ;;  %v2440_v62 = vadd.f32 %v2432_v30, %v2415_v41  ;;  %v2380_v29 = vmul.f32 %v5032_v46, %v6640_v2  ;;  %v2381_v6 = vmul.f32 %v5033_v33, %v6640_v2  ;;  %v5107_v46 = vld [vmem:[%s9549_s2 + $0xb8] sm:$0xff] }
  0x93   : > { %5612 = vmatprep.subr.bf16.mxu0 %v2448_v38  ;;  %v2441_v60 = vadd.f32 %v2433_v0, %v2416_v45  ;;  %v1925_v42 = vadd.f32 %v4984_v63, %v1917_v35  ;;  %v2405_v7 = vmul.f32 %v5040_v19, %v6229_v39  ;;  %v2406_v10 = vmul.f32 %v5041_v22, %v6229_v39  ;;  %v6895_v35 = vld [vmem:[#allocation2 + $0x104] sm:$0xf] }
  0x94   : > { %5613 = vmatpush3.bf16.msra.mxu0 %v2448_v38  ;;  %v2388_v21 = vadd.f32 %v5024_v12, %v2380_v29  ;;  %v2389_v14 = vadd.f32 %v5025_v26, %v2381_v6  ;;  %v2430_v4 = vmul.f32 %v6676_v61, %v2421_v25  ;;  %v2431_v59 = vmul.f32 %v6676_v61, %v2422_v27  ;;  %v5080_v61 = vld [vmem:[%s9551_s4 + $0xb0] sm:$0xff]  ;;  %v515_v26 = vld [vmem:[#allocation2 + $0x100] sm:$0x8] }
  0x95   : > { %5573 = vmatpush3.bf16.msra.mxu1 %v6772_v15  ;;  %v2447_v44 = vpack.c.bf16 %v2441_v60, %v2440_v62  ;;  %v1932_v0 = vpack.c.bf16 %v1925_v42, %v1924_v47  ;;  %v5081_v15 = vld [vmem:[%s9551_s4 + $0xb8] sm:$0xff]  ;;  %v5072_v38 = vld [vmem:[%s9549_s2 + $0x1f0] sm:$0xff]  ;;  %v2750_v41 = vmul.f32 %v5080_v61, %v6640_v2  ;;  %v6897_v47 = vld [vmem:[#allocation2 + $0x108] sm:$0xf]  ;;  %v1257_v25 = vshrl.u32 %v6895_v35, 16 }
  0x96   : > { %5574 = vmatprep.subr.bf16.mxu1 %v1933_v17  ;;  %v2413_v49 = vadd.f32 %v2405_v7, %v2388_v21  ;;  %v2414_v30 = vadd.f32 %v2406_v10, %v2389_v14  ;;  %v2751_v12 = vmul.f32 %v5081_v15, %v6640_v2  ;;  %v519_v27 = vld [vmem:[#allocation2 + $0x114] sm:$0xf]  ;;  %v1260_v29 = vshll.u32 %v6895_v35, 16  ;;  %v520_v42 = vld [vmem:[#allocation2 + $0x118] sm:$0xf] }
  0x97   : > { %5614 = vmatprep.subr.bf16.mxu0 %v2447_v44  ;;  %v2758_v22 = vadd.f32 %v5072_v38, %v2750_v41  ;;  %v1259_v62 = vrot.slane %v1257_v25, 7  ;;  %v1269_v60 = vshll.u32 %v6897_v47, 16  ;;  %v518_v7 = vld [vmem:[#allocation2 + $0x110] sm:$0x8]  ;;  %v1602_v10 = vshrl.u32 %v520_v42, 16 }
  0x98   : > { %5503 = vmatmul.mubr.msk.bf16.gmra.mxu1 %vm1041_vm4, %v6464_v31  ;;  %5547 = vmatmul.mubr.msk.bf16.gmra.mxu0 %vm1041_vm4, %v6601_v48  ;;  %v2438_v63 = vadd.f32 %v2430_v4, %v2413_v49  ;;  %v2439_v23 = vadd.f32 %v2431_v59, %v2414_v30  ;;  %v5106_v31 = vld [vmem:[%s9549_s2 + $0xb0] sm:$0xff]  ;;  %v1596_v49 = vshll.u32 %v519_v27, 16  ;;  %v5845_v25 = vld [vmem:[#allocation2 + $0x8] sm:$0xf] }
  0x99   : > { %5506 = vmatprep.mubr.msk.bf16.mxu1 %vm1041_vm4, %v6497_v5  ;;  %5550 = vmatprep.mubr.msk.bf16.mxu0 %vm1041_vm4, %v6316_v57  ;;  %v5073_v5 = vld [vmem:[%s9549_s2 + $0x1f8] sm:$0xff]  ;;  %v6881_v19 = vpack.c.bf16 %v5107_v46, %v5106_v31  ;;  %v1262_v14 = vor.u32 %v1260_v29, %v1259_v62  ;;  %v1264_v4 = vrot.slane %v1259_v62, 4  ;;  %v1604_v30 = vrot.slane %v1602_v10, 7  ;;  %v5840_v38 = vld [vmem:[#allocation2 + $0x14] sm:$0xf] }
  0x9a   : > { %5575 = vmatpush3.bf16.msra.mxu1 %v1933_v17  ;;  %5615 = vmatpush3.bf16.msra.mxu0 %v2447_v44  ;;  %v2446_v33 = vpack.c.bf16 %v2439_v23, %v2438_v63  ;;  %v2759_v17 = vadd.f32 %v5073_v5, %v2751_v12  ;;  %v5841_v5 = vld [vmem:[#allocation2 + $0x18] sm:$0xf]  ;;  %v5104_v12 = vld [vmem:[%s9549_s2 + $0xa0] sm:$0xff]  ;;  %v5846_v62 = vld [vmem:[#allocation2 + $0x34] sm:$0xf] }
  0x9b   : > { %5576 = vmatprep.subr.bf16.mxu1 %v1932_v0  ;;  %v4992_v41 = vcombine.low %v5840_v38, %v5841_v5  ;;  %v5847_v29 = vld [vmem:[#allocation2 + $0x38] sm:$0xf]  ;;  %v5101_v38 = vld [vmem:[%s9549_s2 + $0x88] sm:$0xff] }
  0x9c   : > { %5616 = vmatprep.subr.bf16.mxu0 %v2446_v33  ;;  %v6883_v45 = vpack.c.bf16 %v2759_v17, %v2758_v22  ;;  %v5842_v22 = vld [vmem:[#allocation2 + $0x24] sm:$0xf]  ;;  %v5077_v10 = vld [vmem:[%s9551_s4 + $0x98] sm:$0xff] }
  0x9e   : > { %5577 = vmatpush3.bf16.msra.mxu1 %v1932_v0  ;;  %5617 = vmatpush3.bf16.msra.mxu0 %v2446_v33  ;;  %v1605_v0 = vshll.u32 %v520_v42, 16  ;;  %v5071_v42 = vld [vmem:[%s9549_s2 + $0x1e8] sm:$0xff] }
  0x9f   : > { %5690 = vmatprep.subr.bf16.mxu0 %v6881_v19  ;;  %5650 = vmatprep.subr.bf16.mxu1 %v6883_v45 }
  0xa0   : > { %5507 = vmatmul.mubr.msk.bf16.gmra.mxu1 %vm1041_vm4, %v6571_v20  ;;  %5551 = vmatmul.mubr.msk.bf16.gmra.mxu0 %vm1041_vm4, %v6341_v16  ;;  %v1266_v20 = vshrl.u32 %v6897_v47, 16  ;;  %v1607_v31 = vor.u32 %v1605_v0, %v1604_v30  ;;  %v5069_v0 = vld [vmem:[%s9549_s2 + $0x1d8] sm:$0xff] }
  0xa1   : > { %5510 = vmatprep.mubr.msk.bf16.mxu1 %vm1041_vm4, %v6601_v48  ;;  %5554 = vmatprep.mubr.msk.bf16.mxu0 %vm1041_vm4, %v6411_v24  ;;  %v1252_v48 = vshrl.u32 %v515_v26, 16  ;;  %v5844_v26 = vld [vmem:[#allocation2 + $0x4] sm:$0xf] }
  0xa2   : > { %v1268_v6 = vrot.slane %v1266_v20, 7  ;;  %v4991_v20 = vcombine.low %v5844_v26, %v5845_v25  ;;  %v920_v26 = vunpack.c.l.bf16 %v6256_v55  ;;  %v5181_v55 = vld [vmem:[%s9549_s2 + $0x230] sm:$0xff] }
  0xa3   : > { %v4929_v21 = vrot.slane %v1252_v48, 11  ;;  %v2748_v48 = vmul.f32 %v5078_v32, %v6640_v2 }
  0xa4   : > { %v1271_v59 = vor.u32 %v1269_v60, %v1268_v6  ;;  %v6971_v6 = vcombine.low %v5846_v62, %v5847_v29  ;;  %v5070_v60 = vld [vmem:[%s9549_s2 + $0x1e0] sm:$0xff] }
  0xa5   : > { %v6921_v63 = vsel %vm6219_vm3, %v4929_v21, %v1262_v14  ;;  %v5102_v21 = vld [vmem:[%s9549_s2 + $0x90] sm:$0xff]  ;;  %v5103_v14 = vld [vmem:[%s9549_s2 + $0x98] sm:$0xff] }
  0xa6   : > { %9749 = vst [vmem:[#allocation34_spill] sm:$0xff] %v6921_v63  ;;  %v3523_v30 = vpack.c.bf16 %v5103_v14, %v5102_v21  ;;  %v7081_v21 = vunpack.c.l.bf16 %v6310_v50  ;;  %v7085_v14 = vcombine.low %v6513_v54, %v6520_v1 }
  0xa8   : > { %5511 = vmatmul.mubr.msk.bf16.gmra.mxu1 %vm1041_vm4, %v6316_v57  ;;  %5555 = vmatmul.mubr.msk.bf16.gmra.mxu0 %vm1041_vm4, %v6447_v11  ;;  %v1593_v57 = vshrl.u32 %v519_v27, 16  ;;  %9755 = vst [vmem:[#allocation40_spill] sm:$0xff] %v7085_v14 }
  0xa9   : > { %5514 = vmatprep.mubr.msk.bf16.mxu1 %vm1041_vm4, %v6341_v16  ;;  %5558 = vmatprep.mubr.msk.bf16.mxu0 %vm1041_vm4, %v6517_v58  ;;  %v1588_v16 = vshrl.u32 %v518_v7, 16 }
  0xaa   : > { %v1595_v44 = vrot.slane %v1593_v57, 7  ;;  %v5076_v57 = vld [vmem:[%s9551_s4 + $0x90] sm:$0xff] }
  0xab   : > { %v4956_v23 = vrot.slane %v1588_v16, 11  ;;  %v5068_v16 = vld [vmem:[%s9549_s2 + $0x1d0] sm:$0xff] }
  0xac   : > { %v1600_v15 = vrot.slane %v1595_v44, 4 }
  0xae   : > { %v6942_v33 = vsel %vm6219_vm3, %v1600_v15, %v1607_v31  ;;  %v7021_v15 = vcombine.low %v6415_v28, %v6418_v37  ;;  %v952_v28 = vld [vmem:[%s9553_s6] sm:$0x1] }
  0xaf   : > { %9752 = vst [vmem:[#allocation37_spill] sm:$0xff] %v6942_v33  ;;  %v5066_v37 = vld [vmem:[%s9549_s2 + $0x1c0] sm:$0xff] }
  0xb0   : > { %5515 = vmatmul.mubr.msk.bf16.gmra.mxu1 %vm1041_vm4, %v6411_v24  ;;  %5559 = vmatmul.mubr.msk.bf16.gmra.mxu0 %vm1041_vm4, %v6543_v53  ;;  %v6925_v24 = vsel %vm6219_vm3, %v1264_v4, %v1271_v59  ;;  %v2756_v4 = vadd.f32 %v5070_v60, %v2748_v48  ;;  %v5182_v60 = vld [vmem:[%s9549_s2 + $0x238] sm:$0xff] }
  0xb1   : > { %5518 = vmatprep.mubr.msk.bf16.mxu1 %vm1041_vm4, %v6447_v11  ;;  %5562 = vmatprep.mubr.msk.bf16.mxu0 %vm1041_vm4, %v6660_v18  ;;  %9750 = vst [vmem:[#allocation35_spill] sm:$0xff] %v6925_v24  ;;  %v4938_v61 = vcombine.low %v6921_v63, %v6925_v24  ;;  %v1598_v11 = vor.u32 %v1596_v49, %v1595_v44 }
  0xb2   : > { %v2746_v44 = vmul.f32 %v5076_v57, %v6640_v2  ;;  %v2747_v49 = vmul.f32 %v5077_v10, %v6640_v2  ;;  %v5148_v57 = vld [vmem:[%s9549_s2 + $0x178] sm:$0xff]  ;;  %v921_v10 = vunpack.c.l.bf16 %v6260_v56 }
  0xb3   : > { %v6938_v46 = vsel %vm6219_vm3, %v4956_v23, %v1598_v11  ;;  %v5075_v23 = vld [vmem:[%s9551_s4 + $0x88] sm:$0xff]  ;;  %v7017_v11 = vstv %s6967_s30 }
  0xb4   : > { %9751 = vst [vmem:[#allocation36_spill] sm:$0xff] %v6938_v46  ;;  %9753 = vst [vmem:[#allocation38_spill] sm:$0xff] %v7017_v11  ;;  %v2754_v5 = vadd.f32 %v5068_v16, %v2746_v44  ;;  %v2755_v32 = vadd.f32 %v5069_v0, %v2747_v49  ;;  %v3044_v49 = vld [vmem:[#allocation2 + $0x18] sm:$0xf] }
  0xb6   : > { %v2761_v25 = vpack.c.bf16 %v2755_v32, %v2754_v5  ;;  %v5848_v32 = vld [vmem:[#allocation2 + $0x84] sm:$0xf] }
  0xb8   : > { %5519 = vmatmul.mubr.msk.bf16.gmra.mxu1 %vm1041_vm4, %v6517_v58  ;;  %5563 = vmatmul.mubr.msk.bf16.gmra.mxu0 %vm1041_vm4, %v6711_v51  ;;  %v4965_v58 = vcombine.low %v6938_v46, %v6942_v33 }
  0xb9   : > { %5522 = vmatprep.mubr.msk.bf16.mxu1 %vm1041_vm4, %v6543_v53  ;;  %5566 = vmatprep.mubr.msk.bf16.mxu0 %vm1041_vm4, %v4938_v61  ;;  %v5079_v53 = vld [vmem:[%s9551_s4 + $0xa8] sm:$0xff] }
  0xba   : > { %v2749_v27 = vmul.f32 %v5079_v53, %v6640_v2  ;;  %v5067_v53 = vld [vmem:[%s9549_s2 + $0x1c8] sm:$0xff] }
  0xbc   : > { %v2757_v59 = vadd.f32 %v5071_v42, %v2749_v27  ;;  %v7057_v27 = vunpack.c.l.bf16 %v6295_v36  ;;  %v7071_v36 = vcombine.low %v6499_v34, %v6507_v40  ;;  %v3041_v34 = vld [vmem:[#allocation2 + $0x8] sm:$0xf]  ;;  %v3043_v40 = vld [vmem:[#allocation2 + $0x14] sm:$0xf] }
  0xbd   : > { %v3107_v1 = vshll.u32 %v3041_v34, 16 }
  0xbe   : > { %v2762_v31 = vpack.c.bf16 %v2757_v59, %v2756_v4 }
  0xc0   : > { %5523 = vmatmul.mubr.msk.bf16.gmra.mxu1 %vm1041_vm4, %v6660_v18  ;;  %5567 = vmatmul.mubr.msk.bf16.gmra.mxu0 %vm1041_vm4, %v4965_v58  ;;  %v5105_v18 = vld [vmem:[%s9549_s2 + $0xa8] sm:$0xff]  ;;  %v5100_v58 = vld [vmem:[%s9549_s2 + $0x80] sm:$0xff] }
  0xc1   : > { %5526 = vmatprep.mubr.msk.bf16.mxu1 %vm1041_vm4, %v6711_v51  ;;  %5618 = vmatprep.mubr.msk.bf16.mxu0 %vm1041_vm4, %v4992_v41  ;;  %v5843_v51 = vld [vmem:[#allocation2 + $0x28] sm:$0xf]  ;;  %v3524_v7 = vpack.c.bf16 %v5105_v18, %v5104_v12  ;;  %v956_v12 = vlaneseq  ;;  %v3522_v18 = vpack.c.bf16 %v5101_v38, %v5100_v58  ;;  %v3131_v58 = vshll.u32 %v3044_v49, 16 }
  0xc2   : > { %v6964_v17 = vcombine.low %v5842_v22, %v5843_v51  ;;  %v5156_v22 = vld [vmem:[%s9552_s5 + $0xb8] sm:$0xff]  ;;  %v954_v51 = vmul.f32 %v7017_v11, %v952_v28  ;;  %v3135_v38 = vshrl.u32 %v3044_v49, 16  ;;  %v5850_v28 = vld [vmem:[#allocation2 + $0x94] sm:$0xf] }
  0xc3   : > { %v3971_v29 = vmul.f32 %v5156_v22, %v6229_v39 }
  0xc5   : > { %v3979_v50 = vadd.f32 %v5148_v57, %v3971_v29  ;;  %v3045_v29 = vld [vmem:[#allocation2 + $0x1c] sm:$0x1] }
  0xc8   : > { %5527 = vmatmul.mubr.msk.bf16.gmra.mxu1 %vm1041_vm4, %v4938_v61  ;;  %5619 = vmatmul.mubr.msk.bf16.vlgmr.msra.gmra.mxu0 %vm1041_vm4, %v6964_v17  ;;  %v7014_v61 = vcombine.low %v6386_v8, %v6388_v9  ;;  %v2745_v9 = vmul.f32 %v5075_v23, %v6640_v2  ;;  %v3122_v23 = vshrl.u32 %v3043_v40, 16 }
  0xc9   : > { %5578 = vmatprep.mubr.msk.bf16.mxu1 %vm1041_vm4, %v4991_v20  ;;  %5691 = vmatpush3.bf16.msra.mxu0 %v6881_v19  ;;  %v5074_v19 = vld [vmem:[%s9551_s4 + $0x80] sm:$0xff] }
  0xca   : > { %5622 = vmatprep.mubr.msk.bf16.mxu0 %vm1041_vm4, %v6971_v6  ;;  %5692 = vmatprep.subr.bf16.mxu0 %v3524_v7  ;;  %v2744_v8 = vmul.f32 %v5074_v19, %v6640_v2  ;;  %v5155_v2 = vld [vmem:[%s9552_s5 + $0xb0] sm:$0xff]  ;;  %v2753_v48 = vadd.f32 %v5067_v53, %v2745_v9  ;;  %v3111_v19 = vshrl.u32 %v3041_v34, 16 }
  0xcb   : > { %v3970_v62 = vmul.f32 %v5155_v2, %v6229_v39 }
  0xcc   : > { %v2752_v20 = vadd.f32 %v5066_v37, %v2744_v8  ;;  %v5849_v8 = vld [vmem:[#allocation2 + $0x88] sm:$0xf]  ;;  %v5851_v37 = vld [vmem:[#allocation2 + $0x98] sm:$0xf] }
  0xcd   : > { %5693 = vmatpush3.bf16.msra.mxu0 %v3524_v7  ;;  %v5147_v7 = vld [vmem:[%s9549_s2 + $0x170] sm:$0xff]  ;;  %v7110_v9 = vcombine.low %v5848_v32, %v5849_v8  ;;  %v7112_v53 = vcombine.low %v5850_v28, %v5851_v37  ;;  %v5855_v28 = vld [vmem:[#allocation2 + $0xb8] sm:$0xf] }
  0xce   : > { %5694 = vmatprep.subr.bf16.mxu0 %v3523_v30  ;;  %v2760_v59 = vpack.c.bf16 %v2753_v48, %v2752_v20  ;;  %v3978_v56 = vadd.f32 %v5147_v7, %v3970_v62  ;;  %v7121_v20 = vrot.slane %v3107_v1, 5  ;;  %v3113_v48 = vrot.slane %v3111_v19, 4  ;;  %v5854_v8 = vld [vmem:[#allocation2 + $0xb4] sm:$0xf] }
  0xcf   : > { %9757 = vst [vmem:[#allocation42_spill] sm:$0xff] %v7110_v9  ;;  %9758 = vst [vmem:[#allocation43_spill] sm:$0xff] %v7112_v53  ;;  %v7138_v37 = vcombine.low %v5854_v8, %v5855_v28  ;;  %v3051_v28 = vld [vmem:[#allocation2 + $0x3c] sm:$0x1] }
  0xd0   : > { %5579 = vmatmul.mubr.msk.bf16.vlgmr.msra.gmra.mxu1 %vm1041_vm4, %v4992_v41  ;;  %5623 = vmatmul.mubr.msk.bf16.gmra.mxu0 %vm1041_vm4, %v7014_v61  ;;  %v957_v41 = vshrl.u32 %v956_v12, 7  ;;  %v3046_v12 = vld [vmem:[#allocation2 + $0x24] sm:$0xf]  ;;  %v3114_v49 = vor.u32 %v3113_v48, %v7121_v20 }
  0xd1   : > { %5651 = vmatpush3.bf16.msra.mxu1 %v6883_v45  ;;  %5582 = vmatprep.mubr.msk.bf16.mxu1 %vm1041_vm4, %v6964_v17  ;;  %v3040_v45 = vld [vmem:[#allocation2 + $0x4] sm:$0xf]  ;;  %v3146_v7 = vshrl.u32 %v3046_v12, 16  ;;  %v3149_v57 = vshll.u32 %v3046_v12, 16  ;;  %9761 = vst [vmem:[#allocation46_spill] sm:$0xff] %v7138_v37 }
  0xd2   : > { %5626 = vmatprep.mubr.msk.bf16.mxu0 %vm1041_vm4, %v7021_v15  ;;  %5652 = vmatprep.subr.bf16.mxu1 %v2762_v31  ;;  %v7067_v42 = vsub.s32 0, %v957_v41  ;;  %v3098_v16 = vshrl.u32 %v3040_v45, 16  ;;  %v3101_v44 = vshll.u32 %v3040_v45, 16  ;;  %v3047_v41 = vld [vmem:[#allocation2 + $0x28] sm:$0xf]  ;;  %v3124_v45 = vrot.slane %v3122_v23, 4 }
  0xd3   : > { %5695 = vmatpush3.bf16.msra.mxu0 %v3523_v30  ;;  %v7090_v30 = vpack.c.bf16 %v5182_v60, %v5181_v55  ;;  %v7123_v55 = vrot.slane %v3131_v58, 5  ;;  %v3137_v60 = vrot.slane %v3135_v38, 4  ;;  %v3159_v34 = vshrl.u32 %v3047_v41, 16  ;;  %v5852_v58 = vld [vmem:[#allocation2 + $0xa4] sm:$0xf] }
  0xd4   : > { %9754 = vst [vmem:[#allocation39_spill] sm:$0xff] %v7067_v42  ;;  %5696 = vmatprep.subr.bf16.mxu0 %v3522_v18  ;;  %v7088_v4 = vrot.slane %v954_v51, %v7067_v42  ;;  %v3100_v2 = vrot.slane %v3098_v16, 4  ;;  %v3103_v22 = vrot.slane %v3101_v44, 5  ;;  %v7115_v51 = vpack.c.bf16 %v3979_v50, %v3978_v56  ;;  %v5853_v38 = vld [vmem:[#allocation2 + $0xa8] sm:$0xf] }
  0xd5   : > { %5653 = vmatpush3.bf16.msra.mxu1 %v2762_v31  ;;  %v3125_v31 = vshll.u32 %v3043_v40, 16  ;;  %v3141_v50 = vshll.u32 %v3045_v29, 16  ;;  %v3138_v19 = vor.u32 %v3137_v60, %v7123_v55  ;;  %v3148_v23 = vrot.slane %v3146_v7, 4  ;;  %v3048_v12 = vld [vmem:[#allocation2 + $0x2c] sm:$0x1] }
  0xd6   : > { %5654 = vmatprep.subr.bf16.mxu1 %v2761_v25  ;;  %v7093_v0 = vmul.f32 %v7088_v4, %v920_v26  ;;  %v7097_v54 = vmul.f32 %v7088_v4, %v7057_v27  ;;  %v7108_v5 = vmul.f32 %v7088_v4, %v921_v10  ;;  %v7119_v26 = vmul.f32 %v7088_v4, %v7081_v21 }
  0xd7   : > { %5697 = vmatpush3.bf16.msra.mxu0 %v3522_v18  ;;  %v3042_v18 = vld [vmem:[#allocation2 + $0xc] sm:$0x1]  ;;  %v3127_v62 = vrot.slane %v3125_v31, 5  ;;  %v3155_v10 = vshll.u32 %v3047_v41, 16  ;;  %v3104_v44 = vor.u32 %v3103_v22, %v3100_v2  ;;  %v3151_v31 = vrot.slane %v3149_v57, 5 }
  0xd8   : > { %9756 = vst [vmem:[#allocation41_spill] sm:$0xff] %v7097_v54  ;;  %5583 = vmatmul.mubr.msk.bf16.gmra.mxu1 %vm1041_vm4, %v6971_v6  ;;  %5627 = vmatmul.mubr.msk.bf16.gmra.mxu0 %vm1041_vm4, %v7071_v36  ;;  %9759 = vst [vmem:[#allocation44_spill] sm:$0xff] %v7119_v26  ;;  %v3117_v56 = vshll.u32 %v3042_v18, 16  ;;  %v7136_v32 = vcombine.low %v5852_v58, %v5853_v38  ;;  %v3161_v2 = vrot.slane %v3159_v34, 4  ;;  %v3115_v29 = vrot.slane %v3114_v49, 4 }
  0xd9   : > { %5586 = vmatprep.mubr.msk.bf16.mxu1 %vm1041_vm4, %v7014_v61  ;;  %5630 = vmatprep.mubr.msk.bf16.mxu0 %vm1041_vm4, %v7085_v14  ;;  %v3128_v1 = vor.u32 %v3127_v62, %v3124_v45  ;;  %v3157_v18 = vrot.slane %v3155_v10, 5  ;;  %v3052_v45 = vld [vmem:[#allocation2 + $0x44] sm:$0xf]  ;;  %v3105_v62 = vrot.slane %v3104_v44, 4  ;;  %v3143_v7 = vrot.slane %v3141_v50, 5 }
  0xda   : > { %5655 = vmatpush3.bf16.msra.mxu1 %v2761_v25  ;;  %5770 = vmatprep.subr.bf16.mxu0 %v7090_v30  ;;  %v3049_v25 = vld [vmem:[#allocation2 + $0x34] sm:$0xf]  ;;  %9760 = vst [vmem:[#allocation45_spill] sm:$0xff] %v7136_v32  ;;  %v3119_v60 = vrot.slane %v3117_v56, 5  ;;  %v9762_v57 = vmov 0  ;;  %v3139_v38 = vrot.slane %v3138_v19, 4  ;;  %v3152_v8 = vor.u32 %v3151_v31, %v3148_v23 }
  0xdb   : > { %5656 = vmatprep.subr.bf16.mxu1 %v2760_v59  ;;  %v3170_v40 = vshrl.u32 %v3049_v25, 16  ;;  %v3173_v16 = vshll.u32 %v3049_v25, 16  ;;  %v9763_v57 = vsel %vm7142_vm7, 4294967295, %v9762_v57  ;;  %v3129_v58 = vrot.slane %v3128_v1, 4  ;;  %v3053_v50 = vld [vmem:[#allocation2 + $0x48] sm:$0xf] }
  0xdc   : > { %9764 = vst [vmem:[#allocation47_spill] sm:$0xff] %v9763_v57  ;;  %v3165_v10 = vshll.u32 %v3048_v12, 16  ;;  %v3162_v34 = vor.u32 %v3161_v2, %v3157_v18  ;;  %v7153_v49 = vsel %vm7142_vm7, %v3105_v62, %v7121_v20  ;;  %v7157_v56 = vsel %vm7142_vm7, %v3115_v29, %v3119_v60  ;;  %v5856_v29 = vld [vmem:[#allocation2 + $0xc4] sm:$0xf]  ;;  %v5857_v60 = vld [vmem:[#allocation2 + $0xc8] sm:$0xf] }
  0xdd   : > { %v3172_v22 = vrot.slane %v3170_v40, 4  ;;  %v3175_v41 = vrot.slane %v3173_v16, 5  ;;  %v3194_v40 = vshrl.u32 %v3052_v45, 16  ;;  %v3197_v16 = vshll.u32 %v3052_v45, 16  ;;  %9765 = vst [vmem:[#allocation48_spill] sm:$0xff] %v7153_v49  ;;  %9766 = vst [vmem:[#allocation49_spill] sm:$0xff] %v7157_v56 }
  0xde   : > { %5657 = vmatpush3.bf16.msra.mxu1 %v2760_v59  ;;  %v3050_v59 = vld [vmem:[#allocation2 + $0x38] sm:$0xf]  ;;  %v7166_v1 = vsel %vm7142_vm7, %v3129_v58, %v7123_v55  ;;  %v7170_v20 = vsel %vm7142_vm7, %v3139_v38, %v3143_v7  ;;  %v3153_v19 = vrot.slane %v3152_v8, 4  ;;  %v3167_v23 = vrot.slane %v3165_v10, 5  ;;  %v5858_v55 = vld [vmem:[#allocation2 + $0xd4] sm:$0xf] }
  0xdf   : > { %5730 = vmatprep.subr.bf16.mxu1 %v7115_v51  ;;  %v3179_v48 = vshll.u32 %v3050_v59, 16  ;;  %v3183_v25 = vshrl.u32 %v3050_v59, 16  ;;  %v3176_v59 = vor.u32 %v3175_v41, %v3172_v22  ;;  %9767 = vst [vmem:[#allocation50_spill] sm:$0xff] %v7166_v1  ;;  %9768 = vst [vmem:[#allocation51_spill] sm:$0xff] %v7170_v20  ;;  %v3163_v31 = vrot.slane %v3162_v34, 4 }
  0xe0   : > { %5587 = vmatmul.mubr.msk.bf16.gmra.mxu1 %vm1041_vm4, %v7021_v15  ;;  %5631 = vmatmul.mubr.msk.bf16.gmra.mxu0 %vm1041_vm4, %v7110_v9  ;;  %v3189_v12 = vshll.u32 %v3051_v28, 16  ;;  %v3196_v2 = vrot.slane %v3194_v40, 4  ;;  %v3199_v22 = vrot.slane %v3197_v16, 5  ;;  %v3203_v45 = vshll.u32 %v3053_v50, 16  ;;  %v5859_v58 = vld [vmem:[#allocation2 + $0xd8] sm:$0xf] }
  0xe1   : > { %5590 = vmatprep.mubr.msk.bf16.mxu1 %vm1041_vm4, %v7071_v36  ;;  %5634 = vmatprep.mubr.msk.bf16.mxu0 %vm1041_vm4, %v7112_v53  ;;  %v3181_v33 = vrot.slane %v3179_v48, 5  ;;  %v3185_v44 = vrot.slane %v3183_v25, 4  ;;  %v3177_v41 = vrot.slane %v3176_v59, 4  ;;  %v3054_v25 = vld [vmem:[#allocation2 + $0x4c] sm:$0x1]  ;;  %v3207_v62 = vshrl.u32 %v3053_v50, 16 }
  0xe2   : > { %v7172_v46 = vcombine.low %v5856_v29, %v5857_v60  ;;  %v7174_v24 = vcombine.low %v5858_v55, %v5859_v58  ;;  %v7178_v7 = vcombine.low %v6535_v43, %v6555_v13  ;;  %v7182_v38 = vcombine.low %v6586_v3, %v6597_v52  ;;  %v3055_v43 = vld [vmem:[#allocation2 + $0x54] sm:$0xf]  ;;  %v3056_v13 = vld [vmem:[#allocation2 + $0x58] sm:$0xf]  ;;  %v3058_v16 = vld [vmem:[#allocation2 + $0x64] sm:$0xf] }
  0xe3   : > { %v3186_v48 = vor.u32 %v3185_v44, %v3181_v33  ;;  %v7186_v8 = vcombine.low %v6895_v35, %v6897_v47  ;;  %v7192_v34 = vcombine.low %v7166_v1, %v7170_v20  ;;  %v7196_v40 = vsel %vm7142_vm7, %v3153_v19, %v3157_v18  ;;  %v3059_v28 = vld [vmem:[#allocation2 + $0x68] sm:$0xf]  ;;  %v3061_v18 = vld [vmem:[#allocation2 + $0x74] sm:$0xf]  ;;  %v3064_v10 = vld [vmem:[#allocation2 + $0x84] sm:$0xf] }
  0xe4   : > { %9769 = vst [vmem:[#allocation52_spill] sm:$0xff] %v7172_v46  ;;  %9770 = vst [vmem:[#allocation53_spill] sm:$0xff] %v7196_v40  ;;  %v7200_v52 = vsel %vm7142_vm7, %v3163_v31, %v3167_v23  ;;  %v3191_v3 = vrot.slane %v3189_v12, 5  ;;  %v3200_v35 = vor.u32 %v3199_v22, %v3196_v2  ;;  %v3213_v47 = vshll.u32 %v3054_v25, 16  ;;  %v3062_v2 = vld [vmem:[#allocation2 + $0x78] sm:$0xf] }
  0xe5   : > { %9771 = vst [vmem:[#allocation54_spill] sm:$0xff] %v7200_v52  ;;  %v7204_v59 = vsel %vm7142_vm7, %v3177_v41, %v3181_v33  ;;  %v3187_v44 = vrot.slane %v3186_v48, 4  ;;  %v3205_v50 = vrot.slane %v3203_v45, 5  ;;  %v3209_v29 = vrot.slane %v3207_v62, 4  ;;  %v3060_v26 = vld [vmem:[#allocation2 + $0x6c] sm:$0x1] }
  0xe6   : > { %v3218_v19 = vshrl.u32 %v3055_v43, 16  ;;  %v3221_v23 = vshll.u32 %v3055_v43, 16  ;;  %v3227_v31 = vshll.u32 %v3056_v13, 16  ;;  %v3231_v12 = vshrl.u32 %v3056_v13, 16 }
  0xe7   : > { %v3242_v33 = vshrl.u32 %v3058_v16, 16  ;;  %v3245_v22 = vshll.u32 %v3058_v16, 16  ;;  %v3251_v41 = vshll.u32 %v3059_v28, 16  ;;  %v3255_v48 = vshrl.u32 %v3059_v28, 16  ;;  %v3065_v16 = vld [vmem:[#allocation2 + $0x88] sm:$0xf] }
  0xe8   : > { %5591 = vmatmul.mubr.msk.bf16.gmra.mxu1 %vm1041_vm4, %v7085_v14  ;;  %5635 = vmatmul.mubr.msk.bf16.gmra.mxu0 %vm1041_vm4, %v7136_v32  ;;  %v3201_v25 = vrot.slane %v3200_v35, 4  ;;  %v3215_v45 = vrot.slane %v3213_v47, 5  ;;  %v3266_v62 = vshrl.u32 %v3061_v18, 16  ;;  %v3269_v60 = vshll.u32 %v3061_v18, 16  ;;  %v3063_v14 = vld [vmem:[#allocation2 + $0x7c] sm:$0x1] }
  0xe9   : > { %5594 = vmatprep.mubr.msk.bf16.mxu1 %vm1041_vm4, %v7110_v9  ;;  %5638 = vmatprep.mubr.msk.bf16.mxu0 %vm1041_vm4, %v7138_v37  ;;  %v7216_v55 = vsel %vm7142_vm7, %v3187_v44, %v3191_v3  ;;  %v3210_v58 = vor.u32 %v3209_v29, %v3205_v50  ;;  %v3275_v43 = vshll.u32 %v3062_v2, 16  ;;  %v3279_v13 = vshrl.u32 %v3062_v2, 16 }
  0xea   : > { %v3220_v20 = vrot.slane %v3218_v19, 4  ;;  %v3223_v1 = vrot.slane %v3221_v23, 5  ;;  %v7218_v63 = vrot.slane %v3227_v31, 5  ;;  %v3244_v28 = vrot.slane %v3242_v33, 4 }
  0xeb   : > { %v3247_v35 = vrot.slane %v3245_v22, 5  ;;  %v7220_v47 = vrot.slane %v3251_v41, 5  ;;  %v3257_v18 = vrot.slane %v3255_v48, 4  ;;  %v3268_v9 = vrot.slane %v3266_v62, 4 }
  0xec   : > { %v3271_v3 = vrot.slane %v3269_v60, 5  ;;  %v3290_v44 = vshrl.u32 %v3064_v10, 16  ;;  %v3293_v29 = vshll.u32 %v3064_v10, 16  ;;  %v7222_v2 = vrot.slane %v3275_v43, 5  ;;  %v5153_v10 = vld [vmem:[%s9552_s5 + $0xa0] sm:$0xff] }
  0xed   : > { %v3281_v19 = vrot.slane %v3279_v13, 4  ;;  %v3299_v23 = vshll.u32 %v3065_v16, 16  ;;  %v3303_v31 = vshrl.u32 %v3065_v16, 16  ;;  %v3211_v33 = vrot.slane %v3210_v58, 4  ;;  %v3066_v16 = vld [vmem:[#allocation2 + $0x8c] sm:$0x1] }
  0xee   : > { %v3224_v22 = vor.u32 %v3223_v1, %v3220_v20  ;;  %v3258_v1 = vor.u32 %v3257_v18, %v7220_v47  ;;  %v3272_v20 = vor.u32 %v3271_v3, %v3268_v9  ;;  %v3285_v62 = vshll.u32 %v3063_v14, 16  ;;  %v5145_v14 = vld [vmem:[%s9549_s2 + $0x160] sm:$0xff]  ;;  %v5146_v18 = vld [vmem:[%s9549_s2 + $0x168] sm:$0xff] }
  0xef   : > { %v3292_v60 = vrot.slane %v3290_v44, 4  ;;  %v3295_v58 = vrot.slane %v3293_v29, 5  ;;  %v3968_v43 = vmul.f32 %v5153_v10, %v6229_v39  ;;  %v3282_v13 = vor.u32 %v3281_v19, %v7222_v2 }
  0xf0   : > { %5595 = vmatmul.mubr.msk.bf16.gmra.mxu1 %vm1041_vm4, %v7112_v53  ;;  %5639 = vmatmul.mubr.msk.bf16.gmra.mxu0 %vm1041_vm4, %v7172_v46  ;;  %v3057_v53 = vld [vmem:[#allocation2 + $0x5c] sm:$0x1]  ;;  %v3225_v54 = vrot.slane %v3224_v22, 4  ;;  %v3259_v44 = vrot.slane %v3258_v1, 4  ;;  %v3273_v19 = vrot.slane %v3272_v20, 4  ;;  %v5179_v20 = vld [vmem:[%s9549_s2 + $0x220] sm:$0xff] }
  0xf1   : > { %5598 = vmatprep.mubr.msk.bf16.mxu1 %vm1041_vm4, %v7136_v32  ;;  %5642 = vmatprep.mubr.msk.bf16.mxu0 %vm1041_vm4, %v7174_v24  ;;  %v3233_v32 = vrot.slane %v3231_v12, 4  ;;  %v7230_v12 = vsel %vm7142_vm7, %v3201_v25, %v3205_v50  ;;  %v3237_v41 = vshll.u32 %v3057_v53, 16  ;;  %v5154_v50 = vld [vmem:[%s9552_s5 + $0xa8] sm:$0xff]  ;;  %v3248_v25 = vor.u32 %v3247_v35, %v3244_v28 }
  0xf2   : > { %9772 = vst [vmem:[#allocation55_spill] sm:$0xff] %v7230_v12  ;;  %v3261_v53 = vshll.u32 %v3060_v26, 16  ;;  %v3969_v35 = vmul.f32 %v5154_v50, %v6229_v39  ;;  %v3067_v26 = vld [vmem:[#allocation2 + $0x94] sm:$0xf]  ;;  %v3283_v22 = vrot.slane %v3282_v13, 4  ;;  %v7264_v50 = vsel %vm7142_vm7, %v3225_v54, %v7218_v63 }
  0xf3   : > { %v3234_v48 = vor.u32 %v3233_v32, %v7218_v63  ;;  %v7248_v32 = vsel %vm7142_vm7, %v3211_v33, %v3215_v45  ;;  %v3239_v28 = vrot.slane %v3237_v41, 5  ;;  %v3249_v3 = vrot.slane %v3248_v25, 4  ;;  %v3068_v33 = vld [vmem:[#allocation2 + $0x98] sm:$0xf]  ;;  %v5180_v63 = vld [vmem:[%s9549_s2 + $0x228] sm:$0xff] }
  0xf4   : > { %9773 = vst [vmem:[#allocation56_spill] sm:$0xff] %v7248_v32  ;;  %v3263_v29 = vrot.slane %v3261_v53, 5  ;;  %v3287_v45 = vrot.slane %v3285_v62, 5  ;;  %v3314_v10 = vshrl.u32 %v3067_v26, 16  ;;  %v3976_v25 = vadd.f32 %v5145_v14, %v3968_v43 }
  0xf5   : > { %v3235_v9 = vrot.slane %v3234_v48, 4  ;;  %v3317_v48 = vshll.u32 %v3067_v26, 16  ;;  %v3977_v1 = vadd.f32 %v5146_v18, %v3969_v35  ;;  %v7285_v54 = vsel %vm7142_vm7, %v3249_v3, %v7220_v47 }
  0xf6   : > { %9775 = vst [vmem:[#allocation57_spill] sm:$0xff] %v7285_v54  ;;  %v3323_v62 = vshll.u32 %v3068_v33, 16  ;;  %v7292_v43 = vsel %vm7142_vm7, %v3259_v44, %v3263_v29  ;;  %v7297_v13 = vsel %vm7142_vm7, %v3273_v19, %v7222_v2  ;;  %v7301_v47 = vsel %vm7142_vm7, %v3283_v22, %v3287_v45  ;;  %v3070_v2 = vld [vmem:[#allocation2 + $0xa4] sm:$0xf] }
  0xf7   : > { %v7274_v53 = vsel %vm7142_vm7, %v3235_v9, %v3239_v28  ;;  %9776 = vst [vmem:[#allocation58_spill] sm:$0xff] %v7292_v43  ;;  %9777 = vst [vmem:[#allocation59_spill] sm:$0xff] %v7301_v47  ;;  %v3316_v26 = vrot.slane %v3314_v10, 4  ;;  %v3319_v9 = vrot.slane %v3317_v48, 5  ;;  %v7305_v14 = vcombine.low %v7196_v40, %v7200_v52 }
  0xf8   : > { %5599 = vmatmul.mubr.msk.bf16.gmra.mxu1 %vm1041_vm4, %v7138_v37  ;;  %5643 = vmatmul.mubr.msk.bf16.gmra.mxu0 %vm1041_vm4, %v7178_v7  ;;  %v3305_v37 = vrot.slane %v3303_v31, 4  ;;  %v3309_v31 = vshll.u32 %v3066_v16, 16  ;;  %v7309_v18 = vcombine.low %v7204_v59, %v7216_v55  ;;  %v4295_v3 = vpack.c.bf16 %v5180_v63, %v5179_v20  ;;  %v5177_v63 = vld [vmem:[%s9549_s2 + $0x210] sm:$0xff] }
  0xf9   : > { %5602 = vmatprep.mubr.msk.bf16.mxu1 %vm1041_vm4, %v7172_v46  ;;  %5646 = vmatprep.mubr.msk.bf16.mxu0 %vm1041_vm4, %v7182_v38  ;;  %v3301_v46 = vrot.slane %v3299_v23, 5  ;;  %v3296_v23 = vor.u32 %v3295_v58, %v3292_v60  ;;  %v3327_v60 = vshrl.u32 %v3068_v33, 16  ;;  %v4955_v58 = vld [vmem:[%s9553_s6 + $0x3] sm:$0x1]  ;;  %v7314_v29 = vcombine.low %v7230_v12, %v7248_v32  ;;  %v5152_v33 = vld [vmem:[%s9552_s5 + $0x98] sm:$0xff] }
  0xfa   : > { %v3311_v28 = vrot.slane %v3309_v31, 5  ;;  %v1516_v44 = vmul.f32 %v4955_v58, %v7017_v11  ;;  %v7316_v19 = vpack.c.bf16 %v3977_v1, %v3976_v25  ;;  %v3325_v45 = vrot.slane %v3323_v62, 5  ;;  %v5151_v31 = vld [vmem:[%s9552_s5 + $0x90] sm:$0xff]  ;;  %v3069_v25 = vld [vmem:[#allocation2 + $0x9c] sm:$0x1] }
  0xfb   : > { %v3306_v41 = vor.u32 %v3305_v37, %v3301_v46  ;;  %v9774_v37 = vcombine.low %v7153_v49, %v7157_v56  ;;  %v3297_v16 = vrot.slane %v3296_v23, 4  ;;  %v3329_v23 = vrot.slane %v3327_v60, 4  ;;  %v3071_v1 = vld [vmem:[#allocation2 + $0xa8] sm:$0xf]  ;;  %v5178_v62 = vld [vmem:[%s9549_s2 + $0x218] sm:$0xff] }
  0xfc   : > { %v7326_v22 = vcombine.low %v7264_v50, %v7274_v53  ;;  %v7334_v10 = vcombine.low %v7297_v13, %v7301_v47  ;;  %v3320_v20 = vor.u32 %v3319_v9, %v3316_v26  ;;  %v3338_v60 = vshrl.u32 %v3070_v2, 16  ;;  %v3073_v12 = vld [vmem:[#allocation2 + $0xb4] sm:$0xf] }
  0xfd   : > { %v3307_v35 = vrot.slane %v3306_v41, 4  ;;  %v7330_v41 = vcombine.low %v7285_v54, %v7292_v43  ;;  %v7338_v48 = vsel %vm7142_vm7, %v3297_v16, %v3301_v46  ;;  %v3341_v58 = vshll.u32 %v3070_v2, 16  ;;  %v9781_v46 = vld [vmem:[#allocation6_spill] sm:$0xff]  ;;  %v5144_v16 = vld [vmem:[%s9549_s2 + $0x158] sm:$0xff] }
  0xfe   : > { %9778 = vst [vmem:[#allocation60_spill] sm:$0xff] %v7334_v10  ;;  %9779 = vst [vmem:[#allocation61_spill] sm:$0xff] %v7338_v48  ;;  %v3967_v26 = vmul.f32 %v5152_v33, %v6229_v39  ;;  %v7361_v9 = vrot.slane %v1516_v44, %v7067_v42  ;;  %v3330_v2 = vor.u32 %v3329_v23, %v3325_v45  ;;  %v3333_v43 = vshll.u32 %v3069_v25, 16 }
  0xff   : > { %v3347_v54 = vshll.u32 %v3071_v1, 16  ;;  %v3351_v32 = vshrl.u32 %v3071_v1, 16  ;;  %v3321_v33 = vrot.slane %v3320_v20, 4  ;;  %v3340_v25 = vrot.slane %v3338_v60, 4 }
 0x100   : > { %5603 = vmatmul.mubr.msk.bf16.gmra.mxu1 %vm1041_vm4, %v7174_v24  ;;  %5647 = vmatmul.mubr.msk.bf16.gmra.mxu0 %vm1041_vm4, %v7186_v8  ;;  %v7380_v23 = vmul.f32 %v7361_v9, %v7057_v27  ;;  %v3343_v1 = vrot.slane %v3341_v58, 5  ;;  %v7384_v52 = vmul.f32 %v7361_v9, %v7081_v21  ;;  %v3975_v56 = vadd.f32 %v5144_v16, %v3967_v26 }
 0x101   : > { %5606 = vmatprep.mubr.msk.bf16.mxu1 %vm1041_vm4, %v7178_v7  ;;  %5698 = vmatprep.mubr.msk.bf16.mxu0 %vm1041_vm4, %v9774_v37  ;;  %v7342_v37 = vsel %vm7142_vm7, %v3307_v35, %v3311_v28  ;;  %v5143_v28 = vld [vmem:[%s9549_s2 + $0x150] sm:$0xff]  ;;  %v3966_v35 = vmul.f32 %v5151_v31, %v6229_v39  ;;  %v3362_v49 = vshrl.u32 %v3073_v12, 16  ;;  %v3331_v20 = vrot.slane %v3330_v2, 4  ;;  %v3072_v2 = vld [vmem:[#allocation2 + $0xac] sm:$0x1] }
 0x102   : > { %9780 = vst [vmem:[#allocation62_spill] sm:$0xff] %v7342_v37  ;;  %v7373_v44 = vcombine.low %v7338_v48, %v7342_v37  ;;  %9785 = vst [vmem:[#allocation64_spill] sm:$0xff] %v7380_v23  ;;  %v3365_v37 = vshll.u32 %v3073_v12, 16  ;;  %v3349_v60 = vrot.slane %v3347_v54, 5  ;;  %v3353_v58 = vrot.slane %v3351_v32, 4  ;;  %v5176_v12 = vld [vmem:[%s9549_s2 + $0x208] sm:$0xff] }
 0x103   : > { %9786 = vst [vmem:[#allocation65_spill] sm:$0xff] %v7384_v52  ;;  %v3974_v40 = vadd.f32 %v5143_v28, %v3966_v35  ;;  %v5175_v28 = vld [vmem:[%s9549_s2 + $0x200] sm:$0xff]  ;;  %v9787_v16 = vunpack.c.l.bf16 %v9781_v46  ;;  %v9789_v32 = vld [vmem:[#allocation9_spill] sm:$0xff]  ;;  %v7411_v48 = vsel %vm7142_vm7, %v3321_v33, %v3325_v45  ;;  %v3344_v52 = vor.u32 %v3343_v1, %v3340_v25  ;;  %v5142_v33 = vld [vmem:[%s9549_s2 + $0x148] sm:$0xff] }
 0x104   : > { %9782 = vst [vmem:[#allocation63_spill] sm:$0xff] %v7373_v44  ;;  %v7407_v54 = vunpack.c.l.bf16 %v9789_v32  ;;  %v3074_v23 = vld [vmem:[#allocation2 + $0xb8] sm:$0xf]  ;;  %v3075_v46 = vld [vmem:[#allocation2 + $0xbc] sm:$0x1]  ;;  %v5141_v45 = vld [vmem:[%s9549_s2 + $0x140] sm:$0xff]  ;;  %v4293_v25 = vpack.c.bf16 %v5176_v12, %v5175_v28 }
 0x105   : > { %v963_v35 = vmul.f32 %v7088_v4, %v9787_v16  ;;  %v3981_v32 = vpack.c.bf16 %v3975_v56, %v3974_v40  ;;  %v9791_v56 = vld [vmem:[#allocation12_spill] sm:$0xff]  ;;  %v3371_v1 = vshll.u32 %v3074_v23, 16 }
 0x106   : > { %9790 = vst [vmem:[#allocation9_spill] sm:$0xff] %v7407_v54  ;;  %v7433_v40 = vunpack.c.l.bf16 %v9791_v56  ;;  %v7450_v56 = vmul.f32 %v7088_v4, %v7407_v54  ;;  %v3077_v54 = vld [vmem:[#allocation2 + $0xc8] sm:$0xf] }
 0x108   : > { %5607 = vmatmul.mubr.msk.bf16.gmra.mxu1 %vm1041_vm4, %v7182_v38  ;;  %5699 = vmatmul.mubr.msk.bf16.vlgmr.msra.gmra.mxu0 %vm1041_vm4, %v7192_v34  ;;  %9792 = vst [vmem:[#allocation12_spill] sm:$0xff] %v7433_v40 }
 0x109   : > { %5658 = vmatprep.mubr.msk.bf16.mxu1 %vm1041_vm4, %v6964_v17  ;;  %5771 = vmatpush3.bf16.msra.mxu0 %v7090_v30  ;;  %v9783_v17 = vld [vmem:[#allocation8_spill] sm:$0xff]  ;;  %v4294_v30 = vpack.c.bf16 %v5178_v62, %v5177_v63  ;;  %v5150_v63 = vld [vmem:[%s9552_s5 + $0x88] sm:$0xff]  ;;  %v3335_v62 = vrot.slane %v3333_v43, 5  ;;  %v3364_v43 = vrot.slane %v3362_v49, 4  ;;  %v3357_v49 = vshll.u32 %v3072_v2, 16 }
 0x10a   : > { %5702 = vmatprep.mubr.msk.bf16.mxu0 %vm1041_vm4, %v7305_v14  ;;  %5772 = vmatprep.subr.bf16.mxu0 %v4295_v3  ;;  %v7376_v31 = vunpack.c.l.bf16 %v9783_v17  ;;  %v5149_v17 = vld [vmem:[%s9552_s5 + $0x80] sm:$0xff]  ;;  %v3965_v47 = vmul.f32 %v5150_v63, %v6229_v39  ;;  %v3345_v63 = vrot.slane %v3344_v52, 4 }
 0x10b   : > { %v3964_v16 = vmul.f32 %v5149_v17, %v6229_v39  ;;  %v7430_v39 = vsel %vm7142_vm7, %v3331_v20, %v3335_v62  ;;  %v3381_v17 = vshll.u32 %v3075_v46, 16  ;;  %v9794_v20 = vld [vmem:[#allocation16_spill] sm:$0xff] }
 0x10c   : > { %9784 = vst [vmem:[#allocation8_spill] sm:$0xff] %v7376_v31  ;;  %v7403_v26 = vmul.f32 %v7088_v4, %v7376_v31  ;;  %v3367_v31 = vrot.slane %v3365_v37, 5  ;;  %v7442_v62 = vunpack.c.l.bf16 %v9794_v20  ;;  %v3973_v28 = vadd.f32 %v5142_v33, %v3965_v47 }
 0x10d   : > { %5773 = vmatpush3.bf16.msra.mxu0 %v4295_v3  ;;  %v9788_v3 = vld [vmem:[#allocation7_spill] sm:$0xff]  ;;  %v7446_v2 = vcombine.low %v7411_v48, %v7430_v39  ;;  %v3359_v47 = vrot.slane %v3357_v49, 5  ;;  %v3373_v33 = vrot.slane %v3371_v1, 5 }
 0x10e   : > { %5774 = vmatprep.subr.bf16.mxu0 %v4294_v30  ;;  %v9793_v37 = vunpack.c.l.bf16 %v9788_v3  ;;  %9795 = vst [vmem:[#allocation16_spill] sm:$0xff] %v7442_v62  ;;  %v9797_v3 = vld [vmem:[#allocation10_spill] sm:$0xff] }
 0x10f   : > { %9796 = vst [vmem:[#allocation66_spill] sm:$0xff] %v7446_v2 }
 0x110   : > { %5659 = vmatmul.mubr.msk.bf16.vlgmr.msra.gmra.mxu1 %vm1041_vm4, %v6971_v6  ;;  %5703 = vmatmul.mubr.msk.bf16.gmra.mxu0 %vm1041_vm4, %v7309_v18  ;;  %v3354_v6 = vor.u32 %v3353_v58, %v3349_v60  ;;  %v3972_v58 = vadd.f32 %v5141_v45, %v3964_v16  ;;  %v3076_v16 = vld [vmem:[#allocation2 + $0xc4] sm:$0xf] }
 0x111   : > { %5731 = vmatpush3.bf16.msra.mxu1 %v7115_v51  ;;  %5662 = vmatprep.mubr.msk.bf16.mxu1 %vm1041_vm4, %v7014_v61  ;;  %v964_v51 = vmul.f32 %v7088_v4, %v9793_v37  ;;  %v3375_v61 = vshrl.u32 %v3074_v23, 16  ;;  %v5460_v12 = vpop.f32.mrf.mxu0  ;;  %v3368_v37 = vor.u32 %v3367_v31, %v3364_v43  ;;  %v7453_v23 = vunpack.c.l.bf16 %v9797_v3  ;;  %v9798_v3 = vld [vmem:[#allocation14_spill] sm:$0xff] }
 0x112   : > { %5706 = vmatprep.mubr.msk.bf16.mxu0 %vm1041_vm4, %v7314_v29  ;;  %5732 = vmatprep.subr.bf16.mxu1 %v7316_v19  ;;  %v7456_v52 = vadd.f32 %v5460_v12, %v963_v35  ;;  %v3355_v46 = vrot.slane %v3354_v6, 4  ;;  %v7462_v31 = vrot.slane %v3381_v17, 5  ;;  %v7465_v43 = vunpack.c.l.bf16 %v9798_v3 }
 0x113   : > { %5775 = vmatpush3.bf16.msra.mxu0 %v4294_v30  ;;  %v7460_v30 = vmul.f32 %v7088_v4, %v7433_v40  ;;  %v1124_v45 = vpop.f32.mrf.mxu0  ;;  %v3377_v20 = vrot.slane %v3375_v61, 4  ;;  %v7472_v35 = vsel %vm7142_vm7, %v3345_v63, %v3349_v60  ;;  %v7476_v6 = vmul.f32 %v7088_v4, %v7442_v62  ;;  %v4982_v63 = vld [vmem:[%s9553_s6 + $0x6] sm:$0x1]  ;;  %v9806_v62 = vld [vmem:[#allocation17_spill] sm:$0xff]  ;;  %v9808_v40 = vld [vmem:[#allocation11_spill] sm:$0xff] }
 0x114   : > { %5776 = vmatprep.subr.bf16.mxu0 %v4293_v25  ;;  %9799 = vst [vmem:[#allocation10_spill] sm:$0xff] %v7465_v43  ;;  %9801 = vst [vmem:[#allocation67_spill] sm:$0xff] %v7472_v35  ;;  %v3980_v49 = vpack.c.bf16 %v3973_v28, %v3972_v58  ;;  %v3369_v61 = vrot.slane %v3368_v37, 4  ;;  %v3386_v60 = vshrl.u32 %v3076_v16, 16  ;;  %v3389_v17 = vshll.u32 %v3076_v16, 16 }
 0x115   : > { %5733 = vmatpush3.bf16.msra.mxu1 %v7316_v19  ;;  %v7468_v19 = vadd.f32 %v1124_v45, %v7093_v0  ;;  %v5461_v1 = vpop.f32.mrf.mxu0  ;;  %v7484_v0 = vmul.f32 %v7088_v4, %v7453_v23  ;;  %v3395_v58 = vshll.u32 %v3077_v54, 16  ;;  %v3399_v28 = vshrl.u32 %v3077_v54, 16  ;;  %v9804_v45 = vld [vmem:[#allocation13_spill] sm:$0xff] }
 0x116   : > { %5734 = vmatprep.subr.bf16.mxu1 %v3981_v32  ;;  %v5476_v12 = vpop.f32.mrf.mxu1  ;;  %v3378_v16 = vor.u32 %v3377_v20, %v3373_v33  ;;  %v7500_v3 = vunpack.c.l.bf16 %v9804_v45  ;;  %v7516_v54 = vmul.f32 %v7088_v4, %v7465_v43  ;;  %v3391_v20 = vrot.slane %v3389_v17, 5  ;;  %v3082_v17 = vld [vmem:[#allocation2 + $0xe4] sm:$0xf] }
 0x117   : > { %9800 = vst [vmem:[#allocation14_spill] sm:$0xff] %v7468_v19  ;;  %5777 = vmatpush3.bf16.msra.mxu0 %v4293_v25  ;;  %v7497_v25 = vsel %vm7142_vm7, %v3355_v46, %v3359_v47  ;;  %v1127_v37 = vpop.f32.mrf.mxu0  ;;  %v7506_v19 = vunpack.c.l.bf16 %v9808_v40  ;;  %v7525_v40 = vsel %vm7142_vm7, %v3369_v61, %v3373_v33  ;;  %v3401_v43 = vrot.slane %v3399_v28, 4 }
 0x118   : > { %5663 = vmatmul.mubr.msk.bf16.gmra.mxu1 %vm1041_vm4, %v7021_v15  ;;  %5707 = vmatmul.mubr.msk.bf16.gmra.mxu0 %vm1041_vm4, %v7326_v22  ;;  %v7493_v15 = vadd.f32 %v5461_v1, %v964_v51  ;;  %9803 = vst [vmem:[#allocation69_spill] sm:$0xff] %v7497_v25  ;;  %9805 = vst [vmem:[#allocation13_spill] sm:$0xff] %v7500_v3  ;;  %v7509_v51 = vadd.f32 %v5476_v12, %v7403_v26  ;;  %v1188_v47 = vpop.f32.mrf.mxu1  ;;  %v3388_v26 = vrot.slane %v3386_v60, 4  ;;  %v9812_v1 = vld [vmem:[#allocation41_spill] sm:$0xff] }
 0x119   : > { %5666 = vmatprep.mubr.msk.bf16.mxu1 %vm1041_vm4, %v7071_v36  ;;  %5710 = vmatprep.mubr.msk.bf16.mxu0 %vm1041_vm4, %v7330_v41  ;;  %v7503_v36 = vunpack.c.l.bf16 %v9806_v62  ;;  %v7512_v46 = vadd.f32 %v1127_v37, %v7108_v5  ;;  %v7521_v62 = vcombine.low %v7472_v35, %v7497_v25  ;;  %v3079_v5 = vld [vmem:[#allocation2 + $0xd4] sm:$0xf]  ;;  %v7528_v12 = vadd.f32 %v1188_v47, %v9812_v1  ;;  %v9814_v37 = vld [vmem:[#allocation15_spill] sm:$0xff] }
 0x11a   : > { %9802 = vst [vmem:[#allocation68_spill] sm:$0xff] %v7493_v15  ;;  %5735 = vmatpush3.bf16.msra.mxu1 %v3981_v32  ;;  %9809 = vst [vmem:[#allocation11_spill] sm:$0xff] %v7509_v51  ;;  %v1827_v32 = vmul.f32 %v4982_v63, %v7017_v11  ;;  %v7531_v45 = vunpack.c.l.bf16 %v9814_v37  ;;  %v3078_v51 = vld [vmem:[#allocation2 + $0xcc] sm:$0x1]  ;;  %v7533_v63 = vrot.slane %v3395_v58, 5  ;;  %v5477_v25 = vpop.f32.mrf.mxu1  ;;  %v3379_v35 = vrot.slane %v3378_v16, 4 }
 0x11b   : > { %9807 = vst [vmem:[#allocation17_spill] sm:$0xff] %v7503_v36  ;;  %9810 = vst [vmem:[#allocation70_spill] sm:$0xff] %v7512_v46  ;;  %5736 = vmatprep.subr.bf16.mxu1 %v3980_v49  ;;  %v3080_v11 = vld [vmem:[#allocation2 + $0xd8] sm:$0xf]  ;;  %v968_v33 = vmul.f32 %v7088_v4, %v7500_v3  ;;  %v7539_v61 = vmul.f32 %v7088_v4, %v7503_v36  ;;  %v966_v60 = vmul.f32 %v7088_v4, %v7506_v19  ;;  %v3083_v1 = vld [vmem:[#allocation2 + $0xe8] sm:$0xf] }
 0x11c   : > { %9811 = vst [vmem:[#allocation71_spill] sm:$0xff] %v7521_v62  ;;  %9813 = vst [vmem:[#allocation41_spill] sm:$0xff] %v7528_v12  ;;  %v7544_v47 = vadd.f32 %v5477_v25, %v7450_v56  ;;  %v3410_v58 = vshrl.u32 %v3079_v5, 16  ;;  %v3413_v28 = vshll.u32 %v3079_v5, 16  ;;  %v7547_v16 = vrot.slane %v1827_v32, %v7067_v42  ;;  %v9817_v37 = vld [vmem:[#allocation40_spill] sm:$0xff]  ;;  %v1191_v36 = vpop.f32.mrf.mxu1  ;;  %v9818_v15 = vld [vmem:[#allocation42_spill] sm:$0xff] }
 0x11d   : > { %9815 = vst [vmem:[#allocation15_spill] sm:$0xff] %v7531_v45  ;;  %v3392_v12 = vor.u32 %v3391_v20, %v3388_v26  ;;  %v3405_v46 = vshll.u32 %v3078_v51, 16  ;;  %v3423_v3 = vshrl.u32 %v3080_v11, 16  ;;  %v9819_v56 = vld [vmem:[#allocation44_spill] sm:$0xff]  ;;  %v3402_v32 = vor.u32 %v3401_v43, %v7533_v63 }
 0x11e   : > { %5737 = vmatpush3.bf16.msra.mxu1 %v3980_v49  ;;  %9816 = vst [vmem:[#allocation72_spill] sm:$0xff] %v7544_v47  ;;  %v3419_v49 = vshll.u32 %v3080_v11, 16  ;;  %v7558_v25 = vadd.f32 %v1191_v36, %v9819_v56  ;;  %v3434_v5 = vshrl.u32 %v3082_v17, 16  ;;  %v5464_v26 = vpop.f32.mrf.mxu0  ;;  %v3437_v51 = vshll.u32 %v3082_v17, 16 }
 0x11f   : > { %v3443_v20 = vshll.u32 %v3083_v1, 16  ;;  %v3447_v11 = vshrl.u32 %v3083_v1, 16  ;;  %v7570_v47 = vadd.f32 %v5464_v26, %v7460_v30  ;;  %v7574_v36 = vmul.f32 %v7088_v4, %v7531_v45  ;;  %v9824_v1 = vld [vmem:[#allocation20_spill] sm:$0xff] }
 0x120   : > { %5667 = vmatmul.mubr.msk.bf16.gmra.mxu1 %vm1041_vm4, %v9817_v37  ;;  %5711 = vmatmul.mubr.msk.bf16.gmra.mxu0 %vm1041_vm4, %v7334_v10  ;;  %9820 = vst [vmem:[#allocation40_spill] sm:$0xff] %v7558_v25  ;;  %v7563_v37 = vmul.f32 %v7547_v16, %v7057_v27  ;;  %v3412_v43 = vrot.slane %v3410_v58, 4  ;;  %v3415_v56 = vrot.slane %v3413_v28, 5  ;;  %v7579_v27 = vsel %vm7142_vm7, %v3379_v35, %v7462_v31  ;;  %v1140_v17 = vpop.f32.mrf.mxu0  ;;  %v3085_v58 = vld [vmem:[#allocation2 + $0xf4] sm:$0xf] }
 0x121   : > { %5670 = vmatprep.mubr.msk.bf16.mxu1 %vm1041_vm4, %v9818_v15  ;;  %5714 = vmatprep.mubr.msk.bf16.mxu0 %vm1041_vm4, %v7373_v44  ;;  %v7567_v15 = vmul.f32 %v7547_v16, %v7081_v21  ;;  %9823 = vst [vmem:[#allocation73_spill] sm:$0xff] %v7570_v47  ;;  %v7582_v25 = vunpack.c.l.bf16 %v9824_v1  ;;  %v3081_v21 = vld [vmem:[#allocation2 + $0xdc] sm:$0x1]  ;;  %v7585_v30 = vadd.f32 %v1140_v17, %v7484_v0  ;;  %v3393_v26 = vrot.slane %v3392_v12, 4  ;;  %v3086_v35 = vld [vmem:[#allocation2 + $0xf8] sm:$0xf] }
 0x122   : > { %9821 = vst [vmem:[#allocation42_spill] sm:$0xff] %v7563_v37  ;;  %v3425_v37 = vrot.slane %v3423_v3, 4  ;;  %v3403_v45 = vrot.slane %v3402_v32, 4  ;;  %v3407_v42 = vrot.slane %v3405_v46, 5  ;;  %v5465_v28 = vpop.f32.mrf.mxu0  ;;  %v3436_v44 = vrot.slane %v3434_v5, 4  ;;  %v9827_v12 = vld [vmem:[#allocation43_spill] sm:$0xff] }
 0x123   : > { %9822 = vst [vmem:[#allocation44_spill] sm:$0xff] %v7567_v15  ;;  %v3421_v15 = vrot.slane %v3419_v49, 5  ;;  %9825 = vst [vmem:[#allocation20_spill] sm:$0xff] %v7585_v30  ;;  %v3439_v47 = vrot.slane %v3437_v51, 5  ;;  %v7587_v10 = vrot.slane %v3443_v20, 5  ;;  %v3449_v31 = vrot.slane %v3447_v11, 4 }
 0x124   : > { %v7591_v1 = vcombine.low %v7525_v40, %v7579_v27  ;;  %v7593_v49 = vadd.f32 %v5465_v28, %v968_v33  ;;  %v3416_v3 = vor.u32 %v3415_v56, %v3412_v43  ;;  %v3429_v0 = vshll.u32 %v3081_v21, 16  ;;  %v3084_v17 = vld [vmem:[#allocation2 + $0xec] sm:$0x1]  ;;  %v1143_v46 = vpop.f32.mrf.mxu0  ;;  %v9828_v11 = vld [vmem:[#allocation45_spill] sm:$0xff] }
 0x125   : > { %v971_v32 = vmul.f32 %v7088_v4, %v7582_v25  ;;  %v3426_v5 = vor.u32 %v3425_v37, %v3421_v15  ;;  %v3458_v51 = vshrl.u32 %v3085_v58, 16  ;;  %v3461_v20 = vshll.u32 %v3085_v58, 16 }
 0x126   : > { %9826 = vst [vmem:[#allocation74_spill] sm:$0xff] %v7593_v49  ;;  %v7605_v33 = vadd.f32 %v1143_v46, %v966_v60  ;;  %v7610_v43 = vsel %vm7142_vm7, %v3393_v26, %v7533_v63  ;;  %v3467_v56 = vshll.u32 %v3086_v35, 16  ;;  %v3471_v21 = vshrl.u32 %v3086_v35, 16  ;;  %v9834_v35 = vld [vmem:[#allocation21_spill] sm:$0xff] }
 0x127   : > { %9830 = vst [vmem:[#allocation45_spill] sm:$0xff] %v7610_v43  ;;  %v7614_v37 = vsel %vm7142_vm7, %v3403_v45, %v3407_v42  ;;  %v3440_v58 = vor.u32 %v3439_v47, %v3436_v44  ;;  %v3417_v60 = vrot.slane %v3416_v3, 4  ;;  %v3431_v46 = vrot.slane %v3429_v0, 5 }
 0x128   : > { %5671 = vmatmul.mubr.msk.bf16.gmra.mxu1 %vm1041_vm4, %v9827_v12  ;;  %5715 = vmatmul.mubr.msk.bf16.gmra.mxu0 %vm1041_vm4, %v7446_v2  ;;  %9829 = vst [vmem:[#allocation43_spill] sm:$0xff] %v7605_v33  ;;  %v5480_v28 = vpop.f32.mrf.mxu1  ;;  %9831 = vst [vmem:[#allocation75_spill] sm:$0xff] %v7614_v37  ;;  %v3450_v12 = vor.u32 %v3449_v31, %v7587_v10  ;;  %v9833_v2 = vld [vmem:[#allocation18_spill] sm:$0xff]  ;;  %v3427_v26 = vrot.slane %v3426_v5, 4  ;;  %v7624_v49 = vunpack.c.l.bf16 %v9834_v35  ;;  %v3460_v30 = vrot.slane %v3458_v51, 4 }
 0x129   : > { %5674 = vmatprep.mubr.msk.bf16.mxu1 %vm1041_vm4, %v9828_v11  ;;  %5718 = vmatprep.mubr.msk.bf16.mxu0 %vm1041_vm4, %v7521_v62  ;;  %v3453_v11 = vshll.u32 %v3084_v17, 16  ;;  %v7618_v62 = vadd.f32 %v5480_v28, %v7476_v6  ;;  %v7621_v33 = vunpack.c.l.bf16 %v9833_v2  ;;  %v3463_v42 = vrot.slane %v3461_v20, 5  ;;  %v3087_v6 = vld [vmem:[#allocation2 + $0xfc] sm:$0x1]  ;;  %v9838_v20 = vld [vmem:[#allocation19_spill] sm:$0xff] }
 0x12a   : > { %v1204_v63 = vpop.f32.mrf.mxu1  ;;  %v7631_v45 = vcombine.low %v7610_v43, %v7614_v37  ;;  %v3469_v47 = vrot.slane %v3467_v56, 5  ;;  %v3473_v31 = vrot.slane %v3471_v21, 4  ;;  %v3441_v2 = vrot.slane %v3440_v58, 4 }
 0x12b   : > { %9832 = vst [vmem:[#allocation76_spill] sm:$0xff] %v7618_v62  ;;  %v7627_v44 = vadd.f32 %v1204_v63, %v7516_v54  ;;  %v3451_v0 = vrot.slane %v3450_v12, 4  ;;  %v3455_v17 = vrot.slane %v3453_v11, 5  ;;  %v7638_v51 = vsel %vm7142_vm7, %v3417_v60, %v3421_v15  ;;  %v9839_v63 = vld [vmem:[#allocation46_spill] sm:$0xff]  ;;  %v9841_v11 = vld [vmem:[#allocation52_spill] sm:$0xff] }
 0x12c   : > { %v5481_v3 = vpop.f32.mrf.mxu1  ;;  %9837 = vst [vmem:[#allocation77_spill] sm:$0xff] %v7638_v51  ;;  %v969_v54 = vmul.f32 %v7088_v4, %v7621_v33  ;;  %v7643_v28 = vunpack.c.l.bf16 %v9838_v20  ;;  %v972_v15 = vmul.f32 %v7088_v4, %v7624_v49  ;;  %v3464_v58 = vor.u32 %v3463_v42, %v3460_v30  ;;  %v9843_v20 = vld [vmem:[#allocation24_spill] sm:$0xff] }
 0x12d   : > { %9835 = vst [vmem:[#allocation18_spill] sm:$0xff] %v7627_v44  ;;  %v7634_v5 = vadd.f32 %v5481_v3, %v7539_v61  ;;  %v7651_v61 = vsel %vm7142_vm7, %v3427_v26, %v3431_v46  ;;  %v3477_v12 = vshll.u32 %v3087_v6, 16  ;;  %v3474_v3 = vor.u32 %v3473_v31, %v3469_v47  ;;  %v9848_v31 = vld [vmem:[#allocation22_spill] sm:$0xff] }
 0x12e   : > { %v1207_v56 = vpop.f32.mrf.mxu1  ;;  %9840 = vst [vmem:[#allocation19_spill] sm:$0xff] %v7651_v61  ;;  %v7665_v46 = vunpack.c.l.bf16 %v9843_v20  ;;  %v7670_v30 = vsel %vm7142_vm7, %v3441_v2, %v7587_v10  ;;  %v7674_v42 = vsel %vm7142_vm7, %v3451_v0, %v3455_v17  ;;  %v7682_v6 = vcombine.low %v7638_v51, %v7651_v61 }
 0x12f   : > { %9836 = vst [vmem:[#allocation21_spill] sm:$0xff] %v7634_v5  ;;  %v7658_v60 = vadd.f32 %v1207_v56, %v7574_v36  ;;  %9845 = vst [vmem:[#allocation24_spill] sm:$0xff] %v7670_v30  ;;  %v7691_v2 = vcombine.low %v7670_v30, %v7674_v42  ;;  %v3465_v0 = vrot.slane %v3464_v58, 4  ;;  %v3475_v17 = vrot.slane %v3474_v3, 4  ;;  %v9855_v58 = vld [vmem:[#allocation28_spill] sm:$0xff]  ;;  %v9864_v30 = vld [vmem:[#allocation27_spill] sm:$0xff] }
 0x130   : > { %5675 = vmatmul.mubr.msk.bf16.gmra.mxu1 %vm1041_vm4, %v9839_v63  ;;  %5719 = vmatmul.mubr.msk.bf16.gmra.mxu0 %vm1041_vm4, %v7591_v1  ;;  %v5468_v21 = vpop.f32.mrf.mxu0  ;;  %9844 = vst [vmem:[#allocation52_spill] sm:$0xff] %v7665_v46  ;;  %9846 = vst [vmem:[#allocation78_spill] sm:$0xff] %v7674_v42  ;;  %v7685_v63 = vunpack.c.l.bf16 %v9848_v31  ;;  %v9853_v31 = vld [vmem:[#allocation23_spill] sm:$0xff]  ;;  %v9872_v5 = vld [vmem:[#allocation33_spill] sm:$0xff] }
 0x131   : > { %5678 = vmatprep.mubr.msk.bf16.mxu1 %vm1041_vm4, %v9841_v11  ;;  %9842 = vst [vmem:[#allocation46_spill] sm:$0xff] %v7658_v60  ;;  %5722 = vmatprep.mubr.msk.bf16.mxu0 %vm1041_vm4, %v7631_v45  ;;  %v7662_v35 = vadd.f32 %v5468_v21, %v971_v32  ;;  %v970_v32 = vmul.f32 %v7088_v4, %v7643_v28  ;;  %9847 = vst [vmem:[#allocation79_spill] sm:$0xff] %v7682_v6  ;;  %v3479_v21 = vrot.slane %v3477_v12, 5  ;;  %v9851_v11 = vld [vmem:[#allocation25_spill] sm:$0xff] }
 0x132   : > { %v1156_v26 = vpop.f32.mrf.mxu0  ;;  %9849 = vst [vmem:[#allocation22_spill] sm:$0xff] %v7685_v63  ;;  %9850 = vst [vmem:[#allocation80_spill] sm:$0xff] %v7691_v2  ;;  %v7696_v20 = vunpack.c.l.bf16 %v9851_v11  ;;  %v7701_v43 = vunpack.c.l.bf16 %v9853_v31  ;;  %v7710_v12 = vunpack.c.l.bf16 %v9855_v58 }
 0x133   : > { %v7676_v36 = vadd.f32 %v1156_v26, %v969_v54  ;;  %v987_v54 = vmul.f32 %v7088_v4, %v7665_v46  ;;  %v7780_v46 = vunpack.c.l.bf16 %v9872_v5 }
 0x134   : > { %v5469_v56 = vpop.f32.mrf.mxu0  ;;  %9852 = vst [vmem:[#allocation25_spill] sm:$0xff] %v7696_v20  ;;  %9854 = vst [vmem:[#allocation23_spill] sm:$0xff] %v7701_v43  ;;  %v988_v11 = vmul.f32 %v7088_v4, %v7696_v20  ;;  %v986_v58 = vmul.f32 %v7088_v4, %v7701_v43  ;;  %v1529_v43 = vmul.f32 %v7361_v9, %v7621_v33 }
 0x135   : > { %v7687_v10 = vadd.f32 %v5469_v56, %v972_v15  ;;  %v985_v15 = vmul.f32 %v7088_v4, %v7685_v63  ;;  %9873 = vst [vmem:[#allocation33_spill] sm:$0xff] %v7780_v46  ;;  %v992_v5 = vmul.f32 %v7088_v4, %v7780_v46 }
 0x136   : > { %v1159_v26 = vpop.f32.mrf.mxu0 }
 0x137   : > { %v7698_v37 = vadd.f32 %v1159_v26, %v970_v32  ;;  %v7718_v32 = vsel %vm7142_vm7, %v3465_v0, %v3469_v47  ;;  %v9859_v26 = vld [vmem:[#allocation26_spill] sm:$0xff]  ;;  %v975_v47 = vmul.f32 %v7088_v4, %v7710_v12  ;;  %v9862_v0 = vld [vmem:[#allocation29_spill] sm:$0xff] }
 0x138   : > { %5679 = vmatmul.mubr.msk.bf16.gmra.mxu1 %vm1041_vm4, %v7174_v24  ;;  %5723 = vmatmul.mubr.msk.bf16.gmra.mxu0 %vm1041_vm4, %v7682_v6  ;;  %v5484_v3 = vpop.f32.mrf.mxu1  ;;  %9856 = vst [vmem:[#allocation28_spill] sm:$0xff] %v7718_v32  ;;  %v7722_v24 = vsel %vm7142_vm7, %v3475_v17, %v3479_v21  ;;  %v7729_v31 = vunpack.c.l.bf16 %v9859_v26  ;;  %v7742_v17 = vunpack.c.l.bf16 %v9862_v0 }
 0x139   : > { %5682 = vmatprep.mubr.msk.bf16.mxu1 %vm1041_vm4, %v7178_v7  ;;  %5726 = vmatprep.mubr.msk.bf16.mxu0 %vm1041_vm4, %v7691_v2  ;;  %9857 = vst [vmem:[#allocation81_spill] sm:$0xff] %v7722_v24  ;;  %v7724_v56 = vadd.f32 %v5484_v3, %v987_v54  ;;  %v7739_v21 = vcombine.low %v7718_v32, %v7722_v24 }
 0x13a   : > { %v1220_v7 = vpop.f32.mrf.mxu1  ;;  %v973_v26 = vmul.f32 %v7088_v4, %v7729_v31 }
 0x13b   : > { %9858 = vst [vmem:[#allocation82_spill] sm:$0xff] %v7724_v56  ;;  %v7733_v42 = vadd.f32 %v1220_v7, %v985_v15  ;;  %9861 = vst [vmem:[#allocation83_spill] sm:$0xff] %v7739_v21  ;;  %v7749_v56 = vunpack.c.l.bf16 %v9864_v30  ;;  %v9866_v30 = vld [vmem:[#allocation32_spill] sm:$0xff] }
 0x13c   : > { %v5485_v54 = vpop.f32.mrf.mxu1  ;;  %v7764_v0 = vunpack.c.l.bf16 %v9866_v30 }
 0x13d   : > { %9860 = vst [vmem:[#allocation26_spill] sm:$0xff] %v7733_v42  ;;  %v7744_v3 = vadd.f32 %v5485_v54, %v988_v11  ;;  %v976_v11 = vmul.f32 %v7088_v4, %v7742_v17 }
 0x13e   : > { %v1223_v15 = vpop.f32.mrf.mxu1  ;;  %9867 = vst [vmem:[#allocation32_spill] sm:$0xff] %v7764_v0  ;;  %v991_v30 = vmul.f32 %v7088_v4, %v7764_v0 }
 0x13f   : > { %9863 = vst [vmem:[#allocation29_spill] sm:$0xff] %v7744_v3  ;;  %v5472_v7 = vpop.f32.mrf.mxu0  ;;  %v7753_v42 = vadd.f32 %v1223_v15, %v986_v58  ;;  %v974_v58 = vmul.f32 %v7088_v4, %v7749_v56  ;;  %v5861_v3 = vld [vmem:[#allocation2 + $0x118] sm:$0xf] }
 0x140   : > { %5683 = vmatmul.mubr.msk.bf16.gmra.mxu1 %vm1041_vm4, %v7182_v38  ;;  %v7755_v60 = vadd.f32 %v5472_v7, %v975_v47  ;;  %5727 = vmatmul.mubr.msk.bf16.gmra.mxu0 %vm1041_vm4, %v7739_v21  ;;  %v9869_v47 = vld [vmem:[#allocation30_spill] sm:$0xff] }
 0x141   : > { %9865 = vst [vmem:[#allocation27_spill] sm:$0xff] %v7753_v42  ;;  %5686 = vmatprep.mubr.msk.bf16.mxu1 %vm1041_vm4, %v7186_v8  ;;  %v1172_v54 = vpop.f32.mrf.mxu0  ;;  %5778 = vmatprep.mubr.msk.bf16.mxu0 %vm1041_vm4, %v7305_v14  ;;  %v7773_v15 = vunpack.c.l.bf16 %v9869_v47  ;;  %v5860_v42 = vld [vmem:[#allocation2 + $0x114] sm:$0xf]  ;;  %v9875_v47 = vld [vmem:[#allocation31_spill] sm:$0xff] }
 0x142   : > { %v7768_v38 = vadd.f32 %v1172_v54, %v973_v26  ;;  %v5082_v20 = vcombine.low %v5860_v42, %v5861_v3  ;;  %v7787_v62 = vunpack.c.l.bf16 %v9875_v47 }
 0x143   : > { %9870 = vst [vmem:[#allocation30_spill] sm:$0xff] %v7773_v15  ;;  %v5473_v7 = vpop.f32.mrf.mxu0  ;;  %v989_v44 = vmul.f32 %v7088_v4, %v7773_v15 }
 0x144   : > { %9868 = vst [vmem:[#allocation84_spill] sm:$0xff] %v7768_v38  ;;  %v7775_v8 = vadd.f32 %v5473_v7, %v976_v11  ;;  %9876 = vst [vmem:[#allocation31_spill] sm:$0xff] %v7787_v62 }
 0x145   : > { %v1175_v26 = vpop.f32.mrf.mxu0 }
 0x146   : > { %9871 = vst [vmem:[#allocation85_spill] sm:$0xff] %v7775_v8  ;;  %v7782_v54 = vadd.f32 %v1175_v26, %v974_v58 }
 0x147   : > { %v5540_v24 = vpop.f32.mrf.mxu0 }
 0x148   : > { %9874 = vst [vmem:[#allocation86_spill] sm:$0xff] %v7782_v54  ;;  %v5488_v21 = vpop.f32.mrf.mxu1  ;;  %5687 = vmatmul.mubr.msk.bf16.gmra.mxu1 %vm1041_vm4, %v5082_v20  ;;  %5779 = vmatmul.mubr.msk.bf16.vlgmr.msra.gmra.mxu0 %vm1041_vm4, %v7309_v18  ;;  %v990_v20 = vmul.f32 %v7088_v4, %v7787_v62  ;;  %v1525_v4 = vmul.f32 %v7361_v9, %v7453_v23 }
 0x149   : > { %v7792_v42 = vadd.f32 %v5488_v21, %v991_v30  ;;  %5738 = vmatprep.mubr.msk.bf16.mxu1 %vm1041_vm4, %v7192_v34  ;;  %v7798_v3 = vpop.f32.mrf.mxu0  ;;  %5782 = vmatprep.mubr.msk.bf16.mxu0 %vm1041_vm4, %v7314_v29  ;;  %v7813_v34 = vunpack.c.l.bf16 %v7204_v59  ;;  %v7833_v59 = vunpack.c.l.bf16 %v7297_v13  ;;  %v7851_v13 = vunpack.c.l.bf16 %v7525_v40 }
 0x14a   : > { %v1236_v11 = vpop.f32.mrf.mxu1  ;;  %v1526_v62 = vmul.f32 %v7361_v9, %v7506_v19 }
 0x14b   : > { %9877 = vst [vmem:[#allocation87_spill] sm:$0xff] %v7792_v42  ;;  %v7802_v58 = vadd.f32 %v1236_v11, %v989_v44  ;;  %v7806_v7 = vpop.f32.mrf.mxu0  ;;  %9880 = vst [vmem:[#allocation90_spill] sm:$0xff] %v7813_v34  ;;  %v7816_v42 = vunpack.c.l.bf16 %v7216_v55  ;;  %v7819_v44 = vunpack.c.l.bf16 %v7264_v50  ;;  %v9884_v55 = vld [vmem:[#allocation59_spill] sm:$0xff]  ;;  %v7839_v50 = vunpack.c.l.bf16 %v7411_v48 }
 0x14c   : > { %v5489_v21 = vpop.f32.mrf.mxu1  ;;  %9883 = vst [vmem:[#allocation93_spill] sm:$0xff] %v7833_v59  ;;  %9888 = vst [vmem:[#allocation96_spill] sm:$0xff] %v7851_v13  ;;  %v9892_v13 = vld [vmem:[#allocation14_spill] sm:$0xff]  ;;  %v9900_v59 = vld [vmem:[#allocation60_spill] sm:$0xff] }
 0x14d   : > { %9878 = vst [vmem:[#allocation88_spill] sm:$0xff] %v7802_v58  ;;  %v7808_v30 = vadd.f32 %v5489_v21, %v992_v5  ;;  %v7810_v26 = vpop.f32.mrf.mxu0  ;;  %9881 = vst [vmem:[#allocation91_spill] sm:$0xff] %v7816_v42  ;;  %v7825_v58 = vld [vmem:[#allocation2 + $0x104] sm:$0xf]  ;;  %v7827_v5 = vld [vmem:[#allocation2 + $0x108] sm:$0xf]  ;;  %v7830_v21 = vunpack.c.l.bf16 %v7274_v53  ;;  %v7848_v53 = vunpack.c.l.bf16 %v7430_v39  ;;  %v7864_v39 = vunpack.c.l.bf16 %v7579_v27 }
 0x14e   : > { %v1239_v47 = vpop.f32.mrf.mxu1  ;;  %9886 = vst [vmem:[#allocation94_spill] sm:$0xff] %v7839_v50 }
 0x14f   : > { %9879 = vst [vmem:[#allocation89_spill] sm:$0xff] %v7808_v30  ;;  %v7821_v11 = vadd.f32 %v1239_v47, %v990_v20  ;;  %v7836_v30 = vunpack.c.l.bf16 %v9884_v55  ;;  %9887 = vst [vmem:[#allocation95_spill] sm:$0xff] %v7848_v53  ;;  %v9893_v53 = vld [vmem:[#allocation12_spill] sm:$0xff] }
 0x150   : > { %v5500_v20 = vpop.f32.mrf.mxu1  ;;  %5739 = vmatmul.mubr.msk.bf16.vlgmr.msra.gmra.mxu1 %vm1041_vm4, %v7305_v14  ;;  %v7843_v47 = vpop.f32.mrf.mxu0  ;;  %5783 = vmatmul.mubr.msk.bf16.gmra.mxu0 %vm1041_vm4, %v7326_v22  ;;  %v7861_v14 = vld [vmem:[#allocation2 + $0x10c] sm:$0x1]  ;;  %v1836_v15 = vmul.f32 %v7547_v16, %v9893_v53  ;;  %v1527_v6 = vmul.f32 %v7361_v9, %v9893_v53 }
 0x151   : > { %9882 = vst [vmem:[#allocation92_spill] sm:$0xff] %v7821_v11  ;;  %9885 = vst [vmem:[#allocation59_spill] sm:$0xff] %v7836_v30  ;;  %v1482_v55 = vadd.f32 %v5500_v20, %v7456_v52  ;;  %v9889_v11 = vld [vmem:[#allocation6_spill] sm:$0xff]  ;;  %5742 = vmatprep.mubr.msk.bf16.mxu1 %vm1041_vm4, %v7309_v18  ;;  %5786 = vmatprep.mubr.msk.bf16.mxu0 %vm1041_vm4, %v7330_v41  ;;  %v3921_v52 = vshrl.u32 %v7825_v58, 16  ;;  %v7886_v30 = vld [vmem:[#allocation2 + $0x114] sm:$0xf] }
 0x152   : > { %v9890_v48 = vunpack.c.l.bf16 %v9889_v11  ;;  %9891 = vst [vmem:[#allocation6_spill] sm:$0xff] %v7864_v39  ;;  %v1353_v0 = vpop.f32.mrf.mxu1  ;;  %v7866_v40 = vpop.f32.mrf.mxu0  ;;  %v9894_v39 = vld [vmem:[#allocation7_spill] sm:$0xff] }
 0x153   : > { %v1480_v18 = vadd.f32 %v1353_v0, %v9892_v13  ;;  %v9895_v32 = vunpack.c.l.bf16 %v9894_v39  ;;  %v1834_v39 = vmul.f32 %v7547_v16, %v7453_v23  ;;  %v1530_v0 = vmul.f32 %v7361_v9, %v7643_v28 }
 0x154   : > { %v1523_v46 = vmul.f32 %v7361_v9, %v9890_v48  ;;  %v1557_v48 = vadd.f32 %v1525_v4, %v1482_v55  ;;  %v5501_v27 = vpop.f32.mrf.mxu1  ;;  %v7881_v11 = vpop.f32.mrf.mxu0  ;;  %v9896_v55 = vld [vmem:[#allocation68_spill] sm:$0xff] }
 0x155   : > { %v1524_v50 = vmul.f32 %v7361_v9, %v9895_v32  ;;  %v1483_v20 = vadd.f32 %v5501_v27, %v9896_v55  ;;  %v5140_v32 = vld [vmem:[%s9553_s6 + $0x2] sm:$0x1] }
 0x156   : > { %v1555_v13 = vadd.f32 %v1523_v46, %v1480_v18  ;;  %v1793_v2 = vadd.f32 %v5540_v24, %v1557_v48  ;;  %v1356_v61 = vpop.f32.mrf.mxu1  ;;  %v7897_v46 = vpop.f32.mrf.mxu0  ;;  %v9897_v18 = vld [vmem:[#allocation13_spill] sm:$0xff]  ;;  %v7903_v24 = vmul.f32 %v7361_v9, %v7729_v31  ;;  %v9898_v48 = vld [vmem:[#allocation70_spill] sm:$0xff] }
 0x157   : > { %v1528_v27 = vmul.f32 %v7361_v9, %v9897_v18  ;;  %v1558_v23 = vadd.f32 %v1526_v62, %v1483_v20  ;;  %v1481_v55 = vadd.f32 %v1356_v61, %v9898_v48  ;;  %v1837_v62 = vmul.f32 %v7547_v16, %v9897_v18  ;;  %v9902_v20 = vld [vmem:[#allocation73_spill] sm:$0xff] }
 0x158   : > { %v7906_v4 = vadd.f32 %v1836_v15, %v1793_v2  ;;  %v1791_v51 = vadd.f32 %v7798_v3, %v1555_v13  ;;  %v5504_v53 = vpop.f32.mrf.mxu1  ;;  %5743 = vmatmul.mubr.msk.bf16.gmra.mxu1 %vm1041_vm4, %v7314_v29  ;;  %v7911_v54 = vpop.f32.mrf.mxu0  ;;  %5787 = vmatmul.mubr.msk.bf16.gmra.mxu0 %vm1041_vm4, %v9900_v59  ;;  %v1835_v61 = vmul.f32 %v7547_v16, %v7506_v19  ;;  %v9901_v2 = vld [vmem:[#allocation38_spill] sm:$0xff]  ;;  %v9903_v29 = vld [vmem:[#allocation63_spill] sm:$0xff]  ;;  %v7926_v48 = vrot.slane %v3921_v52, 4 }
 0x159   : > { %v3849_v15 = vmul.f32 %v5140_v32, %v9901_v2  ;;  %v1556_v3 = vadd.f32 %v1524_v50, %v1481_v55  ;;  %v1486_v13 = vadd.f32 %v5504_v53, %v9902_v20  ;;  %5746 = vmatprep.mubr.msk.bf16.mxu1 %vm1041_vm4, %v7326_v22  ;;  %5790 = vmatprep.mubr.msk.bf16.mxu0 %vm1041_vm4, %v9903_v29  ;;  %v9905_v55 = vld [vmem:[#allocation20_spill] sm:$0xff] }
 0x15a   : > { %9899 = vst [vmem:[#allocation14_spill] sm:$0xff] %v7906_v4  ;;  %v7928_v57 = vadd.f32 %v1834_v39, %v1791_v51  ;;  %v1369_v4 = vpop.f32.mrf.mxu1  ;;  %v7930_v18 = vpop.f32.mrf.mxu0  ;;  %v1531_v19 = vmul.f32 %v7361_v9, %v7582_v25  ;;  %v7936_v50 = vmul.f32 %v7361_v9, %v7749_v56  ;;  %v7940_v22 = vmul.f32 %v7361_v9, %v7624_v49 }
 0x15b   : > { %v1794_v32 = vadd.f32 %v7806_v7, %v1558_v23  ;;  %v1561_v52 = vadd.f32 %v1529_v43, %v1486_v13  ;;  %v1484_v51 = vadd.f32 %v1369_v4, %v9905_v55  ;;  %v1792_v39 = vadd.f32 %v7810_v26, %v1556_v3  ;;  %v9907_v43 = vld [vmem:[#allocation39_spill] sm:$0xff]  ;;  %v9909_v26 = vld [vmem:[#allocation74_spill] sm:$0xff] }
 0x15c   : > { %9904 = vst [vmem:[#allocation12_spill] sm:$0xff] %v7928_v57  ;;  %v1840_v53 = vmul.f32 %v7547_v16, %v7582_v25  ;;  %v5505_v20 = vpop.f32.mrf.mxu1  ;;  %v7947_v57 = vpop.f32.mrf.mxu0  ;;  %v7951_v2 = vmul.f32 %v7361_v9, %v7710_v12  ;;  %v1838_v7 = vmul.f32 %v7547_v16, %v7621_v33  ;;  %v7958_v23 = vrot.slane %v3849_v15, %v9907_v43  ;;  %v9912_v15 = vld [vmem:[#allocation8_spill] sm:$0xff]  ;;  %v9917_v43 = vld [vmem:[#allocation15_spill] sm:$0xff] }
 0x15d   : > { %v7953_v8 = vadd.f32 %v1837_v62, %v1794_v32  ;;  %v1559_v4 = vadd.f32 %v1527_v6, %v1484_v51  ;;  %v1487_v3 = vadd.f32 %v5505_v20, %v9909_v26  ;;  %v7961_v13 = vadd.f32 %v1835_v61, %v1792_v39  ;;  %v9911_v32 = vld [vmem:[#allocation10_spill] sm:$0xff] }
 0x15e   : > { %9908 = vst [vmem:[#allocation68_spill] sm:$0xff] %v7958_v23  ;;  %v1797_v25 = vadd.f32 %v7843_v47, %v1561_v52  ;;  %v1372_v55 = vpop.f32.mrf.mxu1  ;;  %v7964_v38 = vpop.f32.mrf.mxu0  ;;  %v7968_v62 = vmul.f32 %v7361_v9, %v7742_v17  ;;  %v7972_v33 = vmul.f32 %v7361_v9, %v9911_v32  ;;  %v7976_v6 = vmul.f32 %v7361_v9, %v9912_v15  ;;  %v9914_v52 = vld [vmem:[#allocation43_spill] sm:$0xff] }
 0x15f   : > { %9906 = vst [vmem:[#allocation7_spill] sm:$0xff] %v7953_v8  ;;  %9910 = vst [vmem:[#allocation13_spill] sm:$0xff] %v7961_v13  ;;  %v7980_v61 = vmul.f32 %v7958_v23, %v7813_v34  ;;  %v1562_v47 = vadd.f32 %v1530_v0, %v1487_v3  ;;  %v1485_v51 = vadd.f32 %v1372_v55, %v9914_v52  ;;  %v9916_v8 = vld [vmem:[#allocation66_spill] sm:$0xff]  ;;  %v9918_v0 = vshll.u32 %v7825_v58, 16 }
 0x160   : > { %v7983_v39 = vadd.f32 %v1840_v53, %v1797_v25  ;;  %v1795_v20 = vadd.f32 %v7866_v40, %v1559_v4  ;;  %v5508_v26 = vpop.f32.mrf.mxu1  ;;  %5747 = vmatmul.mubr.msk.bf16.gmra.mxu1 %vm1041_vm4, %v7330_v41  ;;  %v7988_v13 = vpop.f32.mrf.mxu0  ;;  %5791 = vmatmul.mubr.msk.bf16.gmra.mxu0 %vm1041_vm4, %v9916_v8  ;;  %v7994_v34 = vmul.f32 %v7361_v9, %v9917_v43  ;;  %v9919_v25 = vld [vmem:[#allocation71_spill] sm:$0xff]  ;;  %v9920_v55 = vshll.u32 %v7827_v5, 16 }
 0x161   : > { %9913 = vst [vmem:[#allocation70_spill] sm:$0xff] %v7980_v61  ;;  %v3926_v3 = vrot.slane %v9918_v0, 5  ;;  %v1841_v53 = vmul.f32 %v7547_v16, %v7624_v49  ;;  %v1839_v40 = vmul.f32 %v7547_v16, %v7643_v28  ;;  %v1560_v4 = vadd.f32 %v1528_v27, %v1485_v51  ;;  %5750 = vmatprep.mubr.msk.bf16.mxu1 %vm1041_vm4, %v9900_v59  ;;  %v9922_v61 = vld [vmem:[#allocation9_spill] sm:$0xff] }
 0x162   : > { %9915 = vst [vmem:[#allocation60_spill] sm:$0xff] %v7983_v39  ;;  %v1490_v41 = vadd.f32 %v5508_v26, %v7662_v35  ;;  %5794 = vmatprep.mubr.msk.bf16.mxu0 %vm1041_vm4, %v9919_v25  ;;  %v8009_v52 = vrot.slane %v9920_v55, 5  ;;  %v8011_v58 = vadd.f32 %v1838_v7, %v1795_v20  ;;  %v1385_v0 = vpop.f32.mrf.mxu1  ;;  %v8013_v49 = vpop.f32.mrf.mxu0  ;;  %v8017_v28 = vmul.f32 %v7361_v9, %v9922_v61  ;;  %v3092_v20 = vld [vmem:[#allocation2 + $0x118] sm:$0xf] }
 0x163   : > { %v8021_v35 = vmul.f32 %v7361_v9, %v7685_v63  ;;  %v1798_v59 = vadd.f32 %v7881_v11, %v1562_v47  ;;  %v8026_v27 = vmul.f32 %v7958_v23, %v7816_v42  ;;  %v1488_v51 = vadd.f32 %v1385_v0, %v7676_v36 }
 0x164   : > { %9921 = vst [vmem:[#allocation73_spill] sm:$0xff] %v8011_v58  ;;  %v1565_v7 = vadd.f32 %v7903_v24, %v1490_v41  ;;  %v1796_v26 = vadd.f32 %v7897_v46, %v1560_v4  ;;  %v1844_v55 = vmul.f32 %v7547_v16, %v7710_v12  ;;  %v5509_v58 = vpop.f32.mrf.mxu1  ;;  %v8033_v39 = vpop.f32.mrf.mxu0  ;;  %v3927_v63 = vor.u32 %v3926_v3, %v7926_v48 }
 0x165   : > { %9923 = vst [vmem:[#allocation63_spill] sm:$0xff] %v8026_v27  ;;  %v9924_v11 = vshrl.u32 %v7827_v5, 16  ;;  %v8038_v42 = vadd.f32 %v1841_v53, %v1798_v59  ;;  %v1842_v24 = vmul.f32 %v7547_v16, %v7729_v31  ;;  %v1563_v36 = vadd.f32 %v1531_v19, %v1488_v51  ;;  %v9974_v27 = vld [vmem:[#allocation31_spill] sm:$0xff] }
 0x166   : > { %v1491_v41 = vadd.f32 %v5509_v58, %v7687_v10  ;;  %v8043_v46 = vadd.f32 %v1839_v40, %v1796_v26  ;;  %v1801_v12 = vadd.f32 %v7911_v54, %v1565_v7  ;;  %v1388_v4 = vpop.f32.mrf.mxu1  ;;  %v8046_v0 = vpop.f32.mrf.mxu0  ;;  %v9925_v48 = vshll.u32 %v7861_v14, 16 }
 0x167   : > { %v3936_v47 = vrot.slane %v9924_v11, 4  ;;  %v4262_v5 = vshll.u32 %v7886_v30, 16  ;;  %v4268_v53 = vshll.u32 %v3092_v20, 16  ;;  %v8053_v59 = vmul.f32 %v7958_v23, %v7819_v44 }
 0x168   : > { %v3942_v3 = vrot.slane %v9925_v48, 5  ;;  %v1566_v31 = vadd.f32 %v7936_v50, %v1491_v41  ;;  %v1489_v10 = vadd.f32 %v1388_v4, %v7698_v37  ;;  %v8057_v19 = vadd.f32 %v1844_v55, %v1801_v12  ;;  %v5512_v40 = vpop.f32.mrf.mxu1  ;;  %5751 = vmatmul.mubr.msk.bf16.gmra.mxu1 %vm1041_vm4, %v9903_v29  ;;  %v8062_v14 = vpop.f32.mrf.mxu0  ;;  %5795 = vmatmul.mubr.msk.bf16.gmra.mxu0 %vm1041_vm4, %v7591_v1  ;;  %v3093_v12 = vld [vmem:[#allocation2 + $0x11c] sm:$0x1] }
 0x169   : > { %9926 = vst [vmem:[#allocation20_spill] sm:$0xff] %v8053_v59  ;;  %v1799_v54 = vadd.f32 %v7930_v18, %v1563_v36  ;;  %v3937_v58 = vor.u32 %v3936_v47, %v8009_v52  ;;  %v4272_v7 = vshrl.u32 %v3092_v20, 16  ;;  %v1845_v50 = vmul.f32 %v7547_v16, %v7742_v17  ;;  %5754 = vmatprep.mubr.msk.bf16.mxu1 %vm1041_vm4, %v9916_v8  ;;  %v9929_v8 = vld [vmem:[#allocation64_spill] sm:$0xff] }
 0x16a   : > { %v1843_v37 = vmul.f32 %v7547_v16, %v7749_v56  ;;  %v1564_v18 = vadd.f32 %v7940_v22, %v1489_v10  ;;  %v1494_v51 = vadd.f32 %v5512_v40, %v7755_v60  ;;  %5798 = vmatprep.mubr.msk.bf16.mxu0 %vm1041_vm4, %v7631_v45  ;;  %v9927_v29 = vshrl.u32 %v7886_v30, 16  ;;  %v1401_v55 = vpop.f32.mrf.mxu1  ;;  %v8081_v17 = vpop.f32.mrf.mxu0  ;;  %v9930_v36 = vld [vmem:[#allocation84_spill] sm:$0xff] }
 0x16b   : > { %v8079_v20 = vadd.f32 %v1842_v24, %v1799_v54  ;;  %v3928_v11 = vrot.slane %v3927_v63, 4  ;;  %v4264_v56 = vrot.slane %v4262_v5, 5  ;;  %v1802_v22 = vadd.f32 %v7947_v57, %v1566_v31  ;;  %v9931_v54 = vld [vmem:[#allocation85_spill] sm:$0xff] }
 0x16c   : > { %v4261_v26 = vrot.slane %v9927_v29, 4  ;;  %v8086_v60 = vmul.f32 %v7958_v23, %v7830_v21  ;;  %v1569_v47 = vadd.f32 %v9929_v8, %v1494_v51  ;;  %v1492_v41 = vadd.f32 %v1401_v55, %v9930_v36  ;;  %v5513_v4 = vpop.f32.mrf.mxu1  ;;  %v8093_v48 = vpop.f32.mrf.mxu0 }
 0x16d   : > { %v1800_v30 = vadd.f32 %v7964_v38, %v1564_v18  ;;  %v1848_v24 = vmul.f32 %v7547_v16, %v9912_v15  ;;  %v3938_v63 = vrot.slane %v3937_v58, 4  ;;  %v4270_v5 = vrot.slane %v4268_v53, 5 }
 0x16e   : > { %9928 = vst [vmem:[#allocation74_spill] sm:$0xff] %v8086_v60  ;;  %v4274_v57 = vrot.slane %v4272_v7, 4  ;;  %v8095_v31 = vadd.f32 %v1845_v50, %v1802_v22  ;;  %v1567_v10 = vadd.f32 %v7951_v2, %v1492_v41  ;;  %v1495_v40 = vadd.f32 %v5513_v4, %v9931_v54  ;;  %v1404_v38 = vpop.f32.mrf.mxu1  ;;  %v8102_v18 = vpop.f32.mrf.mxu0  ;;  %v9934_v7 = vld [vmem:[#allocation93_spill] sm:$0xff]  ;;  %v9944_v54 = vld [vmem:[#allocation80_spill] sm:$0xff] }
 0x16f   : > { %v8099_v51 = vadd.f32 %v1843_v37, %v1800_v30  ;;  %v1805_v29 = vadd.f32 %v7988_v13, %v1569_v47  ;;  %v8107_v55 = vsel %vm7142_vm7, %v3928_v11, %v8009_v52  ;;  %v4265_v53 = vor.u32 %v4264_v56, %v4261_v26  ;;  %v9936_v2 = vld [vmem:[#allocation65_spill] sm:$0xff]  ;;  %v9937_v37 = vld [vmem:[#allocation86_spill] sm:$0xff]  ;;  %v9940_v26 = vld [vmem:[#allocation79_spill] sm:$0xff] }
 0x170   : > { %9933 = vst [vmem:[#allocation10_spill] sm:$0xff] %v8107_v55  ;;  %v4278_v58 = vshll.u32 %v3093_v12, 16  ;;  %v8111_v50 = vmul.f32 %v7958_v23, %v9934_v7  ;;  %v1570_v22 = vadd.f32 %v9936_v2, %v1495_v40  ;;  %v1493_v8 = vadd.f32 %v1404_v38, %v9937_v37  ;;  %v9938_v47 = vld [vmem:[#allocation77_spill] sm:$0xff]  ;;  %v5516_v30 = vpop.f32.mrf.mxu1  ;;  %5755 = vmatmul.mubr.msk.bf16.gmra.mxu1 %vm1041_vm4, %v9919_v25  ;;  %v8123_v52 = vpop.f32.mrf.mxu0  ;;  %v9942_v12 = vld [vmem:[#allocation19_spill] sm:$0xff]  ;;  %v9945_v40 = vld [vmem:[#allocation42_spill] sm:$0xff] }
 0x171   : > { %v8115_v36 = vadd.f32 %v1848_v24, %v1805_v29  ;;  %v1803_v13 = vadd.f32 %v8013_v49, %v1567_v10  ;;  %v8119_v41 = vunpack.c.l.bf16 %v9938_v47  ;;  %5799 = vmatmul.mubr.msk.bf16.gmra.mxu0 %vm1041_vm4, %v9940_v26  ;;  %v8129_v11 = vsel %vm7142_vm7, %v3938_v63, %v3942_v3  ;;  %v9943_v10 = vld [vmem:[#allocation11_spill] sm:$0xff]  ;;  %5758 = vmatprep.mubr.msk.bf16.mxu1 %vm1041_vm4, %v7591_v1  ;;  %v9948_v1 = vld [vmem:[#allocation41_spill] sm:$0xff] }
 0x172   : > { %9935 = vst [vmem:[#allocation8_spill] sm:$0xff] %v8111_v50  ;;  %9941 = vst [vmem:[#allocation66_spill] sm:$0xff] %v8129_v11  ;;  %v4275_v56 = vor.u32 %v4274_v57, %v4270_v5  ;;  %v1849_v49 = vmul.f32 %v7547_v16, %v9922_v61  ;;  %v8134_v24 = vunpack.c.l.bf16 %v9942_v12  ;;  %v1568_v4 = vadd.f32 %v7968_v62, %v1493_v8  ;;  %v1417_v63 = vpop.f32.mrf.mxu1  ;;  %v8145_v57 = vpop.f32.mrf.mxu0  ;;  %v9946_v2 = vld [vmem:[#allocation59_spill] sm:$0xff] }
 0x173   : > { %9939 = vst [vmem:[#allocation43_spill] sm:$0xff] %v8119_v41  ;;  %v1498_v25 = vadd.f32 %v5516_v30, %v9943_v10  ;;  %5802 = vmatprep.mubr.msk.bf16.mxu0 %vm1041_vm4, %v9944_v54  ;;  %v8143_v3 = vadd.f32 %v9945_v40, %v1803_v13  ;;  %v4266_v61 = vrot.slane %v4265_v53, 4  ;;  %v4280_v29 = vrot.slane %v4278_v58, 5  ;;  %v9949_v30 = vld [vmem:[#allocation16_spill] sm:$0xff] }
 0x174   : > { %v1806_v38 = vadd.f32 %v8033_v39, %v1570_v22  ;;  %v8150_v62 = vmul.f32 %v7958_v23, %v9946_v2  ;;  %v1496_v8 = vadd.f32 %v1417_v63, %v9948_v1  ;;  %v1804_v47 = vadd.f32 %v8046_v0, %v1568_v4  ;;  %v5517_v12 = vpop.f32.mrf.mxu1  ;;  %v8157_v10 = vpop.f32.mrf.mxu0  ;;  %v9951_v4 = vld [vmem:[#allocation44_spill] sm:$0xff] }
 0x175   : > { %v1573_v37 = vadd.f32 %v7972_v33, %v1498_v25  ;;  %v1852_v13 = vmul.f32 %v7547_v16, %v9949_v30  ;;  %v8161_v53 = vcombine.low %v8107_v55, %v8129_v11  ;;  %v4276_v39 = vrot.slane %v4275_v56, 4  ;;  %v9950_v25 = vld [vmem:[#allocation72_spill] sm:$0xff]  ;;  %v9952_v55 = vld [vmem:[#allocation23_spill] sm:$0xff] }
 0x176   : > { %9947 = vst [vmem:[#allocation15_spill] sm:$0xff] %v8150_v62  ;;  %v8163_v58 = vadd.f32 %v1849_v49, %v1806_v38  ;;  %v1850_v33 = vmul.f32 %v7547_v16, %v9911_v32  ;;  %v1571_v22 = vadd.f32 %v7976_v6, %v1496_v8  ;;  %v1499_v0 = vadd.f32 %v5517_v12, %v9950_v25  ;;  %v1420_v1 = vpop.f32.mrf.mxu1  ;;  %v8177_v49 = vpop.f32.mrf.mxu0  ;;  %v9954_v6 = vld [vmem:[#allocation94_spill] sm:$0xff]  ;;  %v9957_v12 = vld [vmem:[#allocation28_spill] sm:$0xff] }
 0x177   : > { %v8170_v40 = vadd.f32 %v9951_v4, %v1804_v47  ;;  %v1809_v63 = vadd.f32 %v8062_v14, %v1573_v37  ;;  %v1543_v11 = vmul.f32 %v7361_v9, %v9949_v30  ;;  %v1546_v56 = vmul.f32 %v7361_v9, %v9952_v55  ;;  %v9956_v14 = vld [vmem:[#allocation40_spill] sm:$0xff] }
 0x178   : > { %v8181_v32 = vsel %vm7142_vm7, %v4266_v61, %v4270_v5  ;;  %v8185_v38 = vmul.f32 %v7958_v23, %v9954_v6  ;;  %v1574_v8 = vadd.f32 %v7994_v34, %v1499_v0  ;;  %v1497_v37 = vadd.f32 %v1420_v1, %v9956_v14  ;;  %v5520_v4 = vpop.f32.mrf.mxu1  ;;  %5759 = vmatmul.mubr.msk.bf16.gmra.mxu1 %vm1041_vm4, %v7631_v45  ;;  %v8197_v5 = vpop.f32.mrf.mxu0  ;;  %v9958_v61 = vld [vmem:[#allocation83_spill] sm:$0xff]  ;;  %v9963_v1 = vld [vmem:[#allocation76_spill] sm:$0xff] }
 0x179   : > { %9953 = vst [vmem:[#allocation71_spill] sm:$0xff] %v8181_v32  ;;  %v8189_v47 = vadd.f32 %v1852_v13, %v1809_v63  ;;  %v1807_v30 = vadd.f32 %v8081_v17, %v1571_v22  ;;  %v8193_v25 = vunpack.c.l.bf16 %v9957_v12  ;;  %5803 = vmatmul.mubr.msk.bf16.gmra.mxu0 %vm1041_vm4, %v9958_v61  ;;  %v8203_v34 = vsel %vm7142_vm7, %v4276_v39, %v4280_v29  ;;  %v9960_v13 = vld [vmem:[#allocation17_spill] sm:$0xff] }
 0x17a   : > { %9955 = vst [vmem:[#allocation9_spill] sm:$0xff] %v8185_v38  ;;  %9959 = vst [vmem:[#allocation64_spill] sm:$0xff] %v8203_v34  ;;  %v1853_v0 = vmul.f32 %v7547_v16, %v9960_v13  ;;  %v1851_v17 = vmul.f32 %v7547_v16, %v9917_v43  ;;  %v9961_v22 = vld [vmem:[#allocation81_spill] sm:$0xff]  ;;  %v1572_v45 = vadd.f32 %v8017_v28, %v1497_v37  ;;  %5762 = vmatprep.mubr.msk.bf16.mxu1 %vm1041_vm4, %v9940_v26  ;;  %v1433_v29 = vpop.f32.mrf.mxu1  ;;  %v9965_v43 = vld [vmem:[#allocation30_spill] sm:$0xff] }
 0x17b   : > { %v8210_v63 = vunpack.c.l.bf16 %v9961_v22  ;;  %v1502_v14 = vadd.f32 %v5520_v4, %v9963_v1  ;;  %5806 = vmatprep.mubr.msk.bf16.mxu0 %vm1041_vm4, %v8161_v53  ;;  %v8218_v15 = vadd.f32 %v1850_v33, %v1807_v30  ;;  %v1544_v39 = vmul.f32 %v7361_v9, %v9960_v13  ;;  %v8224_v22 = vpop.f32.mrf.mxu0  ;;  %v9966_v37 = vld [vmem:[#allocation95_spill] sm:$0xff]  ;;  %v9968_v1 = vld [vmem:[#allocation18_spill] sm:$0xff]  ;;  %v9969_v38 = vld [vmem:[#allocation52_spill] sm:$0xff] }
 0x17c   : > { %v1549_v12 = vmul.f32 %v7361_v9, %v9965_v43  ;;  %v1810_v28 = vadd.f32 %v8093_v48, %v1574_v8  ;;  %v8229_v4 = vmul.f32 %v7958_v23, %v9966_v37  ;;  %v1500_v33 = vadd.f32 %v1433_v29, %v9968_v1  ;;  %v5521_v62 = vpop.f32.mrf.mxu1  ;;  %v9972_v29 = vld [vmem:[#allocation21_spill] sm:$0xff]  ;;  %v9975_v37 = vld [vmem:[#allocation34_spill] sm:$0xff] }
 0x17d   : > { %9962 = vst [vmem:[#allocation84_spill] sm:$0xff] %v8210_v63  ;;  %9964 = vst [vmem:[#allocation85_spill] sm:$0xff] %v8218_v15  ;;  %v1577_v26 = vadd.f32 %v8021_v35, %v1502_v14  ;;  %v1808_v30 = vadd.f32 %v8102_v18, %v1572_v45  ;;  %v1856_v13 = vmul.f32 %v7547_v16, %v9969_v38  ;;  %v8238_v60 = vpop.f32.mrf.mxu0 }
 0x17e   : > { %9967 = vst [vmem:[#allocation47_spill] sm:$0xff] %v8229_v4  ;;  %v1547_v50 = vmul.f32 %v7361_v9, %v9969_v38  ;;  %v5183_v48 = vcombine.low %v8181_v32, %v8203_v34  ;;  %v8242_v8 = vadd.f32 %v1853_v0, %v1810_v28  ;;  %v9971_v4 = vld [vmem:[#allocation22_spill] sm:$0xff]  ;;  %v1575_v14 = vadd.f32 %v1543_v11, %v1500_v33  ;;  %v1436_v59 = vpop.f32.mrf.mxu1  ;;  %v9976_v0 = vld [vmem:[#allocation25_spill] sm:$0xff]  ;;  %v9977_v32 = vld [vmem:[#allocation96_spill] sm:$0xff] }
 0x17f   : > { %v1854_v35 = vmul.f32 %v7547_v16, %v9971_v4  ;;  %v1503_v18 = vadd.f32 %v5521_v62, %v9972_v29  ;;  %v8247_v45 = vadd.f32 %v1851_v17, %v1808_v30  ;;  %v1813_v1 = vadd.f32 %v8123_v52, %v1577_v26  ;;  %v8252_v15 = vpop.f32.mrf.mxu0  ;;  %v9979_v17 = vld [vmem:[#allocation46_spill] sm:$0xff]  ;;  %v9981_v34 = vld [vmem:[#allocation32_spill] sm:$0xff] }
 0x180   : > { %9970 = vst [vmem:[#allocation93_spill] sm:$0xff] %v8242_v8  ;;  %v1550_v38 = vmul.f32 %v7361_v9, %v9974_v27  ;;  %v1857_v28 = vmul.f32 %v7547_v16, %v9976_v0  ;;  %v8259_v11 = vmul.f32 %v7958_v23, %v9977_v32  ;;  %v1501_v4 = vadd.f32 %v1436_v59, %v9979_v17  ;;  %v5524_v26 = vpop.f32.mrf.mxu1  ;;  %v9982_v59 = vld [vmem:[#allocation35_spill] sm:$0xff]  ;;  %v8312_v8 = vld [vmem:[#allocation2 + $0x14] sm:$0xf] }
 0x181   : > { %9973 = vst [vmem:[#allocation65_spill] sm:$0xff] %v8247_v45  ;;  %v1578_v62 = vadd.f32 %v1546_v56, %v1503_v18  ;;  %v8262_v33 = vadd.f32 %v1856_v13, %v1813_v1  ;;  %v1811_v52 = vadd.f32 %v8145_v57, %v1575_v14  ;;  %5763 = vmatmul.mubr.msk.bf16.gmra.mxu1 %vm1041_vm4, %v9944_v54  ;;  %v8269_v29 = vpop.f32.mrf.mxu0  ;;  %v9983_v18 = vld [vmem:[#allocation82_spill] sm:$0xff]  ;;  %v9985_v13 = vunpack.c.l.bf16 %v9975_v37 }
 0x182   : > { %9978 = vst [vmem:[#allocation86_spill] sm:$0xff] %v8259_v11  ;;  %v1548_v30 = vmul.f32 %v7361_v9, %v9976_v0  ;;  %5807 = vmatmul.mubr.msk.bf16.gmra.mxu0 %vm1041_vm4, %v5183_v48  ;;  %v8274_v56 = vmul.f32 %v7361_v9, %v9981_v34  ;;  %v1855_v57 = vmul.f32 %v7547_v16, %v9952_v55  ;;  %v5023_v54 = vld [vmem:[%s9553_s6 + $0x1] sm:$0x1]  ;;  %v1449_v17 = vpop.f32.mrf.mxu1  ;;  %v9991_v45 = vunpack.c.l.bf16 %v9982_v59 }
 0x183   : > { %9980 = vst [vmem:[#allocation77_spill] sm:$0xff] %v8262_v33  ;;  %v1576_v14 = vadd.f32 %v1544_v39, %v1501_v4  ;;  %v1506_v1 = vadd.f32 %v5524_v26, %v9983_v18  ;;  %5766 = vmatprep.mubr.msk.bf16.mxu1 %vm1041_vm4, %v9958_v61  ;;  %v8285_v48 = vadd.f32 %v1854_v35, %v1811_v52  ;;  %v8291_v55 = vpop.f32.mrf.mxu0  ;;  %v9986_v39 = vld [vmem:[#allocation33_spill] sm:$0xff]  ;;  %v9987_v26 = vld [vmem:[#allocation6_spill] sm:$0xff] }
 0x184   : > { %v1814_v0 = vadd.f32 %v8157_v10, %v1578_v62  ;;  %v1553_v11 = vmul.f32 %v7361_v9, %v9985_v13  ;;  %v8295_v4 = vmul.f32 %v7361_v9, %v9986_v39  ;;  %v1860_v61 = vmul.f32 %v7547_v16, %v9981_v34  ;;  %v9989_v10 = vld [vmem:[#allocation26_spill] sm:$0xff] }
 0x185   : > { %9984 = vst [vmem:[#allocation79_spill] sm:$0xff] %v8285_v48  ;;  %v8301_v35 = vmul.f32 %v7958_v23, %v9987_v26  ;;  %v1581_v52 = vadd.f32 %v1549_v12, %v1506_v1  ;;  %v1504_v62 = vadd.f32 %v1449_v17, %v9989_v10  ;;  %v1812_v13 = vadd.f32 %v8177_v49, %v1576_v14  ;;  %v5525_v48 = vpop.f32.mrf.mxu1  ;;  %v8307_v33 = vpop.f32.mrf.mxu0  ;;  %v9992_v26 = vld [vmem:[#allocation38_spill] sm:$0xff]  ;;  %v9993_v1 = vld [vmem:[#allocation29_spill] sm:$0xff] }
 0x186   : > { %v8304_v18 = vadd.f32 %v1857_v28, %v1814_v0  ;;  %v1554_v32 = vmul.f32 %v7361_v9, %v9991_v45  ;;  %v1858_v12 = vmul.f32 %v7547_v16, %v9965_v43  ;;  %v1507_v0 = vadd.f32 %v5525_v48, %v9993_v1  ;;  %v5863_v9 = vld [vmem:[#allocation2 + $0x4] sm:$0xf]  ;;  %v9997_v48 = vld [vmem:[#allocation27_spill] sm:$0xff] }
 0x187   : > { %9988 = vst [vmem:[#allocation19_spill] sm:$0xff] %v8301_v35  ;;  %v2291_v35 = vmul.f32 %v5023_v54, %v9992_v26  ;;  %v1579_v28 = vadd.f32 %v1547_v50, %v1504_v62  ;;  %v8319_v49 = vadd.f32 %v1855_v57, %v1812_v13  ;;  %v1817_v14 = vadd.f32 %v8197_v5, %v1581_v52  ;;  %v1452_v17 = vpop.f32.mrf.mxu1  ;;  %v8322_v10 = vpop.f32.mrf.mxu0  ;;  %v5065_v52 = vld [vmem:[%s9553_s6 + $0x4] sm:$0x1] }
 0x188   : > { %9990 = vst [vmem:[#allocation11_spill] sm:$0xff] %v8304_v18  ;;  %v2257_v45 = vunpack.c.l.bf16 %v5863_v9  ;;  %v1861_v34 = vmul.f32 %v7547_v16, %v9986_v39  ;;  %v9995_v18 = vld [vmem:[#allocation36_spill] sm:$0xff]  ;;  %v8329_v43 = vmul.f32 %v7958_v23, %v8119_v41  ;;  %v1582_v50 = vadd.f32 %v1550_v38, %v1507_v0  ;;  %v8345_v38 = vld [vmem:[#allocation2 + $0x18] sm:$0xf]  ;;  %v5865_v0 = vld [vmem:[#allocation2 + $0x8] sm:$0xf] }
 0x189   : > { %9994 = vst [vmem:[#allocation80_spill] sm:$0xff] %v8319_v49  ;;  %v1823_v54 = vunpack.c.l.bf16 %v9995_v18  ;;  %v1505_v57 = vadd.f32 %v1452_v17, %v9997_v48  ;;  %v8332_v62 = vadd.f32 %v1860_v61, %v1817_v14  ;;  %v1815_v5 = vadd.f32 %v8224_v22, %v1579_v28  ;;  %v5528_v13 = vpop.f32.mrf.mxu1  ;;  %5767 = vmatmul.mubr.msk.bf16.gmra.mxu1 %vm1041_vm4, %v8161_v53  ;;  %v8340_v39 = vpop.f32.mrf.mxu0  ;;  %v9999_v18 = vld [vmem:[#allocation39_spill] sm:$0xff]  ;;  %v10001_v49 = vld [vmem:[#allocation37_spill] sm:$0xff] }
 0x18a   : > { %9996 = vst [vmem:[#allocation42_spill] sm:$0xff] %v8329_v43  ;;  %v8343_v1 = vrot.slane %v2291_v35, %v9999_v18  ;;  %v2258_v14 = vunpack.c.l.bf16 %v5865_v0  ;;  %v1859_v22 = vmul.f32 %v7547_v16, %v9974_v27  ;;  %v10000_v17 = vld [vmem:[#allocation87_spill] sm:$0xff]  ;;  %v1818_v53 = vadd.f32 %v8238_v60, %v1582_v50 }
 0x18b   : > { %9998 = vst [vmem:[#allocation59_spill] sm:$0xff] %v8332_v62  ;;  %v1580_v28 = vadd.f32 %v1548_v30, %v1505_v57  ;;  %v1510_v9 = vadd.f32 %v5528_v13, %v10000_v17  ;;  %v8351_v48 = vadd.f32 %v1858_v12, %v1815_v5  ;;  %v1465_v43 = vpop.f32.mrf.mxu1  ;;  %v8354_v62 = vpop.f32.mrf.mxu0  ;;  %v1864_v35 = vmul.f32 %v7547_v16, %v1823_v54  ;;  %v10003_v30 = vld [vmem:[#allocation88_spill] sm:$0xff] }
 0x18c   : > { %v1824_v41 = vunpack.c.l.bf16 %v10001_v49  ;;  %v2655_v61 = vmul.f32 %v5065_v52, %v9992_v26  ;;  %v8361_v0 = vmul.f32 %v7958_v23, %v8134_v24  ;;  %v1508_v57 = vadd.f32 %v1465_v43, %v10003_v30  ;;  %v5866_v52 = vld [vmem:[#allocation2 + $0x34] sm:$0xf] }
 0x18d   : > { %v1585_v27 = vadd.f32 %v1553_v11, %v1510_v9  ;;  %v8364_v12 = vadd.f32 %v1861_v34, %v1818_v53  ;;  %v1816_v60 = vadd.f32 %v8252_v15, %v1580_v28  ;;  %v5529_v50 = vpop.f32.mrf.mxu1  ;;  %v10004_v5 = vunpack.c.l.bf16 %v8312_v8  ;;  %v8371_v13 = vpop.f32.mrf.mxu0  ;;  %v10006_v9 = vld [vmem:[#allocation89_spill] sm:$0xff] }
 0x18e   : > { %10002 = vst [vmem:[#allocation41_spill] sm:$0xff] %v8361_v0  ;;  %v2298_v49 = vmul.f32 %v8343_v1, %v2257_v45  ;;  %v8373_v17 = vunpack.c.l.bf16 %v5866_v52  ;;  %v10005_v11 = vunpack.c.l.bf16 %v9975_v37  ;;  %v1583_v34 = vadd.f32 %v8274_v56, %v1508_v57  ;;  %v5867_v45 = vld [vmem:[#allocation2 + $0x24] sm:$0xf] }
 0x18f   : > { %v2300_v54 = vmul.f32 %v8343_v1, %v10004_v5  ;;  %v1511_v15 = vadd.f32 %v5529_v50, %v10006_v9  ;;  %v8380_v28 = vadd.f32 %v1859_v22, %v1816_v60  ;;  %v1821_v53 = vadd.f32 %v8269_v29, %v1585_v27  ;;  %v1468_v30 = vpop.f32.mrf.mxu1  ;;  %v8383_v5 = vpop.f32.mrf.mxu0  ;;  %v10009_v22 = vld [vmem:[#allocation92_spill] sm:$0xff] }
 0x190   : > { %v1862_v43 = vmul.f32 %v7547_v16, %v10005_v11  ;;  %v8385_v0 = vunpack.c.l.bf16 %v5867_v45  ;;  %v1865_v52 = vmul.f32 %v7547_v16, %v1824_v41  ;;  %v8389_v37 = vrot.slane %v2655_v61, %v9999_v18 }
 0x191   : > { %v8393_v56 = vmul.f32 %v7958_v23, %v8193_v25  ;;  %v1586_v57 = vadd.f32 %v1554_v32, %v1511_v15  ;;  %v1509_v60 = vadd.f32 %v1468_v30, %v10009_v22  ;;  %v8396_v50 = vadd.f32 %v1864_v35, %v1821_v53  ;;  %v5580_v27 = vpop.f32.mrf.mxu1  ;;  %v8403_v61 = vpop.f32.mrf.mxu0  ;;  %v10013_v53 = vld [vmem:[#allocation14_spill] sm:$0xff] }
 0x192   : > { %10007 = vst [vmem:[#allocation16_spill] sm:$0xff] %v8385_v0  ;;  %v1819_v29 = vadd.f32 %v8291_v55, %v1583_v34  ;;  %v10011_v11 = vunpack.c.l.bf16 %v8345_v38  ;;  %v2299_v41 = vmul.f32 %v8343_v1, %v2258_v14  ;;  %v2304_v45 = vmul.f32 %v8343_v1, %v8373_v17  ;;  %v5200_v14 = vld [vmem:[%s9553_s6 + $0x8] sm:$0x1] }
 0x193   : > { %10008 = vst [vmem:[#allocation72_spill] sm:$0xff] %v8393_v56  ;;  %10010 = vst [vmem:[#allocation44_spill] sm:$0xff] %v8396_v50  ;;  %v10012_v32 = vunpack.c.l.bf16 %v9982_v59  ;;  %v1584_v35 = vadd.f32 %v8295_v4, %v1509_v60  ;;  %v2227_v55 = vadd.f32 %v5580_v27, %v10013_v53  ;;  %v1822_v30 = vadd.f32 %v8307_v33, %v1586_v57  ;;  %v2098_v22 = vpop.f32.mrf.mxu1  ;;  %v5868_v56 = vld [vmem:[#allocation2 + $0x28] sm:$0xf] }
 0x194   : > { %v2301_v9 = vmul.f32 %v8343_v1, %v10011_v11  ;;  %v8412_v34 = vadd.f32 %v1862_v43, %v1819_v29  ;;  %v8418_v11 = vpop.f32.mrf.mxu0  ;;  %v8420_v50 = vunpack.c.l.bf16 %v5868_v56  ;;  %v4500_v59 = vmul.f32 %v5200_v14, %v9992_v26  ;;  %v10017_v43 = vld [vmem:[#allocation12_spill] sm:$0xff]  ;;  %v5174_v56 = vld [vmem:[%s9553_s6 + $0x5] sm:$0x1]  ;;  %v5869_v14 = vld [vmem:[#allocation2 + $0x38] sm:$0xf] }
 0x195   : > { %v1863_v15 = vmul.f32 %v7547_v16, %v10012_v32  ;;  %v2664_v16 = vmul.f32 %v8389_v37, %v8385_v0  ;;  %v8427_v4 = vmul.f32 %v7958_v23, %v8210_v63  ;;  %v2332_v33 = vadd.f32 %v2300_v54, %v2227_v55  ;;  %v5581_v27 = vpop.f32.mrf.mxu1 }
 0x196   : > { %10014 = vst [vmem:[#allocation23_spill] sm:$0xff] %v8412_v34  ;;  %10015 = vst [vmem:[#allocation94_spill] sm:$0xff] %v8420_v50  ;;  %v2225_v57 = vadd.f32 %v2098_v22, %v10017_v43  ;;  %v8430_v60 = vadd.f32 %v1865_v52, %v1822_v30  ;;  %v1820_v29 = vadd.f32 %v8322_v10, %v1584_v35  ;;  %v8438_v53 = vpop.f32.mrf.mxu0  ;;  %v8440_v23 = vunpack.c.l.bf16 %v5869_v14  ;;  %v10021_v35 = vld [vmem:[#allocation7_spill] sm:$0xff] }
 0x197   : > { %10016 = vst [vmem:[#allocation40_spill] sm:$0xff] %v8427_v4  ;;  %v2302_v32 = vmul.f32 %v8343_v1, %v8385_v0  ;;  %v10019_v54 = vunpack.c.l.bf16 %v8312_v8  ;;  %v8446_v55 = vrot.slane %v4500_v59, %v9999_v18  ;;  %v2228_v30 = vadd.f32 %v5581_v27, %v10021_v35  ;;  %v2101_v4 = vpop.f32.mrf.mxu1  ;;  %v10024_v59 = vld [vmem:[#allocation90_spill] sm:$0xff] }
 0x198   : > { %10018 = vst [vmem:[#allocation28_spill] sm:$0xff] %v8430_v60  ;;  %v2330_v10 = vadd.f32 %v2298_v49, %v2225_v57  ;;  %v8449_v22 = vadd.f32 %v1863_v15, %v1820_v29  ;;  %v2621_v43 = vadd.f32 %v8340_v39, %v2332_v33  ;;  %v8452_v0 = vpop.f32.mrf.mxu0  ;;  %v5870_v60 = vld [vmem:[#allocation2 + $0x44] sm:$0xf]  ;;  %v2665_v8 = vmul.f32 %v8389_v37, %v8420_v50  ;;  %v10026_v15 = vld [vmem:[#allocation13_spill] sm:$0xff] }
 0x199   : > { %v2662_v52 = vmul.f32 %v8389_v37, %v10019_v54  ;;  %10020 = vst [vmem:[#allocation83_spill] sm:$0xff] %v8446_v55  ;;  %v8454_v14 = vunpack.c.l.bf16 %v5870_v60  ;;  %v4187_v54 = vmul.f32 %v5174_v56, %v9992_v26  ;;  %v8461_v49 = vmul.f32 %v8446_v55, %v10024_v59  ;;  %v5584_v33 = vpop.f32.mrf.mxu1  ;;  %v5871_v56 = vld [vmem:[#allocation2 + $0x54] sm:$0xf] }
 0x19a   : > { %10022 = vst [vmem:[#allocation17_spill] sm:$0xff] %v8449_v22  ;;  %v2333_v57 = vadd.f32 %v2301_v9, %v2228_v30  ;;  %v2226_v29 = vadd.f32 %v2101_v4, %v10026_v15  ;;  %v8464_v27 = vadd.f32 %v2664_v16, %v2621_v43  ;;  %v2619_v39 = vadd.f32 %v8354_v62, %v2330_v10  ;;  %v8471_v22 = vpop.f32.mrf.mxu0  ;;  %v10029_v30 = vld [vmem:[#allocation60_spill] sm:$0xff] }
 0x19b   : > { %10023 = vst [vmem:[#allocation81_spill] sm:$0xff] %v8454_v14  ;;  %10025 = vst [vmem:[#allocation76_spill] sm:$0xff] %v8461_v49  ;;  %v2305_v60 = vmul.f32 %v8343_v1, %v8440_v23  ;;  %v2303_v35 = vmul.f32 %v8343_v1, %v8420_v50  ;;  %v8473_v34 = vunpack.c.l.bf16 %v5871_v56  ;;  %v10028_v9 = vunpack.c.l.bf16 %v8345_v38  ;;  %v2114_v15 = vpop.f32.mrf.mxu1  ;;  %v5872_v50 = vld [vmem:[#allocation2 + $0x48] sm:$0xf] }
 0x19c   : > { %10027 = vst [vmem:[#allocation30_spill] sm:$0xff] %v8464_v27  ;;  %v2331_v16 = vadd.f32 %v2299_v41, %v2226_v29  ;;  %v2231_v43 = vadd.f32 %v5584_v33, %v10029_v30  ;;  %v8479_v62 = vadd.f32 %v2662_v52, %v2619_v39  ;;  %v2622_v10 = vadd.f32 %v8371_v13, %v2333_v57  ;;  %v8482_v49 = vpop.f32.mrf.mxu0  ;;  %v10035_v29 = vld [vmem:[#allocation73_spill] sm:$0xff] }
 0x19d   : > { %v2663_v4 = vmul.f32 %v8389_v37, %v10028_v9  ;;  %v8484_v27 = vunpack.c.l.bf16 %v5872_v50  ;;  %v2668_v56 = vmul.f32 %v8389_v37, %v8454_v14  ;;  %v8489_v38 = vrot.slane %v4187_v54, %v9999_v18  ;;  %v10033_v9 = vld [vmem:[#allocation91_spill] sm:$0xff]  ;;  %v5585_v33 = vpop.f32.mrf.mxu1 }
 0x19e   : > { %10030 = vst [vmem:[#allocation18_spill] sm:$0xff] %v8479_v62  ;;  %v8493_v41 = vmul.f32 %v8446_v55, %v10033_v9  ;;  %v2336_v52 = vadd.f32 %v2304_v45, %v2231_v43  ;;  %v2229_v39 = vadd.f32 %v2114_v15, %v10035_v29  ;;  %v8496_v13 = vadd.f32 %v2665_v8, %v2622_v10  ;;  %v8501_v30 = vpop.f32.mrf.mxu0  ;;  %v5873_v62 = vld [vmem:[#allocation2 + $0x58] sm:$0xf]  ;;  %v5874_v29 = vld [vmem:[#allocation2 + $0x64] sm:$0xf] }
 0x19f   : > { %10031 = vst [vmem:[#allocation52_spill] sm:$0xff] %v8484_v27  ;;  %10032 = vst [vmem:[#allocation22_spill] sm:$0xff] %v8489_v38  ;;  %v2620_v57 = vadd.f32 %v8383_v5, %v2331_v16  ;;  %v2308_v50 = vmul.f32 %v8343_v1, %v8473_v34  ;;  %v8503_v54 = vunpack.c.l.bf16 %v5873_v62  ;;  %v2666_v63 = vmul.f32 %v8389_v37, %v8373_v17  ;;  %v2117_v10 = vpop.f32.mrf.mxu1 }
 0x1a0   : > { %10034 = vst [vmem:[#allocation21_spill] sm:$0xff] %v8493_v41  ;;  %v8509_v45 = vmul.f32 %v8489_v38, %v10024_v59  ;;  %v2334_v8 = vadd.f32 %v2302_v32, %v2229_v39  ;;  %v2232_v43 = vadd.f32 %v5585_v33, %v8038_v42  ;;  %v2625_v16 = vadd.f32 %v8403_v61, %v2336_v52  ;;  %v8517_v62 = vpop.f32.mrf.mxu0 }
 0x1a1   : > { %v8512_v5 = vadd.f32 %v2663_v4, %v2620_v57  ;;  %v2306_v15 = vmul.f32 %v8343_v1, %v8454_v14  ;;  %v8519_v41 = vunpack.c.l.bf16 %v5874_v29  ;;  %v2669_v59 = vmul.f32 %v8389_v37, %v8484_v27  ;;  %v5588_v39 = vpop.f32.mrf.mxu1  ;;  %v5875_v29 = vld [vmem:[#allocation2 + $0x74] sm:$0xf] }
 0x1a2   : > { %10036 = vst [vmem:[#allocation31_spill] sm:$0xff] %v8509_v45  ;;  %v8525_v32 = vmul.f32 %v8446_v55, %v7819_v44  ;;  %v2337_v42 = vadd.f32 %v2305_v60, %v2232_v43  ;;  %v2230_v4 = vadd.f32 %v2117_v10, %v8043_v46  ;;  %v8528_v61 = vadd.f32 %v2668_v56, %v2625_v16  ;;  %v8533_v33 = vpop.f32.mrf.mxu0 }
 0x1a3   : > { %10037 = vst [vmem:[#allocation34_spill] sm:$0xff] %v8519_v41  ;;  %v2623_v52 = vadd.f32 %v8418_v11, %v2334_v8  ;;  %v2309_v57 = vmul.f32 %v8343_v1, %v8503_v54  ;;  %v8535_v45 = vunpack.c.l.bf16 %v5875_v29  ;;  %v2667_v14 = vmul.f32 %v8389_v37, %v8440_v23  ;;  %v2130_v43 = vpop.f32.mrf.mxu1  ;;  %v5876_v29 = vld [vmem:[#allocation2 + $0x68] sm:$0xf] }
 0x1a4   : > { %10038 = vst [vmem:[#allocation25_spill] sm:$0xff] %v8525_v32  ;;  %v8541_v60 = vmul.f32 %v8489_v38, %v10033_v9  ;;  %v2335_v46 = vadd.f32 %v2303_v35, %v2230_v4  ;;  %v2235_v56 = vadd.f32 %v5588_v39, %v8057_v19  ;;  %v2626_v8 = vadd.f32 %v8438_v53, %v2337_v42  ;;  %v8549_v10 = vpop.f32.mrf.mxu0 }
 0x1a5   : > { %v8544_v11 = vadd.f32 %v2666_v63, %v2623_v52  ;;  %v2307_v16 = vmul.f32 %v8343_v1, %v8484_v27  ;;  %v8551_v32 = vunpack.c.l.bf16 %v5876_v29  ;;  %v2672_v9 = vmul.f32 %v8389_v37, %v8519_v41  ;;  %v5589_v4 = vpop.f32.mrf.mxu1  ;;  %v5877_v29 = vld [vmem:[#allocation2 + $0x78] sm:$0xf] }
 0x1a6   : > { %10039 = vst [vmem:[#allocation46_spill] sm:$0xff] %v8541_v60  ;;  %v8557_v35 = vmul.f32 %v8446_v55, %v7830_v21  ;;  %v2340_v19 = vadd.f32 %v2308_v50, %v2235_v56  ;;  %v2233_v63 = vadd.f32 %v2130_v43, %v8079_v20  ;;  %v8560_v53 = vadd.f32 %v2669_v59, %v2626_v8  ;;  %v8565_v39 = vpop.f32.mrf.mxu0 }
 0x1a7   : > { %10040 = vst [vmem:[#allocation32_spill] sm:$0xff] %v8551_v32  ;;  %v2624_v42 = vadd.f32 %v8452_v0, %v2335_v46  ;;  %v2312_v52 = vmul.f32 %v8343_v1, %v8535_v45  ;;  %v8567_v60 = vunpack.c.l.bf16 %v5877_v29  ;;  %v2670_v27 = vmul.f32 %v8389_v37, %v8473_v34  ;;  %v2133_v56 = vpop.f32.mrf.mxu1  ;;  %v5878_v29 = vld [vmem:[#allocation2 + $0x84] sm:$0xf] }
 0x1a8   : > { %10041 = vst [vmem:[#allocation35_spill] sm:$0xff] %v8557_v35  ;;  %v8573_v50 = vmul.f32 %v8489_v38, %v7819_v44  ;;  %v2338_v20 = vadd.f32 %v2306_v15, %v2233_v63  ;;  %v2236_v59 = vadd.f32 %v5589_v4, %v8095_v31  ;;  %v2629_v46 = vadd.f32 %v8471_v22, %v2340_v19  ;;  %v8581_v43 = vpop.f32.mrf.mxu0 }
 0x1a9   : > { %v8576_v0 = vadd.f32 %v2667_v14, %v2624_v42  ;;  %v2310_v8 = vmul.f32 %v8343_v1, %v8519_v41  ;;  %v8583_v35 = vunpack.c.l.bf16 %v5878_v29  ;;  %v2673_v44 = vmul.f32 %v8389_v37, %v8551_v32  ;;  %v5592_v63 = vpop.f32.mrf.mxu1  ;;  %v5879_v29 = vld [vmem:[#allocation2 + $0x94] sm:$0xf] }
 0x1aa   : > { %10042 = vst [vmem:[#allocation82_spill] sm:$0xff] %v8573_v50  ;;  %v8589_v15 = vmul.f32 %v8446_v55, %v9934_v7  ;;  %v2341_v31 = vadd.f32 %v2309_v57, %v2236_v59  ;;  %v2234_v14 = vadd.f32 %v2133_v56, %v8099_v51  ;;  %v8592_v22 = vadd.f32 %v2672_v9, %v2629_v46  ;;  %v8597_v4 = vpop.f32.mrf.mxu0 }
 0x1ab   : > { %10043 = vst [vmem:[#allocation33_spill] sm:$0xff] %v8583_v35  ;;  %v2627_v19 = vadd.f32 %v8482_v49, %v2338_v20  ;;  %v2313_v42 = vmul.f32 %v8343_v1, %v8567_v60  ;;  %v8599_v50 = vunpack.c.l.bf16 %v5879_v29  ;;  %v2671_v41 = vmul.f32 %v8389_v37, %v8503_v54  ;;  %v2146_v59 = vpop.f32.mrf.mxu1  ;;  %v5880_v29 = vld [vmem:[#allocation2 + $0x88] sm:$0xf] }
 0x1ac   : > { %10044 = vst [vmem:[#allocation26_spill] sm:$0xff] %v8589_v15  ;;  %v8605_v57 = vmul.f32 %v8489_v38, %v7830_v21  ;;  %v2339_v51 = vadd.f32 %v2307_v16, %v2234_v14  ;;  %v2239_v9 = vadd.f32 %v5592_v63, %v8115_v36  ;;  %v2630_v20 = vadd.f32 %v8501_v30, %v2341_v31  ;;  %v8613_v56 = vpop.f32.mrf.mxu0 }
 0x1ad   : > { %v8608_v49 = vadd.f32 %v2670_v27, %v2627_v19  ;;  %v2311_v46 = vmul.f32 %v8343_v1, %v8551_v32  ;;  %v8615_v15 = vunpack.c.l.bf16 %v5880_v29  ;;  %v2676_v21 = vmul.f32 %v8389_v37, %v8583_v35  ;;  %v5593_v14 = vpop.f32.mrf.mxu1  ;;  %v5881_v29 = vld [vmem:[#allocation2 + $0x98] sm:$0xf] }
 0x1ae   : > { %10045 = vst [vmem:[#allocation38_spill] sm:$0xff] %v8605_v57  ;;  %v8621_v16 = vmul.f32 %v8446_v55, %v9946_v2  ;;  %v2344_v36 = vadd.f32 %v2312_v52, %v2239_v9  ;;  %v2237_v27 = vadd.f32 %v2146_v59, %v8143_v3  ;;  %v8624_v30 = vadd.f32 %v2673_v44, %v2630_v20  ;;  %v8629_v63 = vpop.f32.mrf.mxu0 }
 0x1af   : > { %10046 = vst [vmem:[#allocation29_spill] sm:$0xff] %v8615_v15  ;;  %v2628_v31 = vadd.f32 %v8517_v62, %v2339_v51  ;;  %v2316_v19 = vmul.f32 %v8343_v1, %v8599_v50  ;;  %v8631_v57 = vunpack.c.l.bf16 %v5881_v29  ;;  %v2674_v32 = vmul.f32 %v8389_v37, %v8535_v45  ;;  %v2149_v9 = vpop.f32.mrf.mxu1  ;;  %v5882_v29 = vld [vmem:[#allocation2 + $0xa4] sm:$0xf] }
 0x1b0   : > { %10047 = vst [vmem:[#allocation36_spill] sm:$0xff] %v8621_v16  ;;  %v8637_v52 = vmul.f32 %v8489_v38, %v9934_v7  ;;  %v2342_v3 = vadd.f32 %v2310_v8, %v2237_v27  ;;  %v2240_v44 = vadd.f32 %v5593_v14, %v8163_v58  ;;  %v2633_v51 = vadd.f32 %v8533_v33, %v2344_v36  ;;  %v8645_v59 = vpop.f32.mrf.mxu0 }
 0x1b1   : > { %10048 = vst [vmem:[#allocation27_spill] sm:$0xff] %v8631_v57  ;;  %v8640_v62 = vadd.f32 %v2671_v41, %v2628_v31  ;;  %v2314_v20 = vmul.f32 %v8343_v1, %v8583_v35  ;;  %v8647_v16 = vunpack.c.l.bf16 %v5882_v29  ;;  %v2677_v7 = vmul.f32 %v8389_v37, %v8615_v15  ;;  %v5596_v27 = vpop.f32.mrf.mxu1  ;;  %v5883_v29 = vld [vmem:[#allocation2 + $0xb4] sm:$0xf] }
 0x1b2   : > { %10049 = vst [vmem:[#allocation39_spill] sm:$0xff] %v8637_v52  ;;  %v8653_v8 = vmul.f32 %v8446_v55, %v9954_v6  ;;  %v2345_v58 = vadd.f32 %v2313_v42, %v2240_v44  ;;  %v2238_v41 = vadd.f32 %v2149_v9, %v8170_v40  ;;  %v8656_v33 = vadd.f32 %v2676_v21, %v2633_v51  ;;  %v8661_v14 = vpop.f32.mrf.mxu0 }
 0x1b3   : > { %10050 = vst [vmem:[#allocation87_spill] sm:$0xff] %v8640_v62  ;;  %10051 = vst [vmem:[#allocation37_spill] sm:$0xff] %v8647_v16  ;;  %v2631_v36 = vadd.f32 %v8549_v10, %v2342_v3  ;;  %v2317_v31 = vmul.f32 %v8343_v1, %v8631_v57  ;;  %v8663_v52 = vunpack.c.l.bf16 %v5883_v29  ;;  %v2675_v35 = vmul.f32 %v8389_v37, %v8567_v60  ;;  %v2162_v44 = vpop.f32.mrf.mxu1  ;;  %v5884_v29 = vld [vmem:[#allocation2 + $0xa8] sm:$0xf] }
 0x1b4   : > { %10052 = vst [vmem:[#allocation88_spill] sm:$0xff] %v8653_v8  ;;  %10053 = vst [vmem:[#allocation89_spill] sm:$0xff] %v8656_v33  ;;  %v8669_v42 = vmul.f32 %v8489_v38, %v9946_v2  ;;  %v2343_v40 = vadd.f32 %v2311_v46, %v2238_v41  ;;  %v2243_v21 = vadd.f32 %v5596_v27, %v8189_v47  ;;  %v8677_v9 = vpop.f32.mrf.mxu0  ;;  %v8679_v8 = vunpack.c.l.bf16 %v5884_v29 }
 0x1b5   : > { %10054 = vst [vmem:[#allocation92_spill] sm:$0xff] %v8663_v52  ;;  %v8672_v10 = vadd.f32 %v2674_v32, %v2631_v36  ;;  %v2634_v3 = vadd.f32 %v8565_v39, %v2345_v58  ;;  %v2315_v51 = vmul.f32 %v8343_v1, %v8615_v15  ;;  %v2680_v2 = vmul.f32 %v8389_v37, %v8647_v16  ;;  %v10060_v32 = vld [vmem:[#allocation85_spill] sm:$0xff]  ;;  %v5597_v36 = vpop.f32.mrf.mxu1 }
 0x1b6   : > { %10055 = vst [vmem:[#allocation14_spill] sm:$0xff] %v8669_v42  ;;  %10057 = vst [vmem:[#allocation7_spill] sm:$0xff] %v8679_v8  ;;  %v10058_v42 = vld [vmem:[#allocation95_spill] sm:$0xff]  ;;  %v2348_v47 = vadd.f32 %v2316_v19, %v2243_v21  ;;  %v2241_v41 = vadd.f32 %v2162_v44, %v10060_v32  ;;  %v2632_v58 = vadd.f32 %v8581_v43, %v2343_v40  ;;  %v8693_v29 = vpop.f32.mrf.mxu0  ;;  %v5885_v15 = vld [vmem:[#allocation2 + $0xb8] sm:$0xf] }
 0x1b7   : > { %10056 = vst [vmem:[#allocation12_spill] sm:$0xff] %v8672_v10  ;;  %v8685_v46 = vmul.f32 %v8446_v55, %v10058_v42  ;;  %v8688_v39 = vadd.f32 %v2677_v7, %v2634_v3  ;;  %v2320_v27 = vmul.f32 %v8343_v1, %v8663_v52  ;;  %v8695_v10 = vunpack.c.l.bf16 %v5885_v15  ;;  %v10063_v21 = vld [vmem:[#allocation93_spill] sm:$0xff]  ;;  %v2165_v44 = vpop.f32.mrf.mxu1 }
 0x1b8   : > { %v2678_v33 = vmul.f32 %v8389_v37, %v8599_v50  ;;  %v8701_v19 = vmul.f32 %v8489_v38, %v9954_v6  ;;  %v2346_v7 = vadd.f32 %v2314_v20, %v2241_v41  ;;  %v2244_v3 = vadd.f32 %v5597_v36, %v10063_v21  ;;  %v8709_v15 = vpop.f32.mrf.mxu0  ;;  %v10068_v41 = vld [vmem:[#allocation65_spill] sm:$0xff] }
 0x1b9   : > { %10059 = vst [vmem:[#allocation90_spill] sm:$0xff] %v8685_v46  ;;  %10061 = vst [vmem:[#allocation13_spill] sm:$0xff] %v8688_v39  ;;  %v8704_v43 = vadd.f32 %v2675_v35, %v2632_v58  ;;  %v2637_v40 = vadd.f32 %v8597_v4, %v2348_v47  ;;  %v2318_v32 = vmul.f32 %v8343_v1, %v8647_v16  ;;  %v5886_v46 = vld [vmem:[#allocation2 + $0xc4] sm:$0xf]  ;;  %v5600_v36 = vpop.f32.mrf.mxu1  ;;  %v5887_v16 = vld [vmem:[#allocation2 + $0xd4] sm:$0xf] }
 0x1ba   : > { %10062 = vst [vmem:[#allocation60_spill] sm:$0xff] %v8701_v19  ;;  %v8711_v39 = vunpack.c.l.bf16 %v5886_v46  ;;  %v2681_v6 = vmul.f32 %v8389_v37, %v8679_v8  ;;  %v10066_v19 = vld [vmem:[#allocation96_spill] sm:$0xff]  ;;  %v2349_v35 = vadd.f32 %v2317_v31, %v2244_v3  ;;  %v2242_v58 = vadd.f32 %v2165_v44, %v10068_v41  ;;  %v8725_v46 = vpop.f32.mrf.mxu0  ;;  %v10071_v3 = vld [vmem:[#allocation77_spill] sm:$0xff] }
 0x1bb   : > { %10064 = vst [vmem:[#allocation91_spill] sm:$0xff] %v8704_v43  ;;  %v8717_v20 = vmul.f32 %v8446_v55, %v10066_v19  ;;  %v8720_v4 = vadd.f32 %v2680_v2, %v2637_v40  ;;  %v2635_v47 = vadd.f32 %v8613_v56, %v2346_v7  ;;  %v2321_v21 = vmul.f32 %v8343_v1, %v8695_v10  ;;  %v2178_v44 = vpop.f32.mrf.mxu1 }
 0x1bc   : > { %10065 = vst [vmem:[#allocation73_spill] sm:$0xff] %v8711_v39  ;;  %v8727_v43 = vunpack.c.l.bf16 %v5887_v16  ;;  %v2679_v62 = vmul.f32 %v8389_v37, %v8631_v57  ;;  %v8733_v31 = vmul.f32 %v8489_v38, %v10058_v42  ;;  %v2347_v2 = vadd.f32 %v2315_v51, %v2242_v58  ;;  %v8741_v16 = vpop.f32.mrf.mxu0  ;;  %v10076_v58 = vld [vmem:[#allocation79_spill] sm:$0xff] }
 0x1bd   : > { %10067 = vst [vmem:[#allocation95_spill] sm:$0xff] %v8717_v20  ;;  %10069 = vst [vmem:[#allocation85_spill] sm:$0xff] %v8720_v4  ;;  %v2247_v40 = vadd.f32 %v5600_v36, %v10071_v3  ;;  %v8736_v56 = vadd.f32 %v2678_v33, %v2635_v47  ;;  %v2638_v7 = vadd.f32 %v8629_v63, %v2349_v35  ;;  %v5888_v20 = vld [vmem:[#allocation2 + $0xc8] sm:$0xf]  ;;  %v5601_v36 = vpop.f32.mrf.mxu1 }
 0x1be   : > { %10070 = vst [vmem:[#allocation93_spill] sm:$0xff] %v8733_v31  ;;  %v2319_v41 = vmul.f32 %v8343_v1, %v8679_v8  ;;  %v8743_v4 = vunpack.c.l.bf16 %v5888_v20  ;;  %v2684_v42 = vmul.f32 %v8389_v37, %v8711_v39  ;;  %v10074_v31 = vld [vmem:[#allocation6_spill] sm:$0xff]  ;;  %v2245_v47 = vadd.f32 %v2178_v44, %v10076_v58  ;;  %v8757_v20 = vpop.f32.mrf.mxu0  ;;  %v5889_v8 = vld [vmem:[#allocation2 + $0xd8] sm:$0xf] }
 0x1bf   : > { %10072 = vst [vmem:[#allocation96_spill] sm:$0xff] %v8736_v56  ;;  %v8749_v51 = vmul.f32 %v8446_v55, %v10074_v31  ;;  %v2352_v33 = vadd.f32 %v2320_v27, %v2247_v40  ;;  %v8752_v63 = vadd.f32 %v2681_v6, %v2638_v7  ;;  %v2636_v35 = vadd.f32 %v8645_v59, %v2347_v2  ;;  %v10079_v40 = vld [vmem:[#allocation11_spill] sm:$0xff]  ;;  %v2181_v44 = vpop.f32.mrf.mxu1 }
 0x1c0   : > { %10073 = vst [vmem:[#allocation65_spill] sm:$0xff] %v8743_v4  ;;  %v2324_v3 = vmul.f32 %v8343_v1, %v8727_v43  ;;  %v8759_v56 = vunpack.c.l.bf16 %v5889_v8  ;;  %v2682_v57 = vmul.f32 %v8389_v37, %v8663_v52  ;;  %v8765_v27 = vmul.f32 %v8489_v38, %v10066_v19  ;;  %v8773_v8 = vpop.f32.mrf.mxu0 }
 0x1c1   : > { %10075 = vst [vmem:[#allocation77_spill] sm:$0xff] %v8749_v51  ;;  %10077 = vst [vmem:[#allocation6_spill] sm:$0xff] %v8752_v63  ;;  %v2350_v6 = vadd.f32 %v2318_v32, %v2245_v47  ;;  %v2248_v7 = vadd.f32 %v5601_v36, %v10079_v40  ;;  %v8768_v59 = vadd.f32 %v2679_v62, %v2636_v35  ;;  %v5890_v51 = vld [vmem:[#allocation2 + $0xe4] sm:$0xf]  ;;  %v10083_v47 = vld [vmem:[#allocation80_spill] sm:$0xff]  ;;  %v5604_v36 = vpop.f32.mrf.mxu1 }
 0x1c2   : > { %10078 = vst [vmem:[#allocation79_spill] sm:$0xff] %v8765_v27  ;;  %v2641_v2 = vadd.f32 %v8661_v14, %v2352_v33  ;;  %v2322_v58 = vmul.f32 %v8343_v1, %v8711_v39  ;;  %v8775_v63 = vunpack.c.l.bf16 %v5890_v51  ;;  %v2685_v19 = vmul.f32 %v8389_v37, %v8743_v4  ;;  %v10081_v27 = vld [vmem:[#allocation43_spill] sm:$0xff]  ;;  %v8789_v51 = vpop.f32.mrf.mxu0  ;;  %v5891_v39 = vld [vmem:[#allocation2 + $0xf4] sm:$0xf] }
 0x1c3   : > { %10080 = vst [vmem:[#allocation11_spill] sm:$0xff] %v8768_v59  ;;  %v8781_v32 = vmul.f32 %v8446_v55, %v10081_v27  ;;  %v2353_v62 = vadd.f32 %v2321_v21, %v2248_v7  ;;  %v2246_v35 = vadd.f32 %v2181_v44, %v10083_v47  ;;  %v2639_v33 = vadd.f32 %v8677_v9, %v2350_v6  ;;  %v10086_v7 = vld [vmem:[#allocation59_spill] sm:$0xff]  ;;  %v2194_v44 = vpop.f32.mrf.mxu1 }
 0x1c4   : > { %v8784_v14 = vadd.f32 %v2684_v42, %v2641_v2  ;;  %v2325_v40 = vmul.f32 %v8343_v1, %v8759_v56  ;;  %v8791_v59 = vunpack.c.l.bf16 %v5891_v39  ;;  %v2683_v52 = vmul.f32 %v8389_v37, %v8695_v10  ;;  %v8805_v39 = vpop.f32.mrf.mxu0 }
 0x1c5   : > { %10082 = vst [vmem:[#allocation43_spill] sm:$0xff] %v8781_v32  ;;  %v8797_v21 = vmul.f32 %v8489_v38, %v10074_v31  ;;  %v2351_v42 = vadd.f32 %v2319_v41, %v2246_v35  ;;  %v2251_v2 = vadd.f32 %v5604_v36, %v10086_v7  ;;  %v8800_v9 = vadd.f32 %v2682_v57, %v2639_v33  ;;  %v5892_v32 = vld [vmem:[#allocation2 + $0xe8] sm:$0xf] }
 0x1c6   : > { %10084 = vst [vmem:[#allocation80_spill] sm:$0xff] %v8784_v14  ;;  %v2642_v6 = vadd.f32 %v8693_v29, %v2353_v62  ;;  %v2323_v47 = vmul.f32 %v8343_v1, %v8743_v4  ;;  %v8807_v14 = vunpack.c.l.bf16 %v5892_v32  ;;  %v2688_v31 = vmul.f32 %v8389_v37, %v8775_v63  ;;  %v5099_v29 = vld [vmem:[%s9553_s6 + $0x7] sm:$0x1]  ;;  %v5605_v32 = vpop.f32.mrf.mxu1  ;;  %v8824_v7 = vpop.f32.mrf.mxu0 }
 0x1c7   : > { %10085 = vst [vmem:[#allocation97_spill] sm:$0xff] %v8797_v21  ;;  %v8813_v41 = vmul.f32 %v8446_v55, %v8134_v24  ;;  %v2356_v57 = vadd.f32 %v2324_v3, %v2251_v2  ;;  %v2249_v35 = vadd.f32 %v2194_v44, %v8351_v48  ;;  %v2640_v33 = vadd.f32 %v8709_v15, %v2351_v42  ;;  %v5893_v21 = vld [vmem:[#allocation2 + $0xf8] sm:$0xf] }
 0x1c8   : > { %v8819_v62 = vadd.f32 %v2685_v19, %v2642_v6  ;;  %v2328_v36 = vmul.f32 %v8343_v1, %v8791_v59  ;;  %v8826_v4 = vunpack.c.l.bf16 %v5893_v21  ;;  %v2686_v48 = vmul.f32 %v8389_v37, %v8727_v43  ;;  %v2197_v6 = vpop.f32.mrf.mxu1  ;;  %v8838_v44 = vpop.f32.mrf.mxu0 }
 0x1c9   : > { %10087 = vst [vmem:[#allocation59_spill] sm:$0xff] %v8813_v41  ;;  %v8832_v3 = vmul.f32 %v8489_v38, %v10081_v27  ;;  %v2354_v19 = vadd.f32 %v2322_v58, %v2249_v35  ;;  %v2252_v2 = vadd.f32 %v5605_v32, %v8364_v12  ;;  %v8835_v15 = vadd.f32 %v2683_v52, %v2640_v33 }
 0x1ca   : > { %10088 = vst [vmem:[#allocation98_spill] sm:$0xff] %v8819_v62  ;;  %v2645_v42 = vadd.f32 %v8725_v46, %v2356_v57  ;;  %v2969_v21 = vmul.f32 %v5099_v29, %v9992_v26  ;;  %v2689_v41 = vmul.f32 %v8389_v37, %v8807_v14  ;;  %v8843_v62 = vld [vmem:[#allocation2 + $0x104] sm:$0xf]  ;;  %v8848_v58 = vmul.f32 %v8446_v55, %v8193_v25  ;;  %v5608_v35 = vpop.f32.mrf.mxu1  ;;  %v8858_v33 = vpop.f32.mrf.mxu0 }
 0x1cb   : > { %10089 = vst [vmem:[#allocation99_spill] sm:$0xff] %v8832_v3  ;;  %v2357_v12 = vadd.f32 %v2325_v40, %v2252_v2  ;;  %v2250_v52 = vadd.f32 %v2197_v6, %v8380_v28  ;;  %v2643_v57 = vadd.f32 %v8741_v16, %v2354_v19  ;;  %v2326_v26 = vmul.f32 %v8343_v1, %v8775_v63 }
 0x1cc   : > { %10090 = vst [vmem:[#allocation100_spill] sm:$0xff] %v8848_v58  ;;  %v8851_v46 = vadd.f32 %v2688_v31, %v2645_v42  ;;  %v2329_v29 = vmul.f32 %v8343_v1, %v8826_v4  ;;  %v2687_v32 = vmul.f32 %v8389_v37, %v8759_v56  ;;  %v8864_v40 = vmul.f32 %v8489_v38, %v8134_v24  ;;  %v10093_v31 = vld [vmem:[#allocation44_spill] sm:$0xff]  ;;  %v2210_v42 = vpop.f32.mrf.mxu1  ;;  %v3656_v27 = vpop.f32.mrf.mxu0 }
 0x1cd   : > { %v2355_v28 = vadd.f32 %v2323_v47, %v2250_v52  ;;  %v2255_v2 = vadd.f32 %v5608_v35, %v10093_v31  ;;  %v8867_v16 = vadd.f32 %v2686_v48, %v2643_v57  ;;  %v2646_v19 = vadd.f32 %v8757_v20, %v2357_v12  ;;  %v10096_v47 = vld [vmem:[#allocation84_spill] sm:$0xff]  ;;  %v10098_v57 = vld [vmem:[#allocation23_spill] sm:$0xff] }
 0x1ce   : > { %10091 = vst [vmem:[#allocation101_spill] sm:$0xff] %v8851_v46  ;;  %10092 = vst [vmem:[#allocation102_spill] sm:$0xff] %v8864_v40  ;;  %v8871_v6 = vrot.slane %v2969_v21, %v9999_v18  ;;  %v10094_v58 = vunpack.c.l.bf16 %v8843_v62  ;;  %v8876_v46 = vld [vmem:[#allocation2 + $0x108] sm:$0xf]  ;;  %v8881_v52 = vmul.f32 %v8446_v55, %v10096_v47  ;;  %v2253_v20 = vadd.f32 %v2210_v42, %v10098_v57  ;;  %v5609_v21 = vpop.f32.mrf.mxu1  ;;  %v10102_v40 = vld [vmem:[#allocation50_spill] sm:$0xff] }
 0x1cf   : > { %10095 = vst [vmem:[#allocation44_spill] sm:$0xff] %v8876_v46  ;;  %v2360_v48 = vadd.f32 %v2328_v36, %v2255_v2  ;;  %v8884_v12 = vadd.f32 %v2689_v41, %v2646_v19  ;;  %v2644_v18 = vadd.f32 %v8773_v8, %v2355_v28  ;;  %v2327_v35 = vmul.f32 %v8343_v1, %v8807_v14  ;;  %v10100_v36 = vld [vmem:[#allocation28_spill] sm:$0xff] }
 0x1d0   : > { %v2692_v3 = vmul.f32 %v8389_v37, %v10094_v58  ;;  %10097 = vst [vmem:[#allocation84_spill] sm:$0xff] %v8881_v52  ;;  %v5701_v58 = vpop.f32.mrf.mxu0  ;;  %v2690_v31 = vmul.f32 %v8389_v37, %v8791_v59  ;;  %v8893_v24 = vmul.f32 %v8489_v38, %v8193_v25  ;;  %v2358_v52 = vadd.f32 %v2326_v26, %v2253_v20  ;;  %v2213_v8 = vpop.f32.mrf.mxu1 }
 0x1d1   : > { %v2256_v2 = vadd.f32 %v5609_v21, %v10100_v36  ;;  %v8896_v42 = vadd.f32 %v2687_v32, %v2644_v18  ;;  %v2649_v41 = vadd.f32 %v8789_v51, %v2360_v48  ;;  %v2978_v28 = vmul.f32 %v8871_v6, %v8373_v17  ;;  %v10105_v51 = vld [vmem:[#allocation16_spill] sm:$0xff] }
 0x1d2   : > { %10099 = vst [vmem:[#allocation23_spill] sm:$0xff] %v8893_v24  ;;  %v3659_v1 = vpop.f32.mrf.mxu0  ;;  %v10101_v19 = vunpack.c.l.bf16 %v8876_v46  ;;  %v9717_v55 = vunpack.c.l.bf16 %v10102_v40  ;;  %v10103_v24 = vld [vmem:[#allocation17_spill] sm:$0xff]  ;;  %v2647_v32 = vadd.f32 %v8805_v39, %v2358_v52  ;;  %v5660_v18 = vpop.f32.mrf.mxu1  ;;  %v2976_v48 = vmul.f32 %v8871_v6, %v10105_v51  ;;  %v10106_v36 = vld [vmem:[#allocation48_spill] sm:$0xff] }
 0x1d3   : > { %v2361_v25 = vadd.f32 %v2329_v29, %v2256_v2  ;;  %v2254_v26 = vadd.f32 %v2213_v8, %v10103_v24  ;;  %v8906_v20 = vadd.f32 %v2692_v3, %v2649_v41  ;;  %v2691_v17 = vmul.f32 %v8389_v37, %v8826_v4  ;;  %v10108_v24 = vld [vmem:[#allocation30_spill] sm:$0xff] }
 0x1d4   : > { %v2693_v57 = vmul.f32 %v8389_v37, %v10101_v19  ;;  %v5704_v21 = vpop.f32.mrf.mxu0  ;;  %v3815_v46 = vunpack.c.l.bf16 %v10106_v36  ;;  %v8916_v19 = vmul.f32 %v8489_v38, %v10096_v47  ;;  %v2935_v3 = vadd.f32 %v5660_v18, %v10108_v24  ;;  %v2806_v52 = vpop.f32.mrf.mxu1  ;;  %v10109_v37 = vld [vmem:[#allocation68_spill] sm:$0xff]  ;;  %v10110_v36 = vld [vmem:[#allocation51_spill] sm:$0xff]  ;;  %v10113_v24 = vld [vmem:[#allocation49_spill] sm:$0xff] }
 0x1d5   : > { %10104 = vst [vmem:[#allocation28_spill] sm:$0xff] %v8906_v20  ;;  %v2359_v29 = vadd.f32 %v2327_v35, %v2254_v26  ;;  %v8919_v2 = vadd.f32 %v2690_v31, %v2647_v32  ;;  %v2650_v39 = vadd.f32 %v8824_v7, %v2361_v25  ;;  %v2979_v41 = vmul.f32 %v8871_v6, %v8440_v23  ;;  %v10112_v7 = vld [vmem:[#allocation94_spill] sm:$0xff] }
 0x1d6   : > { %10107 = vst [vmem:[#allocation17_spill] sm:$0xff] %v8916_v19  ;;  %v3672_v8 = vpop.f32.mrf.mxu0  ;;  %v3858_v51 = vmul.f32 %v10109_v37, %v9717_v55  ;;  %v3010_v47 = vadd.f32 %v2978_v28, %v2935_v3  ;;  %v10111_v19 = vld [vmem:[#allocation18_spill] sm:$0xff]  ;;  %v5661_v32 = vpop.f32.mrf.mxu1  ;;  %v2977_v25 = vmul.f32 %v8871_v6, %v10112_v7  ;;  %v3856_v23 = vmul.f32 %v10109_v37, %v3815_v46 }
 0x1d7   : > { %v2933_v35 = vadd.f32 %v2806_v52, %v10111_v19  ;;  %v8929_v26 = vadd.f32 %v2693_v57, %v2650_v39  ;;  %v2648_v31 = vadd.f32 %v8838_v44, %v2359_v29  ;;  %v3816_v40 = vunpack.c.l.bf16 %v10113_v24 }
 0x1d8   : > { %v5705_v18 = vpop.f32.mrf.mxu0  ;;  %v2936_v55 = vadd.f32 %v5661_v32, %v8496_v13  ;;  %v3785_v28 = vadd.f32 %v8858_v33, %v3010_v47  ;;  %v2809_v57 = vpop.f32.mrf.mxu1  ;;  %v2982_v44 = vmul.f32 %v8871_v6, %v8473_v34  ;;  %v10114_v29 = vunpack.c.l.bf16 %v10110_v36  ;;  %v10116_v47 = vld [vmem:[#allocation53_spill] sm:$0xff] }
 0x1d9   : > { %v3008_v38 = vadd.f32 %v2976_v48, %v2933_v35  ;;  %v8937_v20 = vadd.f32 %v2691_v17, %v2648_v31  ;;  %v2934_v46 = vadd.f32 %v2809_v57, %v8512_v5  ;;  %v10115_v17 = vld [vmem:[#allocation81_spill] sm:$0xff]  ;;  %v8951_v31 = vunpack.c.l.bf16 %v10116_v47  ;;  %v10119_v47 = vld [vmem:[#allocation70_spill] sm:$0xff] }
 0x1da   : > { %v3675_v19 = vpop.f32.mrf.mxu0  ;;  %v3859_v3 = vmul.f32 %v10109_v37, %v10114_v29  ;;  %v3011_v39 = vadd.f32 %v2979_v41, %v2936_v55  ;;  %v8946_v52 = vadd.f32 %v3858_v51, %v3785_v28  ;;  %v5664_v13 = vpop.f32.mrf.mxu1  ;;  %v2980_v35 = vmul.f32 %v8871_v6, %v10115_v17  ;;  %v10117_v17 = vld [vmem:[#allocation52_spill] sm:$0xff] }
 0x1db   : > { %v3783_v48 = vadd.f32 %v3656_v27, %v3008_v38  ;;  %v3857_v34 = vmul.f32 %v10109_v37, %v3816_v40  ;;  %v3009_v32 = vadd.f32 %v2977_v25, %v2934_v46  ;;  %v2939_v7 = vadd.f32 %v5664_v13, %v8528_v61  ;;  %v10118_v61 = vld [vmem:[#allocation54_spill] sm:$0xff] }
 0x1dc   : > { %v5708_v33 = vpop.f32.mrf.mxu0  ;;  %v3786_v55 = vadd.f32 %v5701_v58, %v3011_v39  ;;  %v2822_v5 = vpop.f32.mrf.mxu1  ;;  %v2983_v38 = vmul.f32 %v8871_v6, %v8503_v54  ;;  %v2981_v40 = vmul.f32 %v8871_v6, %v10117_v17  ;;  %v3860_v58 = vmul.f32 %v10109_v37, %v8951_v31 }
 0x1dd   : > { %v8955_v24 = vadd.f32 %v3856_v23, %v3783_v48  ;;  %v3014_v41 = vadd.f32 %v2982_v44, %v2939_v7  ;;  %v2937_v51 = vadd.f32 %v2822_v5, %v8544_v11  ;;  %v3784_v57 = vadd.f32 %v3659_v1, %v3009_v32  ;;  %v10120_v5 = vld [vmem:[#allocation34_spill] sm:$0xff] }
 0x1de   : > { %v3688_v27 = vpop.f32.mrf.mxu0  ;;  %v8960_v28 = vadd.f32 %v3859_v3, %v3786_v55  ;;  %v5665_v29 = vpop.f32.mrf.mxu1  ;;  %v8965_v23 = vunpack.c.l.bf16 %v10118_v61  ;;  %v2986_v1 = vmul.f32 %v8871_v6, %v8535_v45 }
 0x1df   : > { %v3012_v39 = vadd.f32 %v2980_v35, %v2937_v51  ;;  %v2940_v54 = vadd.f32 %v5665_v29, %v8560_v53  ;;  %v8970_v44 = vadd.f32 %v3857_v34, %v3784_v57  ;;  %v3789_v11 = vadd.f32 %v5704_v21, %v3014_v41  ;;  %v10121_v34 = vld [vmem:[#allocation55_spill] sm:$0xff] }
 0x1e0   : > { %v5709_v25 = vpop.f32.mrf.mxu0  ;;  %v2825_v3 = vpop.f32.mrf.mxu1  ;;  %v2984_v35 = vmul.f32 %v8871_v6, %v10120_v5  ;;  %v8981_v51 = vunpack.c.l.bf16 %v10121_v34  ;;  %v3861_v21 = vmul.f32 %v10109_v37, %v8965_v23  ;;  %v10127_v34 = vld [vmem:[#allocation87_spill] sm:$0xff] }
 0x1e1   : > { %v3015_v48 = vadd.f32 %v2983_v38, %v2940_v54  ;;  %v2938_v13 = vadd.f32 %v2825_v3, %v8576_v0  ;;  %v8976_v32 = vadd.f32 %v10119_v47, %v3789_v11  ;;  %v3787_v7 = vadd.f32 %v3672_v8, %v3012_v39  ;;  %v10122_v39 = vld [vmem:[#allocation63_spill] sm:$0xff]  ;;  %v10124_v47 = vld [vmem:[#allocation32_spill] sm:$0xff] }
 0x1e2   : > { %v3691_v46 = vpop.f32.mrf.mxu0  ;;  %v5668_v55 = vpop.f32.mrf.mxu1  ;;  %v2987_v8 = vmul.f32 %v8871_v6, %v8567_v60 }
 0x1e3   : > { %v3013_v45 = vadd.f32 %v2981_v40, %v2938_v13  ;;  %v2943_v38 = vadd.f32 %v5668_v55, %v8592_v22  ;;  %v8986_v41 = vadd.f32 %v3860_v58, %v3787_v7  ;;  %v3790_v0 = vadd.f32 %v5705_v18, %v3015_v48  ;;  %v10125_v58 = vld [vmem:[#allocation56_spill] sm:$0xff] }
 0x1e4   : > { %v5712_v53 = vpop.f32.mrf.mxu0  ;;  %v2838_v57 = vpop.f32.mrf.mxu1  ;;  %v2985_v40 = vmul.f32 %v8871_v6, %v10124_v47  ;;  %v8997_v13 = vunpack.c.l.bf16 %v10125_v58  ;;  %v3864_v18 = vmul.f32 %v10109_v37, %v8981_v51  ;;  %v10130_v47 = vld [vmem:[#allocation33_spill] sm:$0xff] }
 0x1e5   : > { %v3018_v17 = vadd.f32 %v2986_v1, %v2943_v38  ;;  %v2941_v61 = vadd.f32 %v2838_v57, %v8608_v49  ;;  %v8992_v54 = vadd.f32 %v10122_v39, %v3790_v0  ;;  %v3788_v11 = vadd.f32 %v3675_v19, %v3013_v45  ;;  %v10128_v38 = vld [vmem:[#allocation20_spill] sm:$0xff] }
 0x1e6   : > { %v3704_v29 = vpop.f32.mrf.mxu0  ;;  %v5669_v3 = vpop.f32.mrf.mxu1  ;;  %v2990_v19 = vmul.f32 %v8871_v6, %v8599_v50 }
 0x1e7   : > { %10123 = vst [vmem:[#allocation16_spill] sm:$0xff] %v8992_v54  ;;  %v3016_v60 = vadd.f32 %v2984_v35, %v2941_v61  ;;  %v2944_v1 = vadd.f32 %v5669_v3, %v8624_v30  ;;  %v9002_v48 = vadd.f32 %v3861_v21, %v3788_v11  ;;  %v3793_v49 = vadd.f32 %v5708_v33, %v3018_v17  ;;  %v10131_v21 = vld [vmem:[#allocation57_spill] sm:$0xff] }
 0x1e8   : > { %v5713_v22 = vpop.f32.mrf.mxu0  ;;  %v2841_v7 = vpop.f32.mrf.mxu1  ;;  %v2988_v35 = vmul.f32 %v8871_v6, %v10130_v47  ;;  %v9013_v61 = vunpack.c.l.bf16 %v10131_v21  ;;  %v3865_v33 = vmul.f32 %v10109_v37, %v8997_v13  ;;  %v10132_v17 = vld [vmem:[#allocation89_spill] sm:$0xff] }
 0x1e9   : > { %10126 = vst [vmem:[#allocation48_spill] sm:$0xff] %v9002_v48  ;;  %v3019_v5 = vadd.f32 %v2987_v8, %v2944_v1  ;;  %v2942_v45 = vadd.f32 %v2841_v7, %v10127_v34  ;;  %v9008_v0 = vadd.f32 %v10128_v38, %v3793_v49  ;;  %v3791_v57 = vadd.f32 %v3688_v27, %v3016_v60  ;;  %v10134_v1 = vld [vmem:[#allocation27_spill] sm:$0xff]  ;;  %v10135_v7 = vld [vmem:[#allocation12_spill] sm:$0xff]  ;;  %v10136_v38 = vld [vmem:[#allocation74_spill] sm:$0xff] }
 0x1ea   : > { %v3707_v55 = vpop.f32.mrf.mxu0  ;;  %v5672_v39 = vpop.f32.mrf.mxu1  ;;  %v2991_v27 = vmul.f32 %v8871_v6, %v10134_v1  ;;  %v10138_v48 = vld [vmem:[#allocation29_spill] sm:$0xff] }
 0x1eb   : > { %10129 = vst [vmem:[#allocation30_spill] sm:$0xff] %v9008_v0  ;;  %v3017_v50 = vadd.f32 %v2985_v40, %v2942_v45  ;;  %v2947_v8 = vadd.f32 %v5672_v39, %v10132_v17  ;;  %v9018_v11 = vadd.f32 %v3864_v18, %v3791_v57  ;;  %v3794_v3 = vadd.f32 %v5709_v25, %v3019_v5  ;;  %v10139_v18 = vld [vmem:[#allocation58_spill] sm:$0xff]  ;;  %v10140_v39 = vld [vmem:[#allocation13_spill] sm:$0xff] }
 0x1ec   : > { %v5716_v30 = vpop.f32.mrf.mxu0  ;;  %v2854_v58 = vpop.f32.mrf.mxu1  ;;  %v2989_v40 = vmul.f32 %v8871_v6, %v10138_v48  ;;  %v9029_v57 = vunpack.c.l.bf16 %v10139_v18  ;;  %v3868_v25 = vmul.f32 %v10109_v37, %v9013_v61  ;;  %v10143_v48 = vld [vmem:[#allocation91_spill] sm:$0xff]  ;;  %v10146_v54 = vld [vmem:[#allocation37_spill] sm:$0xff] }
 0x1ed   : > { %10133 = vst [vmem:[#allocation68_spill] sm:$0xff] %v9018_v11  ;;  %v3022_v49 = vadd.f32 %v2990_v19, %v2947_v8  ;;  %v2945_v34 = vadd.f32 %v2854_v58, %v10135_v7  ;;  %v9024_v47 = vadd.f32 %v10136_v38, %v3794_v3  ;;  %v3792_v21 = vadd.f32 %v3691_v46, %v3017_v50  ;;  %v10142_v58 = vld [vmem:[#allocation92_spill] sm:$0xff] }
 0x1ee   : > { %v3720_v60 = vpop.f32.mrf.mxu0  ;;  %v5673_v0 = vpop.f32.mrf.mxu1  ;;  %v2994_v46 = vmul.f32 %v8871_v6, %v10142_v58  ;;  %v10144_v38 = vld [vmem:[#allocation8_spill] sm:$0xff] }
 0x1ef   : > { %10137 = vst [vmem:[#allocation51_spill] sm:$0xff] %v9024_v47  ;;  %v3020_v5 = vadd.f32 %v2988_v35, %v2945_v34  ;;  %v2948_v19 = vadd.f32 %v5673_v0, %v10140_v39  ;;  %v9034_v17 = vadd.f32 %v3865_v33, %v3792_v21  ;;  %v3797_v8 = vadd.f32 %v5712_v53, %v3022_v49  ;;  %v10147_v33 = vld [vmem:[#allocation61_spill] sm:$0xff] }
 0x1f0   : > { %v5717_v45 = vpop.f32.mrf.mxu0  ;;  %v2857_v3 = vpop.f32.mrf.mxu1  ;;  %v2992_v35 = vmul.f32 %v8871_v6, %v10146_v54  ;;  %v9045_v34 = vunpack.c.l.bf16 %v10147_v33  ;;  %v3869_v53 = vmul.f32 %v10109_v37, %v9029_v57  ;;  %v10148_v21 = vld [vmem:[#allocation85_spill] sm:$0xff]  ;;  %v10150_v54 = vld [vmem:[#allocation96_spill] sm:$0xff] }
 0x1f1   : > { %10141 = vst [vmem:[#allocation18_spill] sm:$0xff] %v9034_v17  ;;  %v3023_v1 = vadd.f32 %v2991_v27, %v2948_v19  ;;  %v2946_v7 = vadd.f32 %v2857_v3, %v10143_v48  ;;  %v9040_v18 = vadd.f32 %v10144_v38, %v3797_v8  ;;  %v3795_v47 = vadd.f32 %v3704_v29, %v3020_v5  ;;  %v10151_v48 = vld [vmem:[#allocation15_spill] sm:$0xff] }
 0x1f2   : > { %v3723_v50 = vpop.f32.mrf.mxu0  ;;  %v5676_v11 = vpop.f32.mrf.mxu1  ;;  %v2995_v29 = vmul.f32 %v8871_v6, %v8695_v10  ;;  %v10153_v17 = vld [vmem:[#allocation7_spill] sm:$0xff] }
 0x1f3   : > { %10145 = vst [vmem:[#allocation94_spill] sm:$0xff] %v9040_v18  ;;  %v3021_v49 = vadd.f32 %v2989_v40, %v2946_v7  ;;  %v2951_v27 = vadd.f32 %v5676_v11, %v10148_v21  ;;  %v9050_v39 = vadd.f32 %v3868_v25, %v3795_v47  ;;  %v3798_v19 = vadd.f32 %v5713_v22, %v3023_v1  ;;  %v10154_v47 = vld [vmem:[#allocation62_spill] sm:$0xff] }
 0x1f4   : > { %v5720_v0 = vpop.f32.mrf.mxu0  ;;  %v2870_v8 = vpop.f32.mrf.mxu1  ;;  %v2993_v40 = vmul.f32 %v8871_v6, %v10153_v17  ;;  %v9061_v25 = vunpack.c.l.bf16 %v10154_v47  ;;  %v3872_v22 = vmul.f32 %v10109_v37, %v9045_v34  ;;  %v10155_v1 = vld [vmem:[#allocation6_spill] sm:$0xff]  ;;  %v10156_v17 = vld [vmem:[#allocation11_spill] sm:$0xff] }
 0x1f5   : > { %10149 = vst [vmem:[#allocation49_spill] sm:$0xff] %v9050_v39  ;;  %v3026_v3 = vadd.f32 %v2994_v46, %v2951_v27  ;;  %v2949_v58 = vadd.f32 %v2870_v8, %v10150_v54  ;;  %v9056_v38 = vadd.f32 %v10151_v48, %v3798_v19  ;;  %v3796_v33 = vadd.f32 %v3707_v55, %v3021_v49  ;;  %v10157_v54 = vld [vmem:[#allocation9_spill] sm:$0xff] }
 0x1f6   : > { %v3736_v5 = vpop.f32.mrf.mxu0  ;;  %v5677_v18 = vpop.f32.mrf.mxu1  ;;  %v2998_v55 = vmul.f32 %v8871_v6, %v8727_v43  ;;  %v10159_v39 = vld [vmem:[#allocation73_spill] sm:$0xff] }
 0x1f7   : > { %10152 = vst [vmem:[#allocation81_spill] sm:$0xff] %v9056_v38  ;;  %v3024_v10 = vadd.f32 %v2992_v35, %v2949_v58  ;;  %v2952_v46 = vadd.f32 %v5677_v18, %v10155_v1  ;;  %v9066_v7 = vadd.f32 %v3869_v53, %v3796_v33  ;;  %v3801_v21 = vadd.f32 %v5716_v30, %v3026_v3  ;;  %v10160_v53 = vld [vmem:[#allocation67_spill] sm:$0xff]  ;;  %v10161_v3 = vld [vmem:[#allocation80_spill] sm:$0xff] }
 0x1f8   : > { %v5721_v11 = vpop.f32.mrf.mxu0  ;;  %v2873_v27 = vpop.f32.mrf.mxu1  ;;  %v2996_v35 = vmul.f32 %v8871_v6, %v10159_v39  ;;  %v9077_v58 = vunpack.c.l.bf16 %v10160_v53  ;;  %v3873_v30 = vmul.f32 %v10109_v37, %v9061_v25 }
 0x1f9   : > { %v3027_v19 = vadd.f32 %v2995_v29, %v2952_v46  ;;  %v2950_v8 = vadd.f32 %v2873_v27, %v10156_v17  ;;  %v9072_v48 = vadd.f32 %v10157_v54, %v3801_v21  ;;  %v3799_v47 = vadd.f32 %v3720_v60, %v3024_v10  ;;  %v10162_v27 = vld [vmem:[#allocation47_spill] sm:$0xff] }
 0x1fa   : > { %v3739_v49 = vpop.f32.mrf.mxu0  ;;  %v5680_v38 = vpop.f32.mrf.mxu1  ;;  %v2999_v60 = vmul.f32 %v8871_v6, %v8759_v56 }
 0x1fb   : > { %10158 = vst [vmem:[#allocation53_spill] sm:$0xff] %v9072_v48  ;;  %v3025_v43 = vadd.f32 %v2993_v40, %v2950_v8  ;;  %v2955_v29 = vadd.f32 %v5680_v38, %v10161_v3  ;;  %v9082_v33 = vadd.f32 %v3872_v22, %v3799_v47  ;;  %v3802_v1 = vadd.f32 %v5717_v45, %v3027_v19  ;;  %v10163_v48 = vld [vmem:[#allocation65_spill] sm:$0xff]  ;;  %v10165_v19 = vld [vmem:[#allocation98_spill] sm:$0xff] }
 0x1fc   : > { %v5724_v18 = vpop.f32.mrf.mxu0  ;;  %v2886_v46 = vpop.f32.mrf.mxu1  ;;  %v2997_v40 = vmul.f32 %v8871_v6, %v10163_v48  ;;  %v10164_v22 = vld [vmem:[#allocation69_spill] sm:$0xff]  ;;  %v3876_v45 = vmul.f32 %v10109_v37, %v9077_v58 }
 0x1fd   : > { %v3030_v21 = vadd.f32 %v2998_v55, %v2955_v29  ;;  %v2953_v39 = vadd.f32 %v2886_v46, %v8800_v9  ;;  %v9088_v17 = vadd.f32 %v10162_v27, %v3802_v1  ;;  %v3800_v54 = vadd.f32 %v3723_v50, %v3025_v43  ;;  %v10166_v1 = vld [vmem:[#allocation86_spill] sm:$0xff] }
 0x1fe   : > { %v3752_v10 = vpop.f32.mrf.mxu0  ;;  %v5681_v53 = vpop.f32.mrf.mxu1  ;;  %v9093_v8 = vunpack.c.l.bf16 %v10164_v22  ;;  %v3002_v50 = vmul.f32 %v8871_v6, %v8791_v59 }
 0x1ff   : > { %v3028_v56 = vadd.f32 %v2996_v35, %v2953_v39  ;;  %v2956_v55 = vadd.f32 %v5681_v53, %v10165_v19  ;;  %v9098_v47 = vadd.f32 %v3873_v30, %v3800_v54  ;;  %v3805_v9 = vadd.f32 %v5720_v0, %v3030_v21  ;;  %v10168_v30 = vld [vmem:[#allocation45_spill] sm:$0xff] }
 0x200   : > { %v5725_v38 = vpop.f32.mrf.mxu0  ;;  %v2889_v3 = vpop.f32.mrf.mxu1  ;;  %v3000_v35 = vmul.f32 %v8871_v6, %v8775_v63  ;;  %v9109_v54 = vunpack.c.l.bf16 %v10168_v30  ;;  %v3877_v0 = vmul.f32 %v10109_v37, %v9093_v8  ;;  %v10169_v21 = vld [vmem:[#allocation101_spill] sm:$0xff] }
 0x201   : > { %v3031_v29 = vadd.f32 %v2999_v60, %v2956_v55  ;;  %v2954_v48 = vadd.f32 %v2889_v3, %v8835_v15  ;;  %v9104_v46 = vadd.f32 %v10166_v1, %v3805_v9  ;;  %v3803_v27 = vadd.f32 %v3736_v5, %v3028_v56  ;;  %v5896_v56 = vld [vmem:[#allocation2 + $0x114] sm:$0xf]  ;;  %v10170_v1 = vld [vmem:[#allocation19_spill] sm:$0xff] }
 0x202   : > { %v3755_v43 = vpop.f32.mrf.mxu0  ;;  %v5684_v22 = vpop.f32.mrf.mxu1  ;;  %v3003_v5 = vmul.f32 %v8871_v6, %v8826_v4  ;;  %v2965_v55 = vunpack.c.l.bf16 %v5896_v56  ;;  %v3880_v4 = vmul.f32 %v10109_v37, %v9109_v54  ;;  %v10173_v56 = vld [vmem:[#allocation42_spill] sm:$0xff] }
 0x203   : > { %10167 = vst [vmem:[#allocation52_spill] sm:$0xff] %v9104_v46  ;;  %v3029_v59 = vadd.f32 %v2997_v40, %v2954_v48  ;;  %v2959_v60 = vadd.f32 %v5684_v22, %v10169_v21  ;;  %v9114_v53 = vadd.f32 %v3876_v45, %v3803_v27  ;;  %v3806_v15 = vadd.f32 %v5721_v11, %v3031_v29  ;;  %v10172_v11 = vld [vmem:[#allocation75_spill] sm:$0xff] }
 0x204   : > { %v5728_v39 = vpop.f32.mrf.mxu0  ;;  %v2902_v19 = vpop.f32.mrf.mxu1  ;;  %v3001_v45 = vmul.f32 %v8871_v6, %v8807_v14  ;;  %v9125_v29 = vunpack.c.l.bf16 %v10172_v11 }
 0x205   : > { %v3034_v9 = vadd.f32 %v3002_v50, %v2959_v60  ;;  %v2957_v3 = vadd.f32 %v2902_v19, %v8867_v16  ;;  %v9120_v30 = vadd.f32 %v10170_v1, %v3806_v15  ;;  %v3804_v46 = vadd.f32 %v3739_v49, %v3029_v59  ;;  %v5897_v59 = vld [vmem:[#allocation2 + $0x118] sm:$0xf] }
 0x206   : > { %v3768_v63 = vpop.f32.mrf.mxu0  ;;  %v5685_v40 = vpop.f32.mrf.mxu1  ;;  %v3006_v49 = vmul.f32 %v8871_v6, %v2965_v55  ;;  %v2966_v60 = vunpack.c.l.bf16 %v5897_v59  ;;  %v3881_v55 = vmul.f32 %v10109_v37, %v9125_v29 }
 0x207   : > { %10171 = vst [vmem:[#allocation54_spill] sm:$0xff] %v9120_v30  ;;  %v3032_v27 = vadd.f32 %v3000_v35, %v2957_v3  ;;  %v2960_v50 = vadd.f32 %v5685_v40, %v8884_v12  ;;  %v9130_v22 = vadd.f32 %v3877_v0, %v3804_v46  ;;  %v3809_v16 = vadd.f32 %v5724_v18, %v3034_v9  ;;  %v10176_v18 = vld [vmem:[#allocation24_spill] sm:$0xff] }
 0x208   : > { %v5729_v48 = vpop.f32.mrf.mxu0  ;;  %v2905_v21 = vpop.f32.mrf.mxu1  ;;  %v10175_v35 = vunpack.c.l.bf16 %v8843_v62  ;;  %v9141_v0 = vunpack.c.l.bf16 %v10176_v18  ;;  %v10179_v18 = vld [vmem:[#allocation44_spill] sm:$0xff] }
 0x209   : > { %v3035_v14 = vadd.f32 %v3003_v5, %v2960_v50  ;;  %v2958_v19 = vadd.f32 %v2905_v21, %v8896_v42  ;;  %v9135_v1 = vadd.f32 %v10173_v56, %v3809_v16  ;;  %v3807_v11 = vadd.f32 %v3752_v10, %v3032_v27  ;;  %v10177_v5 = vld [vmem:[#allocation28_spill] sm:$0xff]  ;;  %v10178_v21 = vld [vmem:[#allocation41_spill] sm:$0xff] }
 0x20a   : > { %v3771_v15 = vpop.f32.mrf.mxu0  ;;  %v5688_v30 = vpop.f32.mrf.mxu1  ;;  %v3004_v12 = vmul.f32 %v8871_v6, %v10175_v35  ;;  %v3007_v10 = vmul.f32 %v8871_v6, %v2966_v60 }
 0x20b   : > { %10174 = vst [vmem:[#allocation70_spill] sm:$0xff] %v9135_v1  ;;  %v3033_v9 = vadd.f32 %v3001_v45, %v2958_v19  ;;  %v2963_v3 = vadd.f32 %v5688_v30, %v10177_v5  ;;  %v9146_v42 = vadd.f32 %v3880_v4, %v3807_v11  ;;  %v3810_v40 = vadd.f32 %v5725_v38, %v3035_v14  ;;  %v10181_v4 = vld [vmem:[#allocation78_spill] sm:$0xff] }
 0x20c   : > { %v5780_v46 = vpop.f32.mrf.mxu0  ;;  %v2918_v50 = vpop.f32.mrf.mxu1  ;;  %v10180_v1 = vunpack.c.l.bf16 %v10179_v18  ;;  %v9157_v19 = vunpack.c.l.bf16 %v10181_v4  ;;  %v3884_v38 = vmul.f32 %v10109_v37, %v9141_v0  ;;  %v10184_v18 = vld [vmem:[#allocation50_spill] sm:$0xff] }
 0x20d   : > { %v3038_v62 = vadd.f32 %v3006_v49, %v2963_v3  ;;  %v2961_v16 = vadd.f32 %v2918_v50, %v8919_v2  ;;  %v9151_v59 = vadd.f32 %v10178_v21, %v3810_v40  ;;  %v3808_v56 = vadd.f32 %v3755_v43, %v3033_v9  ;;  %v10182_v43 = vld [vmem:[#allocation22_spill] sm:$0xff] }
 0x20e   : > { %v4337_v27 = vpop.f32.mrf.mxu0  ;;  %v5689_v35 = vpop.f32.mrf.mxu1  ;;  %v3005_v45 = vmul.f32 %v8871_v6, %v10180_v1  ;;  %v4196_v9 = vmul.f32 %v10182_v43, %v8951_v31  ;;  %v10183_v1 = vld [vmem:[#allocation72_spill] sm:$0xff] }
 0x20f   : > { %v3036_v60 = vadd.f32 %v3004_v12, %v2961_v16  ;;  %v2964_v49 = vadd.f32 %v5689_v35, %v8929_v26  ;;  %v9162_v2 = vadd.f32 %v3881_v55, %v3808_v56  ;;  %v3813_v14 = vadd.f32 %v5728_v39, %v3038_v62 }
 0x210   : > { %v5781_v30 = vpop.f32.mrf.mxu0  ;;  %v2921_v11 = vpop.f32.mrf.mxu1  ;;  %v10185_v12 = vunpack.c.l.bf16 %v10184_v18  ;;  %v3885_v39 = vmul.f32 %v10109_v37, %v9157_v19  ;;  %v4197_v35 = vmul.f32 %v10182_v43, %v8965_v23  ;;  %v10187_v37 = vld [vmem:[#allocation83_spill] sm:$0xff] }
 0x211   : > { %v3039_v3 = vadd.f32 %v3007_v10, %v2964_v49  ;;  %v2962_v6 = vadd.f32 %v2921_v11, %v8937_v20  ;;  %v9168_v40 = vadd.f32 %v10183_v1, %v3813_v14  ;;  %v3811_v50 = vadd.f32 %v3768_v63, %v3036_v60  ;;  %v10186_v49 = vld [vmem:[#allocation40_spill] sm:$0xff] }
 0x212   : > { %v4340_v5 = vpop.f32.mrf.mxu0  ;;  %v5740_v21 = vpop.f32.mrf.mxu1  ;;  %v4194_v26 = vmul.f32 %v10182_v43, %v10185_v12 }
 0x213   : > { %v3037_v62 = vadd.f32 %v3005_v45, %v2962_v6  ;;  %v4153_v16 = vadd.f32 %v5740_v21, %v8946_v52  ;;  %v9176_v56 = vadd.f32 %v3884_v38, %v3811_v50  ;;  %v3814_v10 = vadd.f32 %v5729_v48, %v3039_v3  ;;  %v10189_v21 = vld [vmem:[#allocation76_spill] sm:$0xff] }
 0x214   : > { %v5784_v55 = vpop.f32.mrf.mxu0  ;;  %v4024_v20 = vpop.f32.mrf.mxu1  ;;  %v4507_v45 = vmul.f32 %v10187_v37, %v8951_v31  ;;  %v10188_v38 = vunpack.c.l.bf16 %v10110_v36 }
 0x215   : > { %v4228_v4 = vadd.f32 %v4196_v9, %v4153_v16  ;;  %v4151_v60 = vadd.f32 %v4024_v20, %v8955_v24  ;;  %v9184_v14 = vadd.f32 %v10186_v49, %v3814_v10  ;;  %v3812_v11 = vadd.f32 %v3771_v15, %v3037_v62  ;;  %v9199_v24 = vld [vmem:[%s9554_s7] ss:$0 sm:$0xff] }
 0x216   : > { %v9180_v63 = vpop.f32.mrf.mxu0  ;;  %v5741_v52 = vpop.f32.mrf.mxu1  ;;  %v4195_v48 = vmul.f32 %v10182_v43, %v10188_v38  ;;  %v4201_v16 = vmul.f32 %v10182_v43, %v8997_v13 }
 0x217   : > { %v4466_v6 = vadd.f32 %v5780_v46, %v4228_v4  ;;  %v4226_v1 = vadd.f32 %v4194_v26, %v4151_v60  ;;  %v4154_v9 = vadd.f32 %v5741_v52, %v8960_v28  ;;  %v9194_v50 = vadd.f32 %v3885_v39, %v3812_v11 }
 0x218   : > { %v9191_v3 = vpop.f32.mrf.mxu0  ;;  %v4027_v15 = vpop.f32.mrf.mxu1  ;;  %v4508_v46 = vmul.f32 %v10187_v37, %v8965_v23  ;;  %v4200_v26 = vmul.f32 %v10182_v43, %v8981_v51  ;;  %v4511_v39 = vmul.f32 %v10187_v37, %v8981_v51  ;;  %v4512_v60 = vmul.f32 %v10187_v37, %v8997_v13 }
 0x219   : > { %v4541_v36 = vadd.f32 %v10189_v21, %v4466_v6  ;;  %v4464_v18 = vadd.f32 %v4337_v27, %v4226_v1  ;;  %v4229_v12 = vadd.f32 %v4197_v35, %v4154_v9  ;;  %v4152_v62 = vadd.f32 %v4027_v15, %v8970_v44 }
 0x21a   : > { %v9201_v31 = vpop.f32.mrf.mxu0  ;;  %v5744_v28 = vpop.f32.mrf.mxu1  ;;  %v4204_v51 = vmul.f32 %v10182_v43, %v9013_v61  ;;  %v9225_v11 = vmul.f32 %v10182_v43, %v9029_v57  ;;  %v9239_v1 = vmul.f32 %v10187_v37, %v9013_v61 }
 0x21b   : > { %v4580_v27 = vadd.f32 %v9199_v24, %v4541_v36  ;;  %v4539_v20 = vadd.f32 %v4507_v45, %v4464_v18  ;;  %v4467_v44 = vadd.f32 %v5781_v30, %v4229_v12  ;;  %v4227_v35 = vadd.f32 %v4195_v48, %v4152_v62  ;;  %v10190_v30 = vld [vmem:[#allocation21_spill] sm:$0xff]  ;;  %v10191_v62 = vld [vmem:[#allocation31_spill] sm:$0xff] }
 0x21c   : > { %v9213_v10 = vpop.f32.mrf.mxu0  ;;  %v4157_v23 = vadd.f32 %v5744_v28, %v8976_v32  ;;  %v4040_v4 = vpop.f32.mrf.mxu1 }
 0x21d   : > { %v4612_v52 = vmax.f32 %v4580_v27, 0.0  ;;  %v4578_v45 = vadd.f32 %v9199_v24, %v4539_v20  ;;  %v4542_v38 = vadd.f32 %v10190_v30, %v4467_v44  ;;  %v4465_v48 = vadd.f32 %v4340_v5, %v4227_v35 }
 0x21e   : > { %v9221_v49 = vpop.f32.mrf.mxu0  ;;  %v4232_v32 = vadd.f32 %v4200_v26, %v4157_v23  ;;  %v4155_v13 = vadd.f32 %v4040_v4, %v8986_v41  ;;  %v5745_v6 = vpop.f32.mrf.mxu1  ;;  %v9245_v5 = vmul.f32 %v10182_v43, %v9045_v34  ;;  %v10192_v41 = vld [vmem:[#allocation16_spill] sm:$0xff]  ;;  %v9254_v20 = vmul.f32 %v10187_v37, %v9029_v57  ;;  %v10194_v4 = vld [vmem:[#allocation25_spill] sm:$0xff] }
 0x21f   : > { %v5240_v15 = vpack.c.bf16 %v4612_v52, %v4612_v52  ;;  %v4610_v21 = vmax.f32 %v4578_v45, 0.0  ;;  %v4581_v36 = vadd.f32 %v9199_v24, %v4542_v38  ;;  %v4540_v18 = vadd.f32 %v4508_v46, %v4465_v48  ;;  %v10193_v46 = vld [vmem:[#allocation48_spill] sm:$0xff] }
 0x220   : > { %v9241_v9 = vpop.f32.mrf.mxu0  ;;  %v4470_v12 = vadd.f32 %v5784_v55, %v4232_v32  ;;  %v4230_v28 = vadd.f32 %v10191_v62, %v4155_v13  ;;  %v4158_v26 = vadd.f32 %v5745_v6, %v10192_v41  ;;  %v4043_v27 = vpop.f32.mrf.mxu1  ;;  %v9266_v57 = vmul.f32 %v10182_v43, %v9061_v25  ;;  %v10195_v6 = vld [vmem:[#allocation46_spill] sm:$0xff] }
 0x221   : > { %4772 = vst.msk [vmem:[%s9234_s25 + $0x8] sm:$0xf] %vm321_vm0, %v5240_v15  ;;  %v5238_v44 = vpack.c.bf16 %v4610_v21, %v4610_v21  ;;  %v4613_v35 = vmax.f32 %v4581_v36, 0.0  ;;  %v4579_v23 = vadd.f32 %v9199_v24, %v4540_v18  ;;  %v4156_v55 = vadd.f32 %v4043_v27, %v10193_v46  ;;  %v10196_v21 = vld [vmem:[#allocation30_spill] sm:$0xff]  ;;  %v10198_v46 = vld [vmem:[#allocation35_spill] sm:$0xff] }
 0x222   : > { %v9250_v61 = vpop.f32.mrf.mxu0  ;;  %v4545_v52 = vadd.f32 %v10194_v4, %v4470_v12  ;;  %v4468_v45 = vadd.f32 %v9180_v63, %v4230_v28  ;;  %v4233_v30 = vadd.f32 %v4201_v16, %v4158_v26  ;;  %v5748_v38 = vpop.f32.mrf.mxu1  ;;  %v9278_v28 = vmul.f32 %v10187_v37, %v9045_v34 }
 0x223   : > { %4770 = vst.msk [vmem:[%s9234_s25] sm:$0xf] %vm321_vm0, %v5238_v44  ;;  %v5241_v32 = vpack.c.bf16 %v4613_v35, %v4613_v35  ;;  %v4611_v13 = vmax.f32 %v4579_v23, 0.0  ;;  %v4231_v15 = vadd.f32 %v10195_v6, %v4156_v55  ;;  %v4161_v36 = vadd.f32 %v5748_v38, %v10196_v21  ;;  %v10197_v44 = vld [vmem:[#allocation68_spill] sm:$0xff] }
 0x224   : > { %v9262_v48 = vpop.f32.mrf.mxu0  ;;  %v4584_v18 = vadd.f32 %v9199_v24, %v4545_v52  ;;  %v4543_v63 = vadd.f32 %v4511_v39, %v4468_v45  ;;  %v4471_v16 = vadd.f32 %v9191_v3, %v4233_v30  ;;  %v4056_v12 = vpop.f32.mrf.mxu1  ;;  %v9290_v34 = vmul.f32 %v10182_v43, %v9077_v58  ;;  %v10200_v30 = vld [vmem:[#allocation51_spill] sm:$0xff] }
 0x225   : > { %4773 = vst.msk [vmem:[%s9234_s25 + $0xc] sm:$0xf] %vm321_vm0, %v5241_v32  ;;  %v5239_v41 = vpack.c.bf16 %v4611_v13, %v4611_v13  ;;  %v4469_v26 = vadd.f32 %v9201_v31, %v4231_v15  ;;  %v4236_v27 = vadd.f32 %v4204_v51, %v4161_v36  ;;  %v4159_v35 = vadd.f32 %v4056_v12, %v10197_v44  ;;  %v10199_v51 = vld [vmem:[#allocation82_spill] sm:$0xff] }
 0x226   : > { %v9274_v62 = vpop.f32.mrf.mxu0  ;;  %v4616_v23 = vmax.f32 %v4584_v18, 0.0  ;;  %v4582_v39 = vadd.f32 %v9199_v24, %v4543_v63  ;;  %v4546_v3 = vadd.f32 %v10198_v46, %v4471_v16  ;;  %v5749_v55 = vpop.f32.mrf.mxu1  ;;  %v9302_v36 = vmul.f32 %v10187_v37, %v9061_v25  ;;  %v10201_v18 = vld [vmem:[#allocation26_spill] sm:$0xff] }
 0x227   : > { %4771 = vst.msk [vmem:[%s9234_s25 + $0x4] sm:$0xf] %vm321_vm0, %v5239_v41  ;;  %v4544_v52 = vadd.f32 %v4512_v60, %v4469_v26  ;;  %v4474_v31 = vadd.f32 %v9213_v10, %v4236_v27  ;;  %v4234_v45 = vadd.f32 %v10199_v51, %v4159_v35  ;;  %v4162_v38 = vadd.f32 %v5749_v55, %v10200_v30  ;;  %v10202_v26 = vld [vmem:[#allocation18_spill] sm:$0xff] }
 0x228   : > { %v9286_v4 = vpop.f32.mrf.mxu0  ;;  %v5244_v32 = vpack.c.bf16 %v4616_v23, %v4616_v23  ;;  %v4614_v13 = vmax.f32 %v4582_v39, 0.0  ;;  %v4585_v6 = vadd.f32 %v9199_v24, %v4546_v3  ;;  %v4059_v15 = vpop.f32.mrf.mxu1  ;;  %v9315_v25 = vmul.f32 %v10182_v43, %v9093_v8  ;;  %v10203_v3 = vld [vmem:[#allocation38_spill] sm:$0xff] }
 0x229   : > { %v4583_v60 = vadd.f32 %v9199_v24, %v4544_v52  ;;  %v4549_v10 = vadd.f32 %v10201_v18, %v4474_v31  ;;  %v4472_v63 = vadd.f32 %v9221_v49, %v4234_v45  ;;  %v4237_v16 = vadd.f32 %v9225_v11, %v4162_v38  ;;  %v10204_v52 = vld [vmem:[#allocation94_spill] sm:$0xff] }
 0x22a   : > { %v9298_v21 = vpop.f32.mrf.mxu0  ;;  %4776 = vst.msk [vmem:[%s9234_s25 + $0x18] sm:$0xf] %vm321_vm0, %v5244_v32  ;;  %v5242_v12 = vpack.c.bf16 %v4614_v13, %v4614_v13  ;;  %v4617_v41 = vmax.f32 %v4585_v6, 0.0  ;;  %v4160_v27 = vadd.f32 %v4059_v15, %v10202_v26  ;;  %v5752_v44 = vpop.f32.mrf.mxu1  ;;  %v9328_v30 = vmul.f32 %v10187_v37, %v9077_v58  ;;  %v10207_v26 = vld [vmem:[#allocation81_spill] sm:$0xff] }
 0x22b   : > { %v4615_v23 = vmax.f32 %v4583_v60, 0.0  ;;  %v4588_v39 = vadd.f32 %v9199_v24, %v4549_v10  ;;  %v4547_v49 = vadd.f32 %v9239_v1, %v4472_v63  ;;  %v4475_v11 = vadd.f32 %v9241_v9, %v4237_v16  ;;  %v10205_v9 = vld [vmem:[#allocation36_spill] sm:$0xff]  ;;  %v10206_v60 = vld [vmem:[#allocation49_spill] sm:$0xff] }
 0x22c   : > { %v9311_v35 = vpop.f32.mrf.mxu0  ;;  %4774 = vst.msk [vmem:[%s9234_s25 + $0x10] sm:$0xf] %vm321_vm0, %v5242_v12  ;;  %v5245_v46 = vpack.c.bf16 %v4617_v41, %v4617_v41  ;;  %v4235_v55 = vadd.f32 %v10203_v3, %v4160_v27  ;;  %v4165_v31 = vadd.f32 %v5752_v44, %v10204_v52  ;;  %v4072_v51 = vpop.f32.mrf.mxu1  ;;  %v9341_v58 = vmul.f32 %v10182_v43, %v9109_v54  ;;  %v10208_v44 = vld [vmem:[#allocation39_spill] sm:$0xff]  ;;  %v10209_v52 = vld [vmem:[#allocation88_spill] sm:$0xff] }
 0x22d   : > { %v5243_v38 = vpack.c.bf16 %v4615_v23, %v4615_v23  ;;  %v4620_v32 = vmax.f32 %v4588_v39, 0.0  ;;  %v4586_v1 = vadd.f32 %v9199_v24, %v4547_v49  ;;  %v4550_v13 = vadd.f32 %v10205_v9, %v4475_v11 }
 0x22e   : > { %v9324_v45 = vpop.f32.mrf.mxu0  ;;  %4777 = vst.msk [vmem:[%s9234_s25 + $0x1c] sm:$0xf] %vm321_vm0, %v5245_v46  ;;  %v4473_v6 = vadd.f32 %v9250_v61, %v4235_v55  ;;  %v4240_v15 = vadd.f32 %v9245_v5, %v4165_v31  ;;  %v4163_v18 = vadd.f32 %v4072_v51, %v10206_v60  ;;  %v5753_v10 = vpop.f32.mrf.mxu1  ;;  %v9354_v11 = vmul.f32 %v10187_v37, %v9093_v8 }
 0x22f   : > { %4775 = vst.msk [vmem:[%s9234_s25 + $0x14] sm:$0xf] %vm321_vm0, %v5243_v38  ;;  %v5248_v16 = vpack.c.bf16 %v4620_v32, %v4620_v32  ;;  %v4618_v12 = vmax.f32 %v4586_v1, 0.0  ;;  %v4589_v41 = vadd.f32 %v9199_v24, %v4550_v13  ;;  %v4166_v61 = vadd.f32 %v5753_v10, %v10207_v26  ;;  %v10211_v13 = vld [vmem:[#allocation53_spill] sm:$0xff] }
 0x230   : > { %v9337_v63 = vpop.f32.mrf.mxu0  ;;  %v4548_v5 = vadd.f32 %v9254_v20, %v4473_v6  ;;  %v4478_v27 = vadd.f32 %v9262_v48, %v4240_v15  ;;  %v4238_v23 = vadd.f32 %v10208_v44, %v4163_v18  ;;  %v4075_v39 = vpop.f32.mrf.mxu1  ;;  %v9367_v8 = vmul.f32 %v10182_v43, %v9125_v29 }
 0x231   : > { %4780 = vst.msk [vmem:[%s9234_s25 + $0x28] sm:$0xf] %vm321_vm0, %v5248_v16  ;;  %v5246_v46 = vpack.c.bf16 %v4618_v12, %v4618_v12  ;;  %v4621_v3 = vmax.f32 %v4589_v41, 0.0  ;;  %v4241_v55 = vadd.f32 %v9266_v57, %v4166_v61  ;;  %v4164_v20 = vadd.f32 %v4075_v39, %v9066_v7  ;;  %v10210_v7 = vld [vmem:[#allocation14_spill] sm:$0xff] }
 0x232   : > { %v9350_v49 = vpop.f32.mrf.mxu0  ;;  %v4587_v48 = vadd.f32 %v9199_v24, %v4548_v5  ;;  %v4553_v31 = vadd.f32 %v10209_v52, %v4478_v27  ;;  %v4476_v51 = vadd.f32 %v9274_v62, %v4238_v23  ;;  %v5756_v38 = vpop.f32.mrf.mxu1  ;;  %v9380_v16 = vmul.f32 %v10187_v37, %v9109_v54 }
 0x233   : > { %4778 = vst.msk [vmem:[%s9234_s25 + $0x20] sm:$0xf] %vm321_vm0, %v5246_v46  ;;  %v5249_v1 = vpack.c.bf16 %v4621_v3, %v4621_v3  ;;  %v4479_v57 = vadd.f32 %v9286_v4, %v4241_v55  ;;  %v4239_v9 = vadd.f32 %v10210_v7, %v4164_v20  ;;  %v4169_v6 = vadd.f32 %v5756_v38, %v10211_v13  ;;  %v10212_v4 = vld [vmem:[#allocation90_spill] sm:$0xff]  ;;  %v10213_v46 = vld [vmem:[#allocation60_spill] sm:$0xff] }
 0x234   : > { %v9363_v32 = vpop.f32.mrf.mxu0  ;;  %v4619_v15 = vmax.f32 %v4587_v48, 0.0  ;;  %v4592_v60 = vadd.f32 %v9199_v24, %v4553_v31  ;;  %v4551_v62 = vadd.f32 %v9278_v28, %v4476_v51  ;;  %v4088_v18 = vpop.f32.mrf.mxu1  ;;  %v9393_v54 = vmul.f32 %v10182_v43, %v9141_v0 }
 0x235   : > { %4781 = vst.msk [vmem:[%s9234_s25 + $0x2c] sm:$0xf] %vm321_vm0, %v5249_v1  ;;  %v4554_v12 = vadd.f32 %v10212_v4, %v4479_v57  ;;  %v4477_v41 = vadd.f32 %v9298_v21, %v4239_v9  ;;  %v4244_v26 = vadd.f32 %v9290_v34, %v4169_v6  ;;  %v4167_v61 = vadd.f32 %v4088_v18, %v9082_v33  ;;  %v10216_v18 = vld [vmem:[#allocation52_spill] sm:$0xff] }
 0x236   : > { %v9376_v10 = vpop.f32.mrf.mxu0  ;;  %v5247_v5 = vpack.c.bf16 %v4619_v15, %v4619_v15  ;;  %v4624_v28 = vmax.f32 %v4592_v60, 0.0  ;;  %v4590_v27 = vadd.f32 %v9199_v24, %v4551_v62  ;;  %v5757_v44 = vpop.f32.mrf.mxu1  ;;  %v9406_v31 = vmul.f32 %v10187_v37, %v9125_v29  ;;  %v10215_v62 = vld [vmem:[#allocation93_spill] sm:$0xff] }
 0x237   : > { %v4593_v39 = vadd.f32 %v9199_v24, %v4554_v12  ;;  %v4552_v21 = vadd.f32 %v9302_v36, %v4477_v41  ;;  %v4482_v34 = vadd.f32 %v9311_v35, %v4244_v26  ;;  %v4242_v33 = vadd.f32 %v10213_v46, %v4167_v61  ;;  %v10214_v35 = vld [vmem:[#allocation95_spill] sm:$0xff]  ;;  %v10217_v26 = vld [vmem:[#allocation10_spill] sm:$0xff] }
 0x238   : > { %v9389_v23 = vpop.f32.mrf.mxu0  ;;  %4779 = vst.msk [vmem:[%s9234_s25 + $0x24] sm:$0xf] %vm321_vm0, %v5247_v5  ;;  %v5252_v3 = vpack.c.bf16 %v4624_v28, %v4624_v28  ;;  %v4622_v55 = vmax.f32 %v4590_v27, 0.0  ;;  %v4170_v20 = vadd.f32 %v5757_v44, %v9088_v17  ;;  %v4091_v48 = vpop.f32.mrf.mxu1  ;;  %v9419_v29 = vmul.f32 %v10182_v43, %v9157_v19  ;;  %v10218_v44 = vld [vmem:[#allocation77_spill] sm:$0xff] }
 0x239   : > { %v4625_v51 = vmax.f32 %v4593_v39, 0.0  ;;  %v4591_v36 = vadd.f32 %v9199_v24, %v4552_v21  ;;  %v4557_v38 = vadd.f32 %v10214_v35, %v4482_v34  ;;  %v4480_v1 = vadd.f32 %v9324_v45, %v4242_v33 }
 0x23a   : > { %v9402_v52 = vpop.f32.mrf.mxu0  ;;  %4784 = vst.msk [vmem:[%s9234_s25 + $0x38] sm:$0xf] %vm321_vm0, %v5252_v3  ;;  %v5250_v57 = vpack.c.bf16 %v4622_v55, %v4622_v55  ;;  %v4245_v17 = vadd.f32 %v9315_v25, %v4170_v20  ;;  %v4168_v7 = vadd.f32 %v4091_v48, %v9098_v47  ;;  %v5760_v9 = vpop.f32.mrf.mxu1  ;;  %v4183_v61 = vunpack.c.l.bf16 %v10217_v26  ;;  %v10219_v55 = vld [vmem:[#allocation79_spill] sm:$0xff]  ;;  %v10220_v48 = vld [vmem:[#allocation54_spill] sm:$0xff] }
 0x23b   : > { %v5253_v6 = vpack.c.bf16 %v4625_v51, %v4625_v51  ;;  %v4623_v15 = vmax.f32 %v4591_v36, 0.0  ;;  %v4596_v60 = vadd.f32 %v9199_v24, %v4557_v38  ;;  %v4555_v45 = vadd.f32 %v9328_v30, %v4480_v1 }
 0x23c   : > { %v9415_v13 = vpop.f32.mrf.mxu0  ;;  %4782 = vst.msk [vmem:[%s9234_s25 + $0x30] sm:$0xf] %vm321_vm0, %v5250_v57  ;;  %v4483_v25 = vadd.f32 %v9337_v63, %v4245_v17  ;;  %v4243_v47 = vadd.f32 %v10215_v62, %v4168_v7  ;;  %v4173_v4 = vadd.f32 %v5760_v9, %v10216_v18  ;;  %v4104_v12 = vpop.f32.mrf.mxu1  ;;  %v9440_v46 = vmul.f32 %v10187_v37, %v9141_v0 }
 0x23d   : > { %4785 = vst.msk [vmem:[%s9234_s25 + $0x3c] sm:$0xf] %vm321_vm0, %v5253_v6  ;;  %v5251_v5 = vpack.c.bf16 %v4623_v15, %v4623_v15  ;;  %v4628_v28 = vmax.f32 %v4596_v60, 0.0  ;;  %v4594_v30 = vadd.f32 %v9199_v24, %v4555_v45  ;;  %v4171_v27 = vadd.f32 %v4104_v12, %v9114_v53 }
 0x23e   : > { %v9428_v41 = vpop.f32.mrf.mxu0  ;;  %v4558_v63 = vadd.f32 %v10218_v44, %v4483_v25  ;;  %v4481_v39 = vadd.f32 %v9350_v49, %v4243_v47  ;;  %v4248_v21 = vadd.f32 %v9341_v58, %v4173_v4  ;;  %v5761_v34 = vpop.f32.mrf.mxu1  ;;  %v9452_v0 = vmul.f32 %v10182_v43, %v4183_v61 }
 0x23f   : > { %4783 = vst.msk [vmem:[%s9234_s25 + $0x34] sm:$0xf] %vm321_vm0, %v5251_v5  ;;  %v5256_v33 = vpack.c.bf16 %v4628_v28, %v4628_v28  ;;  %v4626_v3 = vmax.f32 %v4594_v30, 0.0  ;;  %v4246_v20 = vadd.f32 %v10219_v55, %v4171_v27  ;;  %v4174_v53 = vadd.f32 %v5761_v34, %v10220_v48  ;;  %v10224_v5 = vld [vmem:[#allocation71_spill] sm:$0xff]  ;;  %v10226_v34 = vld [vmem:[#allocation66_spill] sm:$0xff] }
 0x240   : > { %v4597_v51 = vadd.f32 %v9199_v24, %v4558_v63  ;;  %v4556_v49 = vadd.f32 %v9354_v11, %v4481_v39  ;;  %v4486_v58 = vadd.f32 %v9363_v32, %v4248_v21  ;;  %v4107_v36 = vpop.f32.mrf.mxu1  ;;  %v5805_v35 = vpop.f32.mrf.mxu0  ;;  %v10221_v32 = vld [vmem:[#allocation43_spill] sm:$0xff]  ;;  %v9463_v15 = vmul.f32 %v10187_v37, %v9157_v19 }
 0x241   : > { %4788 = vst.msk [vmem:[%s9234_s25 + $0x48] sm:$0xf] %vm321_vm0, %v5256_v33  ;;  %v5254_v38 = vpack.c.bf16 %v4626_v3, %v4626_v3  ;;  %v4484_v1 = vadd.f32 %v9376_v10, %v4246_v20  ;;  %v4249_v57 = vadd.f32 %v9367_v8, %v4174_v53  ;;  %v4172_v17 = vadd.f32 %v4107_v36, %v9130_v22  ;;  %v10222_v8 = vld [vmem:[#allocation97_spill] sm:$0xff]  ;;  %v10223_v22 = vld [vmem:[#allocation70_spill] sm:$0xff]  ;;  %v10225_v30 = vld [vmem:[#allocation59_spill] sm:$0xff] }
 0x242   : > { %v4629_v7 = vmax.f32 %v4597_v51, 0.0  ;;  %v4595_v11 = vadd.f32 %v9199_v24, %v4556_v49  ;;  %v4561_v9 = vadd.f32 %v10221_v32, %v4486_v58  ;;  %v5764_v6 = vpop.f32.mrf.mxu1  ;;  %v4436_v12 = vpop.f32.mrf.mxu0  ;;  %v4496_v19 = vunpack.c.l.bf16 %v10224_v5 }
 0x243   : > { %4786 = vst.msk [vmem:[%s9234_s25 + $0x40] sm:$0xf] %vm321_vm0, %v5254_v38  ;;  %v4559_v60 = vadd.f32 %v9380_v16, %v4484_v1  ;;  %v4487_v10 = vadd.f32 %v9389_v23, %v4249_v57  ;;  %v4247_v45 = vadd.f32 %v10222_v8, %v4172_v17  ;;  %v4177_v25 = vadd.f32 %v5764_v6, %v10223_v22  ;;  %v10228_v57 = vld [vmem:[#allocation100_spill] sm:$0xff]  ;;  %v10229_v8 = vld [vmem:[#allocation102_spill] sm:$0xff] }
 0x244   : > { %v5257_v62 = vpack.c.bf16 %v4629_v7, %v4629_v7  ;;  %v4627_v47 = vmax.f32 %v4595_v11, 0.0  ;;  %v4600_v18 = vadd.f32 %v9199_v24, %v4561_v9  ;;  %v4120_v4 = vpop.f32.mrf.mxu1  ;;  %v4184_v33 = vunpack.c.l.bf16 %v10226_v34  ;;  %v5808_v49 = vpop.f32.mrf.mxu0 }
 0x245   : > { %v4598_v28 = vadd.f32 %v9199_v24, %v4559_v60  ;;  %v4562_v27 = vadd.f32 %v10225_v30, %v4487_v10  ;;  %v4485_v16 = vadd.f32 %v9402_v52, %v4247_v45  ;;  %v4252_v23 = vadd.f32 %v9393_v54, %v4177_v25  ;;  %v10227_v52 = vld [vmem:[#allocation99_spill] sm:$0xff] }
 0x246   : > { %4789 = vst.msk [vmem:[%s9234_s25 + $0x4c] sm:$0xf] %vm321_vm0, %v5257_v62  ;;  %v5255_v44 = vpack.c.bf16 %v4627_v47, %v4627_v47  ;;  %v4632_v63 = vmax.f32 %v4600_v18, 0.0  ;;  %v4175_v39 = vadd.f32 %v4120_v4, %v9146_v42  ;;  %v5765_v21 = vpop.f32.mrf.mxu1  ;;  %v4537_v58 = vmul.f32 %v10187_v37, %v4496_v19  ;;  %v10231_v4 = vld [vmem:[#allocation84_spill] sm:$0xff] }
 0x247   : > { %v4630_v3 = vmax.f32 %v4598_v28, 0.0  ;;  %v4601_v55 = vadd.f32 %v9199_v24, %v4562_v27  ;;  %v4560_v20 = vadd.f32 %v9406_v31, %v4485_v16  ;;  %v4490_v48 = vadd.f32 %v9415_v13, %v4252_v23  ;;  %v10232_v27 = vld [vmem:[#allocation23_spill] sm:$0xff] }
 0x248   : > { %4787 = vst.msk [vmem:[%s9234_s25 + $0x44] sm:$0xf] %vm321_vm0, %v5255_v44  ;;  %v5260_v54 = vpack.c.bf16 %v4632_v63, %v4632_v63  ;;  %v4250_v53 = vadd.f32 %v10227_v52, %v4175_v39  ;;  %v4178_v51 = vadd.f32 %v5765_v21, %v9151_v59  ;;  %v4123_v42 = vpop.f32.mrf.mxu1  ;;  %v4225_v11 = vmul.f32 %v10182_v43, %v4184_v33  ;;  %v10233_v52 = vld [vmem:[#allocation17_spill] sm:$0xff] }
 0x249   : > { %v5258_v36 = vpack.c.bf16 %v4630_v3, %v4630_v3  ;;  %v4633_v38 = vmax.f32 %v4601_v55, 0.0  ;;  %v4599_v1 = vadd.f32 %v9199_v24, %v4560_v20  ;;  %v4565_v31 = vadd.f32 %v10228_v57, %v4490_v48 }
 0x24a   : > { %4792 = vst.msk [vmem:[%s9234_s25 + $0x58] sm:$0xf] %vm321_vm0, %v5260_v54  ;;  %v4488_v13 = vadd.f32 %v9428_v41, %v4250_v53  ;;  %v4253_v17 = vadd.f32 %v9419_v29, %v4178_v51  ;;  %v4176_v7 = vadd.f32 %v4123_v42, %v9162_v2  ;;  %v5768_v59 = vpop.f32.mrf.mxu1  ;;  %v4449_v29 = vpop.f32.mrf.mxu0  ;;  %v10230_v2 = vld [vmem:[#allocation64_spill] sm:$0xff]  ;;  %v4535_v5 = vmul.f32 %v10187_v37, %v4183_v61 }
 0x24b   : > { %4790 = vst.msk [vmem:[%s9234_s25 + $0x50] sm:$0xf] %vm321_vm0, %v5258_v36  ;;  %v5261_v32 = vpack.c.bf16 %v4633_v38, %v4633_v38  ;;  %v4631_v9 = vmax.f32 %v4599_v1, 0.0  ;;  %v4604_v6 = vadd.f32 %v9199_v24, %v4565_v31  ;;  %v4181_v60 = vadd.f32 %v5768_v59, %v9168_v40 }
 0x24c   : > { %v4563_v10 = vadd.f32 %v9440_v46, %v4488_v13  ;;  %v4491_v41 = vadd.f32 %v5805_v35, %v4253_v17  ;;  %v4251_v45 = vadd.f32 %v10229_v8, %v4176_v7  ;;  %v4136_v22 = vpop.f32.mrf.mxu1  ;;  %v4497_v25 = vunpack.c.l.bf16 %v10230_v2  ;;  %v5809_v63 = vpop.f32.mrf.mxu0 }
 0x24d   : > { %4793 = vst.msk [vmem:[%s9234_s25 + $0x5c] sm:$0xf] %vm321_vm0, %v5261_v32  ;;  %v5259_v43 = vpack.c.bf16 %v4631_v9, %v4631_v9  ;;  %v4636_v62 = vmax.f32 %v4604_v6, 0.0  ;;  %v4256_v47 = vadd.f32 %v9452_v0, %v4181_v60  ;;  %v4179_v18 = vadd.f32 %v4136_v22, %v9176_v56 }
 0x24e   : > { %v4602_v40 = vadd.f32 %v9199_v24, %v4563_v10  ;;  %v4566_v46 = vadd.f32 %v10231_v4, %v4491_v41  ;;  %v4489_v35 = vadd.f32 %v4436_v12, %v4251_v45  ;;  %v5769_v19 = vpop.f32.mrf.mxu1  ;;  %v4538_v26 = vmul.f32 %v10187_v37, %v4497_v25 }
 0x24f   : > { %4791 = vst.msk [vmem:[%s9234_s25 + $0x54] sm:$0xf] %vm321_vm0, %v5259_v43  ;;  %v5264_v28 = vpack.c.bf16 %v4636_v62, %v4636_v62  ;;  %v4494_v30 = vadd.f32 %v5808_v49, %v4256_v47  ;;  %v4254_v16 = vadd.f32 %v10232_v27, %v4179_v18  ;;  %v4182_v0 = vadd.f32 %v5769_v19, %v9184_v14 }
 0x250   : > { %v4634_v56 = vmax.f32 %v4602_v40, 0.0  ;;  %v4605_v23 = vadd.f32 %v9199_v24, %v4566_v46  ;;  %v4564_v44 = vadd.f32 %v9463_v15, %v4489_v35  ;;  %v4139_v12 = vpop.f32.mrf.mxu1  ;;  %v4536_v20 = vmul.f32 %v10187_v37, %v4184_v33 }
 0x251   : > { %4796 = vst.msk [vmem:[%s9234_s25 + $0x68] sm:$0xf] %vm321_vm0, %v5264_v28  ;;  %v4569_v61 = vadd.f32 %v4537_v58, %v4494_v30  ;;  %v4492_v39 = vadd.f32 %v4449_v29, %v4254_v16  ;;  %v4257_v21 = vadd.f32 %v4225_v11, %v4182_v0  ;;  %v4180_v34 = vadd.f32 %v4139_v12, %v9194_v50  ;;  %v4452_v50 = vpop.f32.mrf.mxu0 }
 0x252   : > { %v5262_v3 = vpack.c.bf16 %v4634_v56, %v4634_v56  ;;  %v4637_v14 = vmax.f32 %v4605_v23, 0.0  ;;  %v4603_v55 = vadd.f32 %v9199_v24, %v4564_v44 }
 0x253   : > { %v4608_v15 = vadd.f32 %v9199_v24, %v4569_v61  ;;  %v4567_v48 = vadd.f32 %v4535_v5, %v4492_v39  ;;  %v4495_v54 = vadd.f32 %v5809_v63, %v4257_v21  ;;  %v4255_v53 = vadd.f32 %v10233_v52, %v4180_v34 }
 0x254   : > { %4794 = vst.msk [vmem:[%s9234_s25 + $0x60] sm:$0xf] %vm321_vm0, %v5262_v3  ;;  %v5265_v51 = vpack.c.bf16 %v4637_v14, %v4637_v14  ;;  %v4635_v42 = vmax.f32 %v4603_v55, 0.0 }
 0x255   : > { %v4640_v49 = vmax.f32 %v4608_v15, 0.0  ;;  %v4606_v58 = vadd.f32 %v9199_v24, %v4567_v48  ;;  %v4570_v36 = vadd.f32 %v4538_v26, %v4495_v54  ;;  %v4493_v37 = vadd.f32 %v4452_v50, %v4255_v53 }
 0x256   : > { %4797 = vst.msk [vmem:[%s9234_s25 + $0x6c] sm:$0xf] %vm321_vm0, %v5265_v51  ;;  %v5263_v33 = vpack.c.bf16 %v4635_v42, %v4635_v42 }
 0x257   : > { %v5268_v38 = vpack.c.bf16 %v4640_v49, %v4640_v49  ;;  %v4638_v1 = vmax.f32 %v4606_v58, 0.0  ;;  %v4609_v57 = vadd.f32 %v9199_v24, %v4570_v36  ;;  %v4568_v31 = vadd.f32 %v4536_v20, %v4493_v37 }
 0x258   : > { %4795 = vst.msk [vmem:[%s9234_s25 + $0x64] sm:$0xf] %vm321_vm0, %v5263_v33 }
 0x259   : > { %4800 = vst.msk [vmem:[%s9234_s25 + $0x78] sm:$0xf] %vm321_vm0, %v5268_v38  ;;  %v5266_v13 = vpack.c.bf16 %v4638_v1, %v4638_v1  ;;  %v4641_v17 = vmax.f32 %v4609_v57, 0.0  ;;  %v4607_v7 = vadd.f32 %v9199_v24, %v4568_v31 }
 0x25b   : > { %4798 = vst.msk [vmem:[%s9234_s25 + $0x70] sm:$0xf] %vm321_vm0, %v5266_v13  ;;  %v5269_v59 = vpack.c.bf16 %v4641_v17, %v4641_v17  ;;  %v4639_v11 = vmax.f32 %v4607_v7, 0.0 }
 0x25d   : > { %4801 = vst.msk [vmem:[%s9234_s25 + $0x7c] sm:$0xf] %vm321_vm0, %v5269_v59  ;;  %v5267_v32 = vpack.c.bf16 %v4639_v11, %v4639_v11 }
 0x25f   : > { %4799 = vst.msk [vmem:[%s9234_s25 + $0x74] sm:$0xf] %vm321_vm0, %v5267_v32 }
 0x260 PF: > { %s19_s27 = sadd.s32 1, %s5923_s27  }
 0x261   : > { %p16_p1 = scmp.ge.s32.totalorder %s19_s27, 4  }
 0x263   :  { %18 = sbr.rel (!%p16_p1) target bundleno = 1 (0x1), region = 108 }
 0x268   :  { %4823 = vsyncpa [#allocation4], 1 }
 0x269   :  { %4825 = vsyncpa [#allocation4 + $0x1], 1 }

</bundles_post_ra>
